<compile_context>
chip_gen: v5e
topology: v5e:2x2
jax: 0.10.0
libtpu: 0.0.40
codegen_flags: <defaults>
</compile_context>

<pallas_src>
import functools

import jax
import jax.numpy as jnp
from jax.experimental import pallas as pl
from jax.experimental.pallas import tpu as pltpu


# --------------------------------------------------------------------------- #
# Kernel: grouped conv1d (+ fused LeakyReLU) via in-kernel im2col + one matmul #
# --------------------------------------------------------------------------- #
def _conv1d_im2col_kernel(xp_ref, w_ref, o_ref, xcol_ref, *,
                          Kp, CS, Lo_pad, n_extra, lrelu_slope):
    # xp_ref:   (G, Cin_g*S, Lpp)    polyphase-split padded input (one batch elem)
    # w_ref:    (G, Cout_g, R_aug)   im2col-ordered weights, bias folded in
    # o_ref:    (G, Cout_g, Lo_pad)  lane-dense output block (Lo_pad % 128 == 0)
    # xcol_ref: (G, R_aug, Lo_pad)   VMEM scratch: im2col operand
    #
    # Build the im2col operand from Kp contiguous shifted slices (one per
    # retained tap offset; unit-stride lane loads only), then one batched
    # MXU matmul with contraction R_aug instead of K small rank updates.
    for t in range(Kp):                                   # static unroll
        xcol_ref[:, t * CS:(t + 1) * CS, :] = xp_ref[:, :, pl.ds(t, Lo_pad)]
    # Constant-ones rows: their matching weight column holds the bias, so the
    # bias add is folded into the same matmul (no separate bias block/DMA).
    xcol_ref[:, Kp * CS:, :] = jnp.ones(
        (xcol_ref.shape[0], n_extra, Lo_pad), xcol_ref.dtype)

    acc = jax.lax.dot_general(
        w_ref[...], xcol_ref[...],
        dimension_numbers=(((2,), (1,)), ((0,), (0,))),   # batch over groups
        preferred_element_type=jnp.float32)               # (G, Cout_g, Lo_pad)

    if lrelu_slope is not None:                           # fused LeakyReLU (f32)
        acc = jnp.where(acc >= 0, acc, lrelu_slope * acc)
    o_ref[...] = acc.astype(o_ref.dtype)


# --------------------------------------------------------------------------- #
# Per-layer parameter preprocessing (done ONCE, outside the forward path)      #
# --------------------------------------------------------------------------- #
def prepare_conv_params(w, b, *, stride, padding, groups, pad_mode="zeros",
                        lrelu_slope=None, compute_dtype=jnp.float32):
    """w: (Cout, Cin//groups, K), b: (Cout,).  Returns a prepared-layer dict."""
    Cout, Cin_g, K = w.shape
    G = groups
    assert Cout % G == 0
    Cout_g = Cout // G
    S = stride
    Kp = (K + S - 1) // S                 # taps per polyphase branch
    CS = Cin_g * S                        # rows contributed by one tap offset
    R = Kp * CS                           # data contraction length
    n_extra = 8 - (R % 8)                 # >=1 ones-rows (bias) + sublane pad
    R_aug = R + n_extra

    # (Cout, Cin_g, K) -> (G, Cout_g, Cin_g, Kp*S), taps zero-padded to Kp*S.
    w_g = w.reshape(G, Cout_g, Cin_g, K)
    w_g = jnp.pad(w_g, ((0, 0), (0, 0), (0, 0), (0, Kp * S - K)))
    # reorder contraction to (t, c, p) with k = t*S + p (matches the kernel's
    # im2col row ordering: rows of slice t are (c, p) = c*S + p).
    w_g = w_g.reshape(G, Cout_g, Cin_g, Kp, S).transpose(0, 1, 3, 2, 4)
    w_mat = w_g.reshape(G, Cout_g, R)
    # bias column hit by the constant-ones rows of the im2col operand.
    extra = jnp.zeros((G, Cout_g, n_extra), w.dtype)
    extra = extra.at[:, :, 0].set(b.reshape(G, Cout_g))
    w_aug = jnp.concatenate([w_mat, extra], axis=-1).astype(compute_dtype)

    return dict(w_aug=w_aug, stride=S, padding=padding, groups=G, K=K, Kp=Kp,
                Cin_g=Cin_g, CS=CS, Cout_g=Cout_g, n_extra=n_extra, R_aug=R_aug,
                pad_mode=pad_mode, lrelu=lrelu_slope, compute_dtype=compute_dtype)


def conv1d_forward(prep, x):
    """Apply one prepared WNConv1d(+LeakyReLU) layer.  x: (B, Cin, L) f32."""
    B, Cin, L = x.shape
    S, K, Kp = prep["stride"], prep["K"], prep["Kp"]
    G, Cin_g, CS = prep["groups"], prep["Cin_g"], prep["CS"]
    Cout_g, R_aug, n_extra = prep["Cout_g"], prep["R_aug"], prep["n_extra"]
    pad = prep["padding"]
    assert Cin == G * Cin_g, (Cin, G, Cin_g)

    L_pad = L + 2 * pad
    L_out = (L_pad - K) // S + 1
    assert L_out >= 1
    Lo_pad = ((L_out + 127) // 128) * 128            # lane-dense output length
    Lpp = max(Kp - 1 + Lo_pad, (L_pad + S - 1) // S)  # per-phase padded length
    L_ext = S * Lpp

    # Conv padding (reflect for layer_0, zeros otherwise) + zero tail so the
    # polyphase split below is rectangular.  Kept as (jit-fused) XLA glue —
    # tiny at these sizes.
    # TODO(synk): fold the padding into the kernel (zero-init VMEM + offset
    #             DMA) for the large production config.
    if prep["pad_mode"] == "reflect" and pad > 0:
        xpad = jnp.pad(x, ((0, 0), (0, 0), (pad, pad)), mode="reflect")
        xpad = jnp.pad(xpad, ((0, 0), (0, 0), (0, L_ext - L_pad)))
    else:
        xpad = jnp.pad(x, ((0, 0), (0, 0), (pad, pad + L_ext - L_pad)))
    xpad = xpad.astype(prep["compute_dtype"])

    # Polyphase decomposition: row (g, c*S + p) holds x[g*Cin_g + c, p::S], so
    # the kernel only issues unit-stride contiguous lane slices even for S>1.
    xp = (xpad.reshape(B, G, Cin_g, Lpp, S)
              .transpose(0, 1, 2, 4, 3)
              .reshape(B, G, CS, Lpp))

    kernel = functools.partial(
        _conv1d_im2col_kernel, Kp=Kp, CS=CS, Lo_pad=Lo_pad,
        n_extra=n_extra, lrelu_slope=prep["lrelu"])

    out = pl.pallas_call(
        kernel,
        out_shape=jax.ShapeDtypeStruct((B, G, Cout_g, Lo_pad), jnp.float32),
        grid=(B,),                                  # one fat block per batch elem
        in_specs=[
            pl.BlockSpec((None, G, CS, Lpp), lambda b: (b, 0, 0, 0)),
            # weight block index constant along the grid -> stays VMEM-resident
            pl.BlockSpec((G, Cout_g, R_aug), lambda b: (0, 0, 0)),
        ],
        out_specs=pl.BlockSpec((None, G, Cout_g, Lo_pad), lambda b: (b, 0, 0, 0)),
        scratch_shapes=[pltpu.VMEM((G, R_aug, Lo_pad), prep["compute_dtype"])],
        compiler_params=pltpu.CompilerParams(dimension_semantics=("parallel",)),
    )(xp, prep["w_aug"])

    return out.reshape(B, G * Cout_g, Lo_pad)[:, :, :L_out]


# --------------------------------------------------------------------------- #
# Model construction mirroring NLayerDiscriminator.__init__                    #
# --------------------------------------------------------------------------- #
def _make_wn_conv_params(key, cout, cin_g, k):
    """Deterministic weight_norm(Conv1d) params: w = g * v / ||v||_2 per row."""
    kv, kg, kb = jax.random.split(key, 3)
    v = 0.1 * jax.random.normal(kv, (cout, cin_g, k), jnp.float32)
    g = 1.0 + 0.1 * jax.random.normal(kg, (cout,), jnp.float32)
    b = 0.1 * jax.random.normal(kb, (cout,), jnp.float32)
    norm = jnp.sqrt(jnp.sum(v * v, axis=(1, 2), keepdims=True)) + 1e-12
    w = g[:, None, None] * v / norm
    return w, b


def build_nlayer_discriminator(key, ndf, n_layers, downsampling_factor,
                               compute_dtype=jnp.float32):
    """Mirrors NLayerDiscriminator.__init__ (deterministic init); also
    precomputes the weight-norm + im2col reordering once per layer."""
    layers = []
    key, sub = jax.random.split(key)
    w, b = _make_wn_conv_params(sub, ndf, 1, 16)
    layers.append(dict(w=w, b=b, stride=1, padding=7, groups=1,
                       pad_mode="reflect", lrelu=0.2))
    nf = ndf
    stride = downsampling_factor
    nf_prev = ndf
    for _n in range(1, n_layers + 1):
        nf_prev = nf
        nf = min(nf * stride, 1024)
        groups = nf_prev // 4
        key, sub = jax.random.split(key)
        w, b = _make_wn_conv_params(sub, nf, nf_prev // groups, stride * 10 + 1)
        layers.append(dict(w=w, b=b, stride=stride, padding=stride * 5,
                           groups=groups, pad_mode="zeros", lrelu=0.2))
    # layer_{n_layers+1}: WNConv1d(nf_prev, min(nf*2,512), 10, stride=1, pad=1)
    nf2 = min(nf * 2, 512)
    key, sub = jax.random.split(key)
    w, b = _make_wn_conv_params(sub, nf2, nf_prev, 10)
    layers.append(dict(w=w, b=b, stride=1, padding=1, groups=1,
                       pad_mode="zeros", lrelu=0.2))
    # layer_{n_layers+2}: WNConv1d(nf2, 1, 3, stride=1, pad=1) (no activation)
    key, sub = jax.random.split(key)
    w, b = _make_wn_conv_params(sub, 1, nf2, 3)
    layers.append(dict(w=w, b=b, stride=1, padding=1, groups=1,
                       pad_mode="zeros", lrelu=None))

    for lyr in layers:  # one-time preprocessing (NOT per forward)
        lyr["prep"] = prepare_conv_params(
            lyr["w"], lyr["b"], stride=lyr["stride"], padding=lyr["padding"],
            groups=lyr["groups"], pad_mode=lyr["pad_mode"],
            lrelu_slope=lyr["lrelu"], compute_dtype=compute_dtype)
    return layers


def nlayer_discriminator_forward(layers, x):
    """forward(): returns every layer's output, like the PyTorch module."""
    results = []
    for lyr in layers:
        x = conv1d_forward(lyr["prep"], x)
        results.append(x)
    return results


# --------------------------------------------------------------------------- #
# Pure-JAX reference                                                           #
# --------------------------------------------------------------------------- #
def _conv1d_ref(x, w, b, *, stride, padding, groups, pad_mode, lrelu_slope):
    if pad_mode == "reflect" and padding > 0:
        x = jnp.pad(x, ((0, 0), (0, 0), (padding, padding)), mode="reflect")
        pad = (0, 0)
    else:
        pad = (padding, padding)
    y = jax.lax.conv_general_dilated(
        x, w, window_strides=(stride,), padding=[pad],
        dimension_numbers=("NCH", "OIH", "NCH"), feature_group_count=groups,
        precision=jax.lax.Precision.HIGHEST)
    y = y + b[None, :, None]
    if lrelu_slope is not None:
        y = jnp.where(y >= 0, y, lrelu_slope * y)
    return y


if __name__ == "__main__":
    # Small, self-consistent instantiation.  (The docstring config ndf=32 /
    # n_layers=4 / downsampling_factor=4 saturates at 1024 channels; to keep
    # the test shapes small we use downsampling_factor=1 here and separately
    # validate the stride=4 grouped path below with the real layer_1 shape.)
    ndf, n_layers, downsampling_factor = 32, 2, 1
    B, L = 2, 512

    key = jax.random.PRNGKey(0)
    kx, kp, ks = jax.random.split(key, 3)
    x = jax.random.normal(kx, (B, 1, L), jnp.float32)       # (B, C=1, L) NCL
    layers = build_nlayer_discriminator(kp, ndf, n_layers, downsampling_factor)

    fwd = jax.jit(lambda inp: nlayer_discriminator_forward(layers, inp))
    outs = jax.block_until_ready(fwd(x))

    # Cross-check every intermediate result against the pure-JAX reference.
    xr = x
    for lyr, o in zip(layers, outs):
        xr = _conv1d_ref(xr, lyr["w"], lyr["b"], stride=lyr["stride"],
                         padding=lyr["padding"], groups=lyr["groups"],
                         pad_mode=lyr["pad_mode"], lrelu_slope=lyr["lrelu"])
        assert o.shape == xr.shape, (o.shape, xr.shape)
        err = float(jnp.max(jnp.abs(o - xr)))
        ref = float(jnp.max(jnp.abs(xr)))
        assert err <= 2e-3 * (1.0 + ref), f"layer mismatch: {err} (ref max {ref})"

    # Standalone check of the stride>1 grouped path used by the real config
    # (downsampling_factor=4): Conv1d(32, 128, 41, stride=4, pad=20, groups=8).
    kw, kx2 = jax.random.split(ks)
    w2, b2 = _make_wn_conv_params(kw, 128, 4, 41)
    prep2 = prepare_conv_params(w2, b2, stride=4, padding=20, groups=8,
                                pad_mode="zeros", lrelu_slope=0.2)
    x2 = jax.random.normal(kx2, (2, 32, 512), jnp.float32)
    y2 = jax.block_until_ready(jax.jit(lambda a: conv1d_forward(prep2, a))(x2))
    y2r = _conv1d_ref(x2, w2, b2, stride=4, padding=20, groups=8,
                      pad_mode="zeros", lrelu_slope=0.2)
    assert y2.shape == y2r.shape, (y2.shape, y2r.shape)
    err = float(jnp.max(jnp.abs(y2 - y2r)))
    ref = float(jnp.max(jnp.abs(y2r)))
    assert err <= 2e-3 * (1.0 + ref), f"strided layer mismatch: {err}"

    print("KERNEL_OK")
</pallas_src>

<mosaic_0001>
module attributes {stable_mosaic.version = 11 : i64} {
  func.func @_conv1d_im2col_kernel(%arg0: i32, %arg1: memref<1x1x1x527xf32, #tpu.memory_space<vmem>>, %arg2: memref<1x32x24xf32, #tpu.memory_space<vmem>>, %arg3: memref<1x1x32x512xf32, #tpu.memory_space<vmem>>, %arg4: memref<1x24x512xf32, #tpu.memory_space<vmem>>) attributes {dimension_semantics = [#tpu.dimension_semantics<parallel>], iteration_bounds = array<i64: 2>, scalar_prefetch = 0 : i64, scratch_operands = 1 : i64, tpu.core_type = #tpu.core_type<tc>, window_params = [{transform_indices = @transform_0, window_bounds = array<i64: 1, 1, 1, 527>}, {pipeline_mode = #tpu.pipeline_mode<synchronous>, transform_indices = @transform_1, window_bounds = array<i64: 1, 32, 24>}, {transform_indices = @transform_2, window_bounds = array<i64: 1, 1, 32, 512>}]} {
    %c0 = arith.constant 0 : index
    %c0_0 = arith.constant 0 : index
    %c0_1 = arith.constant 0 : index
    %c0_2 = arith.constant 0 : index
    %0 = vector.load %arg1[%c0, %c0_0, %c0_1, %c0_2] : memref<1x1x1x527xf32, #tpu.memory_space<vmem>>, vector<1x1x1x512xf32>
    %1 = vector.shape_cast %0 : vector<1x1x1x512xf32> to vector<1x1x512xf32>
    %c0_3 = arith.constant 0 : index
    %c0_4 = arith.constant 0 : index
    %c0_5 = arith.constant 0 : index
    %2 = vector.load %arg4[%c0_3, %c0_4, %c0_5] : memref<1x24x512xf32, #tpu.memory_space<vmem>>, vector<1x1x512xf32>
    tpu.vector_store %arg4[%c0_3, %c0_4, %c0_5], %1 {strides = array<i32>} : memref<1x24x512xf32, #tpu.memory_space<vmem>>, vector<1x1x512xf32>,
    %c0_6 = arith.constant 0 : index
    %c0_7 = arith.constant 0 : index
    %c0_8 = arith.constant 0 : index
    %c1 = arith.constant 1 : index
    %3 = vector.load %arg1[%c0_6, %c0_7, %c0_8, %c1] : memref<1x1x1x527xf32, #tpu.memory_space<vmem>>, vector<1x1x1x512xf32>
    %4 = vector.shape_cast %3 : vector<1x1x1x512xf32> to vector<1x1x512xf32>
    %c0_9 = arith.constant 0 : index
    %c1_10 = arith.constant 1 : index
    %c0_11 = arith.constant 0 : index
    %5 = vector.load %arg4[%c0_9, %c1_10, %c0_11] : memref<1x24x512xf32, #tpu.memory_space<vmem>>, vector<1x1x512xf32>
    tpu.vector_store %arg4[%c0_9, %c1_10, %c0_11], %4 {strides = array<i32>} : memref<1x24x512xf32, #tpu.memory_space<vmem>>, vector<1x1x512xf32>,
    %c0_12 = arith.constant 0 : index
    %c0_13 = arith.constant 0 : index
    %c0_14 = arith.constant 0 : index
    %c2 = arith.constant 2 : index
    %6 = vector.load %arg1[%c0_12, %c0_13, %c0_14, %c2] : memref<1x1x1x527xf32, #tpu.memory_space<vmem>>, vector<1x1x1x512xf32>
    %7 = vector.shape_cast %6 : vector<1x1x1x512xf32> to vector<1x1x512xf32>
    %c0_15 = arith.constant 0 : index
    %c2_16 = arith.constant 2 : index
    %c0_17 = arith.constant 0 : index
    %8 = vector.load %arg4[%c0_15, %c2_16, %c0_17] : memref<1x24x512xf32, #tpu.memory_space<vmem>>, vector<1x1x512xf32>
    tpu.vector_store %arg4[%c0_15, %c2_16, %c0_17], %7 {strides = array<i32>} : memref<1x24x512xf32, #tpu.memory_space<vmem>>, vector<1x1x512xf32>,
    %c0_18 = arith.constant 0 : index
    %c0_19 = arith.constant 0 : index
    %c0_20 = arith.constant 0 : index
    %c3 = arith.constant 3 : index
    %9 = vector.load %arg1[%c0_18, %c0_19, %c0_20, %c3] : memref<1x1x1x527xf32, #tpu.memory_space<vmem>>, vector<1x1x1x512xf32>
    %10 = vector.shape_cast %9 : vector<1x1x1x512xf32> to vector<1x1x512xf32>
    %c0_21 = arith.constant 0 : index
    %c3_22 = arith.constant 3 : index
    %c0_23 = arith.constant 0 : index
    %11 = vector.load %arg4[%c0_21, %c3_22, %c0_23] : memref<1x24x512xf32, #tpu.memory_space<vmem>>, vector<1x1x512xf32>
    tpu.vector_store %arg4[%c0_21, %c3_22, %c0_23], %10 {strides = array<i32>} : memref<1x24x512xf32, #tpu.memory_space<vmem>>, vector<1x1x512xf32>,
    %c0_24 = arith.constant 0 : index
    %c0_25 = arith.constant 0 : index
    %c0_26 = arith.constant 0 : index
    %c4 = arith.constant 4 : index
    %12 = vector.load %arg1[%c0_24, %c0_25, %c0_26, %c4] : memref<1x1x1x527xf32, #tpu.memory_space<vmem>>, vector<1x1x1x512xf32>
    %13 = vector.shape_cast %12 : vector<1x1x1x512xf32> to vector<1x1x512xf32>
    %c0_27 = arith.constant 0 : index
    %c4_28 = arith.constant 4 : index
    %c0_29 = arith.constant 0 : index
    %14 = vector.load %arg4[%c0_27, %c4_28, %c0_29] : memref<1x24x512xf32, #tpu.memory_space<vmem>>, vector<1x1x512xf32>
    tpu.vector_store %arg4[%c0_27, %c4_28, %c0_29], %13 {strides = array<i32>} : memref<1x24x512xf32, #tpu.memory_space<vmem>>, vector<1x1x512xf32>,
    %c0_30 = arith.constant 0 : index
    %c0_31 = arith.constant 0 : index
    %c0_32 = arith.constant 0 : index
    %c5 = arith.constant 5 : index
    %15 = vector.load %arg1[%c0_30, %c0_31, %c0_32, %c5] : memref<1x1x1x527xf32, #tpu.memory_space<vmem>>, vector<1x1x1x512xf32>
    %16 = vector.shape_cast %15 : vector<1x1x1x512xf32> to vector<1x1x512xf32>
    %c0_33 = arith.constant 0 : index
    %c5_34 = arith.constant 5 : index
    %c0_35 = arith.constant 0 : index
    %17 = vector.load %arg4[%c0_33, %c5_34, %c0_35] : memref<1x24x512xf32, #tpu.memory_space<vmem>>, vector<1x1x512xf32>
    tpu.vector_store %arg4[%c0_33, %c5_34, %c0_35], %16 {strides = array<i32>} : memref<1x24x512xf32, #tpu.memory_space<vmem>>, vector<1x1x512xf32>,
    %c0_36 = arith.constant 0 : index
    %c0_37 = arith.constant 0 : index
    %c0_38 = arith.constant 0 : index
    %c6 = arith.constant 6 : index
    %18 = vector.load %arg1[%c0_36, %c0_37, %c0_38, %c6] : memref<1x1x1x527xf32, #tpu.memory_space<vmem>>, vector<1x1x1x512xf32>
    %19 = vector.shape_cast %18 : vector<1x1x1x512xf32> to vector<1x1x512xf32>
    %c0_39 = arith.constant 0 : index
    %c6_40 = arith.constant 6 : index
    %c0_41 = arith.constant 0 : index
    %20 = vector.load %arg4[%c0_39, %c6_40, %c0_41] : memref<1x24x512xf32, #tpu.memory_space<vmem>>, vector<1x1x512xf32>
    tpu.vector_store %arg4[%c0_39, %c6_40, %c0_41], %19 {strides = array<i32>} : memref<1x24x512xf32, #tpu.memory_space<vmem>>, vector<1x1x512xf32>,
    %c0_42 = arith.constant 0 : index
    %c0_43 = arith.constant 0 : index
    %c0_44 = arith.constant 0 : index
    %c7 = arith.constant 7 : index
    %21 = vector.load %arg1[%c0_42, %c0_43, %c0_44, %c7] : memref<1x1x1x527xf32, #tpu.memory_space<vmem>>, vector<1x1x1x512xf32>
    %22 = vector.shape_cast %21 : vector<1x1x1x512xf32> to vector<1x1x512xf32>
    %c0_45 = arith.constant 0 : index
    %c7_46 = arith.constant 7 : index
    %c0_47 = arith.constant 0 : index
    %23 = vector.load %arg4[%c0_45, %c7_46, %c0_47] : memref<1x24x512xf32, #tpu.memory_space<vmem>>, vector<1x1x512xf32>
    tpu.vector_store %arg4[%c0_45, %c7_46, %c0_47], %22 {strides = array<i32>} : memref<1x24x512xf32, #tpu.memory_space<vmem>>, vector<1x1x512xf32>,
    %c0_48 = arith.constant 0 : index
    %c0_49 = arith.constant 0 : index
    %c0_50 = arith.constant 0 : index
    %c8 = arith.constant 8 : index
    %24 = vector.load %arg1[%c0_48, %c0_49, %c0_50, %c8] : memref<1x1x1x527xf32, #tpu.memory_space<vmem>>, vector<1x1x1x512xf32>
    %25 = vector.shape_cast %24 : vector<1x1x1x512xf32> to vector<1x1x512xf32>
    %c0_51 = arith.constant 0 : index
    %c8_52 = arith.constant 8 : index
    %c0_53 = arith.constant 0 : index
    %26 = vector.load %arg4[%c0_51, %c8_52, %c0_53] : memref<1x24x512xf32, #tpu.memory_space<vmem>>, vector<1x1x512xf32>
    tpu.vector_store %arg4[%c0_51, %c8_52, %c0_53], %25 {strides = array<i32>} : memref<1x24x512xf32, #tpu.memory_space<vmem>>, vector<1x1x512xf32>,
    %c0_54 = arith.constant 0 : index
    %c0_55 = arith.constant 0 : index
    %c0_56 = arith.constant 0 : index
    %c9 = arith.constant 9 : index
    %27 = vector.load %arg1[%c0_54, %c0_55, %c0_56, %c9] : memref<1x1x1x527xf32, #tpu.memory_space<vmem>>, vector<1x1x1x512xf32>
    %28 = vector.shape_cast %27 : vector<1x1x1x512xf32> to vector<1x1x512xf32>
    %c0_57 = arith.constant 0 : index
    %c9_58 = arith.constant 9 : index
    %c0_59 = arith.constant 0 : index
    %29 = vector.load %arg4[%c0_57, %c9_58, %c0_59] : memref<1x24x512xf32, #tpu.memory_space<vmem>>, vector<1x1x512xf32>
    tpu.vector_store %arg4[%c0_57, %c9_58, %c0_59], %28 {strides = array<i32>} : memref<1x24x512xf32, #tpu.memory_space<vmem>>, vector<1x1x512xf32>,
    %c0_60 = arith.constant 0 : index
    %c0_61 = arith.constant 0 : index
    %c0_62 = arith.constant 0 : index
    %c10 = arith.constant 10 : index
    %30 = vector.load %arg1[%c0_60, %c0_61, %c0_62, %c10] : memref<1x1x1x527xf32, #tpu.memory_space<vmem>>, vector<1x1x1x512xf32>
    %31 = vector.shape_cast %30 : vector<1x1x1x512xf32> to vector<1x1x512xf32>
    %c0_63 = arith.constant 0 : index
    %c10_64 = arith.constant 10 : index
    %c0_65 = arith.constant 0 : index
    %32 = vector.load %arg4[%c0_63, %c10_64, %c0_65] : memref<1x24x512xf32, #tpu.memory_space<vmem>>, vector<1x1x512xf32>
    tpu.vector_store %arg4[%c0_63, %c10_64, %c0_65], %31 {strides = array<i32>} : memref<1x24x512xf32, #tpu.memory_space<vmem>>, vector<1x1x512xf32>,
    %c0_66 = arith.constant 0 : index
    %c0_67 = arith.constant 0 : index
    %c0_68 = arith.constant 0 : index
    %c11 = arith.constant 11 : index
    %33 = vector.load %arg1[%c0_66, %c0_67, %c0_68, %c11] : memref<1x1x1x527xf32, #tpu.memory_space<vmem>>, vector<1x1x1x512xf32>
    %34 = vector.shape_cast %33 : vector<1x1x1x512xf32> to vector<1x1x512xf32>
    %c0_69 = arith.constant 0 : index
    %c11_70 = arith.constant 11 : index
    %c0_71 = arith.constant 0 : index
    %35 = vector.load %arg4[%c0_69, %c11_70, %c0_71] : memref<1x24x512xf32, #tpu.memory_space<vmem>>, vector<1x1x512xf32>
    tpu.vector_store %arg4[%c0_69, %c11_70, %c0_71], %34 {strides = array<i32>} : memref<1x24x512xf32, #tpu.memory_space<vmem>>, vector<1x1x512xf32>,
    %c0_72 = arith.constant 0 : index
    %c0_73 = arith.constant 0 : index
    %c0_74 = arith.constant 0 : index
    %c12 = arith.constant 12 : index
    %36 = vector.load %arg1[%c0_72, %c0_73, %c0_74, %c12] : memref<1x1x1x527xf32, #tpu.memory_space<vmem>>, vector<1x1x1x512xf32>
    %37 = vector.shape_cast %36 : vector<1x1x1x512xf32> to vector<1x1x512xf32>
    %c0_75 = arith.constant 0 : index
    %c12_76 = arith.constant 12 : index
    %c0_77 = arith.constant 0 : index
    %38 = vector.load %arg4[%c0_75, %c12_76, %c0_77] : memref<1x24x512xf32, #tpu.memory_space<vmem>>, vector<1x1x512xf32>
    tpu.vector_store %arg4[%c0_75, %c12_76, %c0_77], %37 {strides = array<i32>} : memref<1x24x512xf32, #tpu.memory_space<vmem>>, vector<1x1x512xf32>,
    %c0_78 = arith.constant 0 : index
    %c0_79 = arith.constant 0 : index
    %c0_80 = arith.constant 0 : index
    %c13 = arith.constant 13 : index
    %39 = vector.load %arg1[%c0_78, %c0_79, %c0_80, %c13] : memref<1x1x1x527xf32, #tpu.memory_space<vmem>>, vector<1x1x1x512xf32>
    %40 = vector.shape_cast %39 : vector<1x1x1x512xf32> to vector<1x1x512xf32>
    %c0_81 = arith.constant 0 : index
    %c13_82 = arith.constant 13 : index
    %c0_83 = arith.constant 0 : index
    %41 = vector.load %arg4[%c0_81, %c13_82, %c0_83] : memref<1x24x512xf32, #tpu.memory_space<vmem>>, vector<1x1x512xf32>
    tpu.vector_store %arg4[%c0_81, %c13_82, %c0_83], %40 {strides = array<i32>} : memref<1x24x512xf32, #tpu.memory_space<vmem>>, vector<1x1x512xf32>,
    %c0_84 = arith.constant 0 : index
    %c0_85 = arith.constant 0 : index
    %c0_86 = arith.constant 0 : index
    %c14 = arith.constant 14 : index
    %42 = vector.load %arg1[%c0_84, %c0_85, %c0_86, %c14] : memref<1x1x1x527xf32, #tpu.memory_space<vmem>>, vector<1x1x1x512xf32>
    %43 = vector.shape_cast %42 : vector<1x1x1x512xf32> to vector<1x1x512xf32>
    %c0_87 = arith.constant 0 : index
    %c14_88 = arith.constant 14 : index
    %c0_89 = arith.constant 0 : index
    %44 = vector.load %arg4[%c0_87, %c14_88, %c0_89] : memref<1x24x512xf32, #tpu.memory_space<vmem>>, vector<1x1x512xf32>
    tpu.vector_store %arg4[%c0_87, %c14_88, %c0_89], %43 {strides = array<i32>} : memref<1x24x512xf32, #tpu.memory_space<vmem>>, vector<1x1x512xf32>,
    %c0_90 = arith.constant 0 : index
    %c0_91 = arith.constant 0 : index
    %c0_92 = arith.constant 0 : index
    %c15 = arith.constant 15 : index
    %45 = vector.load %arg1[%c0_90, %c0_91, %c0_92, %c15] : memref<1x1x1x527xf32, #tpu.memory_space<vmem>>, vector<1x1x1x512xf32>
    %46 = vector.shape_cast %45 : vector<1x1x1x512xf32> to vector<1x1x512xf32>
    %c0_93 = arith.constant 0 : index
    %c15_94 = arith.constant 15 : index
    %c0_95 = arith.constant 0 : index
    %47 = vector.load %arg4[%c0_93, %c15_94, %c0_95] : memref<1x24x512xf32, #tpu.memory_space<vmem>>, vector<1x1x512xf32>
    tpu.vector_store %arg4[%c0_93, %c15_94, %c0_95], %46 {strides = array<i32>} : memref<1x24x512xf32, #tpu.memory_space<vmem>>, vector<1x1x512xf32>,
    %cst = arith.constant 1.000000e+00 : f32
    %48 = vector.broadcast %cst : f32 to vector<1x8x512xf32>
    %c0_96 = arith.constant 0 : index
    %c16 = arith.constant 16 : index
    %c0_97 = arith.constant 0 : index
    %49 = vector.load %arg4[%c0_96, %c16, %c0_97] : memref<1x24x512xf32, #tpu.memory_space<vmem>>, vector<1x8x512xf32>
    tpu.vector_store %arg4[%c0_96, %c16, %c0_97], %48 {strides = array<i32>} : memref<1x24x512xf32, #tpu.memory_space<vmem>>, vector<1x8x512xf32>,
    %c0_98 = arith.constant 0 : index
    %c0_99 = arith.constant 0 : index
    %c0_100 = arith.constant 0 : index
    %50 = vector.load %arg2[%c0_98, %c0_99, %c0_100] : memref<1x32x24xf32, #tpu.memory_space<vmem>>, vector<1x32x24xf32>
    %c0_101 = arith.constant 0 : index
    %c0_102 = arith.constant 0 : index
    %c0_103 = arith.constant 0 : index
    %51 = vector.load %arg4[%c0_101, %c0_102, %c0_103] : memref<1x24x512xf32, #tpu.memory_space<vmem>>, vector<1x24x512xf32>
    %cst_104 = arith.constant dense<0.000000e+00> : vector<1x32x512xf32>
    %52 = tpu.matmul %50, %51, %cst_104 {dimension_numbers = #tpu.dot_dimension_numbers<[2], [1], [1], [2], [0, 0, 0, 1, 1, 2], [0], [0]>} : vector<1x32x24xf32>, vector<1x24x512xf32>, vector<1x32x512xf32> -> vector<1x32x512xf32>
    %cst_105 = arith.constant 0.000000e+00 : f32
    %53 = vector.broadcast %cst_105 : f32 to vector<1x32x512xf32>
    %54 = arith.cmpf oge, %52, %53 : vector<1x32x512xf32>
    %cst_106 = arith.constant 2.000000e-01 : f32
    %55 = vector.broadcast %cst_106 : f32 to vector<1x32x512xf32>
    %56 = arith.mulf %55, %52 : vector<1x32x512xf32>
    %57 = arith.select %54, %52, %56 : vector<1x32x512xi1>, vector<1x32x512xf32>
    %c0_107 = arith.constant 0 : index
    %c0_108 = arith.constant 0 : index
    %c0_109 = arith.constant 0 : index
    %c0_110 = arith.constant 0 : index
    %58 = vector.load %arg3[%c0_107, %c0_108, %c0_109, %c0_110] : memref<1x1x32x512xf32, #tpu.memory_space<vmem>>, vector<1x1x32x512xf32>
    %59 = vector.shape_cast %58 : vector<1x1x32x512xf32> to vector<1x32x512xf32>
    %60 = vector.shape_cast %57 : vector<1x32x512xf32> to vector<1x1x32x512xf32>
    tpu.vector_store %arg3[%c0_107, %c0_108, %c0_109, %c0_110], %60 {strides = array<i32>} : memref<1x1x32x512xf32, #tpu.memory_space<vmem>>, vector<1x1x32x512xf32>,
    return
  }
  func.func @transform_0(%arg0: i32) -> (i32, i32, i32, i32) {
    %c0_i32 = arith.constant 0 : i32
    %c0_i32_0 = arith.constant 0 : i32
    %c0_i32_1 = arith.constant 0 : i32
    %c0_i32_2 = arith.constant 0 : i32
    return %arg0, %c0_i32, %c0_i32_0, %c0_i32_1 : i32, i32, i32, i32
  }
  func.func @transform_1(%arg0: i32) -> (i32, i32, i32) {
    %c0_i32 = arith.constant 0 : i32
    %c0_i32_0 = arith.constant 0 : i32
    %c0_i32_1 = arith.constant 0 : i32
    %c0_i32_2 = arith.constant 0 : i32
    return %c0_i32, %c0_i32_0, %c0_i32_1 : i32, i32, i32
  }
  func.func @transform_2(%arg0: i32) -> (i32, i32, i32, i32) {
    %c0_i32 = arith.constant 0 : i32
    %c0_i32_0 = arith.constant 0 : i32
    %c0_i32_1 = arith.constant 0 : i32
    %c0_i32_2 = arith.constant 0 : i32
    return %arg0, %c0_i32, %c0_i32_0, %c0_i32_1 : i32, i32, i32, i32
  }
}

module attributes {stable_mosaic.version = 11 : i64} {
  func.func @_conv1d_im2col_kernel(%arg0: i32, %arg1: memref<1x8x4x522xf32, #tpu.memory_space<vmem>>, %arg2: memref<8x4x48xf32, #tpu.memory_space<vmem>>, %arg3: memref<1x8x4x512xf32, #tpu.memory_space<vmem>>, %arg4: memref<8x48x512xf32, #tpu.memory_space<vmem>>) attributes {dimension_semantics = [#tpu.dimension_semantics<parallel>], iteration_bounds = array<i64: 2>, scalar_prefetch = 0 : i64, scratch_operands = 1 : i64, tpu.core_type = #tpu.core_type<tc>, window_params = [{transform_indices = @transform_0, window_bounds = array<i64: 1, 8, 4, 522>}, {pipeline_mode = #tpu.pipeline_mode<synchronous>, transform_indices = @transform_1, window_bounds = array<i64: 8, 4, 48>}, {transform_indices = @transform_2, window_bounds = array<i64: 1, 8, 4, 512>}]} {
    %c0 = arith.constant 0 : index
    %c0_0 = arith.constant 0 : index
    %c0_1 = arith.constant 0 : index
    %c0_2 = arith.constant 0 : index
    %0 = vector.load %arg1[%c0, %c0_0, %c0_1, %c0_2] : memref<1x8x4x522xf32, #tpu.memory_space<vmem>>, vector<1x8x4x512xf32>
    %1 = vector.shape_cast %0 : vector<1x8x4x512xf32> to vector<8x4x512xf32>
    %c0_3 = arith.constant 0 : index
    %c0_4 = arith.constant 0 : index
    %c0_5 = arith.constant 0 : index
    %2 = vector.load %arg4[%c0_3, %c0_4, %c0_5] : memref<8x48x512xf32, #tpu.memory_space<vmem>>, vector<8x4x512xf32>
    tpu.vector_store %arg4[%c0_3, %c0_4, %c0_5], %1 {strides = array<i32>} : memref<8x48x512xf32, #tpu.memory_space<vmem>>, vector<8x4x512xf32>,
    %c0_6 = arith.constant 0 : index
    %c0_7 = arith.constant 0 : index
    %c0_8 = arith.constant 0 : index
    %c1 = arith.constant 1 : index
    %3 = vector.load %arg1[%c0_6, %c0_7, %c0_8, %c1] : memref<1x8x4x522xf32, #tpu.memory_space<vmem>>, vector<1x8x4x512xf32>
    %4 = vector.shape_cast %3 : vector<1x8x4x512xf32> to vector<8x4x512xf32>
    %c0_9 = arith.constant 0 : index
    %c4 = arith.constant 4 : index
    %c0_10 = arith.constant 0 : index
    %5 = vector.load %arg4[%c0_9, %c4, %c0_10] : memref<8x48x512xf32, #tpu.memory_space<vmem>>, vector<8x4x512xf32>
    tpu.vector_store %arg4[%c0_9, %c4, %c0_10], %4 {strides = array<i32>} : memref<8x48x512xf32, #tpu.memory_space<vmem>>, vector<8x4x512xf32>,
    %c0_11 = arith.constant 0 : index
    %c0_12 = arith.constant 0 : index
    %c0_13 = arith.constant 0 : index
    %c2 = arith.constant 2 : index
    %6 = vector.load %arg1[%c0_11, %c0_12, %c0_13, %c2] : memref<1x8x4x522xf32, #tpu.memory_space<vmem>>, vector<1x8x4x512xf32>
    %7 = vector.shape_cast %6 : vector<1x8x4x512xf32> to vector<8x4x512xf32>
    %c0_14 = arith.constant 0 : index
    %c8 = arith.constant 8 : index
    %c0_15 = arith.constant 0 : index
    %8 = vector.load %arg4[%c0_14, %c8, %c0_15] : memref<8x48x512xf32, #tpu.memory_space<vmem>>, vector<8x4x512xf32>
    tpu.vector_store %arg4[%c0_14, %c8, %c0_15], %7 {strides = array<i32>} : memref<8x48x512xf32, #tpu.memory_space<vmem>>, vector<8x4x512xf32>,
    %c0_16 = arith.constant 0 : index
    %c0_17 = arith.constant 0 : index
    %c0_18 = arith.constant 0 : index
    %c3 = arith.constant 3 : index
    %9 = vector.load %arg1[%c0_16, %c0_17, %c0_18, %c3] : memref<1x8x4x522xf32, #tpu.memory_space<vmem>>, vector<1x8x4x512xf32>
    %10 = vector.shape_cast %9 : vector<1x8x4x512xf32> to vector<8x4x512xf32>
    %c0_19 = arith.constant 0 : index
    %c12 = arith.constant 12 : index
    %c0_20 = arith.constant 0 : index
    %11 = vector.load %arg4[%c0_19, %c12, %c0_20] : memref<8x48x512xf32, #tpu.memory_space<vmem>>, vector<8x4x512xf32>
    tpu.vector_store %arg4[%c0_19, %c12, %c0_20], %10 {strides = array<i32>} : memref<8x48x512xf32, #tpu.memory_space<vmem>>, vector<8x4x512xf32>,
    %c0_21 = arith.constant 0 : index
    %c0_22 = arith.constant 0 : index
    %c0_23 = arith.constant 0 : index
    %c4_24 = arith.constant 4 : index
    %12 = vector.load %arg1[%c0_21, %c0_22, %c0_23, %c4_24] : memref<1x8x4x522xf32, #tpu.memory_space<vmem>>, vector<1x8x4x512xf32>
    %13 = vector.shape_cast %12 : vector<1x8x4x512xf32> to vector<8x4x512xf32>
    %c0_25 = arith.constant 0 : index
    %c16 = arith.constant 16 : index
    %c0_26 = arith.constant 0 : index
    %14 = vector.load %arg4[%c0_25, %c16, %c0_26] : memref<8x48x512xf32, #tpu.memory_space<vmem>>, vector<8x4x512xf32>
    tpu.vector_store %arg4[%c0_25, %c16, %c0_26], %13 {strides = array<i32>} : memref<8x48x512xf32, #tpu.memory_space<vmem>>, vector<8x4x512xf32>,
    %c0_27 = arith.constant 0 : index
    %c0_28 = arith.constant 0 : index
    %c0_29 = arith.constant 0 : index
    %c5 = arith.constant 5 : index
    %15 = vector.load %arg1[%c0_27, %c0_28, %c0_29, %c5] : memref<1x8x4x522xf32, #tpu.memory_space<vmem>>, vector<1x8x4x512xf32>
    %16 = vector.shape_cast %15 : vector<1x8x4x512xf32> to vector<8x4x512xf32>
    %c0_30 = arith.constant 0 : index
    %c20 = arith.constant 20 : index
    %c0_31 = arith.constant 0 : index
    %17 = vector.load %arg4[%c0_30, %c20, %c0_31] : memref<8x48x512xf32, #tpu.memory_space<vmem>>, vector<8x4x512xf32>
    tpu.vector_store %arg4[%c0_30, %c20, %c0_31], %16 {strides = array<i32>} : memref<8x48x512xf32, #tpu.memory_space<vmem>>, vector<8x4x512xf32>,
    %c0_32 = arith.constant 0 : index
    %c0_33 = arith.constant 0 : index
    %c0_34 = arith.constant 0 : index
    %c6 = arith.constant 6 : index
    %18 = vector.load %arg1[%c0_32, %c0_33, %c0_34, %c6] : memref<1x8x4x522xf32, #tpu.memory_space<vmem>>, vector<1x8x4x512xf32>
    %19 = vector.shape_cast %18 : vector<1x8x4x512xf32> to vector<8x4x512xf32>
    %c0_35 = arith.constant 0 : index
    %c24 = arith.constant 24 : index
    %c0_36 = arith.constant 0 : index
    %20 = vector.load %arg4[%c0_35, %c24, %c0_36] : memref<8x48x512xf32, #tpu.memory_space<vmem>>, vector<8x4x512xf32>
    tpu.vector_store %arg4[%c0_35, %c24, %c0_36], %19 {strides = array<i32>} : memref<8x48x512xf32, #tpu.memory_space<vmem>>, vector<8x4x512xf32>,
    %c0_37 = arith.constant 0 : index
    %c0_38 = arith.constant 0 : index
    %c0_39 = arith.constant 0 : index
    %c7 = arith.constant 7 : index
    %21 = vector.load %arg1[%c0_37, %c0_38, %c0_39, %c7] : memref<1x8x4x522xf32, #tpu.memory_space<vmem>>, vector<1x8x4x512xf32>
    %22 = vector.shape_cast %21 : vector<1x8x4x512xf32> to vector<8x4x512xf32>
    %c0_40 = arith.constant 0 : index
    %c28 = arith.constant 28 : index
    %c0_41 = arith.constant 0 : index
    %23 = vector.load %arg4[%c0_40, %c28, %c0_41] : memref<8x48x512xf32, #tpu.memory_space<vmem>>, vector<8x4x512xf32>
    tpu.vector_store %arg4[%c0_40, %c28, %c0_41], %22 {strides = array<i32>} : memref<8x48x512xf32, #tpu.memory_space<vmem>>, vector<8x4x512xf32>,
    %c0_42 = arith.constant 0 : index
    %c0_43 = arith.constant 0 : index
    %c0_44 = arith.constant 0 : index
    %c8_45 = arith.constant 8 : index
    %24 = vector.load %arg1[%c0_42, %c0_43, %c0_44, %c8_45] : memref<1x8x4x522xf32, #tpu.memory_space<vmem>>, vector<1x8x4x512xf32>
    %25 = vector.shape_cast %24 : vector<1x8x4x512xf32> to vector<8x4x512xf32>
    %c0_46 = arith.constant 0 : index
    %c32 = arith.constant 32 : index
    %c0_47 = arith.constant 0 : index
    %26 = vector.load %arg4[%c0_46, %c32, %c0_47] : memref<8x48x512xf32, #tpu.memory_space<vmem>>, vector<8x4x512xf32>
    tpu.vector_store %arg4[%c0_46, %c32, %c0_47], %25 {strides = array<i32>} : memref<8x48x512xf32, #tpu.memory_space<vmem>>, vector<8x4x512xf32>,
    %c0_48 = arith.constant 0 : index
    %c0_49 = arith.constant 0 : index
    %c0_50 = arith.constant 0 : index
    %c9 = arith.constant 9 : index
    %27 = vector.load %arg1[%c0_48, %c0_49, %c0_50, %c9] : memref<1x8x4x522xf32, #tpu.memory_space<vmem>>, vector<1x8x4x512xf32>
    %28 = vector.shape_cast %27 : vector<1x8x4x512xf32> to vector<8x4x512xf32>
    %c0_51 = arith.constant 0 : index
    %c36 = arith.constant 36 : index
    %c0_52 = arith.constant 0 : index
    %29 = vector.load %arg4[%c0_51, %c36, %c0_52] : memref<8x48x512xf32, #tpu.memory_space<vmem>>, vector<8x4x512xf32>
    tpu.vector_store %arg4[%c0_51, %c36, %c0_52], %28 {strides = array<i32>} : memref<8x48x512xf32, #tpu.memory_space<vmem>>, vector<8x4x512xf32>,
    %c0_53 = arith.constant 0 : index
    %c0_54 = arith.constant 0 : index
    %c0_55 = arith.constant 0 : index
    %c10 = arith.constant 10 : index
    %30 = vector.load %arg1[%c0_53, %c0_54, %c0_55, %c10] : memref<1x8x4x522xf32, #tpu.memory_space<vmem>>, vector<1x8x4x512xf32>
    %31 = vector.shape_cast %30 : vector<1x8x4x512xf32> to vector<8x4x512xf32>
    %c0_56 = arith.constant 0 : index
    %c40 = arith.constant 40 : index
    %c0_57 = arith.constant 0 : index
    %32 = vector.load %arg4[%c0_56, %c40, %c0_57] : memref<8x48x512xf32, #tpu.memory_space<vmem>>, vector<8x4x512xf32>
    tpu.vector_store %arg4[%c0_56, %c40, %c0_57], %31 {strides = array<i32>} : memref<8x48x512xf32, #tpu.memory_space<vmem>>, vector<8x4x512xf32>,
    %cst = arith.constant 1.000000e+00 : f32
    %33 = vector.broadcast %cst : f32 to vector<8x4x512xf32>
    %c0_58 = arith.constant 0 : index
    %c44 = arith.constant 44 : index
    %c0_59 = arith.constant 0 : index
    %34 = vector.load %arg4[%c0_58, %c44, %c0_59] : memref<8x48x512xf32, #tpu.memory_space<vmem>>, vector<8x4x512xf32>
    tpu.vector_store %arg4[%c0_58, %c44, %c0_59], %33 {strides = array<i32>} : memref<8x48x512xf32, #tpu.memory_space<vmem>>, vector<8x4x512xf32>,
    %c0_60 = arith.constant 0 : index
    %c0_61 = arith.constant 0 : index
    %c0_62 = arith.constant 0 : index
    %35 = vector.load %arg2[%c0_60, %c0_61, %c0_62] : memref<8x4x48xf32, #tpu.memory_space<vmem>>, vector<8x4x48xf32>
    %c0_63 = arith.constant 0 : index
    %c0_64 = arith.constant 0 : index
    %c0_65 = arith.constant 0 : index
    %36 = vector.load %arg4[%c0_63, %c0_64, %c0_65] : memref<8x48x512xf32, #tpu.memory_space<vmem>>, vector<8x48x512xf32>
    %cst_66 = arith.constant dense<0.000000e+00> : vector<8x4x512xf32>
    %37 = tpu.matmul %35, %36, %cst_66 {dimension_numbers = #tpu.dot_dimension_numbers<[2], [1], [1], [2], [0, 0, 0, 1, 1, 2], [0], [0]>} : vector<8x4x48xf32>, vector<8x48x512xf32>, vector<8x4x512xf32> -> vector<8x4x512xf32>
    %cst_67 = arith.constant 0.000000e+00 : f32
    %38 = vector.broadcast %cst_67 : f32 to vector<8x4x512xf32>
    %39 = arith.cmpf oge, %37, %38 : vector<8x4x512xf32>
    %cst_68 = arith.constant 2.000000e-01 : f32
    %40 = vector.broadcast %cst_68 : f32 to vector<8x4x512xf32>
    %41 = arith.mulf %40, %37 : vector<8x4x512xf32>
    %42 = arith.select %39, %37, %41 : vector<8x4x512xi1>, vector<8x4x512xf32>
    %c0_69 = arith.constant 0 : index
    %c0_70 = arith.constant 0 : index
    %c0_71 = arith.constant 0 : index
    %c0_72 = arith.constant 0 : index
    %43 = vector.load %arg3[%c0_69, %c0_70, %c0_71, %c0_72] : memref<1x8x4x512xf32, #tpu.memory_space<vmem>>, vector<1x8x4x512xf32>
    %44 = vector.shape_cast %43 : vector<1x8x4x512xf32> to vector<8x4x512xf32>
    %45 = vector.shape_cast %42 : vector<8x4x512xf32> to vector<1x8x4x512xf32>
    tpu.vector_store %arg3[%c0_69, %c0_70, %c0_71, %c0_72], %45 {strides = array<i32>} : memref<1x8x4x512xf32, #tpu.memory_space<vmem>>, vector<1x8x4x512xf32>,
    return
  }
  func.func @transform_0(%arg0: i32) -> (i32, i32, i32, i32) {
    %c0_i32 = arith.constant 0 : i32
    %c0_i32_0 = arith.constant 0 : i32
    %c0_i32_1 = arith.constant 0 : i32
    %c0_i32_2 = arith.constant 0 : i32
    return %arg0, %c0_i32, %c0_i32_0, %c0_i32_1 : i32, i32, i32, i32
  }
  func.func @transform_1(%arg0: i32) -> (i32, i32, i32) {
    %c0_i32 = arith.constant 0 : i32
    %c0_i32_0 = arith.constant 0 : i32
    %c0_i32_1 = arith.constant 0 : i32
    %c0_i32_2 = arith.constant 0 : i32
    return %c0_i32, %c0_i32_0, %c0_i32_1 : i32, i32, i32
  }
  func.func @transform_2(%arg0: i32) -> (i32, i32, i32, i32) {
    %c0_i32 = arith.constant 0 : i32
    %c0_i32_0 = arith.constant 0 : i32
    %c0_i32_1 = arith.constant 0 : i32
    %c0_i32_2 = arith.constant 0 : i32
    return %arg0, %c0_i32, %c0_i32_0, %c0_i32_1 : i32, i32, i32, i32
  }
}

module attributes {stable_mosaic.version = 11 : i64} {
  func.func @_conv1d_im2col_kernel(%arg0: i32, %arg1: memref<1x1x32x521xf32, #tpu.memory_space<vmem>>, %arg2: memref<1x64x328xf32, #tpu.memory_space<vmem>>, %arg3: memref<1x1x64x512xf32, #tpu.memory_space<vmem>>, %arg4: memref<1x328x512xf32, #tpu.memory_space<vmem>>) attributes {dimension_semantics = [#tpu.dimension_semantics<parallel>], iteration_bounds = array<i64: 2>, scalar_prefetch = 0 : i64, scratch_operands = 1 : i64, tpu.core_type = #tpu.core_type<tc>, window_params = [{transform_indices = @transform_0, window_bounds = array<i64: 1, 1, 32, 521>}, {pipeline_mode = #tpu.pipeline_mode<synchronous>, transform_indices = @transform_1, window_bounds = array<i64: 1, 64, 328>}, {transform_indices = @transform_2, window_bounds = array<i64: 1, 1, 64, 512>}]} {
    %c0 = arith.constant 0 : index
    %c0_0 = arith.constant 0 : index
    %c0_1 = arith.constant 0 : index
    %c0_2 = arith.constant 0 : index
    %0 = vector.load %arg1[%c0, %c0_0, %c0_1, %c0_2] : memref<1x1x32x521xf32, #tpu.memory_space<vmem>>, vector<1x1x32x512xf32>
    %1 = vector.shape_cast %0 : vector<1x1x32x512xf32> to vector<1x32x512xf32>
    %c0_3 = arith.constant 0 : index
    %c0_4 = arith.constant 0 : index
    %c0_5 = arith.constant 0 : index
    %2 = vector.load %arg4[%c0_3, %c0_4, %c0_5] : memref<1x328x512xf32, #tpu.memory_space<vmem>>, vector<1x32x512xf32>
    tpu.vector_store %arg4[%c0_3, %c0_4, %c0_5], %1 {strides = array<i32>} : memref<1x328x512xf32, #tpu.memory_space<vmem>>, vector<1x32x512xf32>,
    %c0_6 = arith.constant 0 : index
    %c0_7 = arith.constant 0 : index
    %c0_8 = arith.constant 0 : index
    %c1 = arith.constant 1 : index
    %3 = vector.load %arg1[%c0_6, %c0_7, %c0_8, %c1] : memref<1x1x32x521xf32, #tpu.memory_space<vmem>>, vector<1x1x32x512xf32>
    %4 = vector.shape_cast %3 : vector<1x1x32x512xf32> to vector<1x32x512xf32>
    %c0_9 = arith.constant 0 : index
    %c32 = arith.constant 32 : index
    %c0_10 = arith.constant 0 : index
    %5 = vector.load %arg4[%c0_9, %c32, %c0_10] : memref<1x328x512xf32, #tpu.memory_space<vmem>>, vector<1x32x512xf32>
    tpu.vector_store %arg4[%c0_9, %c32, %c0_10], %4 {strides = array<i32>} : memref<1x328x512xf32, #tpu.memory_space<vmem>>, vector<1x32x512xf32>,
    %c0_11 = arith.constant 0 : index
    %c0_12 = arith.constant 0 : index
    %c0_13 = arith.constant 0 : index
    %c2 = arith.constant 2 : index
    %6 = vector.load %arg1[%c0_11, %c0_12, %c0_13, %c2] : memref<1x1x32x521xf32, #tpu.memory_space<vmem>>, vector<1x1x32x512xf32>
    %7 = vector.shape_cast %6 : vector<1x1x32x512xf32> to vector<1x32x512xf32>
    %c0_14 = arith.constant 0 : index
    %c64 = arith.constant 64 : index
    %c0_15 = arith.constant 0 : index
    %8 = vector.load %arg4[%c0_14, %c64, %c0_15] : memref<1x328x512xf32, #tpu.memory_space<vmem>>, vector<1x32x512xf32>
    tpu.vector_store %arg4[%c0_14, %c64, %c0_15], %7 {strides = array<i32>} : memref<1x328x512xf32, #tpu.memory_space<vmem>>, vector<1x32x512xf32>,
    %c0_16 = arith.constant 0 : index
    %c0_17 = arith.constant 0 : index
    %c0_18 = arith.constant 0 : index
    %c3 = arith.constant 3 : index
    %9 = vector.load %arg1[%c0_16, %c0_17, %c0_18, %c3] : memref<1x1x32x521xf32, #tpu.memory_space<vmem>>, vector<1x1x32x512xf32>
    %10 = vector.shape_cast %9 : vector<1x1x32x512xf32> to vector<1x32x512xf32>
    %c0_19 = arith.constant 0 : index
    %c96 = arith.constant 96 : index
    %c0_20 = arith.constant 0 : index
    %11 = vector.load %arg4[%c0_19, %c96, %c0_20] : memref<1x328x512xf32, #tpu.memory_space<vmem>>, vector<1x32x512xf32>
    tpu.vector_store %arg4[%c0_19, %c96, %c0_20], %10 {strides = array<i32>} : memref<1x328x512xf32, #tpu.memory_space<vmem>>, vector<1x32x512xf32>,
    %c0_21 = arith.constant 0 : index
    %c0_22 = arith.constant 0 : index
    %c0_23 = arith.constant 0 : index
    %c4 = arith.constant 4 : index
    %12 = vector.load %arg1[%c0_21, %c0_22, %c0_23, %c4] : memref<1x1x32x521xf32, #tpu.memory_space<vmem>>, vector<1x1x32x512xf32>
    %13 = vector.shape_cast %12 : vector<1x1x32x512xf32> to vector<1x32x512xf32>
    %c0_24 = arith.constant 0 : index
    %c128 = arith.constant 128 : index
    %c0_25 = arith.constant 0 : index
    %14 = vector.load %arg4[%c0_24, %c128, %c0_25] : memref<1x328x512xf32, #tpu.memory_space<vmem>>, vector<1x32x512xf32>
    tpu.vector_store %arg4[%c0_24, %c128, %c0_25], %13 {strides = array<i32>} : memref<1x328x512xf32, #tpu.memory_space<vmem>>, vector<1x32x512xf32>,
    %c0_26 = arith.constant 0 : index
    %c0_27 = arith.constant 0 : index
    %c0_28 = arith.constant 0 : index
    %c5 = arith.constant 5 : index
    %15 = vector.load %arg1[%c0_26, %c0_27, %c0_28, %c5] : memref<1x1x32x521xf32, #tpu.memory_space<vmem>>, vector<1x1x32x512xf32>
    %16 = vector.shape_cast %15 : vector<1x1x32x512xf32> to vector<1x32x512xf32>
    %c0_29 = arith.constant 0 : index
    %c160 = arith.constant 160 : index
    %c0_30 = arith.constant 0 : index
    %17 = vector.load %arg4[%c0_29, %c160, %c0_30] : memref<1x328x512xf32, #tpu.memory_space<vmem>>, vector<1x32x512xf32>
    tpu.vector_store %arg4[%c0_29, %c160, %c0_30], %16 {strides = array<i32>} : memref<1x328x512xf32, #tpu.memory_space<vmem>>, vector<1x32x512xf32>,
    %c0_31 = arith.constant 0 : index
    %c0_32 = arith.constant 0 : index
    %c0_33 = arith.constant 0 : index
    %c6 = arith.constant 6 : index
    %18 = vector.load %arg1[%c0_31, %c0_32, %c0_33, %c6] : memref<1x1x32x521xf32, #tpu.memory_space<vmem>>, vector<1x1x32x512xf32>
    %19 = vector.shape_cast %18 : vector<1x1x32x512xf32> to vector<1x32x512xf32>
    %c0_34 = arith.constant 0 : index
    %c192 = arith.constant 192 : index
    %c0_35 = arith.constant 0 : index
    %20 = vector.load %arg4[%c0_34, %c192, %c0_35] : memref<1x328x512xf32, #tpu.memory_space<vmem>>, vector<1x32x512xf32>
    tpu.vector_store %arg4[%c0_34, %c192, %c0_35], %19 {strides = array<i32>} : memref<1x328x512xf32, #tpu.memory_space<vmem>>, vector<1x32x512xf32>,
    %c0_36 = arith.constant 0 : index
    %c0_37 = arith.constant 0 : index
    %c0_38 = arith.constant 0 : index
    %c7 = arith.constant 7 : index
    %21 = vector.load %arg1[%c0_36, %c0_37, %c0_38, %c7] : memref<1x1x32x521xf32, #tpu.memory_space<vmem>>, vector<1x1x32x512xf32>
    %22 = vector.shape_cast %21 : vector<1x1x32x512xf32> to vector<1x32x512xf32>
    %c0_39 = arith.constant 0 : index
    %c224 = arith.constant 224 : index
    %c0_40 = arith.constant 0 : index
    %23 = vector.load %arg4[%c0_39, %c224, %c0_40] : memref<1x328x512xf32, #tpu.memory_space<vmem>>, vector<1x32x512xf32>
    tpu.vector_store %arg4[%c0_39, %c224, %c0_40], %22 {strides = array<i32>} : memref<1x328x512xf32, #tpu.memory_space<vmem>>, vector<1x32x512xf32>,
    %c0_41 = arith.constant 0 : index
    %c0_42 = arith.constant 0 : index
    %c0_43 = arith.constant 0 : index
    %c8 = arith.constant 8 : index
    %24 = vector.load %arg1[%c0_41, %c0_42, %c0_43, %c8] : memref<1x1x32x521xf32, #tpu.memory_space<vmem>>, vector<1x1x32x512xf32>
    %25 = vector.shape_cast %24 : vector<1x1x32x512xf32> to vector<1x32x512xf32>
    %c0_44 = arith.constant 0 : index
    %c256 = arith.constant 256 : index
    %c0_45 = arith.constant 0 : index
    %26 = vector.load %arg4[%c0_44, %c256, %c0_45] : memref<1x328x512xf32, #tpu.memory_space<vmem>>, vector<1x32x512xf32>
    tpu.vector_store %arg4[%c0_44, %c256, %c0_45], %25 {strides = array<i32>} : memref<1x328x512xf32, #tpu.memory_space<vmem>>, vector<1x32x512xf32>,
    %c0_46 = arith.constant 0 : index
    %c0_47 = arith.constant 0 : index
    %c0_48 = arith.constant 0 : index
    %c9 = arith.constant 9 : index
    %27 = vector.load %arg1[%c0_46, %c0_47, %c0_48, %c9] : memref<1x1x32x521xf32, #tpu.memory_space<vmem>>, vector<1x1x32x512xf32>
    %28 = vector.shape_cast %27 : vector<1x1x32x512xf32> to vector<1x32x512xf32>
    %c0_49 = arith.constant 0 : index
    %c288 = arith.constant 288 : index
    %c0_50 = arith.constant 0 : index
    %29 = vector.load %arg4[%c0_49, %c288, %c0_50] : memref<1x328x512xf32, #tpu.memory_space<vmem>>, vector<1x32x512xf32>
    tpu.vector_store %arg4[%c0_49, %c288, %c0_50], %28 {strides = array<i32>} : memref<1x328x512xf32, #tpu.memory_space<vmem>>, vector<1x32x512xf32>,
    %cst = arith.constant 1.000000e+00 : f32
    %30 = vector.broadcast %cst : f32 to vector<1x8x512xf32>
    %c0_51 = arith.constant 0 : index
    %c320 = arith.constant 320 : index
    %c0_52 = arith.constant 0 : index
    %31 = vector.load %arg4[%c0_51, %c320, %c0_52] : memref<1x328x512xf32, #tpu.memory_space<vmem>>, vector<1x8x512xf32>
    tpu.vector_store %arg4[%c0_51, %c320, %c0_52], %30 {strides = array<i32>} : memref<1x328x512xf32, #tpu.memory_space<vmem>>, vector<1x8x512xf32>,
    %c0_53 = arith.constant 0 : index
    %c0_54 = arith.constant 0 : index
    %c0_55 = arith.constant 0 : index
    %32 = vector.load %arg2[%c0_53, %c0_54, %c0_55] : memref<1x64x328xf32, #tpu.memory_space<vmem>>, vector<1x64x328xf32>
    %c0_56 = arith.constant 0 : index
    %c0_57 = arith.constant 0 : index
    %c0_58 = arith.constant 0 : index
    %33 = vector.load %arg4[%c0_56, %c0_57, %c0_58] : memref<1x328x512xf32, #tpu.memory_space<vmem>>, vector<1x328x512xf32>
    %cst_59 = arith.constant dense<0.000000e+00> : vector<1x64x512xf32>
    %34 = tpu.matmul %32, %33, %cst_59 {dimension_numbers = #tpu.dot_dimension_numbers<[2], [1], [1], [2], [0, 0, 0, 1, 1, 2], [0], [0]>} : vector<1x64x328xf32>, vector<1x328x512xf32>, vector<1x64x512xf32> -> vector<1x64x512xf32>
    %cst_60 = arith.constant 0.000000e+00 : f32
    %35 = vector.broadcast %cst_60 : f32 to vector<1x64x512xf32>
    %36 = arith.cmpf oge, %34, %35 : vector<1x64x512xf32>
    %cst_61 = arith.constant 2.000000e-01 : f32
    %37 = vector.broadcast %cst_61 : f32 to vector<1x64x512xf32>
    %38 = arith.mulf %37, %34 : vector<1x64x512xf32>
    %39 = arith.select %36, %34, %38 : vector<1x64x512xi1>, vector<1x64x512xf32>
    %c0_62 = arith.constant 0 : index
    %c0_63 = arith.constant 0 : index
    %c0_64 = arith.constant 0 : index
    %c0_65 = arith.constant 0 : index
    %40 = vector.load %arg3[%c0_62, %c0_63, %c0_64, %c0_65] : memref<1x1x64x512xf32, #tpu.memory_space<vmem>>, vector<1x1x64x512xf32>
    %41 = vector.shape_cast %40 : vector<1x1x64x512xf32> to vector<1x64x512xf32>
    %42 = vector.shape_cast %39 : vector<1x64x512xf32> to vector<1x1x64x512xf32>
    tpu.vector_store %arg3[%c0_62, %c0_63, %c0_64, %c0_65], %42 {strides = array<i32>} : memref<1x1x64x512xf32, #tpu.memory_space<vmem>>, vector<1x1x64x512xf32>,
    return
  }
  func.func @transform_0(%arg0: i32) -> (i32, i32, i32, i32) {
    %c0_i32 = arith.constant 0 : i32
    %c0_i32_0 = arith.constant 0 : i32
    %c0_i32_1 = arith.constant 0 : i32
    %c0_i32_2 = arith.constant 0 : i32
    return %arg0, %c0_i32, %c0_i32_0, %c0_i32_1 : i32, i32, i32, i32
  }
  func.func @transform_1(%arg0: i32) -> (i32, i32, i32) {
    %c0_i32 = arith.constant 0 : i32
    %c0_i32_0 = arith.constant 0 : i32
    %c0_i32_1 = arith.constant 0 : i32
    %c0_i32_2 = arith.constant 0 : i32
    return %c0_i32, %c0_i32_0, %c0_i32_1 : i32, i32, i32
  }
  func.func @transform_2(%arg0: i32) -> (i32, i32, i32, i32) {
    %c0_i32 = arith.constant 0 : i32
    %c0_i32_0 = arith.constant 0 : i32
    %c0_i32_1 = arith.constant 0 : i32
    %c0_i32_2 = arith.constant 0 : i32
    return %arg0, %c0_i32, %c0_i32_0, %c0_i32_1 : i32, i32, i32, i32
  }
}

module attributes {stable_mosaic.version = 11 : i64} {
  func.func @_conv1d_im2col_kernel(%arg0: i32, %arg1: memref<1x1x64x514xf32, #tpu.memory_space<vmem>>, %arg2: memref<1x1x200xf32, #tpu.memory_space<vmem>>, %arg3: memref<1x1x1x512xf32, #tpu.memory_space<vmem>>, %arg4: memref<1x200x512xf32, #tpu.memory_space<vmem>>) attributes {dimension_semantics = [#tpu.dimension_semantics<parallel>], iteration_bounds = array<i64: 2>, scalar_prefetch = 0 : i64, scratch_operands = 1 : i64, tpu.core_type = #tpu.core_type<tc>, window_params = [{transform_indices = @transform_0, window_bounds = array<i64: 1, 1, 64, 514>}, {pipeline_mode = #tpu.pipeline_mode<synchronous>, transform_indices = @transform_1, window_bounds = array<i64: 1, 1, 200>}, {transform_indices = @transform_2, window_bounds = array<i64: 1, 1, 1, 512>}]} {
    %c0 = arith.constant 0 : index
    %c0_0 = arith.constant 0 : index
    %c0_1 = arith.constant 0 : index
    %c0_2 = arith.constant 0 : index
    %0 = vector.load %arg1[%c0, %c0_0, %c0_1, %c0_2] : memref<1x1x64x514xf32, #tpu.memory_space<vmem>>, vector<1x1x64x512xf32>
    %1 = vector.shape_cast %0 : vector<1x1x64x512xf32> to vector<1x64x512xf32>
    %c0_3 = arith.constant 0 : index
    %c0_4 = arith.constant 0 : index
    %c0_5 = arith.constant 0 : index
    %2 = vector.load %arg4[%c0_3, %c0_4, %c0_5] : memref<1x200x512xf32, #tpu.memory_space<vmem>>, vector<1x64x512xf32>
    tpu.vector_store %arg4[%c0_3, %c0_4, %c0_5], %1 {strides = array<i32>} : memref<1x200x512xf32, #tpu.memory_space<vmem>>, vector<1x64x512xf32>,
    %c0_6 = arith.constant 0 : index
    %c0_7 = arith.constant 0 : index
    %c0_8 = arith.constant 0 : index
    %c1 = arith.constant 1 : index
    %3 = vector.load %arg1[%c0_6, %c0_7, %c0_8, %c1] : memref<1x1x64x514xf32, #tpu.memory_space<vmem>>, vector<1x1x64x512xf32>
    %4 = vector.shape_cast %3 : vector<1x1x64x512xf32> to vector<1x64x512xf32>
    %c0_9 = arith.constant 0 : index
    %c64 = arith.constant 64 : index
    %c0_10 = arith.constant 0 : index
    %5 = vector.load %arg4[%c0_9, %c64, %c0_10] : memref<1x200x512xf32, #tpu.memory_space<vmem>>, vector<1x64x512xf32>
    tpu.vector_store %arg4[%c0_9, %c64, %c0_10], %4 {strides = array<i32>} : memref<1x200x512xf32, #tpu.memory_space<vmem>>, vector<1x64x512xf32>,
    %c0_11 = arith.constant 0 : index
    %c0_12 = arith.constant 0 : index
    %c0_13 = arith.constant 0 : index
    %c2 = arith.constant 2 : index
    %6 = vector.load %arg1[%c0_11, %c0_12, %c0_13, %c2] : memref<1x1x64x514xf32, #tpu.memory_space<vmem>>, vector<1x1x64x512xf32>
    %7 = vector.shape_cast %6 : vector<1x1x64x512xf32> to vector<1x64x512xf32>
    %c0_14 = arith.constant 0 : index
    %c128 = arith.constant 128 : index
    %c0_15 = arith.constant 0 : index
    %8 = vector.load %arg4[%c0_14, %c128, %c0_15] : memref<1x200x512xf32, #tpu.memory_space<vmem>>, vector<1x64x512xf32>
    tpu.vector_store %arg4[%c0_14, %c128, %c0_15], %7 {strides = array<i32>} : memref<1x200x512xf32, #tpu.memory_space<vmem>>, vector<1x64x512xf32>,
    %cst = arith.constant 1.000000e+00 : f32
    %9 = vector.broadcast %cst : f32 to vector<1x8x512xf32>
    %c0_16 = arith.constant 0 : index
    %c192 = arith.constant 192 : index
    %c0_17 = arith.constant 0 : index
    %10 = vector.load %arg4[%c0_16, %c192, %c0_17] : memref<1x200x512xf32, #tpu.memory_space<vmem>>, vector<1x8x512xf32>
    tpu.vector_store %arg4[%c0_16, %c192, %c0_17], %9 {strides = array<i32>} : memref<1x200x512xf32, #tpu.memory_space<vmem>>, vector<1x8x512xf32>,
    %c0_18 = arith.constant 0 : index
    %c0_19 = arith.constant 0 : index
    %c0_20 = arith.constant 0 : index
    %11 = vector.load %arg2[%c0_18, %c0_19, %c0_20] : memref<1x1x200xf32, #tpu.memory_space<vmem>>, vector<1x1x200xf32>
    %c0_21 = arith.constant 0 : index
    %c0_22 = arith.constant 0 : index
    %c0_23 = arith.constant 0 : index
    %12 = vector.load %arg4[%c0_21, %c0_22, %c0_23] : memref<1x200x512xf32, #tpu.memory_space<vmem>>, vector<1x200x512xf32>
    %cst_24 = arith.constant dense<0.000000e+00> : vector<1x1x512xf32>
    %13 = tpu.matmul %11, %12, %cst_24 {dimension_numbers = #tpu.dot_dimension_numbers<[2], [1], [1], [2], [0, 0, 0, 1, 1, 2], [0], [0]>} : vector<1x1x200xf32>, vector<1x200x512xf32>, vector<1x1x512xf32> -> vector<1x1x512xf32>
    %c0_25 = arith.constant 0 : index
    %c0_26 = arith.constant 0 : index
    %c0_27 = arith.constant 0 : index
    %c0_28 = arith.constant 0 : index
    %14 = vector.load %arg3[%c0_25, %c0_26, %c0_27, %c0_28] : memref<1x1x1x512xf32, #tpu.memory_space<vmem>>, vector<1x1x1x512xf32>
    %15 = vector.shape_cast %14 : vector<1x1x1x512xf32> to vector<1x1x512xf32>
    %16 = vector.shape_cast %13 : vector<1x1x512xf32> to vector<1x1x1x512xf32>
    tpu.vector_store %arg3[%c0_25, %c0_26, %c0_27, %c0_28], %16 {strides = array<i32>} : memref<1x1x1x512xf32, #tpu.memory_space<vmem>>, vector<1x1x1x512xf32>,
    return
  }
  func.func @transform_0(%arg0: i32) -> (i32, i32, i32, i32) {
    %c0_i32 = arith.constant 0 : i32
    %c0_i32_0 = arith.constant 0 : i32
    %c0_i32_1 = arith.constant 0 : i32
    %c0_i32_2 = arith.constant 0 : i32
    return %arg0, %c0_i32, %c0_i32_0, %c0_i32_1 : i32, i32, i32, i32
  }
  func.func @transform_1(%arg0: i32) -> (i32, i32, i32) {
    %c0_i32 = arith.constant 0 : i32
    %c0_i32_0 = arith.constant 0 : i32
    %c0_i32_1 = arith.constant 0 : i32
    %c0_i32_2 = arith.constant 0 : i32
    return %c0_i32, %c0_i32_0, %c0_i32_1 : i32, i32, i32
  }
  func.func @transform_2(%arg0: i32) -> (i32, i32, i32, i32) {
    %c0_i32 = arith.constant 0 : i32
    %c0_i32_0 = arith.constant 0 : i32
    %c0_i32_1 = arith.constant 0 : i32
    %c0_i32_2 = arith.constant 0 : i32
    return %arg0, %c0_i32, %c0_i32_0, %c0_i32_1 : i32, i32, i32, i32
  }
}

</mosaic_0001>

<bundles_post_ra>
// kernel: _lambda_.5
= control target key start
LH: loop header
LB: loop body
LE: loop exit
PB: predicated region body
PF: predicated region fallthrough
CT: control target
= control target key end

     0   :  { %7 = vsyncpa [#allocation4], 0  ;;  %s752_s9 = smov 0   ;;  %s864_s0 = inlined_call_operand.vmem [shape: f32[2,1,1,527], index: 0, kind: input, shape index: {}]   ;;  %s865_s1 = inlined_call_operand.hbm [shape: f32[1,32,24], index: 1, kind: input, shape index: {}]   ;;  %s866_s2 = inlined_call_operand.vmem [shape: f32[2,1,32,512], index: 2, kind: output, shape index: {}]  }
   0x1 LB: > { %s102_s12 = sshll.u32 %s865_s1, 4  ;;  %s610_s13 = sadd.s32 4294967295, %s716_s9   ;;  %s716_s9 = sphi %s752_s9, %s13_s9   ;;  %s103_s12 = int_to_ptr.hbm [resolvable:$true] %s102_s12 }
   0x2   : > { %p612_p0 = scmp.ge.s32.totalorder %s716_s9, 1  ;;  %p91_p1 = scmp.lt.s32.totalorder %s716_s9, 3 }
   0x3   : > { %p647_p2 = scmp.eq.s32.totalorder %s610_s13, 0  ;;  %s718_s14 = smov [#allocation3]  }
   0x4   : > { %p92_p3 = pnand %p612_p0, %p91_p1  ;;  %s104_s15 = sshll.u32 %s718_s14, 4  ;;  %s105_s15 = int_to_ptr.vmem [resolvable:$true] %s104_s15 }
   0x5   : > { %s719_s16 = smov 128   ;;  %s720_s17 = smov 8  }
   0x6   : > { %p643_p4 = pneg %p92_p3  ;;  %127 = sbr.rel (%p92_p3) target bundleno = 341 (0x155), region = 28 }
   0x8   : > { %p644_p5 = pnand %p647_p2, %p643_p4 }
   0xa   : > { %646 = dma.hbm_to_vmem [thread:$0]  (!%p644_p5), %s103_s12, 512, %s105_s15, [#allocation4], %s719_s16, %s719_s16, %s720_s17  }
   0xb   : > { %711 = dma.done.wait (%p647_p2), [#allocation4], 512  }
   0xc   : > { %713 = vsyncadd (%p647_p2), [#allocation4], 4294966784  ;;  %p149_p6 = scmp.lt.s32.totalorder %s610_s13, 1  ;;  %s721_s22 = smov 118   ;;  %v159_v15 = vlaneseq  ;;  %vm291_vm0 = vcmask 949248   ;;  %vm302_vm2 = vcmask 941056  }
   0xd   : > { %s722_s23 = smov 120   ;;  %s723_s24 = smov 116   ;;  %vm170_vm3 = vcmask 1039360   ;;  %v736_v25 = vmov 1.0   ;;  %vm269_vm4 = vcmask 965632   ;;  %vm247_vm5 = vcmask 982016  }
   0xe   : > { %s870_s13 = smov (!%p149_p6, %s610_s13), 1  ;;  %s724_s25 = smov 117   ;;  %vm786_vm1 = vcmp.lt.s32.totalorder %v159_v15, 512  ;;  %376 = vmatpush.msra.mxu0 %v736_v25  ;;  %405 = vmatpush.msra.mxu1 %v736_v25  ;;  %vm203_vm6 = vcmask 1014784   ;;  %vm280_vm7 = vcmask 957440   ;;  %vm258_vm8 = vcmask 973824  }
   0xf   : > { %s638_s18 = smul.u32 5, %s870_s13  ;;  %s725_s26 = smov 119   ;;  %434 = vmatpush.msra.mxu2 %v736_v25  ;;  %463 = vmatpush.msra.mxu3 %v736_v25  ;;  %vm236_vm9 = vcmask 990208   ;;  %vm324_vm10 = vcmask 924672   ;;  %vm313_vm11 = vcmask 932864   ;;  %vm192_vm12 = vcmask 1022976  }
  0x10   : > { %s726_s27 = smov 115   ;;  %s727_s28 = smov 113   ;;  %vm181_vm13 = vcmask 1031168   ;;  %vm225_vm14 = vcmask 998400   ;;  %vm214_vm15 = vcmask 1006592  }
  0x11   : > { %s769_s21 = scalar_lea.vmem %s864_s0, %s638_s18  ;;  %s728_s29 = smov 114  }
  0x12   : > { %v264_v0 = vld [vmem:[%s769_s21] sm:$0x1f]  ;;  %s729_s30 = smov 127   ;;  %s730_s3 = smov 125  }
  0x13   : > { %v242_v1 = vld [vmem:[%s769_s21] sm:$0x1f]  ;;  %266 = vrot.lane.b32.xlu1 %v264_v0, %s721_s22  ;;  %s731_s4 = smov 126   ;;  %s732_s5 = smov 124  }
  0x14   : > { %244 = vrot.lane.b32.xlu0 %v242_v1, %s722_s23  ;;  %v286_v2 = vld [vmem:[%s769_s21] sm:$0x1f]  ;;  %s733_s6 = smov 122   ;;  %s734_s7 = smov 123  }
  0x15   : > { %288 = vrot.lane.b32.xlu2 %v286_v2, %s723_s24  ;;  %v275_v3 = vld [vmem:[%s769_s21] sm:$0x1f]  ;;  %s735_s8 = smov 121   ;;  %s637_s10 = sshll.u32 %s870_s13, 7 }
  0x16   : > { %v253_v4 = vld [vmem:[%s769_s21] sm:$0x1f]  ;;  %s843_s14 = scalar_lea.vmem %s866_s2, %s637_s10 }
  0x17   : > { %v297_v5 = vld [vmem:[%s769_s21] sm:$0x1f] }
  0x18   : > { %v319_v6 = vld [vmem:[%s769_s21] sm:$0x1f] }
  0x19   : > { %v308_v7 = vld [vmem:[%s769_s21] sm:$0x1f] }
  0x1a   : > { %v165_v8 = vld [vmem:[%s769_s21] sm:$0x1f] }
  0x1b   : > { %277 = vrot.lane.b32.xlu1 %v275_v3, %s724_s25  ;;  %v187_v9 = vld [vmem:[%s769_s21] sm:$0x1f] }
  0x1c   : > { %255 = vrot.lane.b32.xlu0 %v253_v4, %s725_s26  ;;  %v176_v10 = vld [vmem:[%s769_s21] sm:$0x1f] }
  0x1d   : > { %299 = vrot.lane.b32.xlu2 %v297_v5, %s726_s27  ;;  %v198_v11 = vld [vmem:[%s769_s21] sm:$0x1f] }
  0x1e   : > { %v220_v12 = vld [vmem:[%s769_s21] sm:$0x1f] }
  0x1f   : > { %v209_v13 = vld [vmem:[%s769_s21] sm:$0x1f] }
  0x20   : > { %v231_v14 = vld [vmem:[%s769_s21] sm:$0x1f] }
  0x21   : > { %v158_v36 = vld [vmem:[%s769_s21] sm:$0xf] }
  0x22   : > { %163 = vst.msk [vmem:[#allocation2] ss:$8 sm:$0xf] %vm786_vm1, %v158_v36  ;;  %v334_v4 = vld [vmem:[#allocation3] sm:$0xff] }
  0x23   : > { %321 = vrot.lane.b32.xlu1 %v319_v6, %s727_s28 }
  0x24   : > { %310 = vrot.lane.b32.xlu0 %v308_v7, %s728_s29 }
  0x25   : > { %167 = vrot.lane.b32.xlu2 %v165_v8, %s729_s30 }
  0x2b   : > { %189 = vrot.lane.b32.xlu1 %v187_v9, %s730_s3  ;;  %v335_v9 = vld [vmem:[#allocation3 + $0x8] sm:$0xff] }
  0x2c   : > { %178 = vrot.lane.b32.xlu0 %v176_v10, %s731_s4  ;;  %v336_v10 = vld [vmem:[#allocation3 + $0x10] sm:$0xff] }
  0x2d   : > { %200 = vrot.lane.b32.xlu2 %v198_v11, %s732_s5  ;;  %v337_v11 = vld [vmem:[#allocation3 + $0x18] sm:$0xff] }
  0x33   : > { %222 = vrot.lane.b32.xlu1 %v220_v12, %s733_s6 }
  0x34   : > { %211 = vrot.lane.b32.xlu0 %v209_v13, %s734_s7 }
  0x35   : > { %233 = vrot.lane.b32.xlu2 %v231_v14, %s735_s8 }
  0x6f   : > { %v289_v16 = vpop.permute.xlu2 %288 }
  0x70   : > { %v290_v18 = vrot.slane %v289_v16, 1 }
  0x72   : > { %v292_v19 = vsel %vm291_vm0, %v289_v16, %v290_v18  ;;  %vm350_vm0 = vcmask 195584  }
  0x73   : > { %295 = vst.msk [vmem:[#allocation2 + $0x24] ss:$8 sm:$0xf] %vm786_vm1, %v292_v19 }
  0x77   : > { %v300_v20 = vpop.permute.xlu2 %299 }
  0x78   : > { %v301_v21 = vrot.slane %v300_v20, 1 }
  0x7a   : > { %v303_v22 = vsel %vm302_vm2, %v300_v20, %v301_v21 }
  0x7b   : > { %306 = vst.msk [vmem:[#allocation2 + $0x25] ss:$8 sm:$0xf] %vm786_vm1, %v303_v22 }
  0x7f   : > { %v168_v23 = vpop.permute.xlu2 %167 }
  0x80   : > { %v169_v24 = vrot.slane %v168_v23, 1 }
  0x82   : > { %v171_v26 = vsel %vm170_vm3, %v168_v23, %v169_v24 }
  0x83   : > { %174 = vst.msk [vmem:[#allocation2 + $0x1] ss:$8 sm:$0xf] %vm786_vm1, %v171_v26 }
  0x85   : > { %v267_v27 = vpop.permute.xlu1 %266 }
  0x86   : > { %v245_v28 = vpop.permute.xlu0 %244  ;;  %v268_v29 = vrot.slane %v267_v27, 1 }
  0x87   : > { %v246_v30 = vrot.slane %v245_v28, 1  ;;  %v201_v31 = vpop.permute.xlu2 %200 }
  0x88   : > { %v270_v32 = vsel %vm269_vm4, %v267_v27, %v268_v29  ;;  %v202_v34 = vrot.slane %v201_v31, 1 }
  0x89   : > { %v248_v33 = vsel %vm247_vm5, %v245_v28, %v246_v30  ;;  %273 = vst.msk [vmem:[#allocation2 + $0x22] ss:$8 sm:$0xf] %vm786_vm1, %v270_v32 }
  0x8a   : > { %251 = vst.msk [vmem:[#allocation2 + $0x20] ss:$8 sm:$0xf] %vm786_vm1, %v248_v33  ;;  %v204_v35 = vsel %vm203_vm6, %v201_v31, %v202_v34 }
  0x8b   : > { %207 = vst.msk [vmem:[#allocation2 + $0x4] ss:$8 sm:$0xf] %vm786_vm1, %v204_v35 }
  0x8d   : > { %v278_v37 = vpop.permute.xlu1 %277 }
  0x8e   : > { %v256_v38 = vpop.permute.xlu0 %255  ;;  %v279_v39 = vrot.slane %v278_v37, 1 }
  0x8f   : > { %v257_v40 = vrot.slane %v256_v38, 1  ;;  %v234_v41 = vpop.permute.xlu2 %233 }
  0x90   : > { %v281_v42 = vsel %vm280_vm7, %v278_v37, %v279_v39  ;;  %v235_v44 = vrot.slane %v234_v41, 1 }
  0x91   : > { %v259_v43 = vsel %vm258_vm8, %v256_v38, %v257_v40  ;;  %284 = vst.msk [vmem:[#allocation2 + $0x23] ss:$8 sm:$0xf] %vm786_vm1, %v281_v42 }
  0x92   : > { %262 = vst.msk [vmem:[#allocation2 + $0x21] ss:$8 sm:$0xf] %vm786_vm1, %v259_v43  ;;  %v237_v45 = vsel %vm236_vm9, %v234_v41, %v235_v44 }
  0x93   : > { %240 = vst.msk [vmem:[#allocation2 + $0x7] ss:$8 sm:$0xf] %vm786_vm1, %v237_v45 }
  0x95   : > { %v322_v46 = vpop.permute.xlu1 %321 }
  0x96   : > { %v311_v47 = vpop.permute.xlu0 %310  ;;  %v323_v48 = vrot.slane %v322_v46, 1 }
  0x97   : > { %v312_v49 = vrot.slane %v311_v47, 1 }
  0x98   : > { %v325_v50 = vsel %vm324_vm10, %v322_v46, %v323_v48 }
  0x99   : > { %v314_v51 = vsel %vm313_vm11, %v311_v47, %v312_v49  ;;  %328 = vst.msk [vmem:[#allocation2 + $0x27] ss:$8 sm:$0xf] %vm786_vm1, %v325_v50 }
  0x9a   : > { %317 = vst.msk [vmem:[#allocation2 + $0x26] ss:$8 sm:$0xf] %vm786_vm1, %v314_v51 }
  0x9d   : > { %v190_v52 = vpop.permute.xlu1 %189 }
  0x9e   : > { %v179_v53 = vpop.permute.xlu0 %178  ;;  %v191_v54 = vrot.slane %v190_v52, 1 }
  0x9f   : > { %v180_v55 = vrot.slane %v179_v53, 1 }
  0xa0   : > { %v193_v56 = vsel %vm192_vm12, %v190_v52, %v191_v54 }
  0xa1   : > { %v182_v57 = vsel %vm181_vm13, %v179_v53, %v180_v55  ;;  %196 = vst.msk [vmem:[#allocation2 + $0x3] ss:$8 sm:$0xf] %vm786_vm1, %v193_v56  ;;  %v342_v58 = vld [vmem:[#allocation2 + $0x20] sm:$0xff]  ;;  %v343_v59 = vld [vmem:[#allocation2 + $0x28] sm:$0xff]  ;;  %v344_v60 = vld [vmem:[#allocation2 + $0x30] sm:$0xff] }
  0xa2   : > { %185 = vst.msk [vmem:[#allocation2 + $0x2] ss:$8 sm:$0xf] %vm786_vm1, %v182_v57  ;;  %377 = vmatpush.msra.mxu0 %v342_v58  ;;  %406 = vmatpush.msra.mxu1 %v343_v59  ;;  %v345_v61 = vld [vmem:[#allocation2 + $0x38] sm:$0xff] }
  0xa3   : > { %435 = vmatpush.msra.mxu2 %v344_v60  ;;  %464 = vmatpush.msra.mxu3 %v345_v61 }
  0xa5   : > { %v223_v62 = vpop.permute.xlu1 %222 }
  0xa6   : > { %v212_v63 = vpop.permute.xlu0 %211  ;;  %v224_v0 = vrot.slane %v223_v62, 1 }
  0xa7   : > { %v213_v1 = vrot.slane %v212_v63, 1 }
  0xa8   : > { %v226_v2 = vsel %vm225_vm14, %v223_v62, %v224_v0 }
  0xa9   : > { %v215_v3 = vsel %vm214_vm15, %v212_v63, %v213_v1  ;;  %229 = vst.msk [vmem:[#allocation2 + $0x6] ss:$8 sm:$0xf] %vm786_vm1, %v226_v2 }
  0xaa   : > { %218 = vst.msk [vmem:[#allocation2 + $0x5] ss:$8 sm:$0xf] %vm786_vm1, %v215_v3 }
  0xb1   : > { %v338_v5 = vld [vmem:[#allocation2] sm:$0xff]  ;;  %v339_v6 = vld [vmem:[#allocation2 + $0x8] sm:$0xff]  ;;  %v340_v7 = vld [vmem:[#allocation2 + $0x10] sm:$0xff] }
  0xb2   : > { %378 = vmatpush.msra.mxu0 %v338_v5  ;;  %407 = vmatpush.msra.mxu1 %v339_v6  ;;  %v341_v8 = vld [vmem:[#allocation2 + $0x18] sm:$0xff] }
  0xb3   : > { %436 = vmatpush.msra.mxu2 %v340_v7  ;;  %465 = vmatpush.msra.mxu3 %v341_v8 }
  0xb4   : > { %627 = vmatmul.msk.f32.vlgmr.msra.gmra.mxu2 %vm350_vm0, %v334_v4  ;;  %631 = vmatmul.msk.f32.vlgmr.msra.gmra.mxu3 %vm350_vm0, %v334_v4 }
  0xb5   : > { %619 = vmatmul.msk.f32.vlgmr.msra.gmra.mxu0 %vm350_vm0, %v334_v4  ;;  %623 = vmatmul.msk.f32.vlgmr.msra.gmra.mxu1 %vm350_vm0, %v334_v4 }
  0xbc   : > { %628 = vmatmul.msk.f32.gmra.mxu2 %vm350_vm0, %v335_v9  ;;  %632 = vmatmul.msk.f32.gmra.mxu3 %vm350_vm0, %v335_v9 }
  0xbd   : > { %620 = vmatmul.msk.f32.gmra.mxu0 %vm350_vm0, %v335_v9  ;;  %624 = vmatmul.msk.f32.gmra.mxu1 %vm350_vm0, %v335_v9 }
  0xc4   : > { %629 = vmatmul.msk.f32.gmra.mxu2 %vm350_vm0, %v336_v10  ;;  %633 = vmatmul.msk.f32.gmra.mxu3 %vm350_vm0, %v336_v10 }
  0xc5   : > { %621 = vmatmul.msk.f32.gmra.mxu0 %vm350_vm0, %v336_v10  ;;  %625 = vmatmul.msk.f32.gmra.mxu1 %vm350_vm0, %v336_v10 }
  0xcc   : > { %630 = vmatmul.msk.f32.gmra.mxu2 %vm350_vm0, %v337_v11  ;;  %634 = vmatmul.msk.f32.gmra.mxu3 %vm350_vm0, %v337_v11 }
  0xcd   : > { %622 = vmatmul.msk.f32.gmra.mxu0 %vm350_vm0, %v337_v11  ;;  %626 = vmatmul.msk.f32.gmra.mxu1 %vm350_vm0, %v337_v11 }
 0x132   : > { %v380_v12 = vpop.f32.mrf.mxu0  ;;  %v409_v13 = vpop.f32.mrf.mxu1 }
 0x133   : > { %vm479_vm1 = vcmp.ge.f32.partialorder %v380_v12, 0.0  ;;  %v495_v14 = vmul.f32 0.2, %v380_v12  ;;  %vm480_vm2 = vcmp.ge.f32.partialorder %v409_v13, 0.0  ;;  %v496_v15 = vmul.f32 0.2, %v409_v13 }
 0x135   : > { %v511_v16 = vsel %vm479_vm1, %v380_v12, %v495_v14  ;;  %v512_v17 = vsel %vm480_vm2, %v409_v13, %v496_v15 }
 0x136   : > { %527 = vst [vmem:[%s843_s14] sm:$0xff] %v511_v16 }
 0x137   : > { %528 = vst [vmem:[%s843_s14 + $0x8] sm:$0xff] %v512_v17  ;;  %v438_v18 = vpop.f32.mrf.mxu2  ;;  %v467_v19 = vpop.f32.mrf.mxu3 }
 0x138   : > { %vm481_vm3 = vcmp.ge.f32.partialorder %v438_v18, 0.0  ;;  %v497_v20 = vmul.f32 0.2, %v438_v18  ;;  %vm482_vm4 = vcmp.ge.f32.partialorder %v467_v19, 0.0  ;;  %v498_v21 = vmul.f32 0.2, %v467_v19 }
 0x13a   : > { %v513_v22 = vsel %vm481_vm3, %v438_v18, %v497_v20  ;;  %v514_v23 = vsel %vm482_vm4, %v467_v19, %v498_v21  ;;  %v383_v24 = vpop.f32.mrf.mxu0  ;;  %v412_v25 = vpop.f32.mrf.mxu1 }
 0x13b   : > { %529 = vst [vmem:[%s843_s14 + $0x10] sm:$0xff] %v513_v22  ;;  %vm483_vm5 = vcmp.ge.f32.partialorder %v383_v24, 0.0  ;;  %v499_v26 = vmul.f32 0.2, %v383_v24  ;;  %vm484_vm6 = vcmp.ge.f32.partialorder %v412_v25, 0.0 }
 0x13c   : > { %530 = vst [vmem:[%s843_s14 + $0x18] sm:$0xff] %v514_v23  ;;  %v500_v27 = vmul.f32 0.2, %v412_v25 }
 0x13d   : > { %v515_v28 = vsel %vm483_vm5, %v383_v24, %v499_v26 }
 0x13e   : > { %531 = vst [vmem:[%s843_s14 + $0x20] sm:$0xff] %v515_v28  ;;  %v516_v29 = vsel %vm484_vm6, %v412_v25, %v500_v27 }
 0x13f   : > { %532 = vst [vmem:[%s843_s14 + $0x28] sm:$0xff] %v516_v29  ;;  %v441_v30 = vpop.f32.mrf.mxu2  ;;  %v470_v31 = vpop.f32.mrf.mxu3 }
 0x140   : > { %vm485_vm7 = vcmp.ge.f32.partialorder %v441_v30, 0.0  ;;  %v501_v32 = vmul.f32 0.2, %v441_v30  ;;  %vm486_vm8 = vcmp.ge.f32.partialorder %v470_v31, 0.0  ;;  %v502_v33 = vmul.f32 0.2, %v470_v31 }
 0x142   : > { %v517_v34 = vsel %vm485_vm7, %v441_v30, %v501_v32  ;;  %v518_v35 = vsel %vm486_vm8, %v470_v31, %v502_v33  ;;  %v386_v36 = vpop.f32.mrf.mxu0  ;;  %v415_v37 = vpop.f32.mrf.mxu1 }
 0x143   : > { %533 = vst [vmem:[%s843_s14 + $0x30] sm:$0xff] %v517_v34  ;;  %vm487_vm9 = vcmp.ge.f32.partialorder %v386_v36, 0.0  ;;  %v503_v38 = vmul.f32 0.2, %v386_v36  ;;  %vm488_vm10 = vcmp.ge.f32.partialorder %v415_v37, 0.0 }
 0x144   : > { %534 = vst [vmem:[%s843_s14 + $0x38] sm:$0xff] %v518_v35  ;;  %v504_v39 = vmul.f32 0.2, %v415_v37 }
 0x145   : > { %v519_v40 = vsel %vm487_vm9, %v386_v36, %v503_v38 }
 0x146   : > { %535 = vst [vmem:[%s843_s14 + $0x40] sm:$0xff] %v519_v40  ;;  %v520_v41 = vsel %vm488_vm10, %v415_v37, %v504_v39 }
 0x147   : > { %536 = vst [vmem:[%s843_s14 + $0x48] sm:$0xff] %v520_v41  ;;  %v444_v42 = vpop.f32.mrf.mxu2  ;;  %v473_v43 = vpop.f32.mrf.mxu3 }
 0x148   : > { %vm489_vm11 = vcmp.ge.f32.partialorder %v444_v42, 0.0  ;;  %v505_v44 = vmul.f32 0.2, %v444_v42  ;;  %vm490_vm12 = vcmp.ge.f32.partialorder %v473_v43, 0.0  ;;  %v506_v45 = vmul.f32 0.2, %v473_v43 }
 0x14a   : > { %v521_v46 = vsel %vm489_vm11, %v444_v42, %v505_v44  ;;  %v522_v47 = vsel %vm490_vm12, %v473_v43, %v506_v45  ;;  %v389_v48 = vpop.f32.mrf.mxu0  ;;  %v418_v49 = vpop.f32.mrf.mxu1 }
 0x14b   : > { %537 = vst [vmem:[%s843_s14 + $0x50] sm:$0xff] %v521_v46  ;;  %vm491_vm13 = vcmp.ge.f32.partialorder %v389_v48, 0.0  ;;  %v507_v50 = vmul.f32 0.2, %v389_v48  ;;  %vm492_vm14 = vcmp.ge.f32.partialorder %v418_v49, 0.0 }
 0x14c   : > { %538 = vst [vmem:[%s843_s14 + $0x58] sm:$0xff] %v522_v47  ;;  %v508_v51 = vmul.f32 0.2, %v418_v49 }
 0x14d   : > { %v523_v52 = vsel %vm491_vm13, %v389_v48, %v507_v50 }
 0x14e   : > { %539 = vst [vmem:[%s843_s14 + $0x60] sm:$0xff] %v523_v52  ;;  %v524_v53 = vsel %vm492_vm14, %v418_v49, %v508_v51 }
 0x14f   : > { %540 = vst [vmem:[%s843_s14 + $0x68] sm:$0xff] %v524_v53  ;;  %v447_v54 = vpop.f32.mrf.mxu2  ;;  %v476_v55 = vpop.f32.mrf.mxu3 }
 0x150   : > { %vm493_vm15 = vcmp.ge.f32.partialorder %v447_v54, 0.0  ;;  %v509_v56 = vmul.f32 0.2, %v447_v54  ;;  %vm494_vm0 = vcmp.ge.f32.partialorder %v476_v55, 0.0  ;;  %v510_v57 = vmul.f32 0.2, %v476_v55 }
 0x152   : > { %v525_v58 = vsel %vm493_vm15, %v447_v54, %v509_v56  ;;  %v526_v59 = vsel %vm494_vm0, %v476_v55, %v510_v57 }
 0x153   : > { %541 = vst [vmem:[%s843_s14 + $0x70] sm:$0xff] %v525_v58 }
 0x154   : > { %542 = vst [vmem:[%s843_s14 + $0x78] sm:$0xff] %v526_v59 }
 0x155 PF: > { %s13_s9 = sadd.s32 1, %s716_s9  }
 0x156   : > { %p10_p7 = scmp.ge.s32.totalorder %s13_s9, 4  }
 0x158   :  { %12 = sbr.rel (!%p10_p7) target bundleno = 1 (0x1), region = 78 }
 0x15d   :  { %564 = vsyncpa [#allocation4], 1 }
 0x15e   :  { %566 = vsyncpa [#allocation4 + $0x1], 1 }

// kernel: _lambda_.9
= control target key start
LH: loop header
LB: loop body
LE: loop exit
PB: predicated region body
PF: predicated region fallthrough
CT: control target
= control target key end

     0   :  { %7 = vsyncpa [#allocation4], 0  ;;  %s2074_s0 = inlined_call_operand.vmem [shape: f32[2,1,64,514], index: 0, kind: input, shape index: {}]   ;;  %s2075_s1 = inlined_call_operand.vmem [shape: f32[1,1,200], index: 1, kind: input, shape index: {}]   ;;  %s2076_s2 = inlined_call_operand.hbm [shape: f32[2,1,1,512], index: 2, kind: output, shape index: {}]  }
   0x1   :  { %9 = vsyncpa [#allocation4 + $0x1], 0  ;;  %s1425_s9 = smov 0   ;;  %s1427_s10 = smov 0  }
   0x2   :  { %s1429_s11 = smov 0   ;;  %s1431_s12 = smov 0  }
   0x3 LB: > { %s1446_s13 = sadd.s32 4294967295, %s1405_s12   ;;  %s1086_s14 = sadd.s32 4294967294, %s1405_s12   ;;  %s1405_s12 = sphi %s1431_s12, %s2114_s12   ;;  %s1401_s11 = sphi %s1429_s11, %s2113_s11   ;;  %s1397_s10 = sphi %s1427_s10, %s2112_s10   ;;  %s1393_s9 = sphi %s1425_s9, %s2111_s9  }
   0x4   : > { %s1450_s15 = sadd.s32 1, %s1405_s12   ;;  %s69_s16 = sadd.s32 1, %s1401_s11 }
   0x5   : > { %s66_s17 = ssub.s32 %s1405_s12, %s1450_s15  ;;  %p79_p0 = scmp.ne.s32.totalorder %s1401_s11, %s1397_s10 }
   0x6   : > { %p67_p1 = scmp.eq.s32.totalorder %s66_s17, 0  ;;  %p80_p2 = scmp.eq.s32.totalorder %s1446_s13, 1 }
   0x7   : > { %p85_p3 = scmp.ne.s32.totalorder %s1397_s10, %s1393_s9  ;;  %p86_p4 = scmp.eq.s32.totalorder %s1086_s14, 1 }
   0x8   : > { %s1461_s18 = scalar_select %p67_p1, %s1401_s11, %s69_s16  }
   0x9   : > { %p1463_p5 = por %p80_p2, %p79_p0  ;;  %p1467_p6 = por %p86_p4, %p85_p3 }
   0xa   : > { %p1089_p7 = scmp.ge.s32.totalorder %s1405_s12, 1  ;;  %p115_p8 = scmp.lt.s32.totalorder %s1405_s12, 3 }
   0xc   : > { %p116_p9 = pnand %p1089_p7, %p115_p8 }
   0xd   : > { %p137_p10 = scmp.lt.s32.totalorder (!%p116_p9), %s1446_s13, 1  ;;  %s1407_s26 = smov (!%p116_p9), 127  }
   0xe   : > { %119 = sbr.rel (%p116_p9) target bundleno = 413 (0x19d), region = 28  ;;  %s1408_s27 = smov (!%p116_p9), 126  }
   0xf   : > { %s134_s30 = sand.u32 (!%p116_p9), 1, %s1397_s10   ;;  %s1097_s4 = sshll.u32 (!%p116_p9), %s1446_s13, 2 }
  0x10   : > { %s1090_s3 = sshll.u32 (!%p116_p9), %s134_s30, 2  ;;  %s1022_s7 = scalar_lea.hbm (!%p116_p9), %s2076_s2, %s1097_s4 }
  0x11   : > { %s136_s8 = scalar_lea.vmem (!%p116_p9), [#allocation3], %s1090_s3  ;;  %s1026_s16 = sshll.u32 (!%p116_p9), %s1022_s7, 4  ;;  %s1027_s16 = int_to_ptr.hbm [resolvable:$true] %s1026_s16 }
  0x12   : > { %s1024_s14 = sshll.u32 (!%p116_p9), %s136_s8, 4  ;;  %s1357_s17 = sshra.s32 (!%p116_p9), %s1027_s16, 4  ;;  %s1025_s14 = int_to_ptr.vmem [resolvable:$true] %s1024_s14  ;;  %s1358_s17 = int_to_ptr.hbm [resolvable:$true] %s1357_s17 }
  0x13   : > { %s138_s21 = scalar_select %p137_p10, %s1446_s13, 1  ;;  %vm366_vm0 = vcmask 1039360   ;;  %vm623_vm1 = vcmask 1031168   ;;  %vm829_vm2 = vcmask 588800   ;;  %vm999_vm3 = vcmask 1040384  }
  0x14   : > { %vm1001_vm4 = vcmask 1042434   ;;  %vm1003_vm5 = vcmask 1041408   ;;  %s1012_s13 = scalar_lea.sflag [#allocation4], %s134_s30  ;;  %s1363_s24 = scalar_lea.hbm %s2076_s2, 8 }
  0x15   : > { %s1100_s22 = smul.u32 320, %s138_s21  ;;  %s1359_s21 = scalar_lea.hbm %s1358_s17, 4 }
  0x16   : > { %p1360_p11 = scmp.ne.s32.totalorder %s1358_s17, %s1359_s21  ;;  %p1364_p0 = scmp.lt.s32.totalorder %s1358_s17, %s2076_s2 }
  0x17   : > { %s1478_s25 = scalar_lea.vmem %s2074_s0, %s1100_s22  ;;  %p1365_p1 = scmp.lt.s32.totalorder %s1363_s24, %s1359_s21 }
  0x18   : > { %v1481_v0 = vld [vmem:[%s1478_s25 + $0x120] sm:$0xff]  ;;  %v1484_v1 = vld [vmem:[%s1478_s25 + $0x128] sm:$0xff]  ;;  %v1509_v9 = vld [vmem:[%s1478_s25 + $0xf8] sm:$0xff]  ;;  %p1361_p12 = pnand %p1360_p11, %p1463_p5 }
  0x19   : > { %v1487_v2 = vld [vmem:[%s1478_s25 + $0x20] sm:$0xff]  ;;  %v1491_v3 = vpack.i.bf16 %v1484_v1, %v1481_v0  ;;  %v1494_v4 = vld [vmem:[%s1478_s25 + $0x28] sm:$0xff]  ;;  %v1517_v11 = vld [vmem:[%s1478_s25 + $0x30] sm:$0xff]  ;;  %p1366_p2 = por %p1365_p1, %p1364_p0 }
  0x1a   : > { %v1497_v5 = vld [vmem:[%s1478_s25] sm:$0xff]  ;;  %v1500_v6 = vld [vmem:[%s1478_s25 + $0x8] sm:$0xff]  ;;  %v1153_v7 = vpack.i.bf16 %v1494_v4, %v1487_v2  ;;  %v1520_v12 = vld [vmem:[%s1478_s25 + $0x38] sm:$0xff]  ;;  %p1362_p13 = pneg %p1361_p12 }
  0x1b   : > { %v1143_v8 = vpack.i.bf16 %v1500_v6, %v1497_v5  ;;  %1164 = vrot.lane.b32.xlu2 %v1491_v3, %s1407_s26  ;;  %v1514_v10 = vld [vmem:[%s1478_s25 + $0x100] sm:$0xff]  ;;  %v1523_v13 = vld [vmem:[%s1478_s25 + $0x10] sm:$0xff]  ;;  %v1526_v14 = vld [vmem:[%s1478_s25 + $0x18] sm:$0xff]  ;;  %v1158_v16 = vpack.i.bf16 %v1520_v12, %v1517_v11 }
  0x1c   : > { %1154 = vrot.lane.b32.xlu1 %v1153_v7, %s1407_s26  ;;  %v1168_v15 = vpack.i.bf16 %v1514_v10, %v1509_v9  ;;  %v1148_v17 = vpack.i.bf16 %v1526_v14, %v1523_v13  ;;  %v1536_v18 = vld [vmem:[%s1478_s25 + $0x80] sm:$0xff]  ;;  %v1541_v19 = vld [vmem:[%s1478_s25 + $0x118] sm:$0xff]  ;;  %v1544_v20 = vld [vmem:[%s1478_s25 + $0xa8] sm:$0xff]  ;;  %v1303_v63 = vpack.i.bf16 %v1523_v13, %v1500_v6  ;;  %p1367_p3 = pnand %p1366_p2, %p1362_p13 }
  0x1d   : > { %1144 = vrot.lane.b32.xlu0 %v1143_v8, %s1407_s26  ;;  %v1547_v21 = vld [vmem:[%s1478_s25 + $0xb0] sm:$0xff]  ;;  %v1553_v23 = vld [vmem:[%s1478_s25 + $0xd8] sm:$0xff]  ;;  %v1183_v24 = vpack.i.bf16 %v1536_v18, %v1541_v19  ;;  %v1563_v27 = vld [vmem:[%s1478_s25 + $0xa0] sm:$0xff] }
  0x1e   : > { %v1550_v22 = vld [vmem:[%s1478_s25 + $0xd0] sm:$0xff]  ;;  %v1178_v25 = vpack.i.bf16 %v1547_v21, %v1544_v20  ;;  %v1568_v28 = vld [vmem:[%s1478_s25 + $0xc8] sm:$0xff]  ;;  %v1571_v29 = vld [vmem:[%s1478_s25 + $0x58] sm:$0xff] }
  0x1f   : > { %v1173_v26 = vpack.i.bf16 %v1553_v23, %v1550_v22  ;;  %v1574_v30 = vld [vmem:[%s1478_s25 + $0x60] sm:$0xff]  ;;  %v1577_v31 = vld [vmem:[%s1478_s25 + $0x88] sm:$0xff]  ;;  %v1580_v32 = vld [vmem:[%s1478_s25 + $0xf0] sm:$0xff]  ;;  %v1198_v33 = vpack.i.bf16 %v1563_v27, %v1568_v28 }
  0x20   : > { %v1193_v34 = vpack.i.bf16 %v1574_v30, %v1571_v29  ;;  %v1188_v35 = vpack.i.bf16 %v1580_v32, %v1577_v31  ;;  %v1590_v36 = vld [vmem:[%s1478_s25 + $0x108] sm:$0xff]  ;;  %v240_v37 = vld [vmem:[%s1478_s25 + $0x110] sm:$0xff]  ;;  %v245_v39 = vld [vmem:[%s1478_s25 + $0x138] sm:$0xff] }
  0x21   : > { %v1596_v38 = vld [vmem:[%s1478_s25 + $0x50] sm:$0xff]  ;;  %v1600_v40 = vld [vmem:[%s1478_s25 + $0x78] sm:$0xff]  ;;  %v1213_v42 = vpack.i.bf16 %v240_v37, %v1590_v36  ;;  %v1613_v45 = vld [vmem:[%s1478_s25 + $0xe0] sm:$0xff]  ;;  %v1288_v61 = vpack.i.bf16 %v1517_v11, %v240_v37  ;;  %v1283_v62 = vpack.i.bf16 %v1590_v36, %v1568_v28  ;;  %v1338_v37 = vpack.i.bf16 %v1487_v2, %v1526_v14 }
  0x22   : > { %v1603_v41 = vld [vmem:[%s1478_s25 + $0x130] sm:$0xff]  ;;  %v1208_v43 = vpack.i.bf16 %v1596_v38, %v245_v39  ;;  %v235_v46 = vld [vmem:[%s1478_s25 + $0xe8] sm:$0xff]  ;;  %v225_v49 = vld [vmem:[%s1478_s25 + $0x98] sm:$0xff] }
  0x23   : > { %1169 = vrot.lane.b32.xlu2 %v1168_v15, %s1407_s26  ;;  %v1203_v44 = vpack.i.bf16 %v1603_v41, %v1600_v40  ;;  %v1223_v47 = vpack.i.bf16 %v235_v46, %v1613_v45  ;;  %v1622_v48 = vld [vmem:[%s1478_s25 + $0x90] sm:$0xff]  ;;  %v1626_v50 = vld [vmem:[%s1478_s25 + $0xb8] sm:$0xff]  ;;  %v230_v51 = vld [vmem:[%s1478_s25 + $0xc0] sm:$0xff]  ;;  %v1268_v60 = vpack.i.bf16 %v245_v39, %v1603_v41 }
  0x24   : > { %1159 = vrot.lane.b32.xlu1 %v1158_v16, %s1407_s26  ;;  %v1243_v52 = vpack.i.bf16 %v225_v49, %v1622_v48  ;;  %v1233_v53 = vpack.i.bf16 %v230_v51, %v1626_v50  ;;  %v1635_v54 = vld [vmem:[%s1478_s25 + $0x68] sm:$0xff]  ;;  %v220_v55 = vld [vmem:[%s1478_s25 + $0x70] sm:$0xff]  ;;  %v1643_v57 = vld [vmem:[%s1478_s25 + $0x40] sm:$0xff]  ;;  %v1313_v7 = vpack.i.bf16 %v1596_v38, %v230_v51  ;;  %v1308_v8 = vpack.i.bf16 %v1626_v50, %v1600_v40 }
  0x25   : > { %1149 = vrot.lane.b32.xlu0 %v1148_v17, %s1407_s26  ;;  %v1258_v56 = vpack.i.bf16 %v220_v55, %v1635_v54  ;;  %v215_v58 = vld [vmem:[%s1478_s25 + $0x48] sm:$0xff] }
  0x26   : > { %v1273_v59 = vpack.i.bf16 %v215_v58, %v1643_v57 }
  0x2b   : > { %1184 = vrot.lane.b32.xlu2 %v1183_v24, %s1407_s26 }
  0x2c   : > { %1179 = vrot.lane.b32.xlu1 %v1178_v25, %s1407_s26 }
  0x2d   : > { %1174 = vrot.lane.b32.xlu0 %v1173_v26, %s1407_s26 }
  0x33   : > { %1199 = vrot.lane.b32.xlu2 %v1198_v33, %s1407_s26 }
  0x34   : > { %1194 = vrot.lane.b32.xlu1 %v1193_v34, %s1407_s26 }
  0x35   : > { %1189 = vrot.lane.b32.xlu0 %v1188_v35, %s1407_s26 }
  0x3b   : > { %1214 = vrot.lane.b32.xlu2 %v1213_v42, %s1407_s26 }
  0x3c   : > { %1209 = vrot.lane.b32.xlu1 %v1208_v43, %s1407_s26 }
  0x3d   : > { %1204 = vrot.lane.b32.xlu0 %v1203_v44, %s1407_s26 }
  0x43   : > { %1229 = vrot.lane.b32.xlu2 %v1168_v15, %s1408_s27 }
  0x44   : > { %1224 = vrot.lane.b32.xlu1 %v1223_v47, %s1407_s26 }
  0x45   : > { %1219 = vrot.lane.b32.xlu0 %v1491_v3, %s1408_s27  ;;  %v1293_v3 = vpack.i.bf16 %v1563_v27, %v1520_v12 }
  0x4b   : > { %1244 = vrot.lane.b32.xlu2 %v1243_v52, %s1407_s26 }
  0x4c   : > { %1239 = vrot.lane.b32.xlu1 %v1173_v26, %s1408_s27 }
  0x4d   : > { %1234 = vrot.lane.b32.xlu0 %v1233_v53, %s1407_s26 }
  0x53   : > { %1259 = vrot.lane.b32.xlu2 %v1258_v56, %s1407_s26 }
  0x54   : > { %1254 = vrot.lane.b32.xlu1 %v1183_v24, %s1408_s27  ;;  %v1328_v24 = vpack.i.bf16 %v1497_v5, %v220_v55 }
  0x55   : > { %1249 = vrot.lane.b32.xlu0 %v1178_v25, %s1408_s27  ;;  %v1323_v25 = vpack.i.bf16 %v1635_v54, %v1494_v4 }
  0x5b   : > { %1274 = vrot.lane.b32.xlu2 %v1273_v59, %s1407_s26 }
  0x5c   : > { %1269 = vrot.lane.b32.xlu1 %v1268_v60, %s1408_s27 }
  0x5d   : > { %1264 = vrot.lane.b32.xlu0 %v1188_v35, %s1408_s27 }
  0x63   : > { %1289 = vrot.lane.b32.xlu2 %v1288_v61, %s1408_s27 }
  0x64   : > { %1284 = vrot.lane.b32.xlu1 %v1283_v62, %s1408_s27 }
  0x65   : > { %1279 = vrot.lane.b32.xlu0 %v1193_v34, %s1408_s27 }
  0x6b   : > { %1304 = vrot.lane.b32.xlu2 %v1303_v63, %s1408_s27 }
  0x6c   : > { %1299 = vrot.lane.b32.xlu1 %v1223_v47, %s1408_s27 }
  0x6d   : > { %1294 = vrot.lane.b32.xlu0 %v1293_v3, %s1408_s27 }
  0x73   : > { %1319 = vrot.lane.b32.xlu2 %v1243_v52, %s1408_s27  ;;  %v1409_v52 = vmov 1.0  }
  0x74   : > { %1314 = vrot.lane.b32.xlu1 %v1313_v7, %s1408_s27  ;;  %899 = vmatpush.msra.mxu3 %v1409_v52 }
  0x75   : > { %1309 = vrot.lane.b32.xlu0 %v1308_v8, %s1408_s27  ;;  %v1670_v15 = vpop.permute.xlu2 %1164  ;;  %859 = vmatpush.msra.mxu1 %v1409_v52 }
  0x76   : > { %v2086_v16 = vunpack.i.h.bf16 %v1670_v15  ;;  %v1166_v17 = vunpack.i.l.bf16 %v1670_v15 }
  0x78   : > { %v396_v26 = vsel %vm366_vm0, %v1166_v17, %v2086_v16 }
  0x79   : > { %872 = vmatpush.msra.mxu2 %v396_v26 }
  0x7b   : > { %1334 = vrot.lane.b32.xlu2 %v1273_v59, %s1408_s27 }
  0x7c   : > { %1329 = vrot.lane.b32.xlu1 %v1328_v24, %s1408_s27 }
  0x7d   : > { %1324 = vrot.lane.b32.xlu0 %v1323_v25, %s1408_s27  ;;  %v1683_v33 = vpop.permute.xlu2 %1169 }
  0x7e   : > { %v2080_v34 = vunpack.i.h.bf16 %v1683_v33  ;;  %v1171_v35 = vunpack.i.l.bf16 %v1683_v33 }
  0x80   : > { %v392_v39 = vsel %vm366_vm0, %v1171_v35, %v2080_v34 }
  0x81   : > { %873 = vmatpush.msra.mxu2 %v392_v39 }
  0x85   : > { %1339 = vrot.lane.b32.xlu0 %v1338_v37, %s1408_s27  ;;  %v1185_v42 = vpop.permute.xlu2 %1184 }
  0x86   : > { %v1186_v43 = vunpack.i.l.bf16 %v1185_v42  ;;  %v1187_v3 = vunpack.i.h.bf16 %v1185_v42 }
  0x88   : > { %v395_v44 = vsel %vm366_vm0, %v1186_v43, %v1166_v17 }
  0x89   : > { %832 = vmatpush.msra.mxu0 %v395_v44 }
  0x8d   : > { %v1200_v49 = vpop.permute.xlu2 %1199 }
  0x8e   : > { %v1694_v46 = vpop.permute.xlu1 %1154  ;;  %v1201_v7 = vunpack.i.l.bf16 %v1200_v49  ;;  %v1202_v43 = vunpack.i.h.bf16 %v1200_v49 }
  0x8f   : > { %v1696_v47 = vpop.permute.xlu0 %1144 }
  0x95   : > { %v1704_v53 = vpop.permute.xlu2 %1214 }
  0x96   : > { %v1698_v51 = vpop.permute.xlu1 %1159 }
  0x97   : > { %v1700_v2 = vpop.permute.xlu0 %1149  ;;  %v2082_v44 = vunpack.i.h.bf16 %v1698_v51 }
  0x9d   : > { %v1724_v24 = vpop.permute.xlu2 %1229 }
  0x9e   : > { %v1706_v55 = vpop.permute.xlu1 %1179 }
  0x9f   : > { %v1708_v56 = vpop.permute.xlu0 %1174  ;;  %v2077_v58 = vunpack.i.h.bf16 %v1706_v55  ;;  %v1181_v59 = vunpack.i.l.bf16 %v1706_v55 }
  0xa0   : > { %v2078_v60 = vunpack.i.h.bf16 %v1708_v56  ;;  %v1176_v61 = vunpack.i.l.bf16 %v1708_v56 }
  0xa1   : > { %v384_v63 = vsel %vm366_vm0, %v1181_v59, %v2077_v58  ;;  %v1161_v58 = vunpack.i.l.bf16 %v1698_v51 }
  0xa2   : > { %v388_v62 = vsel %vm366_vm0, %v1176_v61, %v2078_v60  ;;  %v2081_v60 = vunpack.i.l.bf16 %v1700_v2  ;;  %v387_v49 = vsel %vm366_vm0, %v1201_v7, %v1176_v61 }
  0xa3   : > { %874 = vmatpush.msra.mxu2 %v388_v62 }
  0xa5   : > { %875 = vmatpush.msra.mxu2 %v384_v63 }
  0xa6   : > { %v1720_v8 = vpop.permute.xlu1 %1194 }
  0xa7   : > { %v1722_v17 = vpop.permute.xlu0 %1189  ;;  %v2083_v25 = vunpack.i.h.bf16 %v1720_v8  ;;  %v1196_v26 = vunpack.i.l.bf16 %v1720_v8 }
  0xa8   : > { %v1192_v37 = vunpack.i.h.bf16 %v1722_v17  ;;  %v2079_v39 = vunpack.i.l.bf16 %v1722_v17 }
  0xa9   : > { %v376_v63 = vsel %vm366_vm0, %v1196_v26, %v2083_v25 }
  0xaa   : > { %v391_v42 = vsel %vm366_vm0, %v1192_v37, %v1171_v35  ;;  %v380_v62 = vsel %vm366_vm0, %v1187_v3, %v2079_v39  ;;  %v1147_v35 = vunpack.i.h.bf16 %v1696_v47  ;;  %v383_v37 = vsel %vm366_vm0, %v1202_v43, %v1181_v59  ;;  %v1755_v59 = vpop.permute.xlu2 %1244 }
  0xab   : > { %833 = vmatpush.msra.mxu0 %v391_v42  ;;  %876 = vmatpush.msra.mxu2 %v380_v62  ;;  %v372_v39 = vsel %vm366_vm0, %v1161_v58, %v2082_v44 }
  0xac   : > { %v368_v7 = vsel %vm366_vm0, %v1147_v35, %v2081_v60 }
  0xad   : > { %834 = vmatpush.msra.mxu0 %v387_v49  ;;  %877 = vmatpush.msra.mxu2 %v376_v63  ;;  %v1157_v63 = vunpack.i.h.bf16 %v1694_v46 }
  0xae   : > { %v1746_v34 = vpop.permute.xlu1 %1209 }
  0xaf   : > { %v1748_v42 = vpop.permute.xlu0 %1204  ;;  %835 = vmatpush.msra.mxu0 %v383_v37  ;;  %878 = vmatpush.msra.mxu2 %v372_v39  ;;  %v1212_v62 = vunpack.i.h.bf16 %v1746_v34  ;;  %v1146_v39 = vunpack.i.l.bf16 %v1696_v47  ;;  %v1232_v37 = vunpack.i.h.bf16 %v1724_v24  ;;  %v371_v60 = vsel %vm366_vm0, %v1157_v63, %v1161_v58 }
  0xb0   : > { %v1206_v61 = vunpack.i.l.bf16 %v1748_v42 }
  0xb1   : > { %879 = vmatpush.msra.mxu2 %v368_v7  ;;  %v375_v49 = vsel %vm366_vm0, %v1212_v62, %v1196_v26  ;;  %v1231_v7 = vunpack.i.l.bf16 %v1724_v24 }
  0xb2   : > { %v379_v43 = vsel %vm366_vm0, %v1206_v61, %v1187_v3 }
  0xb3   : > { %836 = vmatpush.msra.mxu0 %v379_v43  ;;  %880 = vmatpush.msra.mxu2 %v1481_v0 }
  0xb5   : > { %837 = vmatpush.msra.mxu0 %v375_v49  ;;  %881 = vmatpush.msra.mxu2 %v1509_v9  ;;  %v367_v9 = vsel %vm366_vm0, %v1146_v39, %v1147_v35  ;;  %v1247_v49 = vunpack.i.h.bf16 %v1755_v59 }
  0xb6   : > { %v1766_v44 = vpop.permute.xlu1 %1224 }
  0xb7   : > { %v1768_v3 = vpop.permute.xlu0 %1219  ;;  %838 = vmatpush.msra.mxu0 %v371_v60  ;;  %882 = vmatpush.msra.mxu2 %v1550_v22  ;;  %v649_v60 = vsel %vm623_vm1, %v1231_v7, %v1232_v37  ;;  %v1784_v22 = vpop.permute.xlu2 %1259 }
  0xb8   : > { %v1222_v0 = vunpack.i.h.bf16 %v1768_v3  ;;  %v1221_v47 = vunpack.i.l.bf16 %v1768_v3 }
  0xb9   : > { %839 = vmatpush.msra.mxu0 %v367_v9  ;;  %883 = vmatpush.msra.mxu2 %v1544_v20 }
  0xba   : > { %v653_v58 = vsel %vm623_vm1, %v1221_v47, %v1222_v0 }
  0xbb   : > { %840 = vmatpush.msra.mxu0 %v1541_v19  ;;  %900 = vmatpush.msra.mxu3 %v653_v58 }
  0xbc   : > { %884 = vmatpush.msra.mxu2 %v1536_v18 }
  0xbd   : > { %841 = vmatpush.msra.mxu0 %v1580_v32  ;;  %901 = vmatpush.msra.mxu3 %v649_v60  ;;  %v1262_v60 = vunpack.i.h.bf16 %v1784_v22 }
  0xbe   : > { %885 = vmatpush.msra.mxu2 %v1571_v29  ;;  %v1789_v20 = vpop.permute.xlu1 %1239  ;;  %v2090_v29 = vunpack.i.h.bf16 %v1748_v42 }
  0xbf   : > { %v1791_v26 = vpop.permute.xlu0 %1234  ;;  %842 = vmatpush.msra.mxu0 %v1568_v28  ;;  %v1242_v35 = vunpack.i.h.bf16 %v1789_v20  ;;  %v1241_v19 = vunpack.i.l.bf16 %v1789_v20  ;;  %v1211_v28 = vunpack.i.l.bf16 %v1746_v34 }
  0xc0   : > { %886 = vmatpush.msra.mxu2 %v1517_v11  ;;  %v1217_v11 = vunpack.i.h.bf16 %v1704_v53  ;;  %v1237_v9 = vunpack.i.h.bf16 %v1791_v26  ;;  %v2088_v58 = vunpack.i.l.bf16 %v1791_v26 }
  0xc1   : > { %843 = vmatpush.msra.mxu0 %v1563_v27  ;;  %v645_v18 = vsel %vm623_vm1, %v1241_v19, %v1242_v35  ;;  %v1810_v27 = vpop.permute.xlu2 %1274  ;;  %v398_v43 = vsel %vm366_vm0, %v2090_v29, %v1211_v28  ;;  %v2089_v28 = vunpack.i.l.bf16 %v1784_v22 }
  0xc2   : > { %887 = vmatpush.msra.mxu2 %v1500_v6  ;;  %902 = vmatpush.msra.mxu3 %v645_v18  ;;  %v2085_v6 = vunpack.i.l.bf16 %v1704_v53  ;;  %v2092_v16 = vunpack.i.l.bf16 %v1810_v27 }
  0xc3   : > { %844 = vmatpush.msra.mxu0 %v1600_v40 }
  0xc4   : > { %979 = vmatpush.msrb.mxu2 %v1409_v52  ;;  %v394_v39 = vsel %vm366_vm0, %v2085_v6, %v1217_v11  ;;  %v1277_v11 = vunpack.i.h.bf16 %v1810_v27 }
  0xc5   : > { %845 = vmatpush.msra.mxu0 %v1596_v38  ;;  %v1227_v38 = vunpack.i.h.bf16 %v1766_v44 }
  0xc6   : > { %v1812_v32 = vpop.permute.xlu1 %1254 }
  0xc7   : > { %v1814_v62 = vpop.permute.xlu0 %1249  ;;  %846 = vmatpush.msra.mxu0 %v1494_v4  ;;  %v1256_v40 = vunpack.i.l.bf16 %v1812_v32 }
  0xc8   : > { %v1252_v34 = vunpack.i.h.bf16 %v1814_v62  ;;  %v1251_v61 = vunpack.i.l.bf16 %v1814_v62 }
  0xc9   : > { %847 = vmatpush.msra.mxu0 %v1497_v5  ;;  %v652_v63 = vsel %vm623_vm1, %v1256_v40, %v1221_v47  ;;  %v2084_v5 = vunpack.i.l.bf16 %v1766_v44  ;;  %v2087_v47 = vunpack.i.l.bf16 %v1755_v59  ;;  %v1257_v40 = vunpack.i.h.bf16 %v1812_v32 }
  0xca   : > { %v641_v4 = vsel %vm623_vm1, %v1251_v61, %v1252_v34  ;;  %860 = vmatpush.msra.mxu1 %v652_v63 }
  0xcb   : > { %952 = vmatpush.msrb.mxu0 %v398_v43  ;;  %903 = vmatpush.msra.mxu3 %v641_v4  ;;  %v390_v18 = vsel %vm366_vm0, %v2084_v5, %v1227_v38  ;;  %v386_v4 = vsel %vm366_vm0, %v2088_v58, %v1237_v9  ;;  %v1857_v38 = vpop.permute.xlu2 %1289  ;;  %v378_v9 = vsel %vm366_vm0, %v2089_v28, %v1262_v60  ;;  %v2091_v58 = vunpack.i.h.bf16 %v1700_v2 }
  0xcc   : > { %v374_v60 = vsel %vm366_vm0, %v2092_v16, %v1277_v11 }
  0xcd   : > { %953 = vmatpush.msrb.mxu0 %v394_v39  ;;  %v382_v39 = vsel %vm366_vm0, %v2087_v47, %v1247_v49 }
  0xce   : > { %v1847_v43 = vpop.permute.xlu1 %1269 }
  0xcf   : > { %954 = vmatpush.msrb.mxu0 %v390_v18  ;;  %v1849_v63 = vpop.permute.xlu0 %1264  ;;  %v1272_v18 = vunpack.i.h.bf16 %v1847_v43  ;;  %v1271_v25 = vunpack.i.l.bf16 %v1847_v43 }
  0xd0   : > { %v1267_v5 = vunpack.i.h.bf16 %v1849_v63  ;;  %v1266_v6 = vunpack.i.l.bf16 %v1849_v63 }
  0xd1   : > { %955 = vmatpush.msrb.mxu0 %v386_v4  ;;  %v655_v4 = vsel %vm623_vm1, %v1271_v25, %v1272_v18 }
  0xd2   : > { %v648_v49 = vsel %vm623_vm1, %v1267_v5, %v1231_v7  ;;  %v637_v47 = vsel %vm623_vm1, %v1257_v40, %v1266_v6  ;;  %980 = vmatpush.msrb.mxu2 %v655_v4  ;;  %v1156_v7 = vunpack.i.l.bf16 %v1694_v46  ;;  %v1291_v5 = vunpack.i.l.bf16 %v1857_v38 }
  0xd3   : > { %956 = vmatpush.msrb.mxu0 %v382_v39  ;;  %861 = vmatpush.msra.mxu1 %v648_v49 }
  0xd4   : > { %904 = vmatpush.msra.mxu3 %v637_v47  ;;  %v370_v18 = vsel %vm366_vm0, %v2091_v58, %v1156_v7  ;;  %v1292_v7 = vunpack.i.h.bf16 %v1857_v38 }
  0xd5   : > { %957 = vmatpush.msrb.mxu0 %v378_v9  ;;  %v1891_v9 = vpop.permute.xlu2 %1304 }
  0xd6   : > { %v1285_v39 = vpop.permute.xlu1 %1284 }
  0xd7   : > { %958 = vmatpush.msrb.mxu0 %v374_v60  ;;  %v1884_v28 = vpop.permute.xlu0 %1279  ;;  %v1287_v49 = vunpack.i.h.bf16 %v1285_v39  ;;  %v1286_v47 = vunpack.i.l.bf16 %v1285_v39  ;;  %v1307_v39 = vunpack.i.h.bf16 %v1891_v9 }
  0xd8   : > { %v1282_v29 = vunpack.i.h.bf16 %v1884_v28  ;;  %v1281_v11 = vunpack.i.l.bf16 %v1884_v28  ;;  %v2095_v28 = vunpack.i.h.bf16 %v1748_v42  ;;  %v2099_v42 = vunpack.i.l.bf16 %v1766_v44 }
  0xd9   : > { %959 = vmatpush.msrb.mxu0 %v370_v18  ;;  %v644_v46 = vsel %vm623_vm1, %v1286_v47, %v1241_v19  ;;  %v651_v60 = vsel %vm623_vm1, %v1287_v49, %v1291_v5  ;;  %v1306_v19 = vunpack.i.l.bf16 %v1891_v9  ;;  %v650_v43 = vsel %vm623_vm1, %v1232_v37, %v1287_v49 }
  0xda   : > { %v633_v4 = vsel %vm623_vm1, %v1281_v11, %v1282_v29  ;;  %862 = vmatpush.msra.mxu1 %v644_v46  ;;  %981 = vmatpush.msrb.mxu2 %v651_v60  ;;  %v2104_v44 = vunpack.i.l.bf16 %v1722_v17  ;;  %v2109_v17 = vunpack.i.h.bf16 %v1700_v2 }
  0xdb   : > { %960 = vmatpush.msrb.mxu0 %v1603_v41  ;;  %905 = vmatpush.msra.mxu3 %v633_v4  ;;  %v625_v4 = vsel %vm623_vm1, %v1306_v19, %v1307_v39 }
  0xdd   : > { %961 = vmatpush.msrb.mxu0 %v1590_v36 }
  0xde   : > { %v1300_v18 = vpop.permute.xlu1 %1299 }
  0xdf   : > { %962 = vmatpush.msrb.mxu0 %v1613_v45  ;;  %v1908_v47 = vpop.permute.xlu0 %1294  ;;  %v1302_v58 = vunpack.i.h.bf16 %v1300_v18  ;;  %v1301_v5 = vunpack.i.l.bf16 %v1300_v18 }
  0xe0   : > { %v1297_v41 = vunpack.i.h.bf16 %v1908_v47  ;;  %v1296_v46 = vunpack.i.l.bf16 %v1908_v47 }
  0xe1   : > { %963 = vmatpush.msrb.mxu0 %v1626_v50  ;;  %v647_v60 = vsel %vm623_vm1, %v1301_v5, %v1302_v58  ;;  %v724_v50 = vld [vmem:[%s2075_s1] sm:$0x3] }
  0xe2   : > { %v640_v36 = vsel %vm623_vm1, %v1297_v41, %v1251_v61  ;;  %v629_v45 = vsel %vm623_vm1, %v1292_v7, %v1296_v46  ;;  %v1320_v61 = vpop.permute.xlu2 %1319  ;;  %982 = vmatpush.msrb.mxu2 %v647_v60  ;;  %v1931_v18 = vperm.slane %v724_v50, 0  ;;  %v1933_v41 = vperm.slane %v724_v50, 1 }
  0xe3   : > { %964 = vmatpush.msrb.mxu0 %v1622_v48  ;;  %863 = vmatpush.msra.mxu1 %v640_v36  ;;  %v1322_v16 = vunpack.i.h.bf16 %v1320_v61  ;;  %v1321_v48 = vunpack.i.l.bf16 %v1320_v61  ;;  %v646_v50 = vsel %vm623_vm1, %v1242_v35, %v1301_v5 }
  0xe4   : > { %906 = vmatpush.msra.mxu3 %v629_v45  ;;  %888 = vmatmul.f32.vlgmr.msra.gmra.mxu2 %v1931_v18  ;;  %v654_v45 = vsel %vm623_vm1, %v1222_v0, %v1271_v25 }
  0xe5   : > { %965 = vmatpush.msrb.mxu0 %v1635_v54  ;;  %v639_v0 = vsel %vm623_vm1, %v1321_v48, %v1322_v16  ;;  %v638_v35 = vsel %vm623_vm1, %v1266_v6, %v1321_v48  ;;  %v2097_v48 = vunpack.i.l.bf16 %v1704_v53 }
  0xe6   : > { %907 = vmatpush.msra.mxu3 %v625_v4  ;;  %v1315_v58 = vpop.permute.xlu1 %1314  ;;  %848 = vmatmul.f32.vlgmr.msra.gmra.mxu0 %v1931_v18 }
  0xe7   : > { %v1310_v36 = vpop.permute.xlu0 %1309  ;;  %1093 = vmatmul.msk.f32.vlgmr.msra.gmra.mxu3 %vm829_vm2, %v1933_v41  ;;  %v1317_v54 = vunpack.i.h.bf16 %v1315_v58  ;;  %v1316_v4 = vunpack.i.l.bf16 %v1315_v58  ;;  %966 = vmatpush.msrb.mxu0 %v1643_v57  ;;  %v2098_v58 = vunpack.i.h.bf16 %v1683_v33 }
  0xe8   : > { %939 = vmatpush.msrb.mxu3 %v1409_v52  ;;  %v1312_v60 = vunpack.i.h.bf16 %v1310_v36  ;;  %v1311_v52 = vunpack.i.l.bf16 %v1310_v36 }
  0xe9   : > { %v632_v24 = vsel %vm623_vm1, %v1317_v54, %v1281_v11  ;;  %967 = vmatpush.msrb.mxu0 %v1526_v14  ;;  %v393_v36 = vsel %vm366_vm0, %v2098_v58, %v2097_v48  ;;  %v2101_v54 = vunpack.i.l.bf16 %v1791_v26  ;;  %v2105_v26 = vunpack.i.l.bf16 %v1784_v22 }
  0xea   : > { %940 = vmatpush.msrb.mxu3 %v654_v45  ;;  %v636_v25 = vsel %vm623_vm1, %v1311_v52, %v1257_v40  ;;  %v643_v3 = vsel %vm623_vm1, %v1312_v60, %v1316_v4  ;;  %v1335_v57 = vpop.permute.xlu2 %1334  ;;  %v642_v37 = vsel %vm623_vm1, %v1252_v34, %v1312_v60  ;;  %v2102_v4 = vunpack.i.h.bf16 %v1706_v55 }
  0xeb   : > { %864 = vmatpush.msra.mxu1 %v636_v25  ;;  %983 = vmatpush.msrb.mxu2 %v643_v3  ;;  %v1337_v16 = vunpack.i.h.bf16 %v1335_v57  ;;  %v1336_v32 = vunpack.i.l.bf16 %v1335_v57  ;;  %v2106_v55 = vunpack.i.h.bf16 %v1720_v8  ;;  %v2107_v52 = vunpack.i.l.bf16 %v1810_v27 }
  0xec   : > { %941 = vmatpush.msrb.mxu3 %v650_v43  ;;  %v385_v60 = vsel %vm366_vm0, %v2102_v4, %v2101_v54  ;;  %v2108_v43 = vunpack.i.h.bf16 %v1698_v51  ;;  %v2110_v25 = vunpack.i.l.bf16 %v1700_v2 }
  0xed   : > { %865 = vmatpush.msra.mxu1 %v632_v24  ;;  %984 = vmatpush.msrb.mxu2 %v639_v0  ;;  %v631_v63 = vsel %vm623_vm1, %v1336_v32, %v1337_v16  ;;  %v630_v38 = vsel %vm623_vm1, %v1296_v46, %v1336_v32 }
  0xee   : > { %942 = vmatpush.msrb.mxu3 %v646_v50  ;;  %v1330_v20 = vpop.permute.xlu1 %1329  ;;  %968 = vmatmul.f32.vlgmr.msrb.gmra.mxu0 %v1931_v18 }
  0xef   : > { %v1325_v40 = vpop.permute.xlu0 %1324  ;;  %v1332_v49 = vunpack.i.h.bf16 %v1330_v20  ;;  %v1331_v11 = vunpack.i.l.bf16 %v1330_v20 }
  0xf0   : > { %943 = vmatpush.msrb.mxu3 %v642_v37  ;;  %v1327_v14 = vunpack.i.h.bf16 %v1325_v40  ;;  %v1326_v5 = vunpack.i.l.bf16 %v1325_v40 }
  0xf1   : > { %v624_v6 = vsel %vm623_vm1, %v1332_v49, %v1306_v19 }
  0xf2   : > { %944 = vmatpush.msrb.mxu3 %v638_v35  ;;  %v628_v62 = vsel %vm623_vm1, %v1326_v5, %v1292_v7  ;;  %v634_v34 = vsel %vm623_vm1, %v1282_v29, %v1327_v14  ;;  %v635_v61 = vsel %vm623_vm1, %v1327_v14, %v1331_v11  ;;  %v2096_v29 = vunpack.i.h.bf16 %v1670_v15 }
  0xf3   : > { %866 = vmatpush.msra.mxu1 %v628_v62  ;;  %985 = vmatpush.msrb.mxu2 %v635_v61  ;;  %v2100_v15 = vunpack.i.h.bf16 %v1708_v56  ;;  %v2103_v56 = vunpack.i.l.bf16 %v1755_v59  ;;  %v373_v59 = vsel %vm366_vm0, %v2108_v43, %v2107_v52 }
  0xf4   : > { %945 = vmatpush.msrb.mxu3 %v634_v34  ;;  %v397_v7 = vsel %vm366_vm0, %v2096_v29, %v2095_v28 }
  0xf5   : > { %867 = vmatpush.msra.mxu1 %v624_v6  ;;  %986 = vmatpush.msrb.mxu2 %v631_v63  ;;  %v389_v45 = vsel %vm366_vm0, %v2100_v15, %v2099_v42  ;;  %v381_v9 = vsel %vm366_vm0, %v2104_v44, %v2103_v56 }
  0xf6   : > { %946 = vmatpush.msrb.mxu3 %v630_v38  ;;  %1092 = vmatmul.msk.f32.vlgmr.msra.gmra.mxu1 %vm829_vm2, %v1933_v41 }
  0xf7   : > { %912 = vmatpush.msrb.mxu1 %v397_v7  ;;  %v1340_v19 = vpop.permute.xlu0 %1339 }
  0xf8   : > { %v1342_v47 = vunpack.i.h.bf16 %v1340_v19  ;;  %v1341_v46 = vunpack.i.l.bf16 %v1340_v19 }
  0xf9   : > { %913 = vmatpush.msrb.mxu1 %v393_v36 }
  0xfa   : > { %v626_v53 = vsel %vm623_vm1, %v1307_v39, %v1341_v46  ;;  %v627_v33 = vsel %vm623_vm1, %v1341_v46, %v1342_v47  ;;  %v377_v39 = vsel %vm366_vm0, %v2106_v55, %v2105_v26 }
  0xfb   : > { %914 = vmatpush.msrb.mxu1 %v389_v45  ;;  %947 = vmatpush.msrb.mxu3 %v626_v53 }
  0xfc   : > { %987 = vmatpush.msrb.mxu2 %v627_v33  ;;  %1094 = vmatmul.msk.f32.vlgmr.msrb.gmra.mxu3 %vm829_vm2, %v1933_v41 }
  0xfd   : > { %915 = vmatpush.msrb.mxu1 %v385_v60  ;;  %1095 = vmatmul.msk.f32.vlgmr.msrb.gmra.mxu2 %vm829_vm2, %v1933_v41  ;;  %v369_v41 = vsel %vm366_vm0, %v2110_v25, %v2109_v17 }
  0xff   : > { %916 = vmatpush.msrb.mxu1 %v381_v9 }
 0x101   : > { %917 = vmatpush.msrb.mxu1 %v377_v39 }
 0x103   : > { %918 = vmatpush.msrb.mxu1 %v373_v59 }
 0x105   : > { %919 = vmatpush.msrb.mxu1 %v369_v41 }
 0x107   : > { %920 = vmatpush.msrb.mxu1 %v1484_v1 }
 0x109   : > { %921 = vmatpush.msrb.mxu1 %v1514_v10 }
 0x10b   : > { %922 = vmatpush.msrb.mxu1 %v1553_v23 }
 0x10d   : > { %923 = vmatpush.msrb.mxu1 %v1547_v21 }
 0x10f   : > { %924 = vmatpush.msrb.mxu1 %v1577_v31 }
 0x111   : > { %925 = vmatpush.msrb.mxu1 %v1574_v30 }
 0x113   : > { %926 = vmatpush.msrb.mxu1 %v1520_v12 }
 0x115   : > { %927 = vmatpush.msrb.mxu1 %v1523_v13  ;;  %v1006_v13 = vlaneseq }
 0x116   : > { %928 = vmatmul.f32.vlgmr.msrb.gmra.mxu1 %v1931_v18 }
 0x117   : > { %vm1008_vm6 = vcmp.lt.s32.totalorder %v1006_v13, 512 }
 0x163   : > { %v849_v51 = vpop.f32.mrf.mxu0 }
 0x167   : > { %v889_v2 = vpop.f32.mrf.mxu2 }
 0x16a   : > { %v909_v1 = vpop.f32.mrf.mxu3 }
 0x16b   : > { %v969_v10 = vpop.f32.mrf.mxu0  ;;  %v910_v21 = vadd.f32 %v909_v1, %v889_v2 }
 0x16d   : > { %v996_v30 = vrot.slane %v910_v21, 7 }
 0x173   : > { %v869_v8 = vpop.f32.mrf.mxu1 }
 0x174   : > { %v870_v27 = vadd.f32 %v869_v8, %v849_v51 }
 0x176   : > { %v1000_v50 = vsel %vm999_vm3, %v870_v27, %v996_v30 }
 0x17f   : > { %v949_v31 = vpop.f32.mrf.mxu3 }
 0x180   : > { %v989_v22 = vpop.f32.mrf.mxu2 }
 0x181   : > { %v990_v23 = vadd.f32 %v989_v22, %v969_v10 }
 0x183   : > { %v998_v3 = vrot.slane %v990_v23, 5 }
 0x193   : > { %v929_v12 = vpop.f32.mrf.mxu1 }
 0x194   : > { %v950_v18 = vadd.f32 %v949_v31, %v929_v12 }
 0x196   : > { %v997_v0 = vrot.slane %v950_v18, 6 }
 0x198   : > { %v1002_v57 = vsel %vm1001_vm4, %v997_v0, %v998_v3 }
 0x199   : > { %v1004_v24 = vsel %vm1003_vm5, %v1000_v50, %v1002_v57 }
 0x19a   : > { %1010 = vst.msk [vmem:[%s136_s8] sm:$0xf] %vm1008_vm6, %v1004_v24 }
 0x19b   : > { %1370 = shalt.err (!%p1367_p3)
}
 0x19c   : > { %1101 = dma.vmem_to_hbm [thread:$0]  (%p1463_p5), %s1025_s14, 64, %s1027_s16, %s1012_s13  }
 0x19d PF: > { %p1107_p4 = scmp.ge.s32.totalorder %s1405_s12, 2  ;;  %s1038_s27 = sand.u32 1, %s1393_s9  }
 0x19e   : > { %s1039_s28 = scalar_lea.sflag [#allocation4], %s1038_s27 }
 0x19f   : > { %p1104_p7 = pnand %p1107_p4, %p1467_p6 }
 0x1a1   : > { %p1105_p8 = pneg %p1104_p7 }
 0x1a3   : > { %1388 = dma.done.wait (%p1105_p8), %s1039_s28, 64  }
 0x1a4   : > { %1390 = vsyncadd (%p1105_p8), %s1039_s28, 4294967232  ;;  %p12_p9 = scmp.ge.s32.totalorder %s1450_s15, 4   ;;  %s2111_s9 = smov %s1397_s10 }
 0x1a5   : > { %s2112_s10 = smov %s1401_s11  ;;  %s2113_s11 = smov %s1461_s18 }
 0x1a6   : > { %s2114_s12 = smov %s1450_s15  ;;  %14 = sbr.rel (!%p12_p9) target bundleno = 3 (0x3), region = 63 }
 0x1ab   :  { %1045 = vsyncpa [#allocation4], 1 }
 0x1ac   :  { %1047 = vsyncpa [#allocation4 + $0x1], 1 }

// kernel: _lambda_.8
= control target key start
LH: loop header
LB: loop body
LE: loop exit
PB: predicated region body
PF: predicated region fallthrough
CT: control target
= control target key end

     0   :  { %s2774_s9 = smov 0   ;;  %s4157_s0 = inlined_call_operand.vmem [shape: f32[2,1,32,521], index: 0, kind: input, shape index: {}]   ;;  %s4158_s1 = inlined_call_operand.vmem [shape: f32[1,64,328], index: 1, kind: input, shape index: {}]   ;;  %s4159_s2 = inlined_call_operand.vmem [shape: f32[2,1,64,512], index: 2, kind: output, shape index: {}]  }
   0x1 LB: > { %s2229_s10 = sadd.s32 4294967295, %s2747_s9   ;;  %p2233_p0 = scmp.ge.s32.totalorder %s2747_s9, 1  ;;  %s2747_s9 = sphi %s2774_s9, %s12_s9  }
   0x2   : > { %p112_p1 = scmp.lt.s32.totalorder %s2747_s9, 3 }
   0x4   : > { %p113_p2 = pnand %p2233_p0, %p112_p1 }
   0x6   : > { %116 = sbr.rel (%p113_p2) target bundleno = 600 (0x258), region = 28 }
   0xb   : > { %p134_p3 = scmp.lt.s32.totalorder %s2229_s10, 1  ;;  %s2749_s15 = smov 127   ;;  %vm256_vm0 = vcmask 1039360   ;;  %vm385_vm1 = vcmask 1031168   ;;  %vm514_vm2 = vcmask 1022976   ;;  %vm1288_vm3 = vcmask 973824  }
   0xc   : > { %s2750_s16 = smov 126   ;;  %s2751_s17 = smov 125   ;;  %vm1030_vm4 = vcmask 990208   ;;  %vm901_vm5 = vcmask 998400   ;;  %vm772_vm6 = vcmask 1006592   ;;  %vm1159_vm7 = vcmask 982016  }
   0xd   : > { %s4307_s10 = smov (!%p134_p3, %s2229_s10), 1  ;;  %s2752_s18 = smov 121   ;;  %vm643_vm8 = vcmask 1014784   ;;  %vm1529_vm9 = vcmask 588800  }
   0xe   : > { %s2272_s11 = smul.u32 160, %s4307_s10  ;;  %s2753_s19 = smov 122  }
   0xf   : > { %s2754_s20 = smov 119   ;;  %s2755_s21 = smov 123  }
  0x10   : > { %s2788_s14 = scalar_lea.vmem %s4157_s0, %s2272_s11  ;;  %s2756_s22 = smov 120  }
  0x11   : > { %v2791_v0 = vld [vmem:[%s2788_s14 + $0x40] sm:$0xff]  ;;  %v2794_v1 = vld [vmem:[%s2788_s14 + $0x48] sm:$0xff]  ;;  %v186_v9 = vld [vmem:[%s2788_s14 + $0x50] sm:$0xff]  ;;  %s2757_s23 = smov 124  }
  0x12   : > { %v2797_v2 = vld [vmem:[%s2788_s14 + $0x20] sm:$0xff]  ;;  %v2311_v3 = vpack.i.bf16 %v2794_v1, %v2791_v0  ;;  %v181_v4 = vld [vmem:[%s2788_s14 + $0x28] sm:$0xff]  ;;  %v187_v10 = vld [vmem:[%s2788_s14 + $0x58] sm:$0xff] }
  0x13   : > { %v176_v5 = vld [vmem:[%s2788_s14] sm:$0xff]  ;;  %v177_v6 = vld [vmem:[%s2788_s14 + $0x8] sm:$0xff]  ;;  %v2301_v7 = vpack.i.bf16 %v181_v4, %v2797_v2  ;;  %v182_v11 = vld [vmem:[%s2788_s14 + $0x30] sm:$0xff]  ;;  %v2821_v15 = vpack.i.bf16 %v187_v10, %v186_v9 }
  0x14   : > { %v2805_v8 = vpack.i.bf16 %v177_v6, %v176_v5  ;;  %2312 = vrot.lane.b32.xlu2 %v2311_v3, %s2749_s15  ;;  %v2815_v12 = vld [vmem:[%s2788_s14 + $0x38] sm:$0xff]  ;;  %v2818_v13 = vld [vmem:[%s2788_s14 + $0x10] sm:$0xff]  ;;  %v192_v18 = vld [vmem:[%s2788_s14 + $0x80] sm:$0xff]  ;;  %v2872_v30 = vpack.i.bf16 %v182_v11, %v181_v4 }
  0x15   : > { %2302 = vrot.lane.b32.xlu1 %v2301_v7, %s2749_s15  ;;  %v179_v14 = vld [vmem:[%s2788_s14 + $0x18] sm:$0xff]  ;;  %v2306_v16 = vpack.i.bf16 %v2815_v12, %v182_v11  ;;  %v2834_v19 = vld [vmem:[%s2788_s14 + $0x88] sm:$0xff]  ;;  %v2837_v20 = vld [vmem:[%s2788_s14 + $0x70] sm:$0xff] }
  0x16   : > { %2292 = vrot.lane.b32.xlu0 %v2805_v8, %s2749_s15  ;;  %v2825_v17 = vpack.i.bf16 %v179_v14, %v2818_v13  ;;  %v191_v21 = vld [vmem:[%s2788_s14 + $0x78] sm:$0xff]  ;;  %v2841_v22 = vld [vmem:[%s2788_s14 + $0x60] sm:$0xff]  ;;  %v2844_v23 = vld [vmem:[%s2788_s14 + $0x68] sm:$0xff]  ;;  %v2331_v24 = vpack.i.bf16 %v2834_v19, %v192_v18 }
  0x17   : > { %v2326_v25 = vpack.i.bf16 %v191_v21, %v2837_v20  ;;  %v2850_v26 = vpack.i.bf16 %v2844_v23, %v2841_v22  ;;  %v2857_v27 = vld [vmem:[%s2788_s14 + $0x90] sm:$0xff]  ;;  %v2860_v28 = vld [vmem:[%s2788_s14 + $0x98] sm:$0xff]  ;;  %v2421_v31 = vpack.i.bf16 %v2841_v22, %v187_v10  ;;  %v2431_v32 = vpack.i.bf16 %v192_v18, %v191_v21 }
  0x18   : > { %v2864_v29 = vpack.i.bf16 %v2860_v28, %v2857_v27  ;;  %v2426_v33 = vpack.i.bf16 %v186_v9, %v191_v21 }
  0x1c   : > { %2317 = vrot.lane.b32.xlu2 %v2821_v15, %s2749_s15 }
  0x1d   : > { %2307 = vrot.lane.b32.xlu1 %v2306_v16, %s2749_s15 }
  0x1e   : > { %2297 = vrot.lane.b32.xlu0 %v2825_v17, %s2749_s15 }
  0x24   : > { %2332 = vrot.lane.b32.xlu2 %v2331_v24, %s2749_s15 }
  0x25   : > { %2327 = vrot.lane.b32.xlu1 %v2326_v25, %s2749_s15 }
  0x26   : > { %2322 = vrot.lane.b32.xlu0 %v2850_v26, %s2749_s15 }
  0x2c   : > { %2347 = vrot.lane.b32.xlu2 %v2825_v17, %s2750_s16 }
  0x2d   : > { %2342 = vrot.lane.b32.xlu1 %v2805_v8, %s2750_s16 }
  0x2e   : > { %2337 = vrot.lane.b32.xlu0 %v2864_v29, %s2749_s15 }
  0x34   : > { %2362 = vrot.lane.b32.xlu2 %v2311_v3, %s2750_s16 }
  0x35   : > { %2357 = vrot.lane.b32.xlu1 %v2306_v16, %s2750_s16 }
  0x36   : > { %2352 = vrot.lane.b32.xlu0 %v2301_v7, %s2750_s16 }
  0x3c   : > { %2377 = vrot.lane.b32.xlu2 %v2326_v25, %s2750_s16 }
  0x3d   : > { %2372 = vrot.lane.b32.xlu1 %v2850_v26, %s2750_s16 }
  0x3e   : > { %2367 = vrot.lane.b32.xlu0 %v2821_v15, %s2750_s16 }
  0x44   : > { %2392 = vrot.lane.b32.xlu2 %v2805_v8, %s2751_s17 }
  0x45   : > { %2387 = vrot.lane.b32.xlu1 %v2864_v29, %s2750_s16 }
  0x46   : > { %2382 = vrot.lane.b32.xlu0 %v2331_v24, %s2750_s16 }
  0x4c   : > { %2407 = vrot.lane.b32.xlu2 %v2306_v16, %s2751_s17  ;;  %v2981_v16 = vpack.i.bf16 %v2857_v27, %v2834_v19 }
  0x4d   : > { %2402 = vrot.lane.b32.xlu1 %v2301_v7, %s2751_s17 }
  0x4e   : > { %2397 = vrot.lane.b32.xlu0 %v2825_v17, %s2751_s17 }
  0x54   : > { %2422 = vrot.lane.b32.xlu2 %v2421_v31, %s2751_s17 }
  0x55   : > { %2417 = vrot.lane.b32.xlu1 %v2331_v24, %s2751_s17 }
  0x56   : > { %2412 = vrot.lane.b32.xlu0 %v2311_v3, %s2751_s17 }
  0x5c   : > { %2437 = vrot.lane.b32.xlu2 %v2821_v15, %s2752_s18 }
  0x5d   : > { %2432 = vrot.lane.b32.xlu1 %v2431_v32, %s2752_s18 }
  0x5e   : > { %2427 = vrot.lane.b32.xlu0 %v2426_v33, %s2751_s17 }
  0x64   : > { %2452 = vrot.lane.b32.xlu2 %v2431_v32, %s2753_s19 }
  0x65   : > { %2447 = vrot.lane.b32.xlu1 %v2805_v8, %s2752_s18 }
  0x66   : > { %2442 = vrot.lane.b32.xlu0 %v2872_v30, %s2752_s18 }
  0x6c   : > { %2467 = vrot.lane.b32.xlu2 %v2431_v32, %s2754_s20 }
  0x6d   : > { %2462 = vrot.lane.b32.xlu1 %v2872_v30, %s2753_s19 }
  0x6e   : > { %2457 = vrot.lane.b32.xlu0 %v2821_v15, %s2753_s19  ;;  %v2313_v34 = vpop.permute.xlu2 %2312 }
  0x6f   : > { %v2315_v35 = vunpack.i.h.bf16 %v2313_v34  ;;  %v2314_v36 = vunpack.i.l.bf16 %v2313_v34 }
  0x71   : > { %v2900_v37 = vsel %vm256_vm0, %v2314_v36, %v2315_v35  ;;  %v3012_v35 = vpack.i.bf16 %v2791_v0, %v2815_v12 }
  0x72   : > { %4217 = vst [vmem:[#allocation3_spill] sm:$0xff] %v2900_v37 }
  0x74   : > { %2482 = vrot.lane.b32.xlu2 %v2431_v32, %s2755_s21 }
  0x75   : > { %2477 = vrot.lane.b32.xlu1 %v2821_v15, %s2754_s20 }
  0x76   : > { %2472 = vrot.lane.b32.xlu0 %v2805_v8, %s2753_s19  ;;  %v2907_v38 = vpop.permute.xlu2 %2317 }
  0x77   : > { %v4161_v5 = vunpack.i.h.bf16 %v2907_v38 }
  0x7c   : > { %2497 = vrot.lane.b32.xlu2 %v2805_v8, %s2754_s20 }
  0x7d   : > { %2492 = vrot.lane.b32.xlu1 %v2821_v15, %s2755_s21 }
  0x7e   : > { %2487 = vrot.lane.b32.xlu0 %v2872_v30, %s2754_s20  ;;  %v2915_v39 = vpop.permute.xlu2 %2332 }
  0x7f   : > { %v4164_v3 = vunpack.i.l.bf16 %v2915_v39 }
  0x84   : > { %2512 = vrot.lane.b32.xlu2 %v2805_v8, %s2755_s21 }
  0x85   : > { %2507 = vrot.lane.b32.xlu1 %v2431_v32, %s2756_s22 }
  0x86   : > { %2502 = vrot.lane.b32.xlu0 %v2872_v30, %s2755_s21  ;;  %v2922_v40 = vpop.permute.xlu2 %2347 }
  0x87   : > { %v2350_v41 = vunpack.i.h.bf16 %v2922_v40  ;;  %v2303_v42 = vpop.permute.xlu1 %2302  ;;  %v4166_v44 = vunpack.i.l.bf16 %v2922_v40 }
  0x88   : > { %v2925_v43 = vpop.permute.xlu0 %2292  ;;  %v2305_v47 = vunpack.i.h.bf16 %v2303_v42  ;;  %v2304_v56 = vunpack.i.l.bf16 %v2303_v42 }
  0x89   : > { %v2933_v45 = vsel %vm385_vm1, %v4166_v44, %v2350_v41  ;;  %v4160_v48 = vunpack.i.h.bf16 %v2925_v43 }
  0x8c   : > { %2527 = vrot.lane.b32.xlu2 %v2872_v30, %s2756_s22 }
  0x8d   : > { %2522 = vrot.lane.b32.xlu1 %v2431_v32, %s2757_s23  ;;  %v4165_v32 = vunpack.i.h.bf16 %v2915_v39 }
  0x8e   : > { %2517 = vrot.lane.b32.xlu0 %v2821_v15, %s2756_s22  ;;  %v2363_v46 = vpop.permute.xlu2 %2362 }
  0x8f   : > { %v2365_v49 = vunpack.i.h.bf16 %v2363_v46  ;;  %v2941_v50 = vpop.permute.xlu1 %2307  ;;  %v2364_v57 = vunpack.i.l.bf16 %v2363_v46 }
  0x90   : > { %v2298_v51 = vpop.permute.xlu0 %2297  ;;  %v4163_v52 = vunpack.i.h.bf16 %v2941_v50  ;;  %v4162_v53 = vunpack.i.l.bf16 %v2941_v50 }
  0x91   : > { %v2300_v54 = vunpack.i.h.bf16 %v2298_v51  ;;  %v2299_v55 = vunpack.i.l.bf16 %v2298_v51  ;;  %v2964_v62 = vsel %vm385_vm1, %v2364_v57, %v2365_v49 }
  0x92   : > { %v2953_v59 = vsel %vm256_vm0, %v2305_v47, %v4162_v53  ;;  %v2958_v60 = vsel %vm256_vm0, %v4163_v52, %v2314_v36  ;;  %4218 = vst [vmem:[#allocation4_spill] sm:$0xff] %v2964_v62  ;;  %v2561_v36 = vpack.i.bf16 %v2844_v23, %v2857_v27 }
  0x93   : > { %v2948_v58 = vsel %vm256_vm0, %v4160_v48, %v2299_v55  ;;  %v2961_v61 = vsel %vm256_vm0, %v2299_v55, %v2300_v54  ;;  %v2967_v63 = vsel %vm256_vm0, %v2300_v54, %v2304_v56 }
  0x94   : > { %4219 = vst [vmem:[#allocation5_spill] sm:$0xff] %v2967_v63  ;;  %2542 = vrot.lane.b32.xlu2 %v2872_v30, %s2757_s23 }
  0x95   : > { %2537 = vrot.lane.b32.xlu1 %v2805_v8, %s2756_s22 }
  0x96   : > { %2532 = vrot.lane.b32.xlu0 %v2821_v15, %s2757_s23  ;;  %v2976_v4 = vpop.permute.xlu2 %2377 }
  0x97   : > { %v2328_v6 = vpop.permute.xlu1 %2327  ;;  %v2379_v55 = vunpack.i.l.bf16 %v2976_v4 }
  0x98   : > { %v2323_v7 = vpop.permute.xlu0 %2322  ;;  %v2330_v9 = vunpack.i.h.bf16 %v2328_v6  ;;  %v2329_v10 = vunpack.i.l.bf16 %v2328_v6 }
  0x99   : > { %v2325_v11 = vunpack.i.h.bf16 %v2323_v7  ;;  %v2324_v14 = vunpack.i.l.bf16 %v2323_v7 }
  0x9a   : > { %v2991_v18 = vsel %vm256_vm0, %v2330_v9, %v4164_v3 }
  0x9b   : > { %v2986_v15 = vsel %vm256_vm0, %v4161_v5, %v2324_v14  ;;  %v2994_v21 = vsel %vm256_vm0, %v2324_v14, %v2325_v11  ;;  %v2997_v24 = vsel %vm256_vm0, %v2325_v11, %v2329_v10 }
  0x9c   : > { %4220 = vst [vmem:[#allocation6_spill] sm:$0xff] %v2997_v24  ;;  %2557 = vrot.lane.b32.xlu2 %v2850_v26, %s2752_s18 }
  0x9d   : > { %2552 = vrot.lane.b32.xlu1 %v2981_v16, %s2752_s18 }
  0x9e   : > { %2547 = vrot.lane.b32.xlu0 %v2805_v8, %s2757_s23  ;;  %v3005_v25 = vpop.permute.xlu2 %2392 }
  0x9f   : > { %v3007_v30 = vpop.permute.xlu1 %2342  ;;  %v2394_v62 = vunpack.i.l.bf16 %v3005_v25 }
  0xa0   : > { %v2338_v31 = vpop.permute.xlu0 %2337 }
  0xa1   : > { %v2340_v33 = vunpack.i.h.bf16 %v2338_v31  ;;  %v2339_v34 = vunpack.i.l.bf16 %v2338_v31 }
  0xa3   : > { %v3019_v8 = vsel %vm256_vm0, %v4165_v32, %v2339_v34  ;;  %v3022_v42 = vsel %vm256_vm0, %v2339_v34, %v2340_v33 }
  0xa4   : > { %4221 = vst [vmem:[#allocation7_spill] sm:$0xff] %v3022_v42  ;;  %2572 = vrot.lane.b32.xlu2 %v2825_v17, %s2752_s18 }
  0xa5   : > { %2567 = vrot.lane.b32.xlu1 %v3012_v35, %s2752_s18 }
  0xa6   : > { %2562 = vrot.lane.b32.xlu0 %v2561_v36, %s2751_s17  ;;  %v3029_v0 = vpop.permute.xlu2 %2407 }
  0xa7   : > { %v3031_v46 = vpop.permute.xlu1 %2357  ;;  %v2410_v44 = vunpack.i.h.bf16 %v3029_v0  ;;  %v2409_v24 = vunpack.i.l.bf16 %v3029_v0 }
  0xa8   : > { %v3033_v27 = vpop.permute.xlu0 %2352  ;;  %v4167_v47 = vunpack.i.h.bf16 %v3031_v46 }
  0xa9   : > { %v2354_v49 = vunpack.i.l.bf16 %v3033_v27 }
  0xaa   : > { %v3040_v51 = vsel %vm385_vm1, %v4167_v47, %v2364_v57 }
  0xab   : > { %v3045_v54 = vsel %vm385_vm1, %v2350_v41, %v2354_v49  ;;  %v2611_v49 = vpack.i.bf16 %v2841_v22, %v2834_v19 }
  0xac   : > { %4222 = vst [vmem:[#allocation8_spill] sm:$0xff] %v3045_v54  ;;  %2587 = vrot.lane.b32.xlu2 %v3012_v35, %s2753_s19 }
  0xad   : > { %2582 = vrot.lane.b32.xlu1 %v2850_v26, %s2753_s19 }
  0xae   : > { %2577 = vrot.lane.b32.xlu0 %v2981_v16, %s2753_s19  ;;  %v3054_v56 = vpop.permute.xlu2 %2422 }
  0xaf   : > { %v3056_v57 = vpop.permute.xlu1 %2372 }
  0xb0   : > { %v3058_v6 = vpop.permute.xlu0 %2367  ;;  %v2375_v41 = vunpack.i.h.bf16 %v3056_v57  ;;  %v4168_v7 = vunpack.i.l.bf16 %v3056_v57 }
  0xb2   : > { %v3065_v9 = vsel %vm385_vm1, %v4168_v7, %v2375_v41  ;;  %v3068_v10 = vsel %vm385_vm1, %v2375_v41, %v2379_v55 }
  0xb3   : > { %4223 = vst [vmem:[#allocation9_spill] sm:$0xff] %v3068_v10 }
  0xb4   : > { %2602 = vrot.lane.b32.xlu2 %v2850_v26, %s2755_s21 }
  0xb5   : > { %2597 = vrot.lane.b32.xlu1 %v2981_v16, %s2755_s21 }
  0xb6   : > { %2592 = vrot.lane.b32.xlu0 %v2825_v17, %s2753_s19  ;;  %v3076_v11 = vpop.permute.xlu2 %2437 }
  0xb7   : > { %v2388_v14 = vpop.permute.xlu1 %2387 }
  0xb8   : > { %v3078_v31 = vpop.permute.xlu0 %2382  ;;  %v2390_v33 = vunpack.i.h.bf16 %v2388_v14  ;;  %v2389_v34 = vunpack.i.l.bf16 %v2388_v14 }
  0xb9   : > { %v4169_v36 = vunpack.i.h.bf16 %v3078_v31 }
  0xba   : > { %v3089_v41 = vsel %vm385_vm1, %v2389_v34, %v2390_v33  ;;  %v3103_v33 = vpack.i.bf16 %v2818_v13, %v2815_v12  ;;  %v2424_v12 = vunpack.i.l.bf16 %v3054_v56 }
  0xbb   : > { %v3086_v55 = vsel %vm385_vm1, %v4169_v36, %v2389_v34 }
  0xbc   : > { %2617 = vrot.lane.b32.xlu2 %v2825_v17, %s2755_s21 }
  0xbd   : > { %2612 = vrot.lane.b32.xlu1 %v2611_v49, %s2754_s20 }
  0xbe   : > { %2607 = vrot.lane.b32.xlu0 %v3012_v35, %s2755_s21  ;;  %v3096_v14 = vpop.permute.xlu2 %2452 }
  0xbf   : > { %v3098_v48 = vpop.permute.xlu1 %2402 }
  0xc0   : > { %v2398_v19 = vpop.permute.xlu0 %2397  ;;  %v2404_v22 = vunpack.i.l.bf16 %v3098_v48  ;;  %v2405_v0 = vunpack.i.h.bf16 %v3098_v48 }
  0xc1   : > { %v2400_v5 = vunpack.i.h.bf16 %v2398_v19  ;;  %v2399_v53 = vunpack.i.l.bf16 %v2398_v19  ;;  %v4174_v19 = vunpack.i.h.bf16 %v3054_v56 }
  0xc3   : > { %v3106_v34 = vsel %vm514_vm2, %v2399_v53, %v2400_v5  ;;  %v3109_v52 = vsel %vm514_vm2, %v2400_v5, %v2404_v22  ;;  %v524_v3 = vsel %vm514_vm2, %v2424_v12, %v4174_v19 }
  0xc4   : > { %2632 = vrot.lane.b32.xlu2 %v2850_v26, %s2757_s23  ;;  %v4170_v26 = vmov 1.0  }
  0xc5   : > { %2627 = vrot.lane.b32.xlu1 %v3103_v33, %s2754_s20  ;;  %1643 = vmatpush.msra.mxu2 %v4170_v26 }
  0xc6   : > { %2622 = vrot.lane.b32.xlu0 %v2981_v16, %s2757_s23  ;;  %v3119_v13 = vpop.permute.xlu2 %2467 }
  0xc7   : > { %v2469_v5 = vunpack.i.l.bf16 %v3119_v13  ;;  %v3123_v22 = vpop.permute.xlu1 %2417  ;;  %v4224_v63 = vunpack.i.h.bf16 %v3119_v13 }
  0xc8   : > { %v3125_v32 = vpop.permute.xlu0 %2412  ;;  %v4172_v16 = vunpack.i.h.bf16 %v3123_v22  ;;  %v2419_v47 = vunpack.i.l.bf16 %v3123_v22 }
  0xc9   : > { %v4173_v7 = vunpack.i.l.bf16 %v3125_v32  ;;  %v1301_v26 = vsel %vm1288_vm3, %v2469_v5, %v4224_v63  ;;  %v520_v5 = vsel %vm514_vm2, %v2409_v24, %v2410_v44 }
  0xca   : > { %v528_v36 = vsel %vm514_vm2, %v2419_v47, %v4172_v16  ;;  %1644 = vmatpush.msra.mxu2 %v1301_v26  ;;  %v2395_v16 = vunpack.i.h.bf16 %v3005_v25  ;;  %v2384_v26 = vunpack.i.l.bf16 %v3078_v31  ;;  %v2359_v25 = vunpack.i.l.bf16 %v3031_v46 }
  0xcb   : > { %v3144_v37 = vsel %vm514_vm2, %v2410_v44, %v4173_v7  ;;  %1677 = vmatpush.msra.mxu3 %v528_v36  ;;  %v3158_v36 = vpack.i.bf16 %v2837_v20, %v2860_v28  ;;  %v2370_v28 = vunpack.i.h.bf16 %v3058_v6 }
  0xcc   : > { %2647 = vrot.lane.b32.xlu2 %v2825_v17, %s2757_s23  ;;  %v2439_v17 = vunpack.i.l.bf16 %v3076_v11 }
  0xcd   : > { %2642 = vrot.lane.b32.xlu1 %v2611_v49, %s2756_s22  ;;  %1678 = vmatpush.msra.mxu3 %v524_v3 }
  0xce   : > { %2637 = vrot.lane.b32.xlu0 %v3012_v35, %s2757_s23  ;;  %v3153_v63 = vpop.permute.xlu2 %2482  ;;  %v516_v35 = vsel %vm514_vm2, %v2395_v16, %v2399_v53  ;;  %v4225_v53 = vunpack.i.h.bf16 %v3078_v31  ;;  %v2380_v31 = vunpack.i.h.bf16 %v2976_v4  ;;  %v515_v4 = vsel %vm514_vm2, %v2394_v62, %v2395_v16 }
  0xcf   : > { %v3163_v49 = vpop.permute.xlu1 %2432  ;;  %1679 = vmatpush.msra.mxu3 %v520_v5  ;;  %v4229_v62 = vunpack.i.l.bf16 %v2922_v40  ;;  %v4231_v40 = vunpack.i.l.bf16 %v2915_v39 }
  0xd0   : > { %v2428_v3 = vpop.permute.xlu0 %2427  ;;  %v2435_v7 = vunpack.i.h.bf16 %v3163_v49  ;;  %v2434_v44 = vunpack.i.l.bf16 %v3163_v49  ;;  %v399_v10 = vsel %vm385_vm1, %v2384_v26, %v4225_v53  ;;  %v4241_v49 = vunpack.i.h.bf16 %v3076_v11 }
  0xd1   : > { %v2430_v19 = vunpack.i.h.bf16 %v2428_v3  ;;  %v2429_v42 = vunpack.i.l.bf16 %v2428_v3  ;;  %1680 = vmatpush.msra.mxu3 %v516_v35  ;;  %v2345_v3 = vunpack.i.h.bf16 %v3007_v30 }
  0xd2   : > { %v1043_v5 = vsel %vm1030_vm4, %v2434_v44, %v2435_v7 }
  0xd3   : > { %v527_v54 = vsel %vm514_vm2, %v2429_v42, %v2419_v47  ;;  %1595 = vmatpush.msra.mxu1 %v1043_v5  ;;  %1681 = vmatpush.msra.mxu3 %v399_v10  ;;  %v523_v48 = vsel %vm514_vm2, %v2430_v19, %v2424_v12  ;;  %v4226_v42 = vunpack.i.h.bf16 %v3076_v11  ;;  %v519_v12 = vsel %vm514_vm2, %v2405_v0, %v2409_v24  ;;  %v3523_v11 = vld [vmem:[%s4158_s1 + $0x78] sm:$0xff] }
  0xd4   : > { %1554 = vmatpush.msra.mxu0 %v527_v54  ;;  %2662 = vrot.lane.b32.xlu2 %v3158_v36, %s2752_s18  ;;  %v4227_v54 = vunpack.i.l.bf16 %v3056_v57  ;;  %v4228_v57 = vunpack.i.h.bf16 %v3031_v46  ;;  %v2454_v46 = vunpack.i.l.bf16 %v3096_v14  ;;  %v387_v16 = vsel %vm385_vm1, %v2345_v3, %v4229_v62 }
  0xd5   : > { %v1039_v47 = vsel %vm1030_vm4, %v2439_v17, %v4226_v42  ;;  %2657 = vrot.lane.b32.xlu1 %v3158_v36, %s2751_s17  ;;  %v2369_v17 = vunpack.i.l.bf16 %v3058_v6 }
  0xd6   : > { %1555 = vmatpush.msra.mxu0 %v523_v48  ;;  %v395_v10 = vsel %vm385_vm1, %v2370_v28, %v4227_v54  ;;  %2652 = vrot.lane.b32.xlu0 %v3103_v33, %s2756_s22  ;;  %v3194_v19 = vpop.permute.xlu2 %2497  ;;  %v391_v5 = vsel %vm385_vm1, %v2359_v25, %v4228_v57  ;;  %v2676_v33 = vpack.i.bf16 %v2797_v2, %v2794_v1  ;;  %v4192_v48 = vunpack.i.h.bf16 %v3096_v14 }
  0xd7   : > { %1682 = vmatpush.msra.mxu3 %v395_v10  ;;  %v3198_v35 = vpop.permute.xlu1 %2447  ;;  %1596 = vmatpush.msra.mxu1 %v1039_v47  ;;  %v2355_v1 = vunpack.i.h.bf16 %v3033_v27  ;;  %v398_v2 = vsel %vm385_vm1, %v2380_v31, %v2384_v26  ;;  %v2344_v47 = vunpack.i.l.bf16 %v3007_v30  ;;  %v4230_v54 = vunpack.i.h.bf16 %v2915_v39 }
  0xd8   : > { %v3200_v44 = vpop.permute.xlu0 %2442  ;;  %1556 = vmatpush.msra.mxu0 %v519_v12  ;;  %v4193_v53 = vunpack.i.h.bf16 %v3198_v35  ;;  %v2449_v24 = vunpack.i.l.bf16 %v3198_v35  ;;  %v394_v26 = vsel %vm385_vm1, %v2369_v17, %v2370_v28  ;;  %v914_v30 = vsel %vm901_vm5, %v2454_v46, %v4192_v48 }
  0xd9   : > { %v4194_v6 = vunpack.i.h.bf16 %v3200_v44  ;;  %v2444_v0 = vunpack.i.l.bf16 %v3200_v44  ;;  %1683 = vmatpush.msra.mxu3 %v391_v5  ;;  %v270_v10 = vsel %vm256_vm0, %v4231_v40, %v4230_v54  ;;  %v390_v31 = vsel %vm385_vm1, %v2355_v1, %v2359_v25  ;;  %v701_v1 = vld [vmem:[%s2788_s14 + $0x48] sm:$0xff] }
  0xda   : > { %1557 = vmatpush.msra.mxu0 %v515_v4  ;;  %v1031_v27 = vsel %vm1030_vm4, %v2449_v24, %v4193_v53  ;;  %v2319_v12 = vunpack.i.l.bf16 %v2907_v38  ;;  %v4232_v57 = vunpack.i.h.bf16 %v2941_v50  ;;  %v4233_v5 = vunpack.i.l.bf16 %v2941_v50 }
  0xdb   : > { %1684 = vmatpush.msra.mxu3 %v387_v16  ;;  %v1035_v42 = vsel %vm1030_vm4, %v2444_v0, %v4194_v6  ;;  %v2686_v50 = vpack.i.bf16 %v2837_v20, %v2844_v23  ;;  %v2294_v46 = vunpack.i.l.bf16 %v2925_v43  ;;  %v4234_v20 = vunpack.i.h.bf16 %v2907_v38  ;;  %v696_v16 = vld [vmem:[%s2788_s14 + $0x20] sm:$0xff]  ;;  %v1211_v38 = vld [vmem:[%s2788_s14 + $0x18] sm:$0xff] }
  0xdc   : > { %1558 = vmatpush.msra.mxu0 %v398_v2  ;;  %1597 = vmatpush.msra.mxu1 %v1035_v42  ;;  %v262_v4 = vsel %vm256_vm0, %v4233_v5, %v4232_v57  ;;  %v3292_v40 = vpack.i.bf16 %v696_v16, %v701_v1 }
  0xdd   : > { %1685 = vmatpush.msra.mxu3 %v270_v10  ;;  %2677 = vrot.lane.b32.xlu2 %v2676_v33, %s2753_s19  ;;  %v265_v23 = vsel %vm256_vm0, %v2319_v12, %v4234_v20  ;;  %v1216_v10 = vld [vmem:[%s2788_s14 + $0x40] sm:$0xff]  ;;  %v3329_v20 = vld [vmem:[%s2788_s14 + $0x68] sm:$0xff] }
  0xde   : > { %2672 = vrot.lane.b32.xlu1 %v3158_v36, %s2753_s19  ;;  %1559 = vmatpush.msra.mxu0 %v394_v26  ;;  %v3239_v39 = vpop.permute.xlu2 %2512  ;;  %v3305_v12 = vpack.i.bf16 %v701_v1, %v1216_v10  ;;  %4236 = vst [vmem:[#allocation10_spill] sm:$0xff] %v3329_v20 }
  0xdf   : > { %2667 = vrot.lane.b32.xlu0 %v2676_v33, %s2752_s18  ;;  %1598 = vmatpush.msra.mxu1 %v1031_v27  ;;  %v3244_v28 = vpop.permute.xlu1 %2462  ;;  %v386_v33 = vsel %vm385_vm1, %v2344_v47, %v2345_v3  ;;  %v4235_v47 = vunpack.i.h.bf16 %v2925_v43  ;;  %v3300_v43 = vpack.i.bf16 %v696_v16, %v1211_v38  ;;  %v3337_v38 = vld [vmem:[%s2788_s14 + $0x90] sm:$0xff] }
  0xe0   : > { %1686 = vmatpush.msra.mxu3 %v2986_v15  ;;  %v3246_v17 = vpop.permute.xlu0 %2457  ;;  %1560 = vmatpush.msra.mxu0 %v390_v31  ;;  %v4187_v24 = vunpack.i.h.bf16 %v3244_v28  ;;  %v2464_v25 = vunpack.i.l.bf16 %v3244_v28 }
  0xe1   : > { %v4188_v15 = vunpack.i.h.bf16 %v3246_v17  ;;  %v2459_v0 = vunpack.i.l.bf16 %v3246_v17  ;;  %1599 = vmatpush.msra.mxu1 %v914_v30  ;;  %v257_v54 = vsel %vm256_vm0, %v2294_v46, %v4235_v47  ;;  %v157_v30 = vld [vmem:[%s2788_s14 + $0x80] sm:$0xff]  ;;  %v2499_v46 = vunpack.i.l.bf16 %v3194_v19 }
  0xe2   : > { %1687 = vmatpush.msra.mxu3 %v262_v4  ;;  %1561 = vmatpush.msra.mxu0 %v386_v33  ;;  %v906_v62 = vsel %vm901_vm5, %v2464_v25, %v4187_v24  ;;  %v153_v4 = vld [vmem:[%s2788_s14 + $0x58] sm:$0xff]  ;;  %v577_v33 = vld [vmem:[%s2788_s14 + $0x70] sm:$0xff]  ;;  %v3342_v47 = vld [vmem:[%s4158_s1] sm:$0xff] }
  0xe3   : > { %v910_v3 = vsel %vm901_vm5, %v2459_v0, %v4188_v15  ;;  %v582_v25 = vld [vmem:[%s2788_s14 + $0x98] sm:$0xff] }
  0xe4   : > { %1688 = vmatpush.msra.mxu3 %v2948_v58  ;;  %1562 = vmatpush.msra.mxu0 %v2991_v18  ;;  %v4185_v58 = vunpack.i.h.bf16 %v3153_v63  ;;  %v2484_v18 = vunpack.i.l.bf16 %v3153_v63  ;;  %v156_v0 = vld [vmem:[%s2788_s14 + $0x78] sm:$0xff] }
  0xe5   : > { %1600 = vmatpush.msra.mxu1 %v910_v3  ;;  %2692 = vrot.lane.b32.xlu2 %v3158_v36, %s2755_s21  ;;  %v4176_v3 = vunpack.i.h.bf16 %v3194_v19 }
  0xe6   : > { %2687 = vrot.lane.b32.xlu1 %v2686_v50, %s2754_s20  ;;  %1563 = vmatpush.msra.mxu0 %v265_v23  ;;  %v3281_v36 = vpop.permute.xlu2 %2527  ;;  %v785_v5 = vsel %vm772_vm6, %v2484_v18, %v4185_v58  ;;  %v149_v50 = vld [vmem:[%s2788_s14 + $0x30] sm:$0xff]  ;;  %v145_v23 = vld [vmem:[%s2788_s14 + $0x8] sm:$0xff]  ;;  %v2721_v18 = vpack.i.bf16 %v577_v33, %v582_v25 }
  0xe7   : > { %2682 = vrot.lane.b32.xlu0 %v2864_v29, %s2754_s20  ;;  %1601 = vmatpush.msra.mxu1 %v906_v62  ;;  %v3284_v2 = vpop.permute.xlu1 %2477 }
  0xe8   : > { %v3286_v42 = vpop.permute.xlu0 %2472  ;;  %1564 = vmatpush.msra.mxu0 %v2953_v59  ;;  %v4178_v29 = vunpack.i.h.bf16 %v3284_v2  ;;  %v2479_v27 = vunpack.i.l.bf16 %v3284_v2  ;;  %1689 = vmatpush.msra.mxu3 %v157_v30  ;;  %v152_v30 = vld [vmem:[%s2788_s14 + $0x50] sm:$0xff] }
  0xe9   : > { %v4186_v26 = vunpack.i.h.bf16 %v3286_v42  ;;  %v2474_v59 = vunpack.i.l.bf16 %v3286_v42 }
  0xea   : > { %1565 = vmatpush.msra.mxu0 %v257_v54  ;;  %v1297_v31 = vsel %vm1288_vm3, %v2479_v27, %v4178_v29  ;;  %1690 = vmatpush.msra.mxu3 %v153_v4  ;;  %v2711_v4 = vpack.i.bf16 %v582_v25, %v3337_v38  ;;  %v4179_v25 = vunpack.i.h.bf16 %v3239_v39 }
  0xeb   : > { %v902_v57 = vsel %vm901_vm5, %v2474_v59, %v4186_v26  ;;  %1645 = vmatpush.msra.mxu2 %v1297_v31  ;;  %v2716_v31 = vpack.i.bf16 %v577_v33, %v3329_v20  ;;  %v144_v33 = vld [vmem:[%s2788_s14] sm:$0xff] }
  0xec   : > { %1602 = vmatpush.msra.mxu1 %v902_v57  ;;  %1566 = vmatpush.msra.mxu0 %v156_v0  ;;  %v148_v57 = vld [vmem:[%s2788_s14 + $0x28] sm:$0xff] }
  0xed   : > { %2707 = vrot.lane.b32.xlu2 %v3292_v40, %s2755_s21  ;;  %1691 = vmatpush.msra.mxu3 %v149_v50  ;;  %v1289_v50 = vsel %vm1288_vm3, %v2499_v46, %v4176_v3 }
  0xee   : > { %2702 = vrot.lane.b32.xlu1 %v3300_v43, %s2754_s20  ;;  %1603 = vmatpush.msra.mxu1 %v785_v5  ;;  %v3326_v62 = vpop.permute.xlu2 %2542 }
  0xef   : > { %2697 = vrot.lane.b32.xlu0 %v3305_v12, %s2754_s20  ;;  %v3332_v16 = vpop.permute.xlu1 %2492  ;;  %1567 = vmatpush.msra.mxu0 %v152_v30 }
  0xf0   : > { %v3334_v1 = vpop.permute.xlu0 %2487  ;;  %v4181_v54 = vunpack.i.h.bf16 %v3332_v16  ;;  %v2494_v10 = vunpack.i.l.bf16 %v3332_v16  ;;  %1692 = vmatpush.msra.mxu3 %v145_v23  ;;  %v2514_v23 = vunpack.i.l.bf16 %v3239_v39 }
  0xf1   : > { %v4177_v27 = vunpack.i.h.bf16 %v3334_v1  ;;  %v2489_v59 = vunpack.i.l.bf16 %v3334_v1  ;;  %1693 = vmatmul.f32.vlgmr.msra.gmra.mxu3 %v3342_v47  ;;  %1568 = vmatpush.msra.mxu0 %v148_v57 }
  0xf2   : > { %v781_v5 = vsel %vm772_vm6, %v2494_v10, %v4181_v54 }
  0xf3   : > { %v1293_v0 = vsel %vm1288_vm3, %v2489_v59, %v4177_v27  ;;  %1604 = vmatpush.msra.mxu1 %v781_v5  ;;  %1569 = vmatpush.msra.mxu0 %v144_v33  ;;  %v773_v33 = vsel %vm772_vm6, %v2514_v23, %v4179_v25  ;;  %v4190_v25 = vunpack.i.h.bf16 %v3326_v62 }
  0xf4   : > { %1646 = vmatpush.msra.mxu2 %v1293_v0  ;;  %1570 = vmatmul.f32.vlgmr.msra.gmra.mxu0 %v3342_v47 }
  0xf5   : > { %2722 = vrot.lane.b32.xlu2 %v2721_v18, %s2757_s23  ;;  %v3378_v18 = vld [vmem:[%s4158_s1 + $0x18] sm:$0xff] }
  0xf6   : > { %2717 = vrot.lane.b32.xlu1 %v2716_v31, %s2756_s22  ;;  %1647 = vmatpush.msra.mxu2 %v1289_v50  ;;  %v3368_v10 = vpop.permute.xlu2 %2557 }
  0xf7   : > { %2712 = vrot.lane.b32.xlu0 %v2711_v4, %s2756_s22  ;;  %v3370_v46 = vpop.permute.xlu1 %2507  ;;  %v4237_v4 = vmov 1.0   ;;  %v4198_v24 = vunpack.i.h.bf16 %v3368_v10 }
  0xf8   : > { %v3372_v59 = vpop.permute.xlu0 %2502  ;;  %v4175_v30 = vunpack.i.h.bf16 %v3370_v46  ;;  %v2509_v31 = vunpack.i.l.bf16 %v3370_v46  ;;  %1766 = vmatpush.msrb.mxu0 %v4237_v4 }
  0xf9   : > { %v4180_v57 = vunpack.i.h.bf16 %v3372_v59  ;;  %v2504_v5 = vunpack.i.l.bf16 %v3372_v59  ;;  %1696 = vmatmul.f32.gmra.mxu3 %v3378_v18 }
  0xfa   : > { %v1172_v0 = vsel %vm1159_vm7, %v2509_v31, %v4175_v30  ;;  %v4183_v31 = vunpack.i.h.bf16 %v3281_v36  ;;  %v2529_v30 = vunpack.i.l.bf16 %v3281_v36 }
  0xfb   : > { %v777_v50 = vsel %vm772_vm6, %v2504_v5, %v4180_v57  ;;  %1648 = vmatpush.msra.mxu2 %v1172_v0  ;;  %v2544_v57 = vunpack.i.l.bf16 %v3326_v62 }
  0xfc   : > { %1605 = vmatpush.msra.mxu1 %v777_v50  ;;  %1573 = vmatmul.f32.gmra.mxu0 %v3378_v18  ;;  %v1164_v29 = vsel %vm1159_vm7, %v2529_v30, %v4183_v31  ;;  %v3441_v30 = vld [vmem:[%s4158_s1 + $0x48] sm:$0xff]  ;;  %v3450_v31 = vld [vmem:[%s4158_s1 + $0x10] sm:$0xff] }
  0xfd   : > { %2737 = vrot.lane.b32.xlu2 %v3292_v40, %s2757_s23  ;;  %v3413_v40 = vld [vmem:[%s4158_s1 + $0x30] sm:$0xff]  ;;  %4239 = vst [vmem:[#allocation12_spill] sm:$0xff] %v3441_v30  ;;  %v648_v26 = vsel %vm643_vm8, %v2544_v57, %v4190_v25 }
  0xfe   : > { %2732 = vrot.lane.b32.xlu1 %v3300_v43, %s2756_s22  ;;  %1606 = vmatpush.msra.mxu1 %v773_v33  ;;  %v3403_v5 = vpop.permute.xlu2 %2572  ;;  %4238 = vst [vmem:[#allocation11_spill] sm:$0xff] %v3413_v40 }
  0xff   : > { %2727 = vrot.lane.b32.xlu0 %v3305_v12, %s2756_s22  ;;  %v3405_v23 = vpop.permute.xlu1 %2522 }
 0x100   : > { %v3407_v0 = vpop.permute.xlu0 %2517  ;;  %v4182_v43 = vunpack.i.h.bf16 %v3405_v23  ;;  %v2524_v50 = vunpack.i.l.bf16 %v3405_v23 }
 0x101   : > { %v4184_v12 = vunpack.i.h.bf16 %v3407_v0  ;;  %v2519_v33 = vunpack.i.l.bf16 %v3407_v0  ;;  %1699 = vmatmul.f32.gmra.mxu3 %v3413_v40 }
 0x102   : > { %v656_v3 = vsel %vm643_vm8, %v2524_v50, %v4182_v43 }
 0x103   : > { %v1168_v27 = vsel %vm1159_vm7, %v2519_v33, %v4184_v12  ;;  %1607 = vmatpush.msra.mxu1 %v656_v3 }
 0x104   : > { %1649 = vmatpush.msra.mxu2 %v1168_v27  ;;  %1576 = vmatmul.f32.gmra.mxu0 %v3413_v40  ;;  %v4245_v40 = vunpack.i.h.bf16 %v3403_v5 }
 0x106   : > { %1650 = vmatpush.msra.mxu2 %v1164_v29  ;;  %v3431_v54 = vpop.permute.xlu2 %2587 }
 0x107   : > { %v3433_v50 = vpop.permute.xlu1 %2537 }
 0x108   : > { %v3435_v43 = vpop.permute.xlu0 %2532  ;;  %v4189_v3 = vunpack.i.h.bf16 %v3433_v50  ;;  %v2539_v29 = vunpack.i.l.bf16 %v3433_v50 }
 0x109   : > { %v4191_v27 = vunpack.i.h.bf16 %v3435_v43  ;;  %v2534_v33 = vunpack.i.l.bf16 %v3435_v43  ;;  %1702 = vmatmul.f32.gmra.mxu3 %v3441_v30 }
 0x10a   : > { %v1160_v12 = vsel %vm1159_vm7, %v2539_v29, %v4189_v3  ;;  %v2559_v29 = vunpack.i.l.bf16 %v3368_v10 }
 0x10b   : > { %v652_v58 = vsel %vm643_vm8, %v2534_v33, %v4191_v27  ;;  %1651 = vmatpush.msra.mxu2 %v1160_v12  ;;  %v3485_v27 = vld [vmem:[%s4158_s1 + $0x28] sm:$0xff] }
 0x10c   : > { %1608 = vmatpush.msra.mxu1 %v652_v58  ;;  %2237 = vmatmul.msk.f32.vlgmr.msra.gmra.mxu2 %vm1529_vm9, %v3450_v31  ;;  %v3476_v58 = vld [vmem:[%s4158_s1 + $0x60] sm:$0xff]  ;;  %v1041_v6 = vsel %vm1030_vm4, %v2559_v29, %v4198_v24 }
 0x10d   : > { %1579 = vmatmul.f32.gmra.mxu0 %v3441_v30  ;;  %4240 = vst [vmem:[#allocation13_spill] sm:$0xff] %v3476_v58 }
 0x10e   : > { %1609 = vmatpush.msra.mxu1 %v648_v26  ;;  %v3465_v15 = vpop.permute.xlu2 %2602 }
 0x10f   : > { %v3468_v3 = vpop.permute.xlu1 %2552 }
 0x110   : > { %v3470_v33 = vpop.permute.xlu0 %2547  ;;  %v4199_v57 = vunpack.i.h.bf16 %v3468_v3  ;;  %v2554_v26 = vunpack.i.l.bf16 %v3468_v3 }
 0x111   : > { %v4197_v12 = vunpack.i.h.bf16 %v3470_v33  ;;  %v2549_v25 = vunpack.i.l.bf16 %v3470_v33  ;;  %1705 = vmatmul.f32.gmra.mxu3 %v3476_v58 }
 0x112   : > { %v1044_v48 = vsel %vm1030_vm4, %v2435_v7, %v2554_v26  ;;  %v1045_v53 = vsel %vm1030_vm4, %v2554_v26, %v4199_v57  ;;  %v3503_v7 = vld [vmem:[%s4158_s1 + $0x8] sm:$0xff]  ;;  %v1040_v26 = vsel %vm1030_vm4, %v4241_v49, %v2559_v29  ;;  %v4242_v57 = vunpack.i.h.bf16 %v3200_v44 }
 0x113   : > { %v644_v30 = vsel %vm643_vm8, %v2549_v25, %v4197_v12  ;;  %1718 = vmatpush.msrb.mxu2 %v1044_v48  ;;  %1841 = vmatpush.msrb.mxu3 %v1045_v53  ;;  %v2574_v48 = vunpack.i.l.bf16 %v3403_v5 }
 0x114   : > { %2238 = vmatmul.msk.f32.gmra.mxu2 %vm1529_vm9, %v3485_v27  ;;  %1610 = vmatpush.msra.mxu1 %v644_v30 }
 0x115   : > { %1719 = vmatpush.msrb.mxu2 %v1040_v26  ;;  %1842 = vmatpush.msrb.mxu3 %v1041_v6  ;;  %v3532_v26 = vld [vmem:[%s4158_s1 + $0x40] sm:$0xff]  ;;  %v1033_v44 = vsel %vm1030_vm4, %v2574_v48, %v4245_v40 }
 0x116   : > { %v3510_v25 = vpop.permute.xlu2 %2617  ;;  %1611 = vmatmul.f32.vlgmr.msra.gmra.mxu1 %v3503_v7  ;;  %1582 = vmatmul.f32.gmra.mxu0 %v3476_v58  ;;  %v4243_v58 = vunpack.i.h.bf16 %v3123_v22  ;;  %v4246_v22 = vunpack.i.h.bf16 %v3198_v35 }
 0x117   : > { %v3515_v12 = vpop.permute.xlu1 %2567 }
 0x118   : > { %v3517_v24 = vpop.permute.xlu0 %2562  ;;  %v2569_v30 = vunpack.i.l.bf16 %v3515_v12  ;;  %v4244_v20 = vunpack.i.h.bf16 %v3515_v12 }
 0x119   : > { %v4205_v49 = vunpack.i.l.bf16 %v3517_v24  ;;  %1708 = vmatmul.f32.gmra.mxu3 %v3523_v11 }
 0x11a   : > { %v1036_v53 = vsel %vm1030_vm4, %v4242_v57, %v2569_v30  ;;  %v1037_v29 = vsel %vm1030_vm4, %v2569_v30, %v4244_v20  ;;  %v3552_v57 = vld [vmem:[%s4158_s1 + $0x20] sm:$0xff]  ;;  %v1032_v20 = vsel %vm1030_vm4, %v4246_v22, %v2574_v48 }
 0x11b   : > { %v529_v6 = vsel %vm514_vm2, %v4243_v58, %v4205_v49  ;;  %1720 = vmatpush.msrb.mxu2 %v1036_v53  ;;  %1843 = vmatpush.msrb.mxu3 %v1037_v29  ;;  %v4247_v58 = vunpack.i.h.bf16 %v3517_v24  ;;  %v4248_v53 = vunpack.i.h.bf16 %v3054_v56  ;;  %v3576_v56 = vld [vmem:[%s4158_s1 + $0x90] sm:$0xff] }
 0x11c   : > { %1800 = vmatpush.msrb.mxu1 %v529_v6  ;;  %2239 = vmatmul.msk.f32.gmra.mxu2 %vm1529_vm9, %v3532_v26 }
 0x11d   : > { %v525_v6 = vsel %vm514_vm2, %v4248_v53, %v4247_v58  ;;  %1721 = vmatpush.msrb.mxu2 %v1032_v20  ;;  %1844 = vmatpush.msrb.mxu3 %v1033_v44  ;;  %v2589_v58 = vunpack.i.l.bf16 %v3431_v54  ;;  %v4249_v53 = vunpack.i.h.bf16 %v3096_v14  ;;  %v3604_v20 = vld [vmem:[%s4158_s1 + $0x38] sm:$0xff]  ;;  %v4250_v14 = vunpack.i.h.bf16 %v3246_v17 }
 0x11e   : > { %1801 = vmatpush.msrb.mxu1 %v525_v6  ;;  %v3564_v40 = vpop.permute.xlu2 %2632  ;;  %1585 = vmatmul.f32.gmra.mxu0 %v3523_v11 }
 0x11f   : > { %1614 = vmatmul.f32.gmra.mxu1 %v3552_v57  ;;  %v3567_v30 = vpop.permute.xlu1 %2582 }
 0x120   : > { %v3569_v29 = vpop.permute.xlu0 %2577  ;;  %1802 = vmatpush.msrb.mxu1 %v3144_v37  ;;  %v4206_v35 = vunpack.i.h.bf16 %v3567_v30  ;;  %v2584_v48 = vunpack.i.l.bf16 %v3567_v30  ;;  %v3587_v37 = vld [vmem:[%s4158_s1 + $0x58] sm:$0xff] }
 0x121   : > { %v4207_v44 = vunpack.i.h.bf16 %v3569_v29  ;;  %v2579_v22 = vunpack.i.l.bf16 %v3569_v29  ;;  %1711 = vmatmul.f32.gmra.mxu3 %v3576_v56 }
 0x122   : > { %1803 = vmatpush.msrb.mxu1 %v3106_v34  ;;  %v912_v34 = vsel %vm901_vm5, %v2584_v48, %v4206_v35 }
 0x123   : > { %v915_v6 = vsel %vm901_vm5, %v4249_v53, %v2579_v22  ;;  %v916_v49 = vsel %vm901_vm5, %v2579_v22, %v4207_v44  ;;  %v911_v22 = vsel %vm901_vm5, %v4250_v14, %v2584_v48  ;;  %v2604_v14 = vunpack.i.l.bf16 %v3465_v15 }
 0x124   : > { %1722 = vmatpush.msrb.mxu2 %v915_v6  ;;  %1804 = vmatpush.msrb.mxu1 %v3086_v55  ;;  %v4251_v55 = vunpack.i.h.bf16 %v3431_v54  ;;  %v4252_v6 = vunpack.i.h.bf16 %v3244_v28 }
 0x125   : > { %1845 = vmatpush.msrb.mxu3 %v916_v49  ;;  %2240 = vmatmul.msk.f32.gmra.mxu2 %vm1529_vm9, %v3587_v37 }
 0x126   : > { %1723 = vmatpush.msrb.mxu2 %v911_v22  ;;  %1805 = vmatpush.msrb.mxu1 %v3065_v9  ;;  %v908_v53 = vsel %vm901_vm5, %v2589_v58, %v4251_v55  ;;  %v907_v35 = vsel %vm901_vm5, %v4252_v6, %v2589_v58  ;;  %v3624_v17 = vpop.permute.xlu2 %2647  ;;  %v3634_v58 = vld [vmem:[%s4158_s1 + $0xa8] sm:$0xff]  ;;  %v4253_v22 = vunpack.i.h.bf16 %v3286_v42  ;;  %v3658_v6 = vld [vmem:[%s4158_s1 + $0x50] sm:$0xff]  ;;  %v4254_v42 = vunpack.i.h.bf16 %v3153_v63 }
 0x127   : > { %1846 = vmatpush.msrb.mxu3 %v912_v34  ;;  %1617 = vmatmul.f32.gmra.mxu1 %v3604_v20  ;;  %v3619_v49 = vpop.permute.xlu1 %2597 }
 0x128   : > { %v3621_v44 = vpop.permute.xlu0 %2592  ;;  %1724 = vmatpush.msrb.mxu2 %v907_v35  ;;  %1806 = vmatpush.msrb.mxu1 %v3040_v51  ;;  %v4209_v9 = vunpack.i.h.bf16 %v3619_v49  ;;  %v2599_v48 = vunpack.i.l.bf16 %v3619_v49  ;;  %v4208_v51 = vunpack.i.h.bf16 %v3465_v15  ;;  %v3641_v35 = vld [vmem:[%s4158_s1 + $0x70] sm:$0xff] }
 0x129   : > { %v4210_v34 = vunpack.i.h.bf16 %v3621_v44  ;;  %v2594_v28 = vunpack.i.l.bf16 %v3621_v44  ;;  %1847 = vmatpush.msrb.mxu3 %v908_v53  ;;  %1588 = vmatmul.f32.gmra.mxu0 %v3576_v56 }
 0x12a   : > { %1807 = vmatpush.msrb.mxu1 %v2933_v45  ;;  %1714 = vmatmul.f32.gmra.mxu3 %v3634_v58  ;;  %v787_v45 = vsel %vm772_vm6, %v2599_v48, %v4209_v9 }
 0x12b   : > { %v903_v55 = vsel %vm901_vm5, %v4253_v22, %v2594_v28  ;;  %v904_v53 = vsel %vm901_vm5, %v2594_v28, %v4210_v34  ;;  %v786_v28 = vsel %vm772_vm6, %v4254_v42, %v2599_v48  ;;  %v4255_v22 = vunpack.i.h.bf16 %v3332_v16 }
 0x12c   : > { %1725 = vmatpush.msrb.mxu2 %v903_v55  ;;  %1808 = vmatpush.msrb.mxu1 %v3019_v8  ;;  %v783_v8 = vsel %vm772_vm6, %v2604_v14, %v4208_v51  ;;  %v4213_v42 = vunpack.i.h.bf16 %v3510_v25 }
 0x12d   : > { %1848 = vmatpush.msrb.mxu3 %v904_v53  ;;  %2241 = vmatmul.msk.f32.gmra.mxu2 %vm1529_vm9, %v3641_v35  ;;  %v782_v55 = vsel %vm772_vm6, %v4255_v22, %v2604_v14  ;;  %v2619_v53 = vunpack.i.l.bf16 %v3510_v25 }
 0x12e   : > { %1726 = vmatpush.msrb.mxu2 %v786_v28  ;;  %1809 = vmatpush.msrb.mxu1 %v2994_v21  ;;  %v158_v28 = vld [vmem:[%s2788_s14 + $0x88] sm:$0xff]  ;;  %v2663_v22 = vpop.permute.xlu2 %2662 }
 0x12f   : > { %1849 = vmatpush.msrb.mxu3 %v787_v45  ;;  %1620 = vmatmul.f32.gmra.mxu1 %v3658_v6  ;;  %v3674_v63 = vpop.permute.xlu1 %2612 }
 0x130   : > { %v3676_v48 = vpop.permute.xlu0 %2607  ;;  %1727 = vmatpush.msrb.mxu2 %v782_v55  ;;  %1810 = vmatpush.msrb.mxu1 %v2958_v60  ;;  %v4212_v21 = vunpack.i.h.bf16 %v3674_v63  ;;  %v4214_v45 = vunpack.i.l.bf16 %v3674_v63  ;;  %v3690_v60 = vld [vmem:[%s4158_s1 + $0x88] sm:$0xff]  ;;  %v4256_v55 = vunpack.i.h.bf16 %v3372_v59  ;;  %v4258_v59 = vunpack.i.h.bf16 %v3239_v39 }
 0x131   : > { %v4211_v16 = vunpack.i.h.bf16 %v3676_v48  ;;  %v2609_v14 = vunpack.i.l.bf16 %v3676_v48  ;;  %1850 = vmatpush.msrb.mxu3 %v783_v8  ;;  %1591 = vmatmul.f32.gmra.mxu0 %v3634_v58  ;;  %v4257_v8 = vunpack.i.h.bf16 %v3119_v13  ;;  %v4259_v13 = vunpack.i.h.bf16 %v3284_v2 }
 0x132   : > { %1811 = vmatpush.msrb.mxu1 %v2961_v61  ;;  %v154_v61 = vld [vmem:[%s2788_s14 + $0x60] sm:$0xff]  ;;  %v775_v39 = vsel %vm772_vm6, %v2619_v53, %v4213_v42 }
 0x133   : > { %v778_v51 = vsel %vm772_vm6, %v4256_v55, %v2609_v14  ;;  %v1302_v9 = vsel %vm1288_vm3, %v4257_v8, %v4214_v45  ;;  %v779_v34 = vsel %vm772_vm6, %v2609_v14, %v4211_v16  ;;  %v774_v55 = vsel %vm772_vm6, %v4258_v59, %v2619_v53  ;;  %v150_v14 = vld [vmem:[%s2788_s14 + $0x38] sm:$0xff] }
 0x134   : > { %1728 = vmatpush.msrb.mxu2 %v778_v51  ;;  %1767 = vmatpush.msrb.mxu0 %v1302_v9  ;;  %v1298_v9 = vsel %vm1288_vm3, %v4259_v13, %v4212_v21  ;;  %v3717_v51 = vld [vmem:[%s4158_s1 + $0x68] sm:$0xff]  ;;  %v2634_v8 = vunpack.i.l.bf16 %v3564_v40  ;;  %v146_v13 = vld [vmem:[%s2788_s14 + $0x10] sm:$0xff]  ;;  %v2665_v16 = vunpack.i.h.bf16 %v2663_v22  ;;  %v4261_v45 = vunpack.i.h.bf16 %v3405_v23 }
 0x135   : > { %1812 = vmatpush.msrb.mxu1 %v158_v28  ;;  %2242 = vmatmul.msk.f32.gmra.mxu2 %vm1529_vm9, %v3690_v60  ;;  %v2664_v28 = vunpack.i.l.bf16 %v2663_v22  ;;  %v4260_v22 = vunpack.i.h.bf16 %v3468_v3  ;;  %v4264_v23 = vunpack.i.h.bf16 %v3368_v10  ;;  %v4268_v10 = vunpack.i.h.bf16 %v3564_v40 }
 0x136   : > { %1729 = vmatpush.msrb.mxu2 %v774_v55  ;;  %1768 = vmatpush.msrb.mxu0 %v1298_v9 }
 0x137   : > { %1813 = vmatpush.msrb.mxu1 %v154_v61  ;;  %1851 = vmatpush.msrb.mxu3 %v779_v34  ;;  %v3724_v2 = vpop.permute.xlu1 %2627  ;;  %v3738_v61 = vld [vmem:[%s4158_s1 + $0xa0] sm:$0xff]  ;;  %v1046_v42 = vsel %vm1030_vm4, %v4260_v22, %v2664_v28  ;;  %v3754_v53 = vpop.permute.xlu2 %2677  ;;  %v1042_v3 = vsel %vm1030_vm4, %v4264_v23, %v2665_v16  ;;  %v4267_v28 = vunpack.i.h.bf16 %v3194_v19  ;;  %v654_v16 = vsel %vm643_vm8, %v2634_v8, %v4268_v10 }
 0x138   : > { %v3726_v59 = vpop.permute.xlu0 %2622  ;;  %1623 = vmatmul.f32.gmra.mxu1 %v3717_v51  ;;  %v2629_v55 = vunpack.i.l.bf16 %v3724_v2  ;;  %v2649_v19 = vunpack.i.l.bf16 %v3624_v17 }
 0x139   : > { %v2624_v21 = vunpack.i.l.bf16 %v3726_v59  ;;  %1814 = vmatpush.msrb.mxu1 %v150_v14  ;;  %1852 = vmatpush.msrb.mxu3 %v775_v39  ;;  %v4262_v14 = vunpack.i.h.bf16 %v3334_v1  ;;  %v4263_v34 = vunpack.i.h.bf16 %v3726_v59  ;;  %v4265_v1 = vunpack.i.h.bf16 %v3435_v43 }
 0x13a   : > { %v2650_v43 = vunpack.i.h.bf16 %v3624_v17 }
 0x13b   : > { %1815 = vmatpush.msrb.mxu1 %v146_v13  ;;  %v657_v9 = vsel %vm643_vm8, %v4261_v45, %v2624_v21  ;;  %v1294_v39 = vsel %vm1288_vm3, %v4262_v14, %v2629_v55  ;;  %v658_v13 = vsel %vm643_vm8, %v2624_v21, %v4263_v34  ;;  %v653_v45 = vsel %vm643_vm8, %v4265_v1, %v2634_v8  ;;  %v3796_v1 = vld [vmem:[%s4158_s1 + $0xb8] sm:$0xff] }
 0x13c   : > { %1730 = vmatpush.msrb.mxu2 %v657_v9  ;;  %1769 = vmatpush.msrb.mxu0 %v1294_v39  ;;  %v4266_v21 = vunpack.i.h.bf16 %v3724_v2 }
 0x13d   : > { %1964 = vmatpush.msra.mxu1 %v1046_v42  ;;  %2243 = vmatmul.msk.f32.gmra.mxu2 %vm1529_vm9, %v3738_v61  ;;  %v3767_v42 = vld [vmem:[%s4158_s1 + $0x80] sm:$0xff] }
 0x13e   : > { %1731 = vmatpush.msrb.mxu2 %v653_v45  ;;  %v1290_v9 = vsel %vm1288_vm3, %v4267_v28, %v4266_v21  ;;  %1853 = vmatpush.msrb.mxu3 %v658_v13  ;;  %v4269_v13 = vunpack.i.h.bf16 %v3370_v46  ;;  %v4270_v45 = vunpack.i.h.bf16 %v3326_v62  ;;  %v646_v46 = vsel %vm643_vm8, %v2649_v19, %v2650_v43  ;;  %v3815_v62 = vld [vmem:[%s4158_s1 + $0x98] sm:$0xff] }
 0x13f   : > { %1965 = vmatpush.msra.mxu1 %v1042_v3  ;;  %1770 = vmatpush.msrb.mxu0 %v1290_v9  ;;  %v3778_v34 = vpop.permute.xlu1 %2642  ;;  %v4271_v9 = vunpack.i.h.bf16 %v3407_v0 }
 0x140   : > { %1626 = vmatmul.f32.gmra.mxu1 %v3767_v42  ;;  %v2645_v22 = vunpack.i.h.bf16 %v3778_v34  ;;  %v2644_v14 = vunpack.i.l.bf16 %v3778_v34  ;;  %v3783_v39 = vpop.permute.xlu0 %2637  ;;  %1854 = vmatpush.msrb.mxu3 %v654_v16  ;;  %v4272_v16 = vunpack.i.h.bf16 %v3470_v33 }
 0x141   : > { %v2640_v23 = vunpack.i.h.bf16 %v3783_v39  ;;  %v2639_v8 = vunpack.i.l.bf16 %v3783_v39 }
 0x142   : > { %v1173_v3 = vsel %vm1159_vm7, %v4269_v13, %v2644_v14  ;;  %v1169_v10 = vsel %vm1159_vm7, %v4271_v9, %v2645_v22  ;;  %v3822_v13 = vpop.permute.xlu2 %2692  ;;  %v3840_v9 = vld [vmem:[%s4158_s1 + $0xb0] sm:$0xff] }
 0x143   : > { %v649_v21 = vsel %vm643_vm8, %v4270_v45, %v2639_v8  ;;  %1771 = vmatpush.msrb.mxu0 %v1173_v3  ;;  %v650_v28 = vsel %vm643_vm8, %v2639_v8, %v2640_v23  ;;  %v645_v8 = vsel %vm643_vm8, %v4272_v16, %v2649_v19  ;;  %v2415_v16 = vunpack.i.h.bf16 %v3125_v32 }
 0x144   : > { %1732 = vmatpush.msrb.mxu2 %v649_v21  ;;  %1855 = vmatpush.msrb.mxu3 %v650_v28  ;;  %v4273_v21 = vunpack.i.h.bf16 %v3281_v36  ;;  %v4275_v36 = vunpack.i.l.bf16 %v3517_v24 }
 0x145   : > { %2244 = vmatmul.msk.f32.gmra.mxu2 %vm1529_vm9, %v3796_v1  ;;  %1772 = vmatpush.msrb.mxu0 %v1169_v10 }
 0x146   : > { %1733 = vmatpush.msrb.mxu2 %v645_v8  ;;  %1856 = vmatpush.msrb.mxu3 %v646_v46 }
 0x147   : > { %v2658_v0 = vpop.permute.xlu1 %2657  ;;  %1857 = vmatmul.f32.vlgmr.msrb.gmra.mxu3 %v3503_v7 }
 0x148   : > { %1629 = vmatmul.f32.gmra.mxu1 %v3815_v62  ;;  %1889 = vmatpush.msra.mxu2 %v4237_v4  ;;  %v3826_v3 = vpop.permute.xlu0 %2652  ;;  %v2659_v19 = vunpack.i.l.bf16 %v2658_v0  ;;  %v2660_v46 = vunpack.i.h.bf16 %v2658_v0 }
 0x149   : > { %v4216_v45 = vunpack.i.h.bf16 %v3826_v3  ;;  %v4215_v33 = vunpack.i.l.bf16 %v3826_v3  ;;  %2012 = vmatpush.msra.mxu3 %v4237_v4  ;;  %v4274_v4 = vunpack.i.h.bf16 %v3433_v50  ;;  %v4303_v17 = vunpack.i.l.bf16 %v3826_v3 }
 0x14a   : > { %v530_v8 = vsel %vm514_vm2, %v4275_v36, %v2659_v19  ;;  %v4277_v19 = vunpack.i.l.bf16 %v3125_v32  ;;  %v2679_v32 = vunpack.i.l.bf16 %v3754_v53 }
 0x14b   : > { %v1165_v28 = vsel %vm1159_vm7, %v4273_v21, %v4215_v33  ;;  %v1161_v10 = vsel %vm1159_vm7, %v4274_v4, %v4216_v45  ;;  %v3853_v21 = vpop.permute.xlu2 %2707  ;;  %v4276_v33 = vunpack.i.h.bf16 %v3517_v24  ;;  %v4278_v45 = vunpack.i.h.bf16 %v3515_v12 }
 0x14c   : > { %1773 = vmatpush.msrb.mxu0 %v1165_v28  ;;  %v522_v36 = vsel %vm514_vm2, %v4277_v19, %v2415_v16  ;;  %v4280_v12 = vunpack.i.h.bf16 %v3569_v29 }
 0x14d   : > { %1734 = vmatmul.f32.vlgmr.msrb.gmra.mxu2 %v3503_v7  ;;  %v526_v50 = vsel %vm514_vm2, %v4276_v33, %v2660_v46  ;;  %v4279_v46 = vunpack.i.h.bf16 %v3403_v5 }
 0x14e   : > { %1774 = vmatpush.msrb.mxu0 %v1161_v10 }
 0x14f   : > { %2245 = vmatmul.msk.f32.vlgmr.msrb.gmra.mxu0 %vm1529_vm9, %v3450_v31  ;;  %1860 = vmatmul.f32.gmra.mxu3 %v3552_v57 }
 0x150   : > { %1923 = vmatpush.msra.mxu0 %v530_v8  ;;  %v2673_v0 = vpop.permute.xlu1 %2672  ;;  %1632 = vmatmul.f32.gmra.mxu1 %v3840_v9 }
 0x151   : > { %v2668_v28 = vpop.permute.xlu0 %2667  ;;  %v2674_v8 = vunpack.i.l.bf16 %v2673_v0  ;;  %v2675_v33 = vunpack.i.h.bf16 %v2673_v0  ;;  %v2680_v0 = vunpack.i.h.bf16 %v3754_v53  ;;  %v2694_v53 = vunpack.i.l.bf16 %v3822_v13 }
 0x152   : > { %v2670_v4 = vunpack.i.h.bf16 %v2668_v28  ;;  %v2669_v10 = vunpack.i.l.bf16 %v2668_v28  ;;  %1924 = vmatpush.msra.mxu0 %v526_v50 }
 0x153   : > { %v3886_v19 = vpop.permute.xlu2 %2722 }
 0x154   : > { %1925 = vmatpush.msra.mxu0 %v522_v36  ;;  %v1038_v24 = vsel %vm1030_vm4, %v4278_v45, %v2669_v10  ;;  %v1034_v28 = vsel %vm1030_vm4, %v4279_v46, %v2670_v4  ;;  %v917_v45 = vsel %vm901_vm5, %v4280_v12, %v2674_v8  ;;  %v4281_v10 = vld [vmem:[#allocation9_spill] sm:$0xff]  ;;  %v4283_v8 = vld [vmem:[#allocation4_spill] sm:$0xff] }
 0x155   : > { %1966 = vmatpush.msra.mxu1 %v1038_v24  ;;  %1737 = vmatmul.f32.gmra.mxu2 %v3552_v57  ;;  %v4284_v24 = vunpack.i.l.bf16 %v3674_v63 }
 0x156   : > { %1926 = vmatpush.msra.mxu0 %v3109_v52 }
 0x157   : > { %1967 = vmatpush.msra.mxu1 %v1034_v28  ;;  %2246 = vmatmul.msk.f32.gmra.mxu0 %vm1529_vm9, %v3485_v27  ;;  %v4285_v28 = vunpack.i.h.bf16 %v3431_v54 }
 0x158   : > { %1927 = vmatpush.msra.mxu0 %v3089_v41  ;;  %v2688_v16 = vpop.permute.xlu1 %2687  ;;  %1816 = vmatmul.f32.vlgmr.msrb.gmra.mxu1 %v3342_v47  ;;  %v4282_v41 = vunpack.i.h.bf16 %v3567_v30 }
 0x159   : > { %v2683_v50 = vpop.permute.xlu0 %2682  ;;  %1968 = vmatpush.msra.mxu1 %v917_v45  ;;  %v2689_v52 = vunpack.i.l.bf16 %v2688_v16  ;;  %1863 = vmatmul.f32.gmra.mxu3 %v3604_v20  ;;  %v2690_v36 = vunpack.i.h.bf16 %v2688_v16  ;;  %v909_v30 = vsel %vm901_vm5, %v4285_v28, %v2679_v32  ;;  %v4286_v45 = vld [vmem:[#allocation8_spill] sm:$0xff]  ;;  %v4287_v16 = vunpack.i.h.bf16 %v3674_v63  ;;  %v4289_v32 = vld [vmem:[#allocation7_spill] sm:$0xff] }
 0x15a   : > { %v2685_v5 = vunpack.i.h.bf16 %v2683_v50  ;;  %v2684_v4 = vunpack.i.l.bf16 %v2683_v50  ;;  %1928 = vmatpush.msra.mxu0 %v4281_v10  ;;  %v913_v29 = vsel %vm901_vm5, %v4282_v41, %v2675_v33  ;;  %v2695_v33 = vunpack.i.h.bf16 %v3822_v13 }
 0x15b   : > { %1969 = vmatpush.msra.mxu1 %v913_v29  ;;  %v1299_v50 = vsel %vm1288_vm3, %v4287_v16, %v2689_v52  ;;  %v4288_v10 = vunpack.i.h.bf16 %v3621_v44  ;;  %v2709_v13 = vunpack.i.l.bf16 %v3853_v21  ;;  %v1300_v63 = vsel %vm1288_vm3, %v2689_v52, %v2690_v36  ;;  %v4295_v16 = vld [vmem:[#allocation5_spill] sm:$0xff] }
 0x15c   : > { %1929 = vmatpush.msra.mxu0 %v4283_v8  ;;  %v1303_v46 = vsel %vm1288_vm3, %v4284_v24, %v2684_v4  ;;  %v1304_v12 = vsel %vm1288_vm3, %v2684_v4, %v2685_v5  ;;  %v4290_v5 = vunpack.i.h.bf16 %v3619_v49  ;;  %v4291_v44 = vunpack.i.h.bf16 %v3465_v15  ;;  %v4292_v49 = vld [vmem:[#allocation6_spill] sm:$0xff]  ;;  %v4293_v15 = vld [vmem:[#allocation3_spill] sm:$0xff] }
 0x15d   : > { %1890 = vmatpush.msra.mxu2 %v1303_v46  ;;  %1970 = vmatpush.msra.mxu1 %v909_v30  ;;  %v905_v54 = vsel %vm901_vm5, %v4288_v10, %v2680_v0  ;;  %v2710_v8 = vunpack.i.h.bf16 %v3853_v21  ;;  %v2724_v52 = vunpack.i.l.bf16 %v3886_v19  ;;  %v4294_v21 = vunpack.i.h.bf16 %v3676_v48 }
 0x15e   : > { %1740 = vmatmul.f32.gmra.mxu2 %v3604_v20  ;;  %1930 = vmatpush.msra.mxu0 %v4286_v45  ;;  %v788_v4 = vsel %vm772_vm6, %v4290_v5, %v2694_v53  ;;  %v784_v0 = vsel %vm772_vm6, %v4291_v44, %v2695_v33  ;;  %v2725_v33 = vunpack.i.h.bf16 %v3886_v19  ;;  %v4297_v48 = vunpack.i.h.bf16 %v3510_v25 }
 0x15f   : > { %1891 = vmatpush.msra.mxu2 %v1299_v50  ;;  %1971 = vmatpush.msra.mxu1 %v905_v54  ;;  %v780_v30 = vsel %vm772_vm6, %v4294_v21, %v2709_v13  ;;  %v4296_v50 = vunpack.i.h.bf16 %v3724_v2  ;;  %v4299_v25 = vunpack.i.h.bf16 %v3564_v40  ;;  %v4304_v21 = vunpack.i.h.bf16 %v3826_v3 }
 0x160   : > { %1931 = vmatpush.msra.mxu0 %v4289_v32  ;;  %v2703_v41 = vpop.permute.xlu1 %2702  ;;  %2013 = vmatpush.msra.mxu3 %v1304_v12  ;;  %v2738_v12 = vpop.permute.xlu2 %2737  ;;  %v776_v10 = vsel %vm772_vm6, %v4297_v48, %v2710_v8  ;;  %v4298_v32 = vunpack.i.h.bf16 %v3726_v59  ;;  %v4300_v59 = vld [vmem:[#allocation11_spill] sm:$0xff]  ;;  %v4301_v8 = vld [vmem:[#allocation10_spill] sm:$0xff] }
 0x161   : > { %v2698_v29 = vpop.permute.xlu0 %2697  ;;  %1972 = vmatpush.msra.mxu1 %v788_v4  ;;  %2247 = vmatmul.msk.f32.gmra.mxu0 %vm1529_vm9, %v3532_v26  ;;  %v2704_v24 = vunpack.i.l.bf16 %v2703_v41  ;;  %v2705_v53 = vunpack.i.h.bf16 %v2703_v41  ;;  %v2739_v54 = vunpack.i.l.bf16 %v2738_v12  ;;  %v655_v4 = vsel %vm643_vm8, %v4299_v25, %v2725_v33  ;;  %v151_v33 = vld [vmem:[%s2788_s14 + $0x40] sm:$0xff] }
 0x162   : > { %v2700_v46 = vunpack.i.h.bf16 %v2698_v29  ;;  %v2699_v28 = vunpack.i.l.bf16 %v2698_v29  ;;  %1932 = vmatpush.msra.mxu0 %v4292_v49  ;;  %1819 = vmatmul.f32.gmra.mxu1 %v3378_v18  ;;  %v659_v41 = vsel %vm643_vm8, %v4298_v32, %v2724_v52 }
 0x163   : > { %1973 = vmatpush.msra.mxu1 %v784_v0  ;;  %2014 = vmatpush.msra.mxu3 %v1300_v63  ;;  %v1292_v19 = vsel %vm1288_vm3, %v2704_v24, %v2705_v53  ;;  %v2740_v63 = vunpack.i.h.bf16 %v2738_v12  ;;  %v651_v40 = vsel %vm643_vm8, %v2640_v23, %v2739_v54  ;;  %v147_v12 = vld [vmem:[%s2788_s14 + $0x18] sm:$0xff]  ;;  %s2271_s14 = sshll.u32 %s4307_s10, 8 }
 0x164   : > { %1933 = vmatpush.msra.mxu0 %v4293_v15  ;;  %v1295_v36 = vsel %vm1288_vm3, %v2629_v55, %v2699_v28  ;;  %1866 = vmatmul.f32.gmra.mxu3 %v3658_v6  ;;  %v1296_v45 = vsel %vm1288_vm3, %v2699_v28, %v2700_v46  ;;  %v1291_v55 = vsel %vm1288_vm3, %v4296_v50, %v2704_v24  ;;  %s4015_s24 = scalar_lea.vmem %s4159_s2, %s2271_s14 }
 0x165   : > { %1892 = vmatpush.msra.mxu2 %v1295_v36  ;;  %1974 = vmatpush.msra.mxu1 %v780_v30 }
 0x166   : > { %1743 = vmatmul.f32.gmra.mxu2 %v3658_v6  ;;  %1934 = vmatpush.msra.mxu0 %v4295_v16 }
 0x167   : > { %1893 = vmatpush.msra.mxu2 %v1291_v55  ;;  %1975 = vmatpush.msra.mxu1 %v776_v10 }
 0x168   : > { %v2718_v13 = vpop.permute.xlu1 %2717  ;;  %2015 = vmatpush.msra.mxu3 %v1296_v45  ;;  %1935 = vmatpush.msra.mxu0 %v3337_v38  ;;  %v4305_v45 = vld [vmem:[#allocation13_spill] sm:$0xff] }
 0x169   : > { %v2720_v2 = vunpack.i.h.bf16 %v2718_v13  ;;  %v2713_v5 = vpop.permute.xlu0 %2712  ;;  %1976 = vmatpush.msra.mxu1 %v659_v41  ;;  %2248 = vmatmul.msk.f32.gmra.mxu0 %vm1529_vm9, %v3587_v37  ;;  %v2719_v29 = vunpack.i.l.bf16 %v2718_v13 }
 0x16a   : > { %v2715_v44 = vunpack.i.h.bf16 %v2713_v5  ;;  %v2714_v0 = vunpack.i.l.bf16 %v2713_v5  ;;  %1822 = vmatmul.f32.gmra.mxu1 %v4300_v59  ;;  %2016 = vmatpush.msra.mxu3 %v1292_v19 }
 0x16b   : > { %1977 = vmatpush.msra.mxu1 %v655_v4  ;;  %1936 = vmatpush.msra.mxu0 %v4301_v8  ;;  %v1171_v46 = vsel %vm1159_vm7, %v2719_v29, %v2720_v2  ;;  %v1170_v28 = vsel %vm1159_vm7, %v2645_v22, %v2719_v29  ;;  %v4302_v22 = vld [vmem:[#allocation12_spill] sm:$0xff] }
 0x16c   : > { %v1174_v38 = vsel %vm1159_vm7, %v2644_v14, %v2714_v0  ;;  %1869 = vmatmul.f32.gmra.mxu3 %v3717_v51  ;;  %v1175_v24 = vsel %vm1159_vm7, %v2714_v0, %v2715_v44  ;;  %v647_v14 = vsel %vm643_vm8, %v2650_v43, %v2740_v63 }
 0x16d   : > { %1894 = vmatpush.msra.mxu2 %v1174_v38  ;;  %1978 = vmatpush.msra.mxu1 %v651_v40 }
 0x16e   : > { %1746 = vmatmul.f32.gmra.mxu2 %v3717_v51  ;;  %2017 = vmatpush.msra.mxu3 %v1175_v24 }
 0x16f   : > { %1895 = vmatpush.msra.mxu2 %v1170_v28  ;;  %1979 = vmatpush.msra.mxu1 %v647_v14 }
 0x170   : > { %v2733_v39 = vpop.permute.xlu1 %2732  ;;  %2018 = vmatpush.msra.mxu3 %v1171_v46  ;;  %1937 = vmatpush.msra.mxu0 %v151_v33 }
 0x171   : > { %v2735_v23 = vunpack.i.h.bf16 %v2733_v39  ;;  %v2728_v49 = vpop.permute.xlu0 %2727  ;;  %2249 = vmatmul.msk.f32.gmra.mxu0 %vm1529_vm9, %v3641_v35  ;;  %v2734_v53 = vunpack.i.l.bf16 %v2733_v39  ;;  %v1571_v3 = vpop.f32.mrf.mxu0 }
 0x172   : > { %v2730_v34 = vunpack.i.h.bf16 %v2728_v49  ;;  %v2729_v52 = vunpack.i.l.bf16 %v2728_v49  ;;  %1825 = vmatmul.f32.gmra.mxu1 %v4302_v22  ;;  %1938 = vmatpush.msra.mxu0 %v147_v12 }
 0x173   : > { %v1163_v36 = vsel %vm1159_vm7, %v2734_v53, %v2735_v23  ;;  %v1162_v30 = vsel %vm1159_vm7, %v4304_v21, %v2734_v53 }
 0x174   : > { %v1166_v43 = vsel %vm1159_vm7, %v4303_v17, %v2729_v52  ;;  %1872 = vmatmul.f32.gmra.mxu3 %v3767_v42  ;;  %v1167_v15 = vsel %vm1159_vm7, %v2729_v52, %v2730_v34  ;;  %v3986_v16 = vpop.f32.mrf.mxu3 }
 0x175   : > { %1896 = vmatpush.msra.mxu2 %v1166_v43  ;;  %2019 = vmatpush.msra.mxu3 %v1167_v15 }
 0x176   : > { %1749 = vmatmul.f32.gmra.mxu2 %v3767_v42 }
 0x177   : > { %1897 = vmatpush.msra.mxu2 %v1162_v30  ;;  %2020 = vmatpush.msra.mxu3 %v1163_v36 }
 0x179   : > { %2250 = vmatmul.msk.f32.gmra.mxu0 %vm1529_vm9, %v3690_v60  ;;  %v1574_v55 = vpop.f32.mrf.mxu0 }
 0x17a   : > { %1828 = vmatmul.f32.gmra.mxu1 %v4305_v45 }
 0x17c   : > { %1875 = vmatmul.f32.gmra.mxu3 %v3815_v62  ;;  %v3994_v50 = vpop.f32.mrf.mxu3 }
 0x17e   : > { %1752 = vmatmul.f32.gmra.mxu2 %v3815_v62 }
 0x181   : > { %2251 = vmatmul.msk.f32.gmra.mxu0 %vm1529_vm9, %v3738_v61  ;;  %v1577_v19 = vpop.f32.mrf.mxu0 }
 0x182   : > { %1831 = vmatmul.f32.gmra.mxu1 %v3523_v11 }
 0x184   : > { %1878 = vmatmul.f32.gmra.mxu3 %v3840_v9  ;;  %v4003_v10 = vpop.f32.mrf.mxu3 }
 0x186   : > { %1755 = vmatmul.f32.gmra.mxu2 %v3840_v9 }
 0x189   : > { %2252 = vmatmul.msk.f32.gmra.mxu0 %vm1529_vm9, %v3796_v1 }
 0x18a   : > { %1834 = vmatmul.f32.gmra.mxu1 %v3576_v56 }
 0x18c   : > { %2261 = vmatmul.msk.f32.vlgmr.msra.gmra.mxu3 %vm1529_vm9, %v3450_v31 }
 0x18e   : > { %2253 = vmatmul.msk.f32.vlgmr.msra.gmra.mxu2 %vm1529_vm9, %v3450_v31  ;;  %v4019_v31 = vpop.f32.mrf.mxu3 }
 0x18f   : > { %v1653_v48 = vpop.f32.mrf.mxu2 }
 0x191   : > { %1939 = vmatmul.f32.vlgmr.msra.gmra.mxu0 %v3342_v47 }
 0x192   : > { %1837 = vmatmul.f32.gmra.mxu1 %v3634_v58 }
 0x193   : > { %v1612_v54 = vpop.f32.mrf.mxu1 }
 0x194   : > { %2262 = vmatmul.msk.f32.gmra.mxu3 %vm1529_vm9, %v3485_v27  ;;  %v1613_v13 = vadd.f32 %v1612_v54, %v1571_v3 }
 0x196   : > { %2254 = vmatmul.msk.f32.gmra.mxu2 %vm1529_vm9, %v3485_v27  ;;  %v1654_v32 = vadd.f32 %v1653_v48, %v1613_v13  ;;  %v1580_v27 = vpop.f32.mrf.mxu0  ;;  %v4031_v44 = vpop.f32.mrf.mxu3 }
 0x197   : > { %v1656_v41 = vpop.f32.mrf.mxu2 }
 0x198   : > { %vm2046_vm10 = vcmp.ge.f32.partialorder %v1654_v32, 0.0  ;;  %v2078_v47 = vmul.f32 0.2, %v1654_v32 }
 0x199   : > { %1942 = vmatmul.f32.gmra.mxu0 %v3378_v18 }
 0x19a   : > { %1980 = vmatmul.f32.vlgmr.msra.gmra.mxu1 %v3503_v7  ;;  %v2110_v2 = vsel %vm2046_vm10, %v1654_v32, %v2078_v47 }
 0x19b   : > { %2142 = vst [vmem:[%s4015_s24] sm:$0xff] %v2110_v2 }
 0x19c   : > { %v1615_v5 = vpop.f32.mrf.mxu1  ;;  %2263 = vmatmul.msk.f32.gmra.mxu3 %vm1529_vm9, %v3532_v26 }
 0x19d   : > { %v1616_v25 = vadd.f32 %v1615_v5, %v1574_v55 }
 0x19e   : > { %2255 = vmatmul.msk.f32.gmra.mxu2 %vm1529_vm9, %v3532_v26  ;;  %v1583_v26 = vpop.f32.mrf.mxu0 }
 0x19f   : > { %v1657_v4 = vadd.f32 %v1656_v41, %v1616_v25  ;;  %v1659_v63 = vpop.f32.mrf.mxu2 }
 0x1a1   : > { %vm2050_vm11 = vcmp.ge.f32.partialorder %v1657_v4, 0.0  ;;  %v2082_v18 = vmul.f32 0.2, %v1657_v4  ;;  %1945 = vmatmul.f32.gmra.mxu0 %v4300_v59 }
 0x1a2   : > { %1983 = vmatmul.f32.gmra.mxu1 %v3552_v57 }
 0x1a3   : > { %v2114_v7 = vsel %vm2050_vm11, %v1657_v4, %v2082_v18 }
 0x1a4   : > { %2146 = vst [vmem:[%s4015_s24 + $0x20] sm:$0xff] %v2114_v7  ;;  %v1618_v29 = vpop.f32.mrf.mxu1  ;;  %2264 = vmatmul.msk.f32.gmra.mxu3 %vm1529_vm9, %v3587_v37 }
 0x1a5   : > { %v1619_v0 = vadd.f32 %v1618_v29, %v1577_v19 }
 0x1a6   : > { %2256 = vmatmul.msk.f32.gmra.mxu2 %vm1529_vm9, %v3587_v37  ;;  %v4042_v37 = vpop.f32.mrf.mxu3  ;;  %v1586_v14 = vpop.f32.mrf.mxu0 }
 0x1a7   : > { %v1660_v8 = vadd.f32 %v1659_v63, %v1619_v0 }
 0x1a8   : > { %v1662_v38 = vpop.f32.mrf.mxu2 }
 0x1a9   : > { %vm2054_vm12 = vcmp.ge.f32.partialorder %v1660_v8, 0.0  ;;  %v2086_v59 = vmul.f32 0.2, %v1660_v8  ;;  %1948 = vmatmul.f32.gmra.mxu0 %v4302_v22 }
 0x1aa   : > { %1986 = vmatmul.f32.gmra.mxu1 %v3604_v20 }
 0x1ab   : > { %v2118_v57 = vsel %vm2054_vm12, %v1660_v8, %v2086_v59 }
 0x1ac   : > { %2150 = vst [vmem:[%s4015_s24 + $0x40] sm:$0xff] %v2118_v57  ;;  %v1621_v40 = vpop.f32.mrf.mxu1  ;;  %2265 = vmatmul.msk.f32.gmra.mxu3 %vm1529_vm9, %v3641_v35 }
 0x1ad   : > { %v1622_v24 = vadd.f32 %v1621_v40, %v1580_v27 }
 0x1ae   : > { %2257 = vmatmul.msk.f32.gmra.mxu2 %vm1529_vm9, %v3641_v35  ;;  %v4051_v34 = vpop.f32.mrf.mxu3  ;;  %v1589_v52 = vpop.f32.mrf.mxu0 }
 0x1af   : > { %v1663_v46 = vadd.f32 %v1662_v38, %v1622_v24 }
 0x1b0   : > { %v1665_v28 = vpop.f32.mrf.mxu2 }
 0x1b1   : > { %vm2058_vm13 = vcmp.ge.f32.partialorder %v1663_v46, 0.0  ;;  %v2090_v39 = vmul.f32 0.2, %v1663_v46  ;;  %1951 = vmatmul.f32.gmra.mxu0 %v4305_v45 }
 0x1b2   : > { %1989 = vmatmul.f32.gmra.mxu1 %v3658_v6 }
 0x1b3   : > { %v2122_v20 = vsel %vm2058_vm13, %v1663_v46, %v2090_v39 }
 0x1b4   : > { %2154 = vst [vmem:[%s4015_s24 + $0x60] sm:$0xff] %v2122_v20  ;;  %2266 = vmatmul.msk.f32.gmra.mxu3 %vm1529_vm9, %v3690_v60 }
 0x1b5   : > { %v1624_v23 = vpop.f32.mrf.mxu1 }
 0x1b6   : > { %2258 = vmatmul.msk.f32.gmra.mxu2 %vm1529_vm9, %v3690_v60  ;;  %v1625_v35 = vadd.f32 %v1624_v23, %v1583_v26  ;;  %v1592_v36 = vpop.f32.mrf.mxu0 }
 0x1b8   : > { %v1668_v49 = vpop.f32.mrf.mxu2  ;;  %v1666_v53 = vadd.f32 %v1665_v28, %v1625_v35 }
 0x1b9   : > { %1954 = vmatmul.f32.gmra.mxu0 %v3523_v11 }
 0x1ba   : > { %vm2062_vm14 = vcmp.ge.f32.partialorder %v1666_v53, 0.0  ;;  %v2094_v6 = vmul.f32 0.2, %v1666_v53  ;;  %1992 = vmatmul.f32.gmra.mxu1 %v3717_v51  ;;  %v4062_v51 = vpop.f32.mrf.mxu3 }
 0x1bc   : > { %v2126_v22 = vsel %vm2062_vm14, %v1666_v53, %v2094_v6  ;;  %2267 = vmatmul.msk.f32.gmra.mxu3 %vm1529_vm9, %v3738_v61 }
 0x1bd   : > { %2158 = vst [vmem:[%s4015_s24 + $0x80] sm:$0xff] %v2126_v22  ;;  %v1627_v17 = vpop.f32.mrf.mxu1 }
 0x1be   : > { %2259 = vmatmul.msk.f32.gmra.mxu2 %vm1529_vm9, %v3738_v61  ;;  %v1628_v60 = vadd.f32 %v1627_v17, %v1586_v14 }
 0x1c0   : > { %v1671_v43 = vpop.f32.mrf.mxu2  ;;  %v1669_v15 = vadd.f32 %v1668_v49, %v1628_v60 }
 0x1c1   : > { %1957 = vmatmul.f32.gmra.mxu0 %v3576_v56 }
 0x1c2   : > { %vm2066_vm15 = vcmp.ge.f32.partialorder %v1669_v15, 0.0  ;;  %v2098_v11 = vmul.f32 0.2, %v1669_v15  ;;  %1995 = vmatmul.f32.gmra.mxu1 %v3767_v42 }
 0x1c4   : > { %v2130_v21 = vsel %vm2066_vm15, %v1669_v15, %v2098_v11  ;;  %2268 = vmatmul.msk.f32.gmra.mxu3 %vm1529_vm9, %v3796_v1 }
 0x1c5   : > { %2162 = vst [vmem:[%s4015_s24 + $0xa0] sm:$0xff] %v2130_v21  ;;  %v1630_v30 = vpop.f32.mrf.mxu1 }
 0x1c6   : > { %2260 = vmatmul.msk.f32.gmra.mxu2 %vm1529_vm9, %v3796_v1  ;;  %v1631_v61 = vadd.f32 %v1630_v30, %v1589_v52 }
 0x1c8   : > { %v1672_v33 = vadd.f32 %v1671_v43, %v1631_v61  ;;  %v1674_v56 = vpop.f32.mrf.mxu2 }
 0x1c9   : > { %1960 = vmatmul.f32.gmra.mxu0 %v3634_v58 }
 0x1ca   : > { %vm2070_vm0 = vcmp.ge.f32.partialorder %v1672_v33, 0.0  ;;  %v2102_v42 = vmul.f32 0.2, %v1672_v33  ;;  %1998 = vmatmul.f32.gmra.mxu1 %v3815_v62  ;;  %v4071_v45 = vpop.f32.mrf.mxu3 }
 0x1cc   : > { %v2134_v12 = vsel %vm2070_vm0, %v1672_v33, %v2102_v42  ;;  %v1776_v55 = vpop.f32.mrf.mxu0 }
 0x1cd   : > { %2166 = vst [vmem:[%s4015_s24 + $0xc0] sm:$0xff] %v2134_v12  ;;  %v1633_v3 = vpop.f32.mrf.mxu1 }
 0x1ce   : > { %v1634_v48 = vadd.f32 %v1633_v3, %v1592_v36 }
 0x1d0   : > { %v1675_v19 = vadd.f32 %v1674_v56, %v1634_v48  ;;  %v1735_v1 = vpop.f32.mrf.mxu2 }
 0x1d1   : > { %v1736_v54 = vadd.f32 %v1735_v1, %v3986_v16 }
 0x1d2   : > { %vm2074_vm1 = vcmp.ge.f32.partialorder %v1675_v19, 0.0  ;;  %v2106_v13 = vmul.f32 0.2, %v1675_v19  ;;  %2001 = vmatmul.f32.gmra.mxu1 %v3840_v9  ;;  %v4076_v62 = vpop.f32.mrf.mxu3 }
 0x1d3   : > { %v1777_v58 = vadd.f32 %v1776_v55, %v1736_v54 }
 0x1d4   : > { %v2138_v32 = vsel %vm2074_vm1, %v1675_v19, %v2106_v13  ;;  %v1779_v2 = vpop.f32.mrf.mxu0 }
 0x1d5   : > { %2170 = vst [vmem:[%s4015_s24 + $0xe0] sm:$0xff] %v2138_v32  ;;  %v4079_v41 = vpop.f32.mrf.mxu1  ;;  %vm2047_vm2 = vcmp.ge.f32.partialorder %v1777_v58, 0.0  ;;  %v2079_v47 = vmul.f32 0.2, %v1777_v58 }
 0x1d7   : > { %v2111_v27 = vsel %vm2047_vm2, %v1777_v58, %v2079_v47  ;;  %v1859_v58 = vadd.f32 %v4071_v45, %v4079_v41 }
 0x1d8   : > { %2143 = vst [vmem:[%s4015_s24 + $0x8] sm:$0xff] %v2111_v27  ;;  %v1738_v5 = vpop.f32.mrf.mxu2 }
 0x1d9   : > { %v1739_v16 = vadd.f32 %v1738_v5, %v3994_v50 }
 0x1db   : > { %v1780_v25 = vadd.f32 %v1779_v2, %v1739_v16 }
 0x1dc   : > { %v4083_v4 = vpop.f32.mrf.mxu3 }
 0x1dd   : > { %vm2051_vm3 = vcmp.ge.f32.partialorder %v1780_v25, 0.0  ;;  %v2083_v9 = vmul.f32 0.2, %v1780_v25 }
 0x1de   : > { %v1782_v63 = vpop.f32.mrf.mxu0 }
 0x1df   : > { %v4085_v18 = vpop.f32.mrf.mxu1  ;;  %v2115_v7 = vsel %vm2051_vm3, %v1780_v25, %v2083_v9 }
 0x1e0   : > { %2147 = vst [vmem:[%s4015_s24 + $0x28] sm:$0xff] %v2115_v7  ;;  %v1862_v9 = vadd.f32 %v4076_v62, %v4085_v18 }
 0x1e1   : > { %v1741_v29 = vpop.f32.mrf.mxu2 }
 0x1e2   : > { %v1742_v0 = vadd.f32 %v1741_v29, %v4003_v10 }
 0x1e4   : > { %v1783_v26 = vadd.f32 %v1782_v63, %v1742_v0 }
 0x1e6   : > { %vm2055_vm4 = vcmp.ge.f32.partialorder %v1783_v26, 0.0  ;;  %v2087_v8 = vmul.f32 0.2, %v1783_v26  ;;  %v1785_v38 = vpop.f32.mrf.mxu0 }
 0x1e7   : > { %v4089_v50 = vpop.f32.mrf.mxu1  ;;  %v4091_v59 = vpop.f32.mrf.mxu3 }
 0x1e8   : > { %v2119_v57 = vsel %vm2055_vm4, %v1783_v26, %v2087_v8 }
 0x1e9   : > { %2151 = vst [vmem:[%s4015_s24 + $0x48] sm:$0xff] %v2119_v57  ;;  %v1744_v40 = vpop.f32.mrf.mxu2 }
 0x1ea   : > { %v1745_v24 = vadd.f32 %v1744_v40, %v4019_v31 }
 0x1ec   : > { %v1786_v46 = vadd.f32 %v1785_v38, %v1745_v24  ;;  %v1865_v24 = vadd.f32 %v4083_v4, %v4089_v50 }
 0x1ee   : > { %vm2059_vm5 = vcmp.ge.f32.partialorder %v1786_v46, 0.0  ;;  %v2091_v28 = vmul.f32 0.2, %v1786_v46  ;;  %v1788_v14 = vpop.f32.mrf.mxu0 }
 0x1ef   : > { %v4095_v10 = vpop.f32.mrf.mxu1  ;;  %v4097_v39 = vpop.f32.mrf.mxu3 }
 0x1f0   : > { %v2123_v20 = vsel %vm2059_vm5, %v1786_v46, %v2091_v28  ;;  %v1868_v4 = vadd.f32 %v4091_v59, %v4095_v10 }
 0x1f1   : > { %2155 = vst [vmem:[%s4015_s24 + $0x68] sm:$0xff] %v2123_v20  ;;  %v1747_v23 = vpop.f32.mrf.mxu2 }
 0x1f2   : > { %v1748_v35 = vadd.f32 %v1747_v23, %v4031_v44 }
 0x1f4   : > { %v1789_v49 = vadd.f32 %v1788_v14, %v1748_v35 }
 0x1f6   : > { %vm2063_vm6 = vcmp.ge.f32.partialorder %v1789_v49, 0.0  ;;  %v2095_v53 = vmul.f32 0.2, %v1789_v49  ;;  %v1791_v52 = vpop.f32.mrf.mxu0 }
 0x1f7   : > { %v4101_v31 = vpop.f32.mrf.mxu1  ;;  %v4103_v6 = vpop.f32.mrf.mxu3 }
 0x1f8   : > { %v2127_v22 = vsel %vm2063_vm6, %v1789_v49, %v2095_v53 }
 0x1f9   : > { %2159 = vst [vmem:[%s4015_s24 + $0x88] sm:$0xff] %v2127_v22  ;;  %v1750_v17 = vpop.f32.mrf.mxu2 }
 0x1fa   : > { %v1751_v60 = vadd.f32 %v1750_v17, %v4042_v37 }
 0x1fc   : > { %v1792_v43 = vadd.f32 %v1791_v52, %v1751_v60 }
 0x1fe   : > { %vm2067_vm7 = vcmp.ge.f32.partialorder %v1792_v43, 0.0  ;;  %v2099_v15 = vmul.f32 0.2, %v1792_v43  ;;  %v1794_v11 = vpop.f32.mrf.mxu0 }
 0x1ff   : > { %v4107_v44 = vpop.f32.mrf.mxu1  ;;  %v4109_v36 = vpop.f32.mrf.mxu3 }
 0x200   : > { %v2131_v21 = vsel %vm2067_vm7, %v1792_v43, %v2099_v15 }
 0x201   : > { %2163 = vst [vmem:[%s4015_s24 + $0xa8] sm:$0xff] %v2131_v21  ;;  %v1753_v30 = vpop.f32.mrf.mxu2 }
 0x202   : > { %v1754_v61 = vadd.f32 %v1753_v30, %v4051_v34 }
 0x204   : > { %v1795_v33 = vadd.f32 %v1794_v11, %v1754_v61 }
 0x206   : > { %vm2071_vm8 = vcmp.ge.f32.partialorder %v1795_v33, 0.0  ;;  %v2103_v56 = vmul.f32 0.2, %v1795_v33  ;;  %v1797_v42 = vpop.f32.mrf.mxu0 }
 0x207   : > { %v4113_v37 = vpop.f32.mrf.mxu1  ;;  %v4115_v12 = vpop.f32.mrf.mxu3 }
 0x208   : > { %v2135_v3 = vsel %vm2071_vm8, %v1795_v33, %v2103_v56  ;;  %v1871_v33 = vadd.f32 %v4097_v39, %v4101_v31 }
 0x209   : > { %2167 = vst [vmem:[%s4015_s24 + $0xc8] sm:$0xff] %v2135_v3  ;;  %v1756_v55 = vpop.f32.mrf.mxu2 }
 0x20a   : > { %v1757_v48 = vadd.f32 %v1756_v55, %v4062_v51 }
 0x20c   : > { %v1798_v19 = vadd.f32 %v1797_v42, %v1757_v48 }
 0x20e   : > { %vm2075_vm9 = vcmp.ge.f32.partialorder %v1798_v19, 0.0  ;;  %v2107_v1 = vmul.f32 0.2, %v1798_v19  ;;  %v1940_v54 = vpop.f32.mrf.mxu0 }
 0x20f   : > { %v4119_v34 = vpop.f32.mrf.mxu1  ;;  %v2022_v13 = vpop.f32.mrf.mxu3 }
 0x210   : > { %v2139_v32 = vsel %vm2075_vm9, %v1798_v19, %v2107_v1 }
 0x211   : > { %2171 = vst [vmem:[%s4015_s24 + $0xe8] sm:$0xff] %v2139_v32  ;;  %v1899_v47 = vpop.f32.mrf.mxu2 }
 0x212   : > { %v1900_v2 = vadd.f32 %v1899_v47, %v1859_v58 }
 0x214   : > { %vm2048_vm10 = vcmp.ge.f32.partialorder %v1900_v2, 0.0  ;;  %v2080_v27 = vmul.f32 0.2, %v1900_v2 }
 0x216   : > { %v2112_v5 = vsel %vm2048_vm10, %v1900_v2, %v2080_v27  ;;  %v1943_v16 = vpop.f32.mrf.mxu0 }
 0x217   : > { %2144 = vst [vmem:[%s4015_s24 + $0x10] sm:$0xff] %v2112_v5  ;;  %v1981_v51 = vpop.f32.mrf.mxu1  ;;  %v2025_v25 = vpop.f32.mrf.mxu3 }
 0x218   : > { %v1982_v63 = vadd.f32 %v1981_v51, %v1940_v54 }
 0x219   : > { %v1902_v7 = vpop.f32.mrf.mxu2 }
 0x21a   : > { %v1903_v29 = vadd.f32 %v1902_v7, %v1862_v9  ;;  %v2023_v45 = vadd.f32 %v2022_v13, %v1982_v63  ;;  %v1874_v13 = vadd.f32 %v4103_v6, %v4107_v44  ;;  %v1877_v6 = vadd.f32 %v4109_v36, %v4113_v37 }
 0x21b   : > { %v1880_v36 = vadd.f32 %v4115_v12, %v4119_v34 }
 0x21c   : > { %vm2052_vm11 = vcmp.ge.f32.partialorder %v1903_v29, 0.0  ;;  %v2084_v41 = vmul.f32 0.2, %v1903_v29  ;;  %vm2049_vm12 = vcmp.ge.f32.partialorder %v2023_v45, 0.0  ;;  %v2081_v0 = vmul.f32 0.2, %v2023_v45 }
 0x21e   : > { %v2116_v26 = vsel %vm2052_vm11, %v1903_v29, %v2084_v41  ;;  %v2113_v8 = vsel %vm2049_vm12, %v2023_v45, %v2081_v0  ;;  %v1946_v38 = vpop.f32.mrf.mxu0 }
 0x21f   : > { %2148 = vst [vmem:[%s4015_s24 + $0x30] sm:$0xff] %v2116_v26  ;;  %v1984_v57 = vpop.f32.mrf.mxu1  ;;  %v2028_v40 = vpop.f32.mrf.mxu3 }
 0x220   : > { %2145 = vst [vmem:[%s4015_s24 + $0x18] sm:$0xff] %v2113_v8  ;;  %v1985_v62 = vadd.f32 %v1984_v57, %v1943_v16 }
 0x221   : > { %v1905_v18 = vpop.f32.mrf.mxu2 }
 0x222   : > { %v1906_v46 = vadd.f32 %v1905_v18, %v1865_v24  ;;  %v2026_v28 = vadd.f32 %v2025_v25, %v1985_v62 }
 0x224   : > { %vm2056_vm13 = vcmp.ge.f32.partialorder %v1906_v46, 0.0  ;;  %v2088_v14 = vmul.f32 0.2, %v1906_v46  ;;  %vm2053_vm14 = vcmp.ge.f32.partialorder %v2026_v28, 0.0  ;;  %v2085_v20 = vmul.f32 0.2, %v2026_v28 }
 0x226   : > { %v2120_v23 = vsel %vm2056_vm13, %v1906_v46, %v2088_v14  ;;  %v2117_v35 = vsel %vm2053_vm14, %v2026_v28, %v2085_v20  ;;  %v1949_v49 = vpop.f32.mrf.mxu0 }
 0x227   : > { %2152 = vst [vmem:[%s4015_s24 + $0x50] sm:$0xff] %v2120_v23  ;;  %v1987_v53 = vpop.f32.mrf.mxu1  ;;  %v2031_v52 = vpop.f32.mrf.mxu3 }
 0x228   : > { %2149 = vst [vmem:[%s4015_s24 + $0x38] sm:$0xff] %v2117_v35  ;;  %v1988_v50 = vadd.f32 %v1987_v53, %v1946_v38 }
 0x229   : > { %v1908_v22 = vpop.f32.mrf.mxu2 }
 0x22a   : > { %v1909_v17 = vadd.f32 %v1908_v22, %v1868_v4  ;;  %v2029_v60 = vadd.f32 %v2028_v40, %v1988_v50 }
 0x22c   : > { %vm2060_vm15 = vcmp.ge.f32.partialorder %v1909_v17, 0.0  ;;  %v2092_v43 = vmul.f32 0.2, %v1909_v17  ;;  %vm2057_vm0 = vcmp.ge.f32.partialorder %v2029_v60, 0.0  ;;  %v2089_v15 = vmul.f32 0.2, %v2029_v60 }
 0x22e   : > { %v2124_v11 = vsel %vm2060_vm15, %v1909_v17, %v2092_v43  ;;  %v2121_v21 = vsel %vm2057_vm0, %v2029_v60, %v2089_v15  ;;  %v1952_v61 = vpop.f32.mrf.mxu0 }
 0x22f   : > { %2156 = vst [vmem:[%s4015_s24 + $0x70] sm:$0xff] %v2124_v11  ;;  %v1990_v30 = vpop.f32.mrf.mxu1  ;;  %v2034_v56 = vpop.f32.mrf.mxu3 }
 0x230   : > { %2153 = vst [vmem:[%s4015_s24 + $0x58] sm:$0xff] %v2121_v21  ;;  %v1991_v59 = vadd.f32 %v1990_v30, %v1949_v49 }
 0x231   : > { %v1911_v10 = vpop.f32.mrf.mxu2 }
 0x232   : > { %v1912_v42 = vadd.f32 %v1911_v10, %v1871_v33  ;;  %v2032_v3 = vadd.f32 %v2031_v52, %v1991_v59 }
 0x234   : > { %vm2064_vm1 = vcmp.ge.f32.partialorder %v1912_v42, 0.0  ;;  %v2096_v55 = vmul.f32 0.2, %v1912_v42  ;;  %vm2061_vm2 = vcmp.ge.f32.partialorder %v2032_v3, 0.0  ;;  %v2093_v48 = vmul.f32 0.2, %v2032_v3 }
 0x236   : > { %v2128_v19 = vsel %vm2064_vm1, %v1912_v42, %v2096_v55  ;;  %v2125_v1 = vsel %vm2061_vm2, %v2032_v3, %v2093_v48  ;;  %v1955_v58 = vpop.f32.mrf.mxu0 }
 0x237   : > { %2160 = vst [vmem:[%s4015_s24 + $0x90] sm:$0xff] %v2128_v19  ;;  %v1993_v54 = vpop.f32.mrf.mxu1  ;;  %v2037_v2 = vpop.f32.mrf.mxu3 }
 0x238   : > { %2157 = vst [vmem:[%s4015_s24 + $0x78] sm:$0xff] %v2125_v1  ;;  %v1994_v39 = vadd.f32 %v1993_v54, %v1952_v61 }
 0x239   : > { %v1914_v31 = vpop.f32.mrf.mxu2 }
 0x23a   : > { %v1915_v32 = vadd.f32 %v1914_v31, %v1874_v13  ;;  %v2035_v47 = vadd.f32 %v2034_v56, %v1994_v39 }
 0x23c   : > { %vm2068_vm3 = vcmp.ge.f32.partialorder %v1915_v32, 0.0  ;;  %v2100_v27 = vmul.f32 0.2, %v1915_v32  ;;  %vm2065_vm4 = vcmp.ge.f32.partialorder %v2035_v47, 0.0  ;;  %v2097_v5 = vmul.f32 0.2, %v2035_v47 }
 0x23e   : > { %v2132_v16 = vsel %vm2068_vm3, %v1915_v32, %v2100_v27  ;;  %v2129_v51 = vsel %vm2065_vm4, %v2035_v47, %v2097_v5  ;;  %v1958_v29 = vpop.f32.mrf.mxu0 }
 0x23f   : > { %2164 = vst [vmem:[%s4015_s24 + $0xb0] sm:$0xff] %v2132_v16  ;;  %v1996_v25 = vpop.f32.mrf.mxu1  ;;  %v2040_v0 = vpop.f32.mrf.mxu3 }
 0x240   : > { %2161 = vst [vmem:[%s4015_s24 + $0x98] sm:$0xff] %v2129_v51  ;;  %v1997_v44 = vadd.f32 %v1996_v25, %v1955_v58 }
 0x241   : > { %v1917_v9 = vpop.f32.mrf.mxu2 }
 0x242   : > { %v1918_v63 = vadd.f32 %v1917_v9, %v1877_v6  ;;  %v2038_v7 = vadd.f32 %v2037_v2, %v1997_v44 }
 0x244   : > { %vm2072_vm5 = vcmp.ge.f32.partialorder %v1918_v63, 0.0  ;;  %v2104_v45 = vmul.f32 0.2, %v1918_v63  ;;  %vm2069_vm6 = vcmp.ge.f32.partialorder %v2038_v7, 0.0  ;;  %v2101_v41 = vmul.f32 0.2, %v2038_v7 }
 0x246   : > { %v2136_v26 = vsel %vm2072_vm5, %v1918_v63, %v2104_v45  ;;  %v2133_v8 = vsel %vm2069_vm6, %v2038_v7, %v2101_v41  ;;  %v1961_v46 = vpop.f32.mrf.mxu0 }
 0x247   : > { %2168 = vst [vmem:[%s4015_s24 + $0xd0] sm:$0xff] %v2136_v26  ;;  %v1999_v38 = vpop.f32.mrf.mxu1  ;;  %v2043_v23 = vpop.f32.mrf.mxu3 }
 0x248   : > { %2165 = vst [vmem:[%s4015_s24 + $0xb8] sm:$0xff] %v2133_v8  ;;  %v2000_v37 = vadd.f32 %v1999_v38, %v1958_v29 }
 0x249   : > { %v1920_v57 = vpop.f32.mrf.mxu2 }
 0x24a   : > { %v1921_v40 = vadd.f32 %v1920_v57, %v1880_v36  ;;  %v2041_v24 = vadd.f32 %v2040_v0, %v2000_v37 }
 0x24c   : > { %vm2076_vm7 = vcmp.ge.f32.partialorder %v1921_v40, 0.0  ;;  %v2108_v62 = vmul.f32 0.2, %v1921_v40  ;;  %vm2073_vm8 = vcmp.ge.f32.partialorder %v2041_v24, 0.0  ;;  %v2105_v18 = vmul.f32 0.2, %v2041_v24 }
 0x24e   : > { %v2140_v28 = vsel %vm2076_vm7, %v1921_v40, %v2108_v62  ;;  %v2137_v14 = vsel %vm2073_vm8, %v2041_v24, %v2105_v18 }
 0x24f   : > { %2172 = vst [vmem:[%s4015_s24 + $0xf0] sm:$0xff] %v2140_v28  ;;  %v2002_v20 = vpop.f32.mrf.mxu1 }
 0x250   : > { %2169 = vst [vmem:[%s4015_s24 + $0xd8] sm:$0xff] %v2137_v14  ;;  %v2003_v35 = vadd.f32 %v2002_v20, %v1961_v46 }
 0x252   : > { %v2044_v12 = vadd.f32 %v2043_v23, %v2003_v35 }
 0x254   : > { %vm2077_vm9 = vcmp.ge.f32.partialorder %v2044_v12, 0.0  ;;  %v2109_v34 = vmul.f32 0.2, %v2044_v12 }
 0x256   : > { %v2141_v49 = vsel %vm2077_vm9, %v2044_v12, %v2109_v34 }
 0x257   : > { %2173 = vst [vmem:[%s4015_s24 + $0xf8] sm:$0xff] %v2141_v49 }
 0x258 PF: > { %s12_s9 = sadd.s32 1, %s2747_s9  }
 0x259   : > { %p9_p4 = scmp.ge.s32.totalorder %s12_s9, 4  }
 0x25b   :  { %11 = sbr.rel (!%p9_p4) target bundleno = 1 (0x1), region = 58 }

// kernel: _lambda_.6
= control target key start
LH: loop header
LB: loop body
LE: loop exit
PB: predicated region body
PF: predicated region fallthrough
CT: control target
= control target key end

     0   :  { %s4458_s9 = smov 0   ;;  %s6268_s0 = inlined_call_operand.vmem [shape: f32[2,8,4,522], index: 0, kind: input, shape index: {}]   ;;  %s6269_s1 = inlined_call_operand.vmem [shape: f32[8,4,48], index: 1, kind: input, shape index: {}]   ;;  %s6270_s2 = inlined_call_operand.vmem [shape: f32[2,8,4,512], index: 2, kind: output, shape index: {}]  }
   0x1 LB: > { %s4361_s10 = sadd.s32 4294967295, %s4430_s9   ;;  %p4365_p0 = scmp.ge.s32.totalorder %s4430_s9, 1  ;;  %s4430_s9 = sphi %s4458_s9, %s12_s9  }
   0x2   : > { %p112_p1 = scmp.lt.s32.totalorder %s4430_s9, 3 }
   0x4   : > { %p113_p2 = pnand %p4365_p0, %p112_p1 }
   0x5   : > { %p134_p3 = scmp.lt.s32.totalorder (!%p113_p2), %s4361_s10, 1  ;;  %s4432_s15 = smov (!%p113_p2), 127  }
   0x6   : > { %116 = sbr.rel (%p113_p2) target bundleno = 1409 (0x581), region = 28  ;;  %s4433_s16 = smov (!%p113_p2), 126  }
   0x7   : > { %s4434_s17 = smov (!%p113_p2), 125   ;;  %s4435_s18 = smov (!%p113_p2), 124  }
   0x8   : > { %s4436_s19 = smov (!%p113_p2), 123   ;;  %s4437_s20 = smov (!%p113_p2), 122  }
   0x9   : > { %s4438_s21 = smov (!%p113_p2), 121   ;;  %s4439_s22 = smov (!%p113_p2), 120  }
   0xa   : > { %s4440_s23 = smov (!%p113_p2), 118   ;;  %s4441_s24 = smov (!%p113_p2), 119  }
   0xb   : > { %s6272_s10 = smov (!%p134_p3, %s4361_s10), 1  ;;  %vm487_vm0 = vcmask 1039360   ;;  %vm779_vm1 = vcmask 1031168   ;;  %vm1072_vm2 = vcmask 1022976   ;;  %vm1364_vm3 = vcmask 1014784  }
   0xc   : > { %s4404_s11 = smul.u32 160, %s6272_s10  ;;  %vm1657_vm4 = vcmask 1006592   ;;  %vm1949_vm5 = vcmask 998400   ;;  %vm2242_vm6 = vcmask 990208   ;;  %vm2534_vm7 = vcmask 982016   ;;  %s4403_s13 = sshll.u32 %s6272_s10, 7 }
   0xd   : > { %vm3119_vm8 = vcmask 965632   ;;  %vm2827_vm9 = vcmask 973824   ;;  %vm3448_vm10 = vcmask 392192   ;;  %vm4257_vm15 = vcmask 1043456  }
   0xe   : > { %s4472_s14 = scalar_lea.vmem %s6268_s0, %s4404_s11 }
   0xf   : > { %v4475_v0 = vld [vmem:[%s4472_s14 + $0x14] sm:$0xff]  ;;  %v4479_v1 = vld [vmem:[%s4472_s14 + $0x8] sm:$0xff]  ;;  %v4483_v2 = vld [vmem:[%s4472_s14] sm:$0xff] }
  0x10   : > { %184 = vst [vmem:[#allocation1 + $0x20] ss:$2 sm:$0xff] %v4475_v0  ;;  %v4487_v3 = vld [vmem:[%s4472_s14 + $0x1c] sm:$0xff]  ;;  %v4495_v7 = vld [vmem:[%s4472_s14 + $0x30] sm:$0xff]  ;;  %v4499_v11 = vld [vmem:[%s4472_s14 + $0x28] sm:$0xff] }
  0x11   : > { %178 = vst [vmem:[#allocation1 + $0x10] ss:$2 sm:$0xff] %v4479_v1  ;;  %v4491_v4 = vld [vmem:[%s4472_s14 + $0x3c] sm:$0xff]  ;;  %v4502_v13 = vld [vmem:[%s4472_s14 + $0x64] sm:$0xff]  ;;  %v4511_v19 = vld [vmem:[%s4472_s14 + $0x8c] sm:$0xff] }
  0x12   : > { %176 = vst [vmem:[#allocation1] ss:$2 sm:$0xff] %v4483_v2  ;;  %v4507_v16 = vld [vmem:[%s4472_s14 + $0x58] sm:$0xff]  ;;  %v4515_v22 = vld [vmem:[%s4472_s14 + $0x80] sm:$0xff]  ;;  %v293_v25 = vld [vmem:[%s4472_s14 + $0x10] sm:$0xf] }
  0x13   : > { %186 = vst [vmem:[#allocation1 + $0x30] ss:$2 sm:$0xff] %v4487_v3  ;;  %v4521_v31 = vld [vmem:[%s4472_s14 + $0x50] sm:$0xff]  ;;  %v4526_v35 = vld [vmem:[%s4472_s14 + $0x44] sm:$0xff]  ;;  %v4531_v38 = vld [vmem:[%s4472_s14 + $0x78] sm:$0xff] }
  0x14   : > { %v4535_v41 = vld [vmem:[%s4472_s14 + $0x6c] sm:$0xff]  ;;  %v4541_v47 = vld [vmem:[%s4472_s14 + $0x94] sm:$0xff]  ;;  %v296_v50 = vld [vmem:[%s4472_s14 + $0x24] sm:$0xf] }
  0x15   : > { %v299_v55 = vld [vmem:[%s4472_s14 + $0x38] sm:$0xf] }
  0x17   : > { %v187_v5 = vld.sshfl [vmem:[#allocation1 + $0x20] sm:$0xff pattern:$0x75316420]  ;;  %v188_v6 = vld.sshfl [vmem:[#allocation1 + $0x28] sm:$0xff pattern:$0x75316420] }
  0x18   : > { %197 = vst [vmem:[#allocation1 + $0x20] ss:$2 sm:$0xff] %v4491_v4  ;;  %v181_v8 = vld.sshfl [vmem:[#allocation1 + $0x10] sm:$0xff pattern:$0x75316420] }
  0x19   : > { %263 = vst [vmem:[#allocation2 + $0x210] sm:$0xf] %v187_v5  ;;  %v182_v9 = vld.sshfl [vmem:[#allocation1 + $0x18] sm:$0xff pattern:$0x75316420] }
  0x1a   : > { %264 = vst [vmem:[#allocation2 + $0x128] sm:$0xf] %v188_v6  ;;  %v179_v10 = vld.sshfl [vmem:[#allocation1] sm:$0xff pattern:$0x75316420] }
  0x1b   : > { %192 = vst [vmem:[#allocation1 + $0x10] ss:$2 sm:$0xff] %v4495_v7  ;;  %v180_v12 = vld.sshfl [vmem:[#allocation1 + $0x8] sm:$0xff pattern:$0x75316420] }
  0x1c   : > { %261 = vst [vmem:[#allocation2 + $0x518] sm:$0xf] %v181_v8  ;;  %v189_v33 = vld.sshfl [vmem:[#allocation1 + $0x30] sm:$0xff pattern:$0x75316420] }
  0x1d   : > { %262 = vst [vmem:[#allocation2 + $0x18] sm:$0xf] %v182_v9  ;;  %v190_v36 = vld.sshfl [vmem:[#allocation1 + $0x38] sm:$0xff pattern:$0x75316420] }
  0x1e   : > { %191 = vst [vmem:[#allocation1] ss:$2 sm:$0xff] %v4499_v11  ;;  %v302_v8 = vld [vmem:[%s4472_s14 + $0x4c] sm:$0xf] }
  0x1f   : > { %v199_v14 = vld.sshfl [vmem:[#allocation1 + $0x20] sm:$0xff pattern:$0x75316420]  ;;  %v200_v15 = vld.sshfl [vmem:[#allocation1 + $0x28] sm:$0xff pattern:$0x75316420] }
  0x20   : > { %209 = vst [vmem:[#allocation1 + $0x20] ss:$2 sm:$0xff] %v4502_v13 }
  0x21   : > { %271 = vst [vmem:[#allocation2 + $0x228] sm:$0xf] %v199_v14 }
  0x22   : > { %272 = vst [vmem:[#allocation2 + $0xa0] sm:$0xf] %v200_v15  ;;  %v195_v17 = vld.sshfl [vmem:[#allocation1 + $0x10] sm:$0xff pattern:$0x75316420] }
  0x23   : > { %v196_v18 = vld.sshfl [vmem:[#allocation1 + $0x18] sm:$0xff pattern:$0x75316420]  ;;  %269 = vst [vmem:[#allocation2 + $0x390] sm:$0xf] %v195_v17 }
  0x24   : > { %204 = vst [vmem:[#allocation1 + $0x10] ss:$2 sm:$0xff] %v4507_v16 }
  0x25   : > { %270 = vst [vmem:[#allocation2 + $0x78] sm:$0xf] %v196_v18  ;;  %v193_v28 = vld.sshfl [vmem:[#allocation1] sm:$0xff pattern:$0x75316420] }
  0x26   : > { %259 = vst [vmem:[#allocation2 + $0x410] sm:$0xf] %v179_v10  ;;  %v194_v32 = vld.sshfl [vmem:[#allocation1 + $0x8] sm:$0xff pattern:$0x75316420] }
  0x27   : > { %v211_v20 = vld.sshfl [vmem:[#allocation1 + $0x20] sm:$0xff pattern:$0x75316420]  ;;  %v212_v21 = vld.sshfl [vmem:[#allocation1 + $0x28] sm:$0xff pattern:$0x75316420] }
  0x28   : > { %221 = vst [vmem:[#allocation1 + $0x20] ss:$2 sm:$0xff] %v4511_v19  ;;  %v305_v18 = vld [vmem:[%s4472_s14 + $0x60] sm:$0xf] }
  0x29   : > { %279 = vst [vmem:[#allocation2 + $0x130] sm:$0xf] %v211_v20 }
  0x2a   : > { %280 = vst [vmem:[#allocation2 + $0x20] sm:$0xf] %v212_v21 }
  0x2b   : > { %v207_v23 = vld.sshfl [vmem:[#allocation1 + $0x10] sm:$0xff pattern:$0x75316420]  ;;  %v208_v24 = vld.sshfl [vmem:[#allocation1 + $0x18] sm:$0xff pattern:$0x75316420] }
  0x2c   : > { %216 = vst [vmem:[#allocation1 + $0x10] ss:$2 sm:$0xff] %v4515_v22 }
  0x2d   : > { %277 = vst [vmem:[#allocation2 + $0x220] sm:$0xf] %v207_v23  ;;  %v308_v23 = vld [vmem:[%s4472_s14 + $0x74] sm:$0xf] }
  0x2e   : > { %278 = vst [vmem:[#allocation2 + $0x4e0] sm:$0xf] %v208_v24 }
  0x2f   : > { %v223_v26 = vld.sshfl [vmem:[#allocation1 + $0x20] sm:$0xff pattern:$0x75316420]  ;;  %v224_v27 = vld.sshfl [vmem:[#allocation1 + $0x28] sm:$0xff pattern:$0x75316420] }
  0x30   : > { %344 = vst [vmem:[#allocation1 + $0x21] ss:$2 sm:$0xff] %v293_v25 }
  0x31   : > { %287 = vst [vmem:[#allocation2 + $0x428] sm:$0xf] %v223_v26 }
  0x32   : > { %288 = vst [vmem:[#allocation2 + $0x5e0] sm:$0xf] %v224_v27 }
  0x33   : > { %v219_v29 = vld.sshfl [vmem:[#allocation1 + $0x10] sm:$0xff pattern:$0x75316420]  ;;  %v220_v30 = vld.sshfl [vmem:[#allocation1 + $0x18] sm:$0xff pattern:$0x75316420] }
  0x34   : > { %342 = vst [vmem:[#allocation1 + $0x11] ss:$2 sm:$0xff] %v4479_v1 }
  0x35   : > { %285 = vst [vmem:[#allocation2 + $0x368] sm:$0xf] %v219_v29 }
  0x36   : > { %286 = vst [vmem:[#allocation2 + $0x160] sm:$0xf] %v220_v30 }
  0x37   : > { %v349_v34 = vld.sshfl [vmem:[#allocation1 + $0x20] sm:$0xff pattern:$0x75316420]  ;;  %203 = vst [vmem:[#allocation1] ss:$2 sm:$0xff] %v4521_v31 }
  0x38   : > { %415 = vrot.lane.b32.xlu2 %v349_v34, %s4432_s15  ;;  %260 = vst [vmem:[#allocation2 + $0x430] sm:$0xf] %v180_v12 }
  0x39   : > { %267 = vst [vmem:[#allocation2 + $0x28] sm:$0xf] %v193_v28 }
  0x3a   : > { %268 = vst [vmem:[#allocation2 + $0xb0] sm:$0xf] %v194_v32 }
  0x3b   : > { %v347_v37 = vld.sshfl [vmem:[#allocation1 + $0x10] sm:$0xff pattern:$0x75316420]  ;;  %198 = vst [vmem:[#allocation1 + $0x30] ss:$2 sm:$0xff] %v4526_v35 }
  0x3c   : > { %411 = vrot.lane.b32.xlu1 %v347_v37, %s4432_s15  ;;  %265 = vst [vmem:[#allocation2 + $0x200] sm:$0xf] %v189_v33  ;;  %v348_v42 = vld.sshfl [vmem:[#allocation1 + $0x18] sm:$0xff pattern:$0x75316420] }
  0x3d   : > { %266 = vst [vmem:[#allocation2 + $0x2b8] sm:$0xf] %v190_v36  ;;  %v311_v33 = vld [vmem:[%s4472_s14 + $0x88] sm:$0xf] }
  0x3e   : > { %v205_v39 = vld.sshfl [vmem:[#allocation1] sm:$0xff pattern:$0x75316420]  ;;  %v206_v40 = vld.sshfl [vmem:[#allocation1 + $0x8] sm:$0xff pattern:$0x75316420] }
  0x3f   : > { %215 = vst [vmem:[#allocation1] ss:$2 sm:$0xff] %v4531_v38 }
  0x40   : > { %275 = vst [vmem:[#allocation2 + $0x3a0] sm:$0xf] %v205_v39 }
  0x41   : > { %276 = vst [vmem:[#allocation2 + $0x3b0] sm:$0xf] %v206_v40 }
  0x42   : > { %v201_v43 = vld.sshfl [vmem:[#allocation1 + $0x30] sm:$0xff pattern:$0x75316420]  ;;  %v202_v44 = vld.sshfl [vmem:[#allocation1 + $0x38] sm:$0xff pattern:$0x75316420] }
  0x43   : > { %210 = vst [vmem:[#allocation1 + $0x30] ss:$2 sm:$0xff] %v4535_v41 }
  0x44   : > { %273 = vst [vmem:[#allocation2 + $0x198] sm:$0xf] %v201_v43  ;;  %413 = vrot.lane.b32.xlu1 %v348_v42, %s4432_s15  ;;  %v314_v43 = vld [vmem:[%s4472_s14 + $0x9c] sm:$0xf] }
  0x45   : > { %274 = vst [vmem:[#allocation2 + $0x418] sm:$0xf] %v202_v44 }
  0x46   : > { %v217_v45 = vld.sshfl [vmem:[#allocation1] sm:$0xff pattern:$0x75316420]  ;;  %v218_v46 = vld.sshfl [vmem:[#allocation1 + $0x8] sm:$0xff pattern:$0x75316420] }
  0x47   : > { %340 = vst [vmem:[#allocation1 + $0x1] ss:$2 sm:$0xff] %v4483_v2 }
  0x48   : > { %283 = vst [vmem:[#allocation2 + $0x1c8] sm:$0xf] %v217_v45 }
  0x49   : > { %284 = vst [vmem:[#allocation2 + $0x488] sm:$0xf] %v218_v46 }
  0x4a   : > { %v213_v48 = vld.sshfl [vmem:[#allocation1 + $0x30] sm:$0xff pattern:$0x75316420]  ;;  %v214_v49 = vld.sshfl [vmem:[#allocation1 + $0x38] sm:$0xff pattern:$0x75316420] }
  0x4b   : > { %222 = vst [vmem:[#allocation1 + $0x30] ss:$2 sm:$0xff] %v4541_v47 }
  0x4c   : > { %281 = vst [vmem:[#allocation2 + $0x8] sm:$0xf] %v213_v48  ;;  %v586_v48 = vld [vmem:[%s4472_s14 + $0x10] sm:$0xf] }
  0x4d   : > { %282 = vst [vmem:[#allocation2 + $0x328] sm:$0xf] %v214_v49 }
  0x4e   : > { %v345_v51 = vld.sshfl [vmem:[#allocation1] sm:$0xff pattern:$0x75316420]  ;;  %v346_v52 = vld.sshfl [vmem:[#allocation1 + $0x8] sm:$0xff pattern:$0x75316420] }
  0x4f   : > { %407 = vrot.lane.b32.xlu0 %v345_v51, %s4432_s15  ;;  %354 = vst [vmem:[#allocation1 + $0x1] ss:$2 sm:$0xff] %v4487_v3 }
  0x50   : > { %355 = vst [vmem:[#allocation1 + $0x11] ss:$2 sm:$0xff] %v296_v50 }
  0x51   : > { %359 = vst [vmem:[#allocation1 + $0x21] ss:$2 sm:$0xff] %v4499_v11 }
  0x52   : > { %v225_v53 = vld.sshfl [vmem:[#allocation1 + $0x30] sm:$0xff pattern:$0x75316420]  ;;  %v226_v54 = vld.sshfl [vmem:[#allocation1 + $0x38] sm:$0xff pattern:$0x75316420] }
  0x53   : > { %351 = vst [vmem:[#allocation1 + $0x31] ss:$2 sm:$0xff] %v4475_v0 }
  0x54   : > { %289 = vst [vmem:[#allocation2 + $0x388] sm:$0xf] %v225_v53 }
  0x55   : > { %290 = vst [vmem:[#allocation2 + $0x510] sm:$0xf] %v226_v54 }
  0x56   : > { %v357_v56 = vld.sshfl [vmem:[#allocation1 + $0x8] sm:$0xff pattern:$0x75316420]  ;;  %v356_v57 = vld.sshfl [vmem:[#allocation1] sm:$0xff pattern:$0x75316420] }
  0x57   : > { %409 = vrot.lane.b32.xlu0 %v346_v52, %s4432_s15  ;;  %421 = vrot.lane.b32.xlu1 %v356_v57, %s4432_s15  ;;  %365 = vst [vmem:[#allocation1 + $0x1] ss:$2 sm:$0xff] %v299_v55  ;;  %v358_v58 = vld.sshfl [vmem:[#allocation1 + $0x10] sm:$0xff pattern:$0x75316420] }
  0x58   : > { %v362_v59 = vld.sshfl [vmem:[#allocation1 + $0x28] sm:$0xff pattern:$0x75316420]  ;;  %367 = vst [vmem:[#allocation1 + $0x11] ss:$2 sm:$0xff] %v4491_v4 }
  0x59   : > { %v361_v62 = vld.sshfl [vmem:[#allocation1 + $0x20] sm:$0xff pattern:$0x75316420] }
  0x5a   : > { %v352_v60 = vld.sshfl [vmem:[#allocation1 + $0x30] sm:$0xff pattern:$0x75316420]  ;;  %v353_v61 = vld.sshfl [vmem:[#allocation1 + $0x38] sm:$0xff pattern:$0x75316420] }
  0x5b   : > { %417 = vrot.lane.b32.xlu2 %v352_v60, %s4432_s15  ;;  %360 = vst [vmem:[#allocation1 + $0x31] ss:$2 sm:$0xff] %v4495_v7 }
  0x5c   : > { %368 = vst [vmem:[#allocation1 + $0x21] ss:$2 sm:$0xff] %v4526_v35 }
  0x5e   : > { %v366_v63 = vld.sshfl [vmem:[#allocation1] sm:$0xff pattern:$0x75316420] }
  0x5f   : > { %419 = vrot.lane.b32.xlu0 %v353_v61, %s4432_s15  ;;  %427 = vrot.lane.b32.xlu1 %v361_v62, %s4432_s15  ;;  %375 = vst [vmem:[#allocation1 + $0x1] ss:$2 sm:$0xff] %v4521_v31  ;;  %v370_v5 = vld.sshfl [vmem:[#allocation1 + $0x10] sm:$0xff pattern:$0x75316420] }
  0x60   : > { %v371_v6 = vld.sshfl [vmem:[#allocation1 + $0x18] sm:$0xff pattern:$0x75316420] }
  0x61   : > { %376 = vst [vmem:[#allocation1 + $0x11] ss:$2 sm:$0xff] %v4507_v16 }
  0x62   : > { %v363_v9 = vld.sshfl [vmem:[#allocation1 + $0x30] sm:$0xff pattern:$0x75316420]  ;;  %v364_v10 = vld.sshfl [vmem:[#allocation1 + $0x38] sm:$0xff pattern:$0x75316420] }
  0x63   : > { %423 = vrot.lane.b32.xlu2 %v357_v56, %s4432_s15  ;;  %369 = vst [vmem:[#allocation1 + $0x31] ss:$2 sm:$0xff] %v302_v8  ;;  %v372_v15 = vld.sshfl [vmem:[#allocation1 + $0x20] sm:$0xff pattern:$0x75316420] }
  0x64   : > { %v373_v17 = vld.sshfl [vmem:[#allocation1 + $0x28] sm:$0xff pattern:$0x75316420]  ;;  %v589_v56 = vld [vmem:[%s4472_s14 + $0x24] sm:$0xf] }
  0x65   : > { %377 = vst [vmem:[#allocation1 + $0x21] ss:$2 sm:$0xff] %v305_v18 }
  0x66   : > { %v378_v12 = vld.sshfl [vmem:[#allocation1] sm:$0xff pattern:$0x75316420]  ;;  %v379_v14 = vld.sshfl [vmem:[#allocation1 + $0x8] sm:$0xff pattern:$0x75316420] }
  0x67   : > { %425 = vrot.lane.b32.xlu0 %v358_v58, %s4432_s15  ;;  %433 = vrot.lane.b32.xlu1 %v364_v10, %s4432_s15  ;;  %386 = vst [vmem:[#allocation1 + $0x1] ss:$2 sm:$0xff] %v4535_v41 }
  0x68   : > { %v380_v21 = vld.sshfl [vmem:[#allocation1 + $0x10] sm:$0xff pattern:$0x75316420]  ;;  %v381_v24 = vld.sshfl [vmem:[#allocation1 + $0x18] sm:$0xff pattern:$0x75316420] }
  0x69   : > { %387 = vst [vmem:[#allocation1 + $0x11] ss:$2 sm:$0xff] %v308_v23 }
  0x6a   : > { %v374_v20 = vld.sshfl [vmem:[#allocation1 + $0x30] sm:$0xff pattern:$0x75316420] }
  0x6b   : > { %429 = vrot.lane.b32.xlu2 %v362_v59, %s4432_s15  ;;  %383 = vst [vmem:[#allocation1 + $0x31] ss:$2 sm:$0xff] %v4502_v13 }
  0x6c   : > { %v382_v27 = vld.sshfl [vmem:[#allocation1 + $0x20] sm:$0xff pattern:$0x75316420] }
  0x6d   : > { %391 = vst [vmem:[#allocation1 + $0x21] ss:$2 sm:$0xff] %v4531_v38 }
  0x6e   : > { %v389_v29 = vld.sshfl [vmem:[#allocation1 + $0x8] sm:$0xff pattern:$0x75316420]  ;;  %v388_v30 = vld.sshfl [vmem:[#allocation1] sm:$0xff pattern:$0x75316420] }
  0x6f   : > { %431 = vrot.lane.b32.xlu0 %v363_v9, %s4432_s15  ;;  %439 = vrot.lane.b32.xlu1 %v371_v6, %s4432_s15  ;;  %397 = vst [vmem:[#allocation1 + $0x1] ss:$2 sm:$0xff] %v311_v33  ;;  %v592_v9 = vld [vmem:[%s4472_s14 + $0x38] sm:$0xf] }
  0x70   : > { %v390_v28 = vld.sshfl [vmem:[#allocation1 + $0x10] sm:$0xff pattern:$0x75316420] }
  0x71   : > { %399 = vst [vmem:[#allocation1 + $0x11] ss:$2 sm:$0xff] %v4511_v19 }
  0x72   : > { %v384_v25 = vld.sshfl [vmem:[#allocation1 + $0x30] sm:$0xff pattern:$0x75316420]  ;;  %v385_v26 = vld.sshfl [vmem:[#allocation1 + $0x38] sm:$0xff pattern:$0x75316420] }
  0x73   : > { %435 = vrot.lane.b32.xlu2 %v366_v63, %s4432_s15  ;;  %392 = vst [vmem:[#allocation1 + $0x31] ss:$2 sm:$0xff] %v4515_v22 }
  0x74   : > { %v394_v32 = vld.sshfl [vmem:[#allocation1 + $0x28] sm:$0xff pattern:$0x75316420]  ;;  %v393_v34 = vld.sshfl [vmem:[#allocation1 + $0x20] sm:$0xff pattern:$0x75316420] }
  0x75   : > { %400 = vst [vmem:[#allocation1 + $0x21] ss:$2 sm:$0xff] %v4541_v47 }
  0x76   : > { %v398_v36 = vld.sshfl [vmem:[#allocation1] sm:$0xff pattern:$0x75316420] }
  0x77   : > { %437 = vrot.lane.b32.xlu0 %v370_v5, %s4432_s15  ;;  %445 = vrot.lane.b32.xlu1 %v374_v20, %s4432_s15  ;;  %632 = vst [vmem:[#allocation1] ss:$2 sm:$0xff] %v4483_v2  ;;  %v595_v20 = vld [vmem:[%s4472_s14 + $0x4c] sm:$0xf] }
  0x78   : > { %v402_v39 = vld.sshfl [vmem:[#allocation1 + $0x10] sm:$0xff pattern:$0x75316420]  ;;  %v403_v42 = vld.sshfl [vmem:[#allocation1 + $0x18] sm:$0xff pattern:$0x75316420] }
  0x79   : > { %634 = vst [vmem:[#allocation1 + $0x10] ss:$2 sm:$0xff] %v4479_v1 }
  0x7a   : > { %v395_v37 = vld.sshfl [vmem:[#allocation1 + $0x30] sm:$0xff pattern:$0x75316420]  ;;  %v396_v40 = vld.sshfl [vmem:[#allocation1 + $0x38] sm:$0xff pattern:$0x75316420] }
  0x7b   : > { %441 = vrot.lane.b32.xlu2 %v372_v15, %s4432_s15  ;;  %401 = vst [vmem:[#allocation1 + $0x31] ss:$2 sm:$0xff] %v314_v43 }
  0x7c   : > { %v405_v44 = vld.sshfl [vmem:[#allocation1 + $0x28] sm:$0xff pattern:$0x75316420]  ;;  %v404_v45 = vld.sshfl [vmem:[#allocation1 + $0x20] sm:$0xff pattern:$0x75316420] }
  0x7d   : > { %636 = vst [vmem:[#allocation1 + $0x20] ss:$2 sm:$0xff] %v586_v48 }
  0x7e   : > { %v638_v46 = vld.sshfl [vmem:[#allocation1 + $0x8] sm:$0xff pattern:$0x75316420]  ;;  %v637_v50 = vld.sshfl [vmem:[#allocation1] sm:$0xff pattern:$0x75316420] }
  0x7f   : > { %443 = vrot.lane.b32.xlu0 %v373_v17, %s4432_s15  ;;  %451 = vrot.lane.b32.xlu1 %v380_v21, %s4432_s15  ;;  %646 = vst [vmem:[#allocation1] ss:$2 sm:$0xff] %v4487_v3 }
  0x80   : > { %v639_v54 = vld.sshfl [vmem:[#allocation1 + $0x10] sm:$0xff pattern:$0x75316420]  ;;  %v640_v55 = vld.sshfl [vmem:[#allocation1 + $0x18] sm:$0xff pattern:$0x75316420] }
  0x81   : > { %647 = vst [vmem:[#allocation1 + $0x10] ss:$2 sm:$0xff] %v589_v56 }
  0x82   : > { %v406_v49 = vld.sshfl [vmem:[#allocation1 + $0x30] sm:$0xff pattern:$0x75316420] }
  0x83   : > { %447 = vrot.lane.b32.xlu2 %v378_v12, %s4432_s15  ;;  %643 = vst [vmem:[#allocation1 + $0x30] ss:$2 sm:$0xff] %v4475_v0 }
  0x84   : > { %v641_v51 = vld.sshfl [vmem:[#allocation1 + $0x20] sm:$0xff pattern:$0x75316420] }
  0x85   : > { %651 = vst [vmem:[#allocation1 + $0x20] ss:$2 sm:$0xff] %v4499_v11 }
  0x86   : > { %v648_v8 = vld.sshfl [vmem:[#allocation1] sm:$0xff pattern:$0x75316420] }
  0x87   : > { %449 = vrot.lane.b32.xlu0 %v379_v14, %s4432_s15  ;;  %457 = vrot.lane.b32.xlu1 %v384_v25, %s4432_s15 }
  0x88   : > { %v650_v59 = vld.sshfl [vmem:[#allocation1 + $0x10] sm:$0xff pattern:$0x75316420] }
  0x89   : > { %659 = vst [vmem:[#allocation1 + $0x10] ss:$2 sm:$0xff] %v4491_v4  ;;  %v649_v4 = vld.sshfl [vmem:[#allocation1 + $0x8] sm:$0xff pattern:$0x75316420] }
  0x8a   : > { %v644_v52 = vld.sshfl [vmem:[#allocation1 + $0x30] sm:$0xff pattern:$0x75316420]  ;;  %v645_v53 = vld.sshfl [vmem:[#allocation1 + $0x38] sm:$0xff pattern:$0x75316420] }
  0x8b   : > { %453 = vrot.lane.b32.xlu2 %v381_v24, %s4432_s15  ;;  %652 = vst [vmem:[#allocation1 + $0x30] ss:$2 sm:$0xff] %v4495_v7 }
  0x8c   : > { %v653_v61 = vld.sshfl [vmem:[#allocation1 + $0x20] sm:$0xff pattern:$0x75316420]  ;;  %v654_v62 = vld.sshfl [vmem:[#allocation1 + $0x28] sm:$0xff pattern:$0x75316420] }
  0x8d   : > { %660 = vst [vmem:[#allocation1 + $0x20] ss:$2 sm:$0xff] %v4526_v35 }
  0x8e   : > { %657 = vst [vmem:[#allocation1] ss:$2 sm:$0xff] %v592_v9 }
  0x8f   : > { %455 = vrot.lane.b32.xlu0 %v382_v27, %s4432_s15  ;;  %463 = vrot.lane.b32.xlu1 %v389_v29, %s4432_s15 }
  0x90   : > { %v662_v12 = vld.sshfl [vmem:[#allocation1 + $0x10] sm:$0xff pattern:$0x75316420]  ;;  %v4618_v14 = vld.sshfl [vmem:[#allocation1 + $0x18] sm:$0xff pattern:$0x75316420] }
  0x91   : > { %668 = vst [vmem:[#allocation1 + $0x10] ss:$2 sm:$0xff] %v4507_v16 }
  0x92   : > { %v416_v57 = vpop.permute.xlu2 %415  ;;  %v655_v17 = vld.sshfl [vmem:[#allocation1 + $0x30] sm:$0xff pattern:$0x75316420]  ;;  %v656_v18 = vld.sshfl [vmem:[#allocation1 + $0x38] sm:$0xff pattern:$0x75316420] }
  0x93   : > { %459 = vrot.lane.b32.xlu2 %v385_v26, %s4432_s15  ;;  %661 = vst [vmem:[#allocation1 + $0x30] ss:$2 sm:$0xff] %v595_v20 }
  0x95   : > { %v658_v21 = vld.sshfl [vmem:[#allocation1] sm:$0xff pattern:$0x75316420] }
  0x96   : > { %667 = vst [vmem:[#allocation1] ss:$2 sm:$0xff] %v4521_v31 }
  0x97   : > { %461 = vrot.lane.b32.xlu0 %v388_v30, %s4432_s15  ;;  %469 = vrot.lane.b32.xlu1 %v394_v32, %s4432_s15 }
  0x9a   : > { %v666_v29 = vld.sshfl [vmem:[#allocation1 + $0x30] sm:$0xff pattern:$0x75316420] }
  0x9b   : > { %465 = vrot.lane.b32.xlu2 %v390_v28, %s4432_s15  ;;  %675 = vst [vmem:[#allocation1 + $0x30] ss:$2 sm:$0xff] %v4502_v13 }
  0x9d   : > { %v670_v43 = vld.sshfl [vmem:[#allocation1] sm:$0xff pattern:$0x75316420] }
  0x9f   : > { %467 = vrot.lane.b32.xlu0 %v393_v34, %s4432_s15  ;;  %475 = vrot.lane.b32.xlu1 %v398_v36, %s4432_s15 }
  0xa3   : > { %471 = vrot.lane.b32.xlu2 %v395_v37, %s4432_s15  ;;  %v665_v37 = vld.sshfl [vmem:[#allocation1 + $0x28] sm:$0xff pattern:$0x75316420] }
  0xa7   : > { %473 = vrot.lane.b32.xlu0 %v396_v40, %s4432_s15  ;;  %481 = vrot.lane.b32.xlu1 %v404_v45, %s4432_s15  ;;  %v664_v40 = vld.sshfl [vmem:[#allocation1 + $0x20] sm:$0xff pattern:$0x75316420] }
  0xab   : > { %477 = vrot.lane.b32.xlu2 %v402_v39, %s4432_s15  ;;  %v598_v39 = vld [vmem:[%s4472_s14 + $0x60] sm:$0xf] }
  0xac   : > { %669 = vst [vmem:[#allocation1 + $0x20] ss:$2 sm:$0xff] %v598_v39 }
  0xae   : > { %v412_v58 = vpop.permute.xlu1 %411 }
  0xaf   : > { %479 = vrot.lane.b32.xlu0 %v403_v42, %s4432_s15  ;;  %699 = vrot.lane.b32.xlu1 %v637_v50, %s4433_s16  ;;  %v671_v42 = vld.sshfl [vmem:[#allocation1 + $0x8] sm:$0xff pattern:$0x75316420]  ;;  %v4646_v50 = vld.sshfl [vmem:[#allocation1 + $0x30] sm:$0xff pattern:$0x75316420] }
  0xb0   : > { %678 = vst [vmem:[#allocation1] ss:$2 sm:$0xff] %v4535_v41 }
  0xb3   : > { %483 = vrot.lane.b32.xlu2 %v405_v44, %s4432_s15 }
  0xb5   : > { %v418_v60 = vpop.permute.xlu2 %417 }
  0xb6   : > { %v414_v63 = vpop.permute.xlu1 %413 }
  0xb7   : > { %485 = vrot.lane.b32.xlu0 %v406_v49, %s4432_s15  ;;  %705 = vrot.lane.b32.xlu1 %v640_v55, %s4433_s16  ;;  %v490_v5 = vsel %vm487_vm0, %v412_v58, %v414_v63  ;;  %v491_v6 = vsel %vm487_vm0, %v414_v63, %v416_v57  ;;  %v672_v57 = vld.sshfl [vmem:[#allocation1 + $0x10] sm:$0xff pattern:$0x75316420]  ;;  %v604_v63 = vld [vmem:[%s4472_s14 + $0x88] sm:$0xf] }
  0xb8   : > { %554 = vst [vmem:[#allocation2 + $0x518] sm:$0xf0] %v490_v5  ;;  %v680_v5 = vld.sshfl [vmem:[#allocation1] sm:$0xff pattern:$0x75316420] }
  0xb9   : > { %555 = vst [vmem:[#allocation2 + $0x18] sm:$0xf0] %v491_v6 }
  0xbb   : > { %701 = vrot.lane.b32.xlu2 %v638_v46, %s4433_s16 }
  0xbd   : > { %v424_v10 = vpop.permute.xlu2 %423 }
  0xbf   : > { %703 = vrot.lane.b32.xlu0 %v639_v54, %s4433_s16  ;;  %711 = vrot.lane.b32.xlu1 %v645_v53, %s4433_s16 }
  0xc1   : > { %v408_v15 = vpop.permute.xlu0 %407 }
  0xc3   : > { %707 = vrot.lane.b32.xlu2 %v641_v51, %s4433_s16  ;;  %v674_v51 = vld.sshfl [vmem:[#allocation1 + $0x20] sm:$0xff pattern:$0x75316420] }
  0xc4   : > { %683 = vst [vmem:[#allocation1 + $0x20] ss:$2 sm:$0xff] %v4531_v38  ;;  %v601_v38 = vld [vmem:[%s4472_s14 + $0x74] sm:$0xf] }
  0xc5   : > { %v430_v23 = vpop.permute.xlu2 %429 }
  0xc7   : > { %709 = vrot.lane.b32.xlu0 %v644_v52, %s4433_s16  ;;  %717 = vrot.lane.b32.xlu1 %v650_v59, %s4433_s16  ;;  %v4648_v52 = vld.sshfl [vmem:[#allocation1 + $0x38] sm:$0xff pattern:$0x75316420] }
  0xc8   : > { %684 = vst [vmem:[#allocation1 + $0x30] ss:$2 sm:$0xff] %v4515_v22  ;;  %v673_v59 = vld.sshfl [vmem:[#allocation1 + $0x18] sm:$0xff pattern:$0x75316420] }
  0xc9   : > { %v410_v16 = vpop.permute.xlu0 %409  ;;  %v422_v24 = vpop.permute.xlu1 %421  ;;  %679 = vst [vmem:[#allocation1 + $0x10] ss:$2 sm:$0xff] %v601_v38 }
  0xca   : > { %v488_v25 = vsel %vm487_vm0, %v408_v15, %v410_v16  ;;  %v489_v26 = vsel %vm487_vm0, %v410_v16, %v412_v58  ;;  %v494_v27 = vsel %vm487_vm0, %v422_v24, %v424_v10 }
  0xcb   : > { %713 = vrot.lane.b32.xlu2 %v648_v8, %s4433_s16  ;;  %552 = vst [vmem:[#allocation2 + $0x410] sm:$0xf0] %v488_v25  ;;  %v685_v9 = vld.sshfl [vmem:[#allocation1 + $0x20] sm:$0xff pattern:$0x75316420] }
  0xcc   : > { %553 = vst [vmem:[#allocation2 + $0x430] sm:$0xf0] %v489_v26 }
  0xcd   : > { %v436_v28 = vpop.permute.xlu2 %435  ;;  %558 = vst [vmem:[#allocation2 + $0x200] sm:$0xf0] %v494_v27 }
  0xcf   : > { %715 = vrot.lane.b32.xlu0 %v649_v4, %s4433_s16  ;;  %723 = vrot.lane.b32.xlu1 %v655_v17, %s4433_s16  ;;  %v686_v4 = vld.sshfl [vmem:[#allocation1 + $0x28] sm:$0xff pattern:$0x75316420]  ;;  %v687_v26 = vld.sshfl [vmem:[#allocation1 + $0x30] sm:$0xff pattern:$0x75316420] }
  0xd0   : > { %v682_v8 = vld.sshfl [vmem:[#allocation1 + $0x10] sm:$0xff pattern:$0x75316420]  ;;  %692 = vst [vmem:[#allocation1 + $0x20] ss:$2 sm:$0xff] %v4541_v47 }
  0xd1   : > { %v420_v30 = vpop.permute.xlu0 %419  ;;  %v428_v32 = vpop.permute.xlu1 %427  ;;  %691 = vst [vmem:[#allocation1 + $0x10] ss:$2 sm:$0xff] %v4511_v19 }
  0xd2   : > { %v492_v33 = vsel %vm487_vm0, %v418_v60, %v420_v30  ;;  %v493_v34 = vsel %vm487_vm0, %v420_v30, %v422_v24  ;;  %v496_v36 = vsel %vm487_vm0, %v428_v32, %v430_v23 }
  0xd3   : > { %719 = vrot.lane.b32.xlu2 %v653_v61, %s4433_s16  ;;  %556 = vst [vmem:[#allocation2 + $0x210] sm:$0xf0] %v492_v33 }
  0xd4   : > { %557 = vst [vmem:[#allocation2 + $0x128] sm:$0xf0] %v493_v34 }
  0xd5   : > { %v442_v13 = vpop.permute.xlu2 %441  ;;  %560 = vst [vmem:[#allocation2 + $0x28] sm:$0xf0] %v496_v36 }
  0xd7   : > { %721 = vrot.lane.b32.xlu0 %v654_v62, %s4433_s16  ;;  %729 = vrot.lane.b32.xlu1 %v662_v12, %s4433_s16  ;;  %v681_v62 = vld.sshfl [vmem:[#allocation1 + $0x8] sm:$0xff pattern:$0x75316420] }
  0xd8   : > { %689 = vst [vmem:[#allocation1] ss:$2 sm:$0xff] %v604_v63  ;;  %v4676_v47 = vld.sshfl [vmem:[#allocation1 + $0x10] sm:$0xff pattern:$0x75316420]  ;;  %v4725_v63 = vld [vmem:[%s4472_s14 + $0x3c] sm:$0xff] }
  0xd9   : > { %v426_v44 = vpop.permute.xlu0 %425  ;;  %v434_v45 = vpop.permute.xlu1 %433  ;;  %v695_v20 = vld.sshfl [vmem:[#allocation1 + $0x18] sm:$0xff pattern:$0x75316420] }
  0xda   : > { %v495_v46 = vsel %vm487_vm0, %v424_v10, %v426_v44  ;;  %v499_v48 = vsel %vm487_vm0, %v434_v45, %v436_v28  ;;  %927 = vst [vmem:[#allocation1 + $0x11] ss:$2 sm:$0xff] %v4479_v1  ;;  %v688_v28 = vld.sshfl [vmem:[#allocation1 + $0x38] sm:$0xff pattern:$0x75316420] }
  0xdb   : > { %725 = vrot.lane.b32.xlu2 %v656_v18, %s4433_s16  ;;  %559 = vst [vmem:[#allocation2 + $0x2b8] sm:$0xf0] %v495_v46  ;;  %v878_v44 = vld [vmem:[%s4472_s14 + $0x10] sm:$0xf] }
  0xdc   : > { %563 = vst [vmem:[#allocation2 + $0x78] sm:$0xf0] %v499_v48  ;;  %v697_v46 = vld.sshfl [vmem:[#allocation1 + $0x28] sm:$0xff pattern:$0x75316420] }
  0xdd   : > { %v448_v49 = vpop.permute.xlu2 %447 }
  0xdf   : > { %727 = vrot.lane.b32.xlu0 %v658_v21, %s4433_s16  ;;  %735 = vrot.lane.b32.xlu1 %v665_v37, %s4433_s16  ;;  %v690_v19 = vld.sshfl [vmem:[#allocation1] sm:$0xff pattern:$0x75316420] }
  0xe0   : > { %925 = vst [vmem:[#allocation1 + $0x1] ss:$2 sm:$0xff] %v4483_v2  ;;  %v607_v2 = vld [vmem:[%s4472_s14 + $0x9c] sm:$0xf] }
  0xe1   : > { %v432_v41 = vpop.permute.xlu0 %431  ;;  %v440_v53 = vpop.permute.xlu1 %439  ;;  %693 = vst [vmem:[#allocation1 + $0x30] ss:$2 sm:$0xff] %v607_v2 }
  0xe2   : > { %v497_v54 = vsel %vm487_vm0, %v430_v23, %v432_v41  ;;  %v498_v55 = vsel %vm487_vm0, %v432_v41, %v434_v45  ;;  %v501_v56 = vsel %vm487_vm0, %v440_v53, %v442_v13  ;;  %v881_v41 = vld [vmem:[%s4472_s14 + $0x24] sm:$0xf] }
  0xe3   : > { %731 = vrot.lane.b32.xlu2 %v4618_v14, %s4433_s16  ;;  %561 = vst [vmem:[#allocation2 + $0xb0] sm:$0xf0] %v497_v54 }
  0xe4   : > { %562 = vst [vmem:[#allocation2 + $0x390] sm:$0xf0] %v498_v55 }
  0xe5   : > { %v454_v58 = vpop.permute.xlu2 %453  ;;  %565 = vst [vmem:[#allocation2 + $0xa0] sm:$0xf0] %v501_v56 }
  0xe7   : > { %733 = vrot.lane.b32.xlu0 %v664_v40, %s4433_s16  ;;  %741 = vrot.lane.b32.xlu1 %v671_v42, %s4433_s16  ;;  %v930_v36 = vld.sshfl [vmem:[#allocation1] sm:$0xff pattern:$0x75316420]  ;;  %v4691_v37 = vld.sshfl [vmem:[#allocation1 + $0x8] sm:$0xff pattern:$0x75316420] }
  0xe8   : > { %v698_v34 = vld.sshfl [vmem:[#allocation1 + $0x30] sm:$0xff pattern:$0x75316420]  ;;  %939 = vst [vmem:[#allocation1 + $0x1] ss:$2 sm:$0xff] %v4487_v3 }
  0xe9   : > { %v438_v22 = vpop.permute.xlu0 %437  ;;  %v446_v60 = vpop.permute.xlu1 %445  ;;  %936 = vst [vmem:[#allocation1 + $0x31] ss:$2 sm:$0xff] %v4475_v0  ;;  %v696_v0 = vld.sshfl [vmem:[#allocation1 + $0x20] sm:$0xff pattern:$0x75316420] }
  0xea   : > { %v500_v61 = vsel %vm487_vm0, %v438_v22, %v440_v53  ;;  %929 = vst [vmem:[#allocation1 + $0x21] ss:$2 sm:$0xff] %v878_v44  ;;  %v933_v53 = vld.sshfl [vmem:[#allocation1 + $0x18] sm:$0xff pattern:$0x75316420] }
  0xeb   : > { %737 = vrot.lane.b32.xlu2 %v666_v29, %s4433_s16  ;;  %564 = vst [vmem:[#allocation2 + $0x228] sm:$0xf0] %v500_v61 }
  0xed   : > { %v460_v6 = vpop.permute.xlu2 %459 }
  0xef   : > { %739 = vrot.lane.b32.xlu0 %v670_v43, %s4433_s16  ;;  %747 = vrot.lane.b32.xlu1 %v674_v51, %s4433_s16 }
  0xf0   : > { %v937_v3 = vld.sshfl [vmem:[#allocation1 + $0x30] sm:$0xff pattern:$0x75316420]  ;;  %v4704_v48 = vld.sshfl [vmem:[#allocation1 + $0x38] sm:$0xff pattern:$0x75316420] }
  0xf1   : > { %v444_v10 = vpop.permute.xlu0 %443  ;;  %v452_v12 = vpop.permute.xlu1 %451  ;;  %945 = vst [vmem:[#allocation1 + $0x31] ss:$2 sm:$0xff] %v4495_v7  ;;  %v934_v55 = vld.sshfl [vmem:[#allocation1 + $0x20] sm:$0xff pattern:$0x75316420] }
  0xf2   : > { %v502_v14 = vsel %vm487_vm0, %v442_v13, %v444_v10  ;;  %v503_v15 = vsel %vm487_vm0, %v444_v10, %v446_v60  ;;  %v506_v17 = vsel %vm487_vm0, %v452_v12, %v454_v58  ;;  %944 = vst [vmem:[#allocation1 + $0x21] ss:$2 sm:$0xff] %v4499_v11 }
  0xf3   : > { %743 = vrot.lane.b32.xlu2 %v672_v57, %s4433_s16  ;;  %566 = vst [vmem:[#allocation2 + $0x198] sm:$0xf0] %v502_v14 }
  0xf4   : > { %567 = vst [vmem:[#allocation2 + $0x418] sm:$0xf0] %v503_v15 }
  0xf5   : > { %v466_v18 = vpop.permute.xlu2 %465  ;;  %570 = vst [vmem:[#allocation2 + $0x220] sm:$0xf0] %v506_v17 }
  0xf7   : > { %745 = vrot.lane.b32.xlu0 %v673_v59, %s4433_s16  ;;  %753 = vrot.lane.b32.xlu1 %v680_v5, %s4433_s16  ;;  %v942_v5 = vld.sshfl [vmem:[#allocation1 + $0x8] sm:$0xff pattern:$0x75316420] }
  0xf9   : > { %v450_v21 = vpop.permute.xlu0 %449  ;;  %v458_v23 = vpop.permute.xlu1 %457  ;;  %v947_v10 = vld.sshfl [vmem:[#allocation1 + $0x28] sm:$0xff pattern:$0x75316420] }
  0xfa   : > { %v504_v16 = vsel %vm487_vm0, %v448_v49, %v450_v21  ;;  %v505_v24 = vsel %vm487_vm0, %v450_v21, %v452_v12  ;;  %v508_v25 = vsel %vm487_vm0, %v458_v23, %v460_v6  ;;  %v946_v12 = vld.sshfl [vmem:[#allocation1 + $0x20] sm:$0xff pattern:$0x75316420] }
  0xfb   : > { %749 = vrot.lane.b32.xlu2 %v4646_v50, %s4433_s16  ;;  %568 = vst [vmem:[#allocation2 + $0x3a0] sm:$0xf0] %v504_v16 }
  0xfc   : > { %569 = vst [vmem:[#allocation2 + $0x3b0] sm:$0xf0] %v505_v24  ;;  %v887_v24 = vld [vmem:[%s4472_s14 + $0x4c] sm:$0xf] }
  0xfd   : > { %v472_v27 = vpop.permute.xlu2 %471  ;;  %572 = vst [vmem:[#allocation2 + $0x130] sm:$0xf0] %v508_v25  ;;  %v948_v25 = vld.sshfl [vmem:[#allocation1 + $0x30] sm:$0xff pattern:$0x75316420] }
  0xfe   : > { %953 = vst [vmem:[#allocation1 + $0x21] ss:$2 sm:$0xff] %v4526_v35 }
  0xff   : > { %751 = vrot.lane.b32.xlu0 %v4648_v52, %s4433_s16  ;;  %759 = vrot.lane.b32.xlu1 %v685_v9, %s4433_s16  ;;  %v932_v52 = vld.sshfl [vmem:[#allocation1 + $0x10] sm:$0xff pattern:$0x75316420] }
 0x100   : > { %940 = vst [vmem:[#allocation1 + $0x11] ss:$2 sm:$0xff] %v881_v41  ;;  %v893_v41 = vld [vmem:[%s4472_s14 + $0x74] sm:$0xf] }
 0x101   : > { %v456_v1 = vpop.permute.xlu0 %455  ;;  %v464_v29 = vpop.permute.xlu1 %463 }
 0x102   : > { %v507_v30 = vsel %vm487_vm0, %v454_v58, %v456_v1  ;;  %v511_v32 = vsel %vm487_vm0, %v464_v29, %v466_v18 }
 0x103   : > { %755 = vrot.lane.b32.xlu2 %v681_v62, %s4433_s16  ;;  %571 = vst [vmem:[#allocation2 + $0x4e0] sm:$0xf0] %v507_v30  ;;  %v4751_v30 = vld [vmem:[%s4472_s14 + $0x58] sm:$0xff] }
 0x104   : > { %575 = vst [vmem:[#allocation2 + $0x328] sm:$0xf0] %v511_v32  ;;  %v890_v32 = vld [vmem:[%s4472_s14 + $0x60] sm:$0xf] }
 0x105   : > { %v478_v33 = vpop.permute.xlu2 %477 }
 0x107   : > { %757 = vrot.lane.b32.xlu0 %v682_v8, %s4433_s16  ;;  %765 = vrot.lane.b32.xlu1 %v688_v28, %s4433_s16  ;;  %v884_v8 = vld [vmem:[%s4472_s14 + $0x38] sm:$0xf]  ;;  %v943_v9 = vld.sshfl [vmem:[#allocation1 + $0x10] sm:$0xff pattern:$0x75316420] }
 0x108   : > { %952 = vst [vmem:[#allocation1 + $0x11] ss:$2 sm:$0xff] %v4725_v63 }
 0x109   : > { %v462_v39 = vpop.permute.xlu0 %461  ;;  %v470_v40 = vpop.permute.xlu1 %469 }
 0x10a   : > { %v509_v13 = vsel %vm487_vm0, %v460_v6, %v462_v39  ;;  %v510_v42 = vsel %vm487_vm0, %v462_v39, %v464_v29  ;;  %v513_v43 = vsel %vm487_vm0, %v470_v40, %v472_v27  ;;  %v941_v6 = vld.sshfl [vmem:[#allocation1] sm:$0xff pattern:$0x75316420]  ;;  %v958_v29 = vld.sshfl [vmem:[#allocation1 + $0x28] sm:$0xff pattern:$0x75316420] }
 0x10b   : > { %761 = vrot.lane.b32.xlu2 %v686_v4, %s4433_s16  ;;  %573 = vst [vmem:[#allocation2 + $0x20] sm:$0xf0] %v509_v13 }
 0x10c   : > { %574 = vst [vmem:[#allocation2 + $0x8] sm:$0xf0] %v510_v42 }
 0x10d   : > { %v484_v45 = vpop.permute.xlu2 %483  ;;  %577 = vst [vmem:[#allocation2 + $0x488] sm:$0xf0] %v513_v43  ;;  %v4764_v43 = vld [vmem:[%s4472_s14 + $0x64] sm:$0xff] }
 0x10e   : > { %950 = vst [vmem:[#allocation1 + $0x1] ss:$2 sm:$0xff] %v884_v8 }
 0x10f   : > { %763 = vrot.lane.b32.xlu0 %v687_v26, %s4433_s16  ;;  %771 = vrot.lane.b32.xlu1 %v695_v20, %s4433_s16  ;;  %v955_v28 = vld.sshfl [vmem:[#allocation1 + $0x10] sm:$0xff pattern:$0x75316420] }
 0x111   : > { %v468_v49 = vpop.permute.xlu0 %467  ;;  %v476_v50 = vpop.permute.xlu1 %475 }
 0x112   : > { %v512_v51 = vsel %vm487_vm0, %v468_v49, %v470_v40 }
 0x113   : > { %767 = vrot.lane.b32.xlu2 %v690_v19, %s4433_s16  ;;  %576 = vst [vmem:[#allocation2 + $0x1c8] sm:$0xf0] %v512_v51 }
 0x115   : > { %v702_v54 = vpop.permute.xlu2 %701 }
 0x117   : > { %769 = vrot.lane.b32.xlu0 %v4676_v47, %s4433_s16  ;;  %777 = vrot.lane.b32.xlu1 %v698_v34, %s4433_s16  ;;  %v951_v47 = vld.sshfl [vmem:[#allocation1] sm:$0xff pattern:$0x75316420] }
 0x118   : > { %960 = vst [vmem:[#allocation1 + $0x1] ss:$2 sm:$0xff] %v4521_v31  ;;  %v949_v31 = vld.sshfl [vmem:[#allocation1 + $0x38] sm:$0xff pattern:$0x75316420] }
 0x119   : > { %v474_v7 = vpop.permute.xlu0 %473  ;;  %v482_v56 = vpop.permute.xlu1 %481  ;;  %954 = vst [vmem:[#allocation1 + $0x31] ss:$2 sm:$0xff] %v887_v24  ;;  %v957_v34 = vld.sshfl [vmem:[#allocation1 + $0x20] sm:$0xff pattern:$0x75316420] }
 0x11a   : > { %v514_v38 = vsel %vm487_vm0, %v472_v27, %v474_v7  ;;  %v515_v57 = vsel %vm487_vm0, %v474_v7, %v476_v50  ;;  %v518_v58 = vsel %vm487_vm0, %v482_v56, %v484_v45  ;;  %962 = vst [vmem:[#allocation1 + $0x21] ss:$2 sm:$0xff] %v890_v32  ;;  %v4825_v32 = vld [vmem:[%s4472_s14] sm:$0xff] }
 0x11b   : > { %773 = vrot.lane.b32.xlu2 %v696_v0, %s4433_s16  ;;  %578 = vst [vmem:[#allocation2 + $0x368] sm:$0xf0] %v514_v38  ;;  %v4767_v0 = vld [vmem:[%s4472_s14 + $0x6c] sm:$0xff] }
 0x11c   : > { %579 = vst [vmem:[#allocation2 + $0x160] sm:$0xf0] %v515_v57 }
 0x11d   : > { %v708_v59 = vpop.permute.xlu2 %707  ;;  %582 = vst [vmem:[#allocation2 + $0x388] sm:$0xf0] %v518_v58 }
 0x11f   : > { %775 = vrot.lane.b32.xlu0 %v697_v46, %s4433_s16  ;;  %996 = vrot.lane.b32.xlu1 %v932_v52, %s4434_s17  ;;  %v964_v44 = vld.sshfl [vmem:[#allocation1 + $0x8] sm:$0xff pattern:$0x75316420] }
 0x120   : > { %v959_v46 = vld.sshfl [vmem:[#allocation1 + $0x30] sm:$0xff pattern:$0x75316420] }
 0x121   : > { %v480_v11 = vpop.permute.xlu0 %479  ;;  %v700_v22 = vpop.permute.xlu1 %699  ;;  %968 = vst [vmem:[#allocation1 + $0x31] ss:$2 sm:$0xff] %v4764_v43 }
 0x122   : > { %v516_v60 = vsel %vm487_vm0, %v478_v33, %v480_v11  ;;  %v517_v61 = vsel %vm487_vm0, %v480_v11, %v482_v56  ;;  %v780_v62 = vsel %vm779_vm1, %v700_v22, %v702_v54  ;;  %v956_v33 = vld.sshfl [vmem:[#allocation1 + $0x18] sm:$0xff pattern:$0x75316420]  ;;  %v967_v56 = vld.sshfl [vmem:[#allocation1 + $0x20] sm:$0xff pattern:$0x75316420] }
 0x123   : > { %992 = vrot.lane.b32.xlu2 %v930_v36, %s4434_s17  ;;  %580 = vst [vmem:[#allocation2 + $0x428] sm:$0xf0] %v516_v60  ;;  %v4788_v11 = vld [vmem:[%s4472_s14 + $0x80] sm:$0xff] }
 0x124   : > { %581 = vst [vmem:[#allocation2 + $0x5e0] sm:$0xf0] %v517_v61 }
 0x125   : > { %v714_v4 = vpop.permute.xlu2 %713  ;;  %844 = vst [vmem:[#allocation2 + $0x318] sm:$0xf] %v780_v62 }
 0x126   : > { %961 = vst [vmem:[#allocation1 + $0x11] ss:$2 sm:$0xff] %v4751_v30 }
 0x127   : > { %994 = vrot.lane.b32.xlu0 %v4691_v37, %s4434_s17  ;;  %1002 = vrot.lane.b32.xlu1 %v937_v3, %s4434_s17  ;;  %v963_v3 = vld.sshfl [vmem:[#allocation1] sm:$0xff pattern:$0x75316420] }
 0x128   : > { %971 = vst [vmem:[#allocation1 + $0x1] ss:$2 sm:$0xff] %v4767_v0  ;;  %v969_v22 = vld.sshfl [vmem:[#allocation1 + $0x30] sm:$0xff pattern:$0x75316420] }
 0x129   : > { %v486_v14 = vpop.permute.xlu0 %485  ;;  %v706_v15 = vpop.permute.xlu1 %705  ;;  %v970_v60 = vld.sshfl [vmem:[#allocation1 + $0x38] sm:$0xff pattern:$0x75316420] }
 0x12a   : > { %v519_v17 = vsel %vm487_vm0, %v484_v45, %v486_v14  ;;  %v783_v18 = vsel %vm779_vm1, %v706_v15, %v708_v59  ;;  %977 = vst [vmem:[#allocation1 + $0x31] ss:$2 sm:$0xff] %v4788_v11 }
 0x12b   : > { %998 = vrot.lane.b32.xlu2 %v933_v53, %s4434_s17  ;;  %583 = vst [vmem:[#allocation2 + $0x510] sm:$0xf0] %v519_v17 }
 0x12c   : > { %847 = vst [vmem:[#allocation2 + $0x2f0] sm:$0xf] %v783_v18 }
 0x12d   : > { %v720_v19 = vpop.permute.xlu2 %719  ;;  %v966_v7 = vld.sshfl [vmem:[#allocation1 + $0x18] sm:$0xff pattern:$0x75316420] }
 0x12f   : > { %1000 = vrot.lane.b32.xlu0 %v934_v55, %s4434_s17  ;;  %1008 = vrot.lane.b32.xlu1 %v942_v5, %s4434_s17  ;;  %v965_v55 = vld.sshfl [vmem:[#allocation1 + $0x10] sm:$0xff pattern:$0x75316420]  ;;  %v974_v17 = vld.sshfl [vmem:[#allocation1 + $0x8] sm:$0xff pattern:$0x75316420] }
 0x130   : > { %972 = vst [vmem:[#allocation1 + $0x11] ss:$2 sm:$0xff] %v893_v41 }
 0x131   : > { %v704_v35 = vpop.permute.xlu0 %703  ;;  %v712_v20 = vpop.permute.xlu1 %711  ;;  %v980_v24 = vld.sshfl [vmem:[#allocation1 + $0x30] sm:$0xff pattern:$0x75316420] }
 0x132   : > { %v781_v21 = vsel %vm779_vm1, %v702_v54, %v704_v35  ;;  %v782_v23 = vsel %vm779_vm1, %v704_v35, %v706_v15  ;;  %v785_v16 = vsel %vm779_vm1, %v712_v20, %v714_v4  ;;  %v4779_v54 = vld [vmem:[%s4472_s14 + $0x78] sm:$0xff] }
 0x133   : > { %1004 = vrot.lane.b32.xlu2 %v4704_v48, %s4434_s17  ;;  %845 = vst [vmem:[#allocation2 + $0x3d0] sm:$0xf] %v781_v21  ;;  %v4809_v21 = vld [vmem:[%s4472_s14 + $0x94] sm:$0xff] }
 0x134   : > { %846 = vst [vmem:[#allocation2 + $0x400] sm:$0xf] %v782_v23  ;;  %v899_v23 = vld [vmem:[%s4472_s14 + $0x9c] sm:$0xf] }
 0x135   : > { %v4745_v2 = vpop.permute.xlu2 %725  ;;  %849 = vst [vmem:[#allocation2 + $0x468] sm:$0xf] %v785_v16 }
 0x136   : > { %976 = vst [vmem:[#allocation1 + $0x21] ss:$2 sm:$0xff] %v4779_v54 }
 0x137   : > { %1006 = vrot.lane.b32.xlu0 %v941_v6, %s4434_s17  ;;  %1014 = vrot.lane.b32.xlu1 %v947_v10, %s4434_s17  ;;  %v973_v10 = vld.sshfl [vmem:[#allocation1] sm:$0xff pattern:$0x75316420]  ;;  %v975_v15 = vld.sshfl [vmem:[#allocation1 + $0x10] sm:$0xff pattern:$0x75316420] }
 0x139   : > { %v710_v26 = vpop.permute.xlu0 %709  ;;  %v718_v27 = vpop.permute.xlu1 %717 }
 0x13a   : > { %v784_v1 = vsel %vm779_vm1, %v710_v26, %v712_v20 }
 0x13b   : > { %1010 = vrot.lane.b32.xlu2 %v943_v9, %s4434_s17  ;;  %848 = vst [vmem:[#allocation2 + $0x3b8] sm:$0xf] %v784_v1  ;;  %v4799_v9 = vld [vmem:[%s4472_s14 + $0x8c] sm:$0xff] }
 0x13c   : > { %984 = vst [vmem:[#allocation1 + $0x11] ss:$2 sm:$0xff] %v4799_v9  ;;  %v4822_v1 = vld [vmem:[%s4472_s14 + $0x8] sm:$0xff] }
 0x13d   : > { %v732_v36 = vpop.permute.xlu2 %731  ;;  %v979_v20 = vld.sshfl [vmem:[#allocation1 + $0x28] sm:$0xff pattern:$0x75316420] }
 0x13f   : > { %1012 = vrot.lane.b32.xlu0 %v946_v12, %s4434_s17  ;;  %1020 = vrot.lane.b32.xlu1 %v951_v47, %s4434_s17  ;;  %v896_v12 = vld [vmem:[%s4472_s14 + $0x88] sm:$0xf]  ;;  %v978_v47 = vld.sshfl [vmem:[#allocation1 + $0x20] sm:$0xff pattern:$0x75316420] }
 0x140   : > { %982 = vst [vmem:[#allocation1 + $0x1] ss:$2 sm:$0xff] %v896_v12 }
 0x141   : > { %v716_v37 = vpop.permute.xlu0 %715  ;;  %v724_v39 = vpop.permute.xlu1 %723  ;;  %985 = vst [vmem:[#allocation1 + $0x21] ss:$2 sm:$0xff] %v4809_v21 }
 0x142   : > { %v786_v40 = vsel %vm779_vm1, %v714_v4, %v716_v37  ;;  %v787_v13 = vsel %vm779_vm1, %v716_v37, %v718_v27  ;;  %v790_v42 = vsel %vm779_vm1, %v724_v39, %v4745_v2 }
 0x143   : > { %1016 = vrot.lane.b32.xlu2 %v948_v25, %s4434_s17  ;;  %850 = vst [vmem:[#allocation2 + $0x508] sm:$0xf] %v786_v40  ;;  %v981_v25 = vld.sshfl [vmem:[#allocation1 + $0x38] sm:$0xff pattern:$0x75316420] }
 0x144   : > { %851 = vst [vmem:[#allocation2 + $0x5e8] sm:$0xf] %v787_v13 }
 0x145   : > { %v738_v45 = vpop.permute.xlu2 %737  ;;  %854 = vst [vmem:[#allocation2 + $0x4e8] sm:$0xf] %v790_v42 }
 0x146   : > { %986 = vst [vmem:[#allocation1 + $0x31] ss:$2 sm:$0xff] %v899_v23 }
 0x147   : > { %1018 = vrot.lane.b32.xlu0 %v949_v31, %s4434_s17  ;;  %1026 = vrot.lane.b32.xlu1 %v957_v34, %s4434_s17  ;;  %v988_v34 = vld.sshfl [vmem:[#allocation1 + $0x18] sm:$0xff pattern:$0x75316420] }
 0x149   : > { %v722_v48 = vpop.permute.xlu0 %721  ;;  %v730_v49 = vpop.permute.xlu1 %729 }
 0x14a   : > { %v788_v50 = vsel %vm779_vm1, %v720_v19, %v722_v48  ;;  %v789_v51 = vsel %vm779_vm1, %v722_v48, %v724_v39  ;;  %v792_v52 = vsel %vm779_vm1, %v730_v49, %v732_v36  ;;  %v989_v49 = vld.sshfl [vmem:[#allocation1 + $0x20] sm:$0xff pattern:$0x75316420] }
 0x14b   : > { %1022 = vrot.lane.b32.xlu2 %v955_v28, %s4434_s17  ;;  %852 = vst [vmem:[#allocation2 + $0x578] sm:$0xf] %v788_v50 }
 0x14c   : > { %853 = vst [vmem:[#allocation2 + $0x590] sm:$0xf] %v789_v51 }
 0x14d   : > { %v744_v53 = vpop.permute.xlu2 %743  ;;  %856 = vst [vmem:[#allocation2 + $0x138] sm:$0xf] %v792_v52  ;;  %v991_v48 = vld.sshfl [vmem:[#allocation1 + $0x30] sm:$0xff pattern:$0x75316420] }
 0x14f   : > { %1024 = vrot.lane.b32.xlu0 %v956_v33, %s4434_s17  ;;  %1032 = vrot.lane.b32.xlu1 %v963_v3, %s4434_s17  ;;  %v990_v3 = vld.sshfl [vmem:[#allocation1 + $0x28] sm:$0xff pattern:$0x75316420] }
 0x151   : > { %v728_v38 = vpop.permute.xlu0 %727  ;;  %v736_v57 = vpop.permute.xlu1 %735 }
 0x152   : > { %v791_v58 = vsel %vm779_vm1, %v4745_v2, %v728_v38  ;;  %v795_v59 = vsel %vm779_vm1, %v736_v57, %v738_v45 }
 0x153   : > { %1028 = vrot.lane.b32.xlu2 %v958_v29, %s4434_s17  ;;  %855 = vst [vmem:[#allocation2 + $0x520] sm:$0xf] %v791_v58  ;;  %v987_v29 = vld.sshfl [vmem:[#allocation1 + $0x10] sm:$0xff pattern:$0x75316420] }
 0x154   : > { %859 = vst [vmem:[#allocation2 + $0x5a0] sm:$0xf] %v795_v59 }
 0x155   : > { %v750_v61 = vpop.permute.xlu2 %749  ;;  %1219 = vst [vmem:[#allocation1 + $0x10] ss:$2 sm:$0xff] %v4822_v1 }
 0x157   : > { %1030 = vrot.lane.b32.xlu0 %v959_v46, %s4434_s17  ;;  %1038 = vrot.lane.b32.xlu1 %v966_v7, %s4434_s17  ;;  %v1171_v46 = vld [vmem:[%s4472_s14 + $0x10] sm:$0xf] }
 0x158   : > { %1221 = vst [vmem:[#allocation1 + $0x20] ss:$2 sm:$0xff] %v1171_v46 }
 0x159   : > { %v734_v62 = vpop.permute.xlu0 %733  ;;  %v742_v5 = vpop.permute.xlu1 %741 }
 0x15a   : > { %v793_v6 = vsel %vm779_vm1, %v732_v36, %v734_v62  ;;  %v794_v8 = vsel %vm779_vm1, %v734_v62, %v736_v57  ;;  %v797_v4 = vsel %vm779_vm1, %v742_v5, %v744_v53  ;;  %v983_v36 = vld.sshfl [vmem:[#allocation1] sm:$0xff pattern:$0x75316420]  ;;  %v4863_v62 = vld [vmem:[%s4472_s14 + $0x28] sm:$0xff] }
 0x15b   : > { %1034 = vrot.lane.b32.xlu2 %v964_v44, %s4434_s17  ;;  %857 = vst [vmem:[#allocation2 + $0x380] sm:$0xf] %v793_v6  ;;  %v4836_v44 = vld [vmem:[%s4472_s14 + $0x14] sm:$0xff] }
 0x15c   : > { %858 = vst [vmem:[#allocation2 + $0x408] sm:$0xf] %v794_v8  ;;  %v1225_v6 = vld.sshfl [vmem:[#allocation1 + $0x18] sm:$0xff pattern:$0x75316420] }
 0x15d   : > { %v4802_v14 = vpop.permute.xlu2 %755  ;;  %861 = vst [vmem:[#allocation2 + $0x450] sm:$0xf] %v797_v4 }
 0x15e   : > { %1217 = vst [vmem:[#allocation1] ss:$2 sm:$0xff] %v4825_v32 }
 0x15f   : > { %1036 = vrot.lane.b32.xlu0 %v965_v55, %s4434_s17  ;;  %1044 = vrot.lane.b32.xlu1 %v970_v60, %s4434_s17  ;;  %1228 = vst [vmem:[#allocation1 + $0x30] ss:$2 sm:$0xff] %v4836_v44  ;;  %v1174_v60 = vld [vmem:[%s4472_s14 + $0x24] sm:$0xf] }
 0x160   : > { %v1226_v8 = vld.sshfl [vmem:[#allocation1 + $0x20] sm:$0xff pattern:$0x75316420] }
 0x161   : > { %v740_v18 = vpop.permute.xlu0 %739  ;;  %v748_v19 = vpop.permute.xlu1 %747  ;;  %1236 = vst [vmem:[#allocation1 + $0x20] ss:$2 sm:$0xff] %v4863_v62 }
 0x162   : > { %v796_v35 = vsel %vm779_vm1, %v740_v18, %v742_v5  ;;  %v1177_v18 = vld [vmem:[%s4472_s14 + $0x38] sm:$0xf] }
 0x163   : > { %1040 = vrot.lane.b32.xlu2 %v967_v56, %s4434_s17  ;;  %860 = vst [vmem:[#allocation2 + $0x4f8] sm:$0xf] %v796_v35 }
 0x165   : > { %v762_v16 = vpop.permute.xlu2 %761  ;;  %v1223_v55 = vld.sshfl [vmem:[#allocation1 + $0x8] sm:$0xff pattern:$0x75316420]  ;;  %v1222_v7 = vld.sshfl [vmem:[#allocation1] sm:$0xff pattern:$0x75316420] }
 0x166   : > { %v1229_v12 = vld.sshfl [vmem:[#allocation1 + $0x30] sm:$0xff pattern:$0x75316420] }
 0x167   : > { %1042 = vrot.lane.b32.xlu0 %v969_v22, %s4434_s17  ;;  %1050 = vrot.lane.b32.xlu1 %v975_v15, %s4434_s17  ;;  %v1230_v15 = vld.sshfl [vmem:[#allocation1 + $0x38] sm:$0xff pattern:$0x75316420] }
 0x169   : > { %v746_v2 = vpop.permute.xlu0 %745  ;;  %v754_v31 = vpop.permute.xlu1 %753 }
 0x16a   : > { %v798_v26 = vsel %vm779_vm1, %v744_v53, %v746_v2  ;;  %v799_v27 = vsel %vm779_vm1, %v746_v2, %v748_v19  ;;  %v802_v28 = vsel %vm779_vm1, %v754_v31, %v4802_v14  ;;  %v4848_v53 = vld [vmem:[%s4472_s14 + $0x1c] sm:$0xff] }
 0x16b   : > { %1046 = vrot.lane.b32.xlu2 %v973_v10, %s4434_s17  ;;  %862 = vst [vmem:[#allocation2 + $0xc8] sm:$0xf] %v798_v26  ;;  %v1239_v26 = vld.sshfl [vmem:[#allocation1 + $0x28] sm:$0xff pattern:$0x75316420] }
 0x16c   : > { %863 = vst [vmem:[#allocation2 + $0x558] sm:$0xf] %v799_v27 }
 0x16d   : > { %v768_v33 = vpop.permute.xlu2 %767  ;;  %866 = vst [vmem:[#allocation2 + $0x598] sm:$0xf] %v802_v28  ;;  %v1238_v28 = vld.sshfl [vmem:[#allocation1 + $0x20] sm:$0xff pattern:$0x75316420] }
 0x16e   : > { %1231 = vst [vmem:[#allocation1] ss:$2 sm:$0xff] %v4848_v53 }
 0x16f   : > { %1048 = vrot.lane.b32.xlu0 %v974_v17, %s4434_s17  ;;  %1056 = vrot.lane.b32.xlu1 %v980_v24, %s4434_s17  ;;  %v4872_v17 = vld [vmem:[%s4472_s14 + $0x30] sm:$0xff] }
 0x170   : > { %1237 = vst [vmem:[#allocation1 + $0x30] ss:$2 sm:$0xff] %v4872_v17 }
 0x171   : > { %v752_v37 = vpop.permute.xlu0 %751  ;;  %v760_v39 = vpop.permute.xlu1 %759 }
 0x172   : > { %v800_v40 = vsel %vm779_vm1, %v750_v61, %v752_v37  ;;  %v801_v13 = vsel %vm779_vm1, %v752_v37, %v754_v31  ;;  %v804_v42 = vsel %vm779_vm1, %v760_v39, %v762_v16  ;;  %v1224_v61 = vld.sshfl [vmem:[#allocation1 + $0x10] sm:$0xff pattern:$0x75316420]  ;;  %v4889_v31 = vld [vmem:[%s4472_s14 + $0x44] sm:$0xff] }
 0x173   : > { %1052 = vrot.lane.b32.xlu2 %v978_v47, %s4434_s17  ;;  %864 = vst [vmem:[#allocation2 + $0x5c8] sm:$0xf] %v800_v40 }
 0x174   : > { %865 = vst [vmem:[#allocation2 + $0xe0] sm:$0xf] %v801_v13  ;;  %v1180_v13 = vld [vmem:[%s4472_s14 + $0x4c] sm:$0xf] }
 0x175   : > { %v4838_v45 = vpop.permute.xlu2 %773  ;;  %868 = vst [vmem:[#allocation2 + $0x2e0] sm:$0xf] %v804_v42  ;;  %v1234_v19 = vld.sshfl [vmem:[#allocation1 + $0x8] sm:$0xff pattern:$0x75316420] }
 0x176   : > { %1232 = vst [vmem:[#allocation1 + $0x10] ss:$2 sm:$0xff] %v1174_v60  ;;  %v1233_v47 = vld.sshfl [vmem:[#allocation1] sm:$0xff pattern:$0x75316420] }
 0x177   : > { %1054 = vrot.lane.b32.xlu0 %v979_v20, %s4434_s17  ;;  %1062 = vrot.lane.b32.xlu1 %v987_v29, %s4434_s17  ;;  %1242 = vst [vmem:[#allocation1] ss:$2 sm:$0xff] %v1177_v18  ;;  %v1240_v42 = vld.sshfl [vmem:[#allocation1 + $0x30] sm:$0xff pattern:$0x75316420] }
 0x178   : > { %1245 = vst [vmem:[#allocation1 + $0x20] ss:$2 sm:$0xff] %v4889_v31  ;;  %v1183_v60 = vld [vmem:[%s4472_s14 + $0x60] sm:$0xf]  ;;  %v1186_v18 = vld [vmem:[%s4472_s14 + $0x74] sm:$0xf] }
 0x179   : > { %v758_v50 = vpop.permute.xlu0 %757  ;;  %v766_v51 = vpop.permute.xlu1 %765 }
 0x17a   : > { %v803_v52 = vsel %vm779_vm1, %v4802_v14, %v758_v50  ;;  %v807_v41 = vsel %vm779_vm1, %v766_v51, %v768_v33 }
 0x17b   : > { %1058 = vrot.lane.b32.xlu2 %v981_v25, %s4434_s17  ;;  %867 = vst [vmem:[#allocation2 + $0x288] sm:$0xf] %v803_v52 }
 0x17c   : > { %871 = vst [vmem:[#allocation2 + $0x2b0] sm:$0xf] %v807_v41 }
 0x17d   : > { %v4851_v56 = vpop.permute.xlu2 %992  ;;  %v1235_v20 = vld.sshfl [vmem:[#allocation1 + $0x10] sm:$0xff pattern:$0x75316420] }
 0x17e   : > { %1244 = vst [vmem:[#allocation1 + $0x10] ss:$2 sm:$0xff] %v4725_v63 }
 0x17f   : > { %1060 = vrot.lane.b32.xlu0 %v983_v36, %s4434_s17  ;;  %1068 = vrot.lane.b32.xlu1 %v990_v3, %s4434_s17  ;;  %v1241_v3 = vld.sshfl [vmem:[#allocation1 + $0x38] sm:$0xff pattern:$0x75316420] }
 0x180   : > { %1246 = vst [vmem:[#allocation1 + $0x30] ss:$2 sm:$0xff] %v1180_v13 }
 0x181   : > { %v764_v38 = vpop.permute.xlu0 %763  ;;  %v772_v57 = vpop.permute.xlu1 %771 }
 0x182   : > { %v805_v58 = vsel %vm779_vm1, %v762_v16, %v764_v38  ;;  %v806_v59 = vsel %vm779_vm1, %v764_v38, %v766_v51  ;;  %v809_v22 = vsel %vm779_vm1, %v772_v57, %v4838_v45 }
 0x183   : > { %1064 = vrot.lane.b32.xlu2 %v988_v34, %s4434_s17  ;;  %869 = vst [vmem:[#allocation2 + $0x5d8] sm:$0xf] %v805_v58 }
 0x184   : > { %870 = vst [vmem:[#allocation2 + $0x588] sm:$0xf] %v806_v59 }
 0x185   : > { %v4865_v5 = vpop.permute.xlu2 %998  ;;  %873 = vst [vmem:[#allocation2 + $0x68] sm:$0xf] %v809_v22  ;;  %v4894_v29 = vld.sshfl [vmem:[#allocation1 + $0x10] sm:$0xff pattern:$0x75316420] }
 0x186   : > { %v1248_v33 = vld.sshfl [vmem:[#allocation1 + $0x18] sm:$0xff pattern:$0x75316420] }
 0x187   : > { %1066 = vrot.lane.b32.xlu0 %v989_v49, %s4434_s17  ;;  %1286 = vrot.lane.b32.xlu1 %v1223_v55, %s4435_s18  ;;  %1253 = vst [vmem:[#allocation1 + $0x10] ss:$2 sm:$0xff] %v4751_v30  ;;  %v1251_v55 = vld.sshfl [vmem:[#allocation1 + $0x30] sm:$0xff pattern:$0x75316420] }
 0x188   : > { %1260 = vst [vmem:[#allocation1 + $0x30] ss:$2 sm:$0xff] %v4764_v43 }
 0x189   : > { %v770_v4 = vpop.permute.xlu0 %769  ;;  %v778_v10 = vpop.permute.xlu1 %777 }
 0x18a   : > { %v808_v14 = vsel %vm779_vm1, %v770_v4, %v772_v57 }
 0x18b   : > { %1070 = vrot.lane.b32.xlu2 %v991_v48, %s4434_s17  ;;  %872 = vst [vmem:[#allocation2 + $0xf8] sm:$0xf] %v808_v14  ;;  %v1243_v48 = vld.sshfl [vmem:[#allocation1] sm:$0xff pattern:$0x75316420]  ;;  %s6221_s17 = scalar_lea.vmem %s6270_s2, %s4403_s13 }
 0x18d   : > { %v4877_v35 = vpop.permute.xlu2 %1004 }
 0x18f   : > { %1284 = vrot.lane.b32.xlu0 %v1222_v7, %s4435_s18  ;;  %1292 = vrot.lane.b32.xlu1 %v1226_v8, %s4435_s18  ;;  %v1261_v8 = vld.sshfl [vmem:[#allocation1 + $0x30] sm:$0xff pattern:$0x75316420]  ;;  %v4928_v4 = vld.sshfl [vmem:[#allocation1 + $0x38] sm:$0xff pattern:$0x75316420] }
 0x190   : > { %1269 = vst [vmem:[#allocation1 + $0x30] ss:$2 sm:$0xff] %v4788_v11 }
 0x191   : > { %v776_v23 = vpop.permute.xlu0 %775  ;;  %v997_v16 = vpop.permute.xlu1 %996 }
 0x192   : > { %v810_v24 = vsel %vm779_vm1, %v4838_v45, %v776_v23  ;;  %v811_v25 = vsel %vm779_vm1, %v776_v23, %v778_v10  ;;  %v1075_v2 = vsel %vm1072_vm2, %v997_v16, %v4865_v5  ;;  %v4905_v45 = vld [vmem:[%s4472_s14 + $0x50] sm:$0xff] }
 0x193   : > { %1288 = vrot.lane.b32.xlu2 %v1224_v61, %s4435_s18  ;;  %874 = vst [vmem:[#allocation2 + $0x168] sm:$0xf] %v810_v24  ;;  %v1249_v61 = vld.sshfl [vmem:[#allocation1 + $0x20] sm:$0xff pattern:$0x75316420] }
 0x194   : > { %875 = vst [vmem:[#allocation2 + $0x4a0] sm:$0xf] %v811_v25 }
 0x195   : > { %v1011_v27 = vpop.permute.xlu2 %1010  ;;  %1139 = vst [vmem:[#allocation2 + $0x400] sm:$0xf0] %v1075_v2 }
 0x196   : > { %1252 = vst [vmem:[#allocation1] ss:$2 sm:$0xff] %v4905_v45 }
 0x197   : > { %1290 = vrot.lane.b32.xlu0 %v1225_v6, %s4435_s18  ;;  %1298 = vrot.lane.b32.xlu1 %v1233_v47, %s4435_s18  ;;  %v1250_v6 = vld.sshfl [vmem:[#allocation1 + $0x28] sm:$0xff pattern:$0x75316420] }
 0x198   : > { %1254 = vst [vmem:[#allocation1 + $0x20] ss:$2 sm:$0xff] %v1183_v60 }
 0x199   : > { %v995_v34 = vpop.permute.xlu0 %994  ;;  %v1003_v36 = vpop.permute.xlu1 %1002 }
 0x19a   : > { %v1073_v37 = vsel %vm1072_vm2, %v4851_v56, %v995_v34  ;;  %v1074_v39 = vsel %vm1072_vm2, %v995_v34, %v997_v16  ;;  %v1077_v40 = vsel %vm1072_vm2, %v1003_v36, %v4877_v35 }
 0x19b   : > { %1294 = vrot.lane.b32.xlu2 %v1229_v12, %s4435_s18  ;;  %1137 = vst [vmem:[#allocation2 + $0x318] sm:$0xf0] %v1073_v37  ;;  %v1189_v37 = vld [vmem:[%s4472_s14 + $0x88] sm:$0xf] }
 0x19c   : > { %1138 = vst [vmem:[#allocation2 + $0x3d0] sm:$0xf0] %v1074_v39 }
 0x19d   : > { %v1017_v46 = vpop.permute.xlu2 %1016  ;;  %1141 = vst [vmem:[#allocation2 + $0x3b8] sm:$0xf0] %v1077_v40  ;;  %v1255_v7 = vld.sshfl [vmem:[#allocation1] sm:$0xff pattern:$0x75316420] }
 0x19e   : > { %v4916_v56 = vld.sshfl [vmem:[#allocation1 + $0x8] sm:$0xff pattern:$0x75316420] }
 0x19f   : > { %1296 = vrot.lane.b32.xlu0 %v1230_v15, %s4435_s18  ;;  %1304 = vrot.lane.b32.xlu1 %v1238_v28, %s4435_s18  ;;  %1263 = vst [vmem:[#allocation1] ss:$2 sm:$0xff] %v4767_v0  ;;  %v1257_v15 = vld.sshfl [vmem:[#allocation1 + $0x10] sm:$0xff pattern:$0x75316420] }
 0x1a1   : > { %v1001_v49 = vpop.permute.xlu0 %1000  ;;  %v1009_v50 = vpop.permute.xlu1 %1008 }
 0x1a2   : > { %v1076_v51 = vsel %vm1072_vm2, %v4865_v5, %v1001_v49  ;;  %v1080_v52 = vsel %vm1072_vm2, %v1009_v50, %v1011_v27 }
 0x1a3   : > { %1300 = vrot.lane.b32.xlu2 %v1234_v19, %s4435_s18  ;;  %1140 = vst [vmem:[#allocation2 + $0x2f0] sm:$0xf0] %v1076_v51  ;;  %v1258_v19 = vld.sshfl [vmem:[#allocation1 + $0x18] sm:$0xff pattern:$0x75316420] }
 0x1a4   : > { %1144 = vst [vmem:[#allocation2 + $0x5e8] sm:$0xf0] %v1080_v52 }
 0x1a5   : > { %v1023_v41 = vpop.permute.xlu2 %1022  ;;  %1264 = vst [vmem:[#allocation1 + $0x10] ss:$2 sm:$0xff] %v1186_v18 }
 0x1a6   : > { %v1266_v36 = vld.sshfl [vmem:[#allocation1 + $0x8] sm:$0xff pattern:$0x75316420]  ;;  %v1265_v39 = vld.sshfl [vmem:[#allocation1] sm:$0xff pattern:$0x75316420] }
 0x1a7   : > { %1302 = vrot.lane.b32.xlu0 %v1235_v20, %s4435_s18  ;;  %1310 = vrot.lane.b32.xlu1 %v1241_v3, %s4435_s18  ;;  %1274 = vst [vmem:[#allocation1] ss:$2 sm:$0xff] %v1189_v37 }
 0x1a9   : > { %v1007_v38 = vpop.permute.xlu0 %1006  ;;  %v1015_v57 = vpop.permute.xlu1 %1014 }
 0x1aa   : > { %v1078_v58 = vsel %vm1072_vm2, %v4877_v35, %v1007_v38  ;;  %v1079_v59 = vsel %vm1072_vm2, %v1007_v38, %v1009_v50  ;;  %v1082_v22 = vsel %vm1072_vm2, %v1015_v57, %v1017_v46  ;;  %v1259_v35 = vld.sshfl [vmem:[#allocation1 + $0x20] sm:$0xff pattern:$0x75316420]  ;;  %v1272_v38 = vld.sshfl [vmem:[#allocation1 + $0x30] sm:$0xff pattern:$0x75316420] }
 0x1ab   : > { %1306 = vrot.lane.b32.xlu2 %v1239_v26, %s4435_s18  ;;  %1142 = vst [vmem:[#allocation2 + $0x468] sm:$0xf0] %v1078_v58 }
 0x1ac   : > { %1143 = vst [vmem:[#allocation2 + $0x508] sm:$0xf0] %v1079_v59  ;;  %v1267_v26 = vld.sshfl [vmem:[#allocation1 + $0x10] sm:$0xff pattern:$0x75316420] }
 0x1ad   : > { %v1029_v5 = vpop.permute.xlu2 %1028  ;;  %1146 = vst [vmem:[#allocation2 + $0x590] sm:$0xf0] %v1082_v22  ;;  %v1273_v22 = vld.sshfl [vmem:[#allocation1 + $0x38] sm:$0xff pattern:$0x75316420] }
 0x1ae   : > { %1268 = vst [vmem:[#allocation1 + $0x20] ss:$2 sm:$0xff] %v4779_v54  ;;  %v1275_v51 = vld.sshfl [vmem:[#allocation1] sm:$0xff pattern:$0x75316420] }
 0x1af   : > { %1308 = vrot.lane.b32.xlu0 %v1240_v42, %s4435_s18  ;;  %1316 = vrot.lane.b32.xlu1 %v1248_v33, %s4435_s18  ;;  %1276 = vst [vmem:[#allocation1 + $0x10] ss:$2 sm:$0xff] %v4799_v9 }
 0x1b0   : > { %1510 = vst [vmem:[#allocation1 + $0x1] ss:$2 sm:$0xff] %v4825_v32 }
 0x1b1   : > { %v1013_v10 = vpop.permute.xlu0 %1012  ;;  %v1021_v12 = vpop.permute.xlu1 %1020 }
 0x1b2   : > { %v1081_v14 = vsel %vm1072_vm2, %v1013_v10, %v1015_v57  ;;  %v1192_v57 = vld [vmem:[%s4472_s14 + $0x9c] sm:$0xf]  ;;  %v1463_v10 = vld [vmem:[%s4472_s14 + $0x10] sm:$0xf] }
 0x1b3   : > { %1312 = vrot.lane.b32.xlu2 %v1243_v48, %s4435_s18  ;;  %1145 = vst [vmem:[#allocation2 + $0x578] sm:$0xf0] %v1081_v14 }
 0x1b4   : > { %1278 = vst [vmem:[#allocation1 + $0x30] ss:$2 sm:$0xff] %v1192_v57 }
 0x1b5   : > { %v1035_v47 = vpop.permute.xlu2 %1034  ;;  %v1271_v13 = vld.sshfl [vmem:[#allocation1 + $0x28] sm:$0xff pattern:$0x75316420]  ;;  %v1270_v42 = vld.sshfl [vmem:[#allocation1 + $0x20] sm:$0xff pattern:$0x75316420] }
 0x1b6   : > { %1277 = vst [vmem:[#allocation1 + $0x20] ss:$2 sm:$0xff] %v4809_v21  ;;  %v1279_v58 = vld.sshfl [vmem:[#allocation1 + $0x10] sm:$0xff pattern:$0x75316420] }
 0x1b7   : > { %1314 = vrot.lane.b32.xlu0 %v4894_v29, %s4435_s18  ;;  %1322 = vrot.lane.b32.xlu1 %v1251_v55, %s4435_s18  ;;  %v1280_v60 = vld.sshfl [vmem:[#allocation1 + $0x18] sm:$0xff pattern:$0x75316420]  ;;  %v1515_v14 = vld.sshfl [vmem:[#allocation1] sm:$0xff pattern:$0x75316420] }
 0x1b8   : > { %1512 = vst [vmem:[#allocation1 + $0x11] ss:$2 sm:$0xff] %v4822_v1 }
 0x1b9   : > { %v1019_v20 = vpop.permute.xlu0 %1018  ;;  %v1027_v23 = vpop.permute.xlu1 %1026 }
 0x1ba   : > { %v1083_v16 = vsel %vm1072_vm2, %v1017_v46, %v1019_v20  ;;  %v1084_v24 = vsel %vm1072_vm2, %v1019_v20, %v1021_v12  ;;  %v1087_v25 = vsel %vm1072_vm2, %v1027_v23, %v1029_v5  ;;  %v4972_v12 = vld.sshfl [vmem:[#allocation1 + $0x8] sm:$0xff pattern:$0x75316420] }
 0x1bb   : > { %1318 = vrot.lane.b32.xlu2 %v1249_v61, %s4435_s18  ;;  %1147 = vst [vmem:[#allocation2 + $0x4e8] sm:$0xf0] %v1083_v16  ;;  %v1283_v18 = vld.sshfl [vmem:[#allocation1 + $0x30] sm:$0xff pattern:$0x75316420] }
 0x1bc   : > { %1148 = vst [vmem:[#allocation2 + $0x520] sm:$0xf0] %v1084_v24 }
 0x1bd   : > { %v1041_v2 = vpop.permute.xlu2 %1040  ;;  %1151 = vst [vmem:[#allocation2 + $0x408] sm:$0xf0] %v1087_v25 }
 0x1be   : > { %1524 = vst [vmem:[#allocation1 + $0x1] ss:$2 sm:$0xff] %v4848_v53 }
 0x1bf   : > { %1320 = vrot.lane.b32.xlu0 %v1250_v6, %s4435_s18  ;;  %1328 = vrot.lane.b32.xlu1 %v1257_v15, %s4435_s18  ;;  %v1282_v6 = vld.sshfl [vmem:[#allocation1 + $0x28] sm:$0xff pattern:$0x75316420]  ;;  %1521 = vst [vmem:[#allocation1 + $0x31] ss:$2 sm:$0xff] %v4836_v44 }
 0x1c1   : > { %v1025_v27 = vpop.permute.xlu0 %1024  ;;  %v1033_v28 = vpop.permute.xlu1 %1032 }
 0x1c2   : > { %v1085_v29 = vsel %vm1072_vm2, %v1023_v41, %v1025_v27  ;;  %v1086_v33 = vsel %vm1072_vm2, %v1025_v27, %v1027_v23  ;;  %v1089_v34 = vsel %vm1072_vm2, %v1033_v28, %v1035_v47 }
 0x1c3   : > { %1324 = vrot.lane.b32.xlu2 %v1255_v7, %s4435_s18  ;;  %1149 = vst [vmem:[#allocation2 + $0x138] sm:$0xf0] %v1085_v29 }
 0x1c4   : > { %1150 = vst [vmem:[#allocation2 + $0x380] sm:$0xf0] %v1086_v33 }
 0x1c5   : > { %v1047_v40 = vpop.permute.xlu2 %1046  ;;  %1153 = vst [vmem:[#allocation2 + $0x4f8] sm:$0xf0] %v1089_v34  ;;  %v1466_v34 = vld [vmem:[%s4472_s14 + $0x24] sm:$0xf] }
 0x1c6   : > { %v4987_v25 = vld.sshfl [vmem:[#allocation1 + $0x30] sm:$0xff pattern:$0x75316420] }
 0x1c7   : > { %1326 = vrot.lane.b32.xlu0 %v4916_v56, %s4435_s18  ;;  %1334 = vrot.lane.b32.xlu1 %v1261_v8, %s4435_s18 }
 0x1c9   : > { %v1031_v46 = vpop.permute.xlu0 %1030  ;;  %v1039_v3 = vpop.permute.xlu1 %1038 }
 0x1ca   : > { %v1088_v48 = vsel %vm1072_vm2, %v1029_v5, %v1031_v46  ;;  %v1092_v49 = vsel %vm1072_vm2, %v1039_v3, %v1041_v2  ;;  %v1523_v2 = vld.sshfl [vmem:[#allocation1 + $0x38] sm:$0xff pattern:$0x75316420] }
 0x1cb   : > { %1330 = vrot.lane.b32.xlu2 %v1258_v19, %s4435_s18  ;;  %1152 = vst [vmem:[#allocation2 + $0x5a0] sm:$0xf0] %v1088_v48 }
 0x1cc   : > { %1156 = vst [vmem:[#allocation2 + $0x558] sm:$0xf0] %v1092_v49 }
 0x1cd   : > { %v1053_v50 = vpop.permute.xlu2 %1052  ;;  %1530 = vst [vmem:[#allocation1 + $0x31] ss:$2 sm:$0xff] %v4872_v17 }
 0x1cf   : > { %1332 = vrot.lane.b32.xlu0 %v1259_v35, %s4435_s18  ;;  %1340 = vrot.lane.b32.xlu1 %v1266_v36, %s4435_s18  ;;  %v1517_v36 = vld.sshfl [vmem:[#allocation1 + $0x10] sm:$0xff pattern:$0x75316420] }
 0x1d1   : > { %v1037_v52 = vpop.permute.xlu0 %1036  ;;  %v1045_v41 = vpop.permute.xlu1 %1044 }
 0x1d2   : > { %v1090_v55 = vsel %vm1072_vm2, %v1035_v47, %v1037_v52  ;;  %v1091_v7 = vsel %vm1072_vm2, %v1037_v52, %v1039_v3  ;;  %v1094_v56 = vsel %vm1072_vm2, %v1045_v41, %v1047_v40 }
 0x1d3   : > { %1336 = vrot.lane.b32.xlu2 %v4928_v4, %s4435_s18  ;;  %1154 = vst [vmem:[#allocation2 + $0x450] sm:$0xf0] %v1090_v55  ;;  %v1281_v4 = vld.sshfl [vmem:[#allocation1 + $0x20] sm:$0xff pattern:$0x75316420] }
 0x1d4   : > { %1155 = vst [vmem:[#allocation2 + $0xc8] sm:$0xf0] %v1091_v7 }
 0x1d5   : > { %v1059_v59 = vpop.permute.xlu2 %1058  ;;  %1158 = vst [vmem:[#allocation2 + $0xe0] sm:$0xf0] %v1094_v56  ;;  %v1469_v56 = vld [vmem:[%s4472_s14 + $0x38] sm:$0xf] }
 0x1d6   : > { %1514 = vst [vmem:[#allocation1 + $0x21] ss:$2 sm:$0xff] %v1463_v10 }
 0x1d7   : > { %1338 = vrot.lane.b32.xlu0 %v1265_v39, %s4435_s18  ;;  %1346 = vrot.lane.b32.xlu1 %v1271_v13, %s4435_s18  ;;  %v1518_v39 = vld.sshfl [vmem:[#allocation1 + $0x18] sm:$0xff pattern:$0x75316420] }
 0x1d8   : > { %1525 = vst [vmem:[#allocation1 + $0x11] ss:$2 sm:$0xff] %v1466_v34 }
 0x1d9   : > { %v1043_v61 = vpop.permute.xlu0 %1042  ;;  %v1051_v5 = vpop.permute.xlu1 %1050 }
 0x1da   : > { %v1093_v8 = vsel %vm1072_vm2, %v1043_v61, %v1045_v41 }
 0x1db   : > { %1342 = vrot.lane.b32.xlu2 %v1267_v26, %s4435_s18  ;;  %1157 = vst [vmem:[#allocation2 + $0x5c8] sm:$0xf0] %v1093_v8  ;;  %v1534_v8 = vld.sshfl [vmem:[#allocation1 + $0x38] sm:$0xff pattern:$0x75316420] }
 0x1dd   : > { %v1065_v15 = vpop.permute.xlu2 %1064  ;;  %v4982_v24 = vld.sshfl [vmem:[#allocation1 + $0x20] sm:$0xff pattern:$0x75316420] }
 0x1de   : > { %1529 = vst [vmem:[#allocation1 + $0x21] ss:$2 sm:$0xff] %v4863_v62 }
 0x1df   : > { %1344 = vrot.lane.b32.xlu0 %v1270_v42, %s4435_s18  ;;  %1352 = vrot.lane.b32.xlu1 %v1275_v51, %s4435_s18  ;;  %v1528_v48 = vld.sshfl [vmem:[#allocation1 + $0x10] sm:$0xff pattern:$0x75316420] }
 0x1e0   : > { %1537 = vst [vmem:[#allocation1 + $0x11] ss:$2 sm:$0xff] %v4725_v63  ;;  %v1526_v63 = vld.sshfl [vmem:[#allocation1] sm:$0xff pattern:$0x75316420] }
 0x1e1   : > { %v1049_v19 = vpop.permute.xlu0 %1048  ;;  %v1057_v47 = vpop.permute.xlu1 %1056 }
 0x1e2   : > { %v1095_v35 = vsel %vm1072_vm2, %v1047_v40, %v1049_v19  ;;  %v1096_v20 = vsel %vm1072_vm2, %v1049_v19, %v1051_v5  ;;  %v1099_v23 = vsel %vm1072_vm2, %v1057_v47, %v1059_v59  ;;  %v1533_v5 = vld.sshfl [vmem:[#allocation1 + $0x30] sm:$0xff pattern:$0x75316420] }
 0x1e3   : > { %1348 = vrot.lane.b32.xlu2 %v1272_v38, %s4435_s18  ;;  %1159 = vst [vmem:[#allocation2 + $0x598] sm:$0xf0] %v1095_v35  ;;  %v1527_v38 = vld.sshfl [vmem:[#allocation1 + $0x8] sm:$0xff pattern:$0x75316420] }
 0x1e4   : > { %1160 = vst [vmem:[#allocation2 + $0x288] sm:$0xf0] %v1096_v20 }
 0x1e5   : > { %v1071_v16 = vpop.permute.xlu2 %1070  ;;  %1163 = vst [vmem:[#allocation2 + $0x588] sm:$0xf0] %v1099_v23  ;;  %v1531_v49 = vld.sshfl [vmem:[#allocation1 + $0x20] sm:$0xff pattern:$0x75316420] }
 0x1e6   : > { %1535 = vst [vmem:[#allocation1 + $0x1] ss:$2 sm:$0xff] %v1469_v56 }
 0x1e7   : > { %1350 = vrot.lane.b32.xlu0 %v1273_v22, %s4435_s18  ;;  %1358 = vrot.lane.b32.xlu1 %v1281_v4, %s4435_s18 }
 0x1e9   : > { %v1055_v26 = vpop.permute.xlu0 %1054  ;;  %v1063_v27 = vpop.permute.xlu1 %1062 }
 0x1ea   : > { %v1097_v28 = vsel %vm1072_vm2, %v1053_v50, %v1055_v26  ;;  %v1098_v29 = vsel %vm1072_vm2, %v1055_v26, %v1057_v47  ;;  %v1101_v33 = vsel %vm1072_vm2, %v1063_v27, %v1065_v15  ;;  %v5000_v50 = vld.sshfl [vmem:[#allocation1 + $0x28] sm:$0xff pattern:$0x75316420] }
 0x1eb   : > { %1354 = vrot.lane.b32.xlu2 %v1279_v58, %s4435_s18  ;;  %1161 = vst [vmem:[#allocation2 + $0x2e0] sm:$0xf0] %v1097_v28  ;;  %v1540_v58 = vld.sshfl [vmem:[#allocation1 + $0x10] sm:$0xff pattern:$0x75316420] }
 0x1ec   : > { %1162 = vst [vmem:[#allocation2 + $0x5d8] sm:$0xf0] %v1098_v29 }
 0x1ed   : > { %v1289_v37 = vpop.permute.xlu2 %1288  ;;  %1165 = vst [vmem:[#allocation2 + $0xf8] sm:$0xf0] %v1101_v33  ;;  %v1536_v10 = vld.sshfl [vmem:[#allocation1] sm:$0xff pattern:$0x75316420] }
 0x1ee   : > { %1538 = vst [vmem:[#allocation1 + $0x21] ss:$2 sm:$0xff] %v4889_v31 }
 0x1ef   : > { %1356 = vrot.lane.b32.xlu0 %v1280_v60, %s4435_s18  ;;  %1577 = vrot.lane.b32.xlu1 %v1515_v14, %s4436_s19  ;;  %1545 = vst [vmem:[#allocation1 + $0x1] ss:$2 sm:$0xff] %v4905_v45 }
 0x1f1   : > { %v1061_v40 = vpop.permute.xlu0 %1060  ;;  %v1069_v13 = vpop.permute.xlu1 %1068 }
 0x1f2   : > { %v1100_v42 = vsel %vm1072_vm2, %v1059_v59, %v1061_v40  ;;  %v1104_v46 = vsel %vm1072_vm2, %v1069_v13, %v1071_v16  ;;  %v5012_v59 = vld.sshfl [vmem:[#allocation1 + $0x18] sm:$0xff pattern:$0x75316420] }
 0x1f3   : > { %1360 = vrot.lane.b32.xlu2 %v1282_v6, %s4435_s18  ;;  %1164 = vst [vmem:[#allocation2 + $0x2b0] sm:$0xf0] %v1100_v42  ;;  %v1472_v6 = vld [vmem:[%s4472_s14 + $0x4c] sm:$0xf] }
 0x1f4   : > { %1168 = vst [vmem:[#allocation2 + $0x4a0] sm:$0xf0] %v1104_v46 }
 0x1f5   : > { %v1295_v3 = vpop.permute.xlu2 %1294  ;;  %1546 = vst [vmem:[#allocation1 + $0x11] ss:$2 sm:$0xff] %v4751_v30  ;;  %v1542_v26 = vld.sshfl [vmem:[#allocation1 + $0x20] sm:$0xff pattern:$0x75316420] }
 0x1f6   : > { %1539 = vst [vmem:[#allocation1 + $0x31] ss:$2 sm:$0xff] %v1472_v6  ;;  %v1549_v27 = vld.sshfl [vmem:[#allocation1 + $0x8] sm:$0xff pattern:$0x75316420] }
 0x1f7   : > { %1362 = vrot.lane.b32.xlu0 %v1283_v18, %s4435_s18  ;;  %1583 = vrot.lane.b32.xlu1 %v1518_v39, %s4436_s19  ;;  %v1548_v28 = vld.sshfl [vmem:[#allocation1] sm:$0xff pattern:$0x75316420] }
 0x1f8   : > { %1556 = vst [vmem:[#allocation1 + $0x1] ss:$2 sm:$0xff] %v4767_v0 }
 0x1f9   : > { %v1067_v51 = vpop.permute.xlu0 %1066  ;;  %v1287_v52 = vpop.permute.xlu1 %1286 }
 0x1fa   : > { %v1102_v41 = vsel %vm1072_vm2, %v1065_v15, %v1067_v51  ;;  %v1103_v55 = vsel %vm1072_vm2, %v1067_v51, %v1069_v13  ;;  %v1366_v7 = vsel %vm1364_vm3, %v1287_v52, %v1289_v37 }
 0x1fb   : > { %1579 = vrot.lane.b32.xlu2 %v4972_v12, %s4436_s19  ;;  %1166 = vst [vmem:[#allocation2 + $0x68] sm:$0xf0] %v1102_v41 }
 0x1fc   : > { %1167 = vst [vmem:[#allocation2 + $0x168] sm:$0xf0] %v1103_v55  ;;  %v1551_v51 = vld.sshfl [vmem:[#allocation1 + $0x18] sm:$0xff pattern:$0x75316420] }
 0x1fd   : > { %v1301_v57 = vpop.permute.xlu2 %1300  ;;  %1430 = vst [vmem:[#allocation2 + $0x280] sm:$0xf] %v1366_v7  ;;  %v1544_v47 = vld.sshfl [vmem:[#allocation1 + $0x30] sm:$0xff pattern:$0x75316420] }
 0x1fe   : > { %1553 = vst [vmem:[#allocation1 + $0x31] ss:$2 sm:$0xff] %v4764_v43  ;;  %v1481_v7 = vld [vmem:[%s4472_s14 + $0x88] sm:$0xf] }
 0x1ff   : > { %1581 = vrot.lane.b32.xlu0 %v1517_v36, %s4436_s19  ;;  %1589 = vrot.lane.b32.xlu1 %v1523_v2, %s4436_s19  ;;  %v1475_v2 = vld [vmem:[%s4472_s14 + $0x60] sm:$0xf]  ;;  %v1559_v55 = vld.sshfl [vmem:[#allocation1 + $0x8] sm:$0xff pattern:$0x75316420] }
 0x201   : > { %v1285_v22 = vpop.permute.xlu0 %1284  ;;  %v1293_v60 = vpop.permute.xlu1 %1292 }
 0x202   : > { %v1365_v61 = vsel %vm1364_vm3, %v1285_v22, %v1287_v52 }
 0x203   : > { %1585 = vrot.lane.b32.xlu2 %v4982_v24, %s4436_s19  ;;  %1429 = vst [vmem:[#allocation2 + $0x530] sm:$0xf] %v1365_v61 }
 0x205   : > { %v1307_v4 = vpop.permute.xlu2 %1306  ;;  %v5044_v39 = vld.sshfl [vmem:[#allocation1 + $0x30] sm:$0xff pattern:$0x75316420]  ;;  %v5046_v13 = vld.sshfl [vmem:[#allocation1 + $0x38] sm:$0xff pattern:$0x75316420] }
 0x206   : > { %1562 = vst [vmem:[#allocation1 + $0x31] ss:$2 sm:$0xff] %v4788_v11 }
 0x207   : > { %1587 = vrot.lane.b32.xlu0 %v4987_v25, %s4436_s19  ;;  %1595 = vrot.lane.b32.xlu1 %v1528_v48, %s4436_s19  ;;  %v1543_v25 = vld.sshfl [vmem:[#allocation1 + $0x28] sm:$0xff pattern:$0x75316420] }
 0x208   : > { %1547 = vst [vmem:[#allocation1 + $0x21] ss:$2 sm:$0xff] %v1475_v2 }
 0x209   : > { %v1291_v30 = vpop.permute.xlu0 %1290  ;;  %v1299_v12 = vpop.permute.xlu1 %1298 }
 0x20a   : > { %v1367_v14 = vsel %vm1364_vm3, %v1289_v37, %v1291_v30  ;;  %v1368_v15 = vsel %vm1364_vm3, %v1291_v30, %v1293_v60  ;;  %v1371_v18 = vsel %vm1364_vm3, %v1299_v12, %v1301_v57 }
 0x20b   : > { %1591 = vrot.lane.b32.xlu2 %v1526_v63, %s4436_s19  ;;  %1431 = vst [vmem:[#allocation2 + $0x158] sm:$0xf] %v1367_v14  ;;  %v1558_v63 = vld.sshfl [vmem:[#allocation1] sm:$0xff pattern:$0x75316420] }
 0x20c   : > { %1432 = vst [vmem:[#allocation2 + $0x550] sm:$0xf] %v1368_v15 }
 0x20d   : > { %v1313_v19 = vpop.permute.xlu2 %1312  ;;  %1435 = vst [vmem:[#allocation2 + $0x300] sm:$0xf] %v1371_v18  ;;  %v1565_v15 = vld.sshfl [vmem:[#allocation1 + $0x30] sm:$0xff pattern:$0x75316420] }
 0x20e   : > { %1567 = vst [vmem:[#allocation1 + $0x1] ss:$2 sm:$0xff] %v1481_v7  ;;  %v5123_v7 = vld [vmem:[%s4472_s14 + $0x3c] sm:$0xff] }
 0x20f   : > { %1593 = vrot.lane.b32.xlu0 %v1527_v38, %s4436_s19  ;;  %1601 = vrot.lane.b32.xlu1 %v1533_v5, %s4436_s19  ;;  %v1552_v40 = vld.sshfl [vmem:[#allocation1 + $0x20] sm:$0xff pattern:$0x75316420] }
 0x210   : > { %1561 = vst [vmem:[#allocation1 + $0x21] ss:$2 sm:$0xff] %v4779_v54  ;;  %v1478_v54 = vld [vmem:[%s4472_s14 + $0x74] sm:$0xf] }
 0x211   : > { %v1297_v35 = vpop.permute.xlu0 %1296  ;;  %v1305_v20 = vpop.permute.xlu1 %1304 }
 0x212   : > { %v1369_v23 = vsel %vm1364_vm3, %v1295_v3, %v1297_v35  ;;  %v1370_v16 = vsel %vm1364_vm3, %v1297_v35, %v1299_v12  ;;  %v1373_v24 = vsel %vm1364_vm3, %v1305_v20, %v1307_v4 }
 0x213   : > { %1597 = vrot.lane.b32.xlu2 %v1531_v49, %s4436_s19  ;;  %1433 = vst [vmem:[#allocation2 + $0x240] sm:$0xf] %v1369_v23  ;;  %v1550_v49 = vld.sshfl [vmem:[#allocation1 + $0x10] sm:$0xff pattern:$0x75316420] }
 0x214   : > { %1434 = vst [vmem:[#allocation2 + $0x40] sm:$0xf] %v1370_v16 }
 0x215   : > { %v1319_v43 = vpop.permute.xlu2 %1318  ;;  %1437 = vst [vmem:[#allocation2 + $0x458] sm:$0xf] %v1373_v24 }
 0x216   : > { %1557 = vst [vmem:[#allocation1 + $0x11] ss:$2 sm:$0xff] %v1478_v54 }
 0x217   : > { %1599 = vrot.lane.b32.xlu0 %v5000_v50, %s4436_s19  ;;  %1607 = vrot.lane.b32.xlu1 %v1540_v58, %s4436_s19  ;;  %v1563_v58 = vld.sshfl [vmem:[#allocation1 + $0x20] sm:$0xff pattern:$0x75316420] }
 0x219   : > { %v1303_v29 = vpop.permute.xlu0 %1302  ;;  %v1311_v33 = vpop.permute.xlu1 %1310 }
 0x21a   : > { %v1372_v34 = vsel %vm1364_vm3, %v1301_v57, %v1303_v29  ;;  %v1376_v36 = vsel %vm1364_vm3, %v1311_v33, %v1313_v19  ;;  %v1564_v57 = vld.sshfl [vmem:[#allocation1 + $0x28] sm:$0xff pattern:$0x75316420]  ;;  %v1566_v19 = vld.sshfl [vmem:[#allocation1 + $0x38] sm:$0xff pattern:$0x75316420] }
 0x21b   : > { %1603 = vrot.lane.b32.xlu2 %v1534_v8, %s4436_s19  ;;  %1436 = vst [vmem:[#allocation2 + $0x460] sm:$0xf] %v1372_v34  ;;  %v1756_v29 = vld [vmem:[%s4472_s14 + $0x10] sm:$0xf] }
 0x21c   : > { %1440 = vst [vmem:[#allocation2 + $0x1d8] sm:$0xf] %v1376_v36 }
 0x21d   : > { %v1325_v37 = vpop.permute.xlu2 %1324  ;;  %v1560_v38 = vld.sshfl [vmem:[#allocation1 + $0x10] sm:$0xff pattern:$0x75316420]  ;;  %1570 = vst [vmem:[#allocation1 + $0x21] ss:$2 sm:$0xff] %v4809_v21 }
 0x21e   : > { %1569 = vst [vmem:[#allocation1 + $0x11] ss:$2 sm:$0xff] %v4799_v9  ;;  %v1568_v9 = vld.sshfl [vmem:[#allocation1] sm:$0xff pattern:$0x75316420] }
 0x21f   : > { %1605 = vrot.lane.b32.xlu0 %v1536_v10, %s4436_s19  ;;  %1613 = vrot.lane.b32.xlu1 %v1543_v25, %s4436_s19  ;;  %1802 = vst [vmem:[#allocation1] ss:$2 sm:$0xff] %v4825_v32  ;;  %v1484_v32 = vld [vmem:[%s4472_s14 + $0x9c] sm:$0xf] }
 0x220   : > { %1571 = vst [vmem:[#allocation1 + $0x31] ss:$2 sm:$0xff] %v1484_v32 }
 0x221   : > { %v1309_v0 = vpop.permute.xlu0 %1308  ;;  %v1317_v42 = vpop.permute.xlu1 %1316 }
 0x222   : > { %v1374_v46 = vsel %vm1364_vm3, %v1307_v4, %v1309_v0  ;;  %v1375_v3 = vsel %vm1364_vm3, %v1309_v0, %v1311_v33  ;;  %v1378_v48 = vsel %vm1364_vm3, %v1317_v42, %v1319_v43  ;;  %v1759_v0 = vld [vmem:[%s4472_s14 + $0x24] sm:$0xf] }
 0x223   : > { %1609 = vrot.lane.b32.xlu2 %v5012_v59, %s4436_s19  ;;  %1438 = vst [vmem:[#allocation2 + $0x70] sm:$0xf] %v1374_v46 }
 0x224   : > { %1439 = vst [vmem:[#allocation2 + $0x568] sm:$0xf] %v1375_v3  ;;  %v1575_v34 = vld.sshfl [vmem:[#allocation1 + $0x28] sm:$0xff pattern:$0x75316420] }
 0x225   : > { %v1331_v50 = vpop.permute.xlu2 %1330  ;;  %1442 = vst [vmem:[#allocation2 + $0x5c0] sm:$0xf] %v1378_v48  ;;  %v5074_v21 = vld.sshfl [vmem:[#allocation1 + $0x10] sm:$0xff pattern:$0x75316420] }
 0x226   : > { %v1573_v8 = vld.sshfl [vmem:[#allocation1 + $0x18] sm:$0xff pattern:$0x75316420]  ;;  %v1807_v24 = vld.sshfl [vmem:[#allocation1] sm:$0xff pattern:$0x75316420] }
 0x227   : > { %1611 = vrot.lane.b32.xlu0 %v1542_v26, %s4436_s19  ;;  %1619 = vrot.lane.b32.xlu1 %v1549_v27, %s4436_s19  ;;  %1804 = vst [vmem:[#allocation1 + $0x10] ss:$2 sm:$0xff] %v4822_v1  ;;  %v1576_v16 = vld.sshfl [vmem:[#allocation1 + $0x30] sm:$0xff pattern:$0x75316420] }
 0x228   : > { %v5089_v25 = vld.sshfl [vmem:[#allocation1 + $0x8] sm:$0xff pattern:$0x75316420]  ;;  %1813 = vst [vmem:[#allocation1 + $0x30] ss:$2 sm:$0xff] %v4836_v44 }
 0x229   : > { %v1315_v11 = vpop.permute.xlu0 %1314  ;;  %v1323_v52 = vpop.permute.xlu1 %1322  ;;  %1816 = vst [vmem:[#allocation1] ss:$2 sm:$0xff] %v4848_v53  ;;  %v1574_v44 = vld.sshfl [vmem:[#allocation1 + $0x20] sm:$0xff pattern:$0x75316420] }
 0x22a   : > { %v1377_v41 = vsel %vm1364_vm3, %v1315_v11, %v1317_v42  ;;  %1806 = vst [vmem:[#allocation1 + $0x20] ss:$2 sm:$0xff] %v1756_v29 }
 0x22b   : > { %1615 = vrot.lane.b32.xlu2 %v1544_v47, %s4436_s19  ;;  %1441 = vst [vmem:[#allocation2 + $0x180] sm:$0xf] %v1377_v41 }
 0x22d   : > { %v1337_v56 = vpop.permute.xlu2 %1336 }
 0x22e   : > { %v1810_v42 = vld.sshfl [vmem:[#allocation1 + $0x18] sm:$0xff pattern:$0x75316420] }
 0x22f   : > { %1617 = vrot.lane.b32.xlu0 %v1548_v28, %s4436_s19  ;;  %1625 = vrot.lane.b32.xlu1 %v1552_v40, %s4436_s19  ;;  %v1814_v53 = vld.sshfl [vmem:[#allocation1 + $0x30] sm:$0xff pattern:$0x75316420]  ;;  %v5102_v36 = vld.sshfl [vmem:[#allocation1 + $0x38] sm:$0xff pattern:$0x75316420] }
 0x230   : > { %1822 = vst [vmem:[#allocation1 + $0x30] ss:$2 sm:$0xff] %v4872_v17 }
 0x231   : > { %v1321_v59 = vpop.permute.xlu0 %1320  ;;  %v1329_v22 = vpop.permute.xlu1 %1328  ;;  %v1811_v3 = vld.sshfl [vmem:[#allocation1 + $0x20] sm:$0xff pattern:$0x75316420] }
 0x232   : > { %v1379_v60 = vsel %vm1364_vm3, %v1319_v43, %v1321_v59  ;;  %v1380_v61 = vsel %vm1364_vm3, %v1321_v59, %v1323_v52  ;;  %v1383_v5 = vsel %vm1364_vm3, %v1329_v22, %v1331_v50  ;;  %1821 = vst [vmem:[#allocation1 + $0x20] ss:$2 sm:$0xff] %v4863_v62 }
 0x233   : > { %1621 = vrot.lane.b32.xlu2 %v1550_v49, %s4436_s19  ;;  %1443 = vst [vmem:[#allocation2 + $0x338] sm:$0xf] %v1379_v60 }
 0x234   : > { %1444 = vst [vmem:[#allocation2 + $0x230] sm:$0xf] %v1380_v61 }
 0x235   : > { %v1343_v6 = vpop.permute.xlu2 %1342  ;;  %1447 = vst [vmem:[#allocation2 + $0x1e0] sm:$0xf] %v1383_v5 }
 0x237   : > { %1623 = vrot.lane.b32.xlu0 %v1551_v51, %s4436_s19  ;;  %1631 = vrot.lane.b32.xlu1 %v1558_v63, %s4436_s19  ;;  %v1819_v63 = vld.sshfl [vmem:[#allocation1 + $0x8] sm:$0xff pattern:$0x75316420] }
 0x239   : > { %v1327_v4 = vpop.permute.xlu0 %1326  ;;  %v1335_v10 = vpop.permute.xlu1 %1334  ;;  %v1824_v59 = vld.sshfl [vmem:[#allocation1 + $0x28] sm:$0xff pattern:$0x75316420] }
 0x23a   : > { %v1381_v30 = vsel %vm1364_vm3, %v1325_v37, %v1327_v4  ;;  %v1382_v12 = vsel %vm1364_vm3, %v1327_v4, %v1329_v22  ;;  %v1385_v14 = vsel %vm1364_vm3, %v1335_v10, %v1337_v56  ;;  %v1823_v22 = vld.sshfl [vmem:[#allocation1 + $0x20] sm:$0xff pattern:$0x75316420] }
 0x23b   : > { %1627 = vrot.lane.b32.xlu2 %v5044_v39, %s4436_s19  ;;  %1445 = vst [vmem:[#allocation2 + $0x98] sm:$0xf] %v1381_v30 }
 0x23c   : > { %1446 = vst [vmem:[#allocation2 + $0x528] sm:$0xf] %v1382_v12  ;;  %v1765_v12 = vld [vmem:[%s4472_s14 + $0x4c] sm:$0xf] }
 0x23d   : > { %v1349_v18 = vpop.permute.xlu2 %1348  ;;  %1449 = vst [vmem:[#allocation2 + $0x438] sm:$0xf] %v1385_v14  ;;  %v1825_v14 = vld.sshfl [vmem:[#allocation1 + $0x30] sm:$0xff pattern:$0x75316420] }
 0x23e   : > { %1830 = vst [vmem:[#allocation1 + $0x20] ss:$2 sm:$0xff] %v4889_v31 }
 0x23f   : > { %1629 = vrot.lane.b32.xlu0 %v5046_v13, %s4436_s19  ;;  %1637 = vrot.lane.b32.xlu1 %v1563_v58, %s4436_s19  ;;  %v1809_v13 = vld.sshfl [vmem:[#allocation1 + $0x10] sm:$0xff pattern:$0x75316420] }
 0x240   : > { %1817 = vst [vmem:[#allocation1 + $0x10] ss:$2 sm:$0xff] %v1759_v0  ;;  %v1771_v0 = vld [vmem:[%s4472_s14 + $0x74] sm:$0xf] }
 0x241   : > { %v1333_v1 = vpop.permute.xlu0 %1332  ;;  %v1341_v47 = vpop.permute.xlu1 %1340 }
 0x242   : > { %v1384_v35 = vsel %vm1364_vm3, %v1331_v50, %v1333_v1  ;;  %v1388_v20 = vsel %vm1364_vm3, %v1341_v47, %v1343_v6 }
 0x243   : > { %1633 = vrot.lane.b32.xlu2 %v1559_v55, %s4436_s19  ;;  %1448 = vst [vmem:[#allocation2 + $0x2a0] sm:$0xf] %v1384_v35  ;;  %v5149_v35 = vld [vmem:[%s4472_s14 + $0x58] sm:$0xff] }
 0x244   : > { %1452 = vst [vmem:[#allocation2 + $0x420] sm:$0xf] %v1388_v20  ;;  %v1768_v20 = vld [vmem:[%s4472_s14 + $0x60] sm:$0xf] }
 0x245   : > { %v1355_v23 = vpop.permute.xlu2 %1354 }
 0x247   : > { %1635 = vrot.lane.b32.xlu0 %v1560_v38, %s4436_s19  ;;  %1643 = vrot.lane.b32.xlu1 %v1566_v19, %s4436_s19  ;;  %v1762_v38 = vld [vmem:[%s4472_s14 + $0x38] sm:$0xf]  ;;  %v1820_v58 = vld.sshfl [vmem:[#allocation1 + $0x10] sm:$0xff pattern:$0x75316420] }
 0x248   : > { %1829 = vst [vmem:[#allocation1 + $0x10] ss:$2 sm:$0xff] %v5123_v7 }
 0x249   : > { %v1339_v2 = vpop.permute.xlu0 %1338  ;;  %v1347_v26 = vpop.permute.xlu1 %1346 }
 0x24a   : > { %v1386_v43 = vsel %vm1364_vm3, %v1337_v56, %v1339_v2  ;;  %v1387_v27 = vsel %vm1364_vm3, %v1339_v2, %v1341_v47  ;;  %v1390_v28 = vsel %vm1364_vm3, %v1347_v26, %v1349_v18  ;;  %v1818_v56 = vld.sshfl [vmem:[#allocation1] sm:$0xff pattern:$0x75316420]  ;;  %v1835_v47 = vld.sshfl [vmem:[#allocation1 + $0x28] sm:$0xff pattern:$0x75316420] }
 0x24b   : > { %1639 = vrot.lane.b32.xlu2 %v1564_v57, %s4436_s19  ;;  %1450 = vst [vmem:[#allocation2 + $0x170] sm:$0xf] %v1386_v43 }
 0x24c   : > { %1451 = vst [vmem:[#allocation2 + $0x570] sm:$0xf] %v1387_v27 }
 0x24d   : > { %v1361_v33 = vpop.permute.xlu2 %1360  ;;  %1454 = vst [vmem:[#allocation2 + $0x4c8] sm:$0xf] %v1390_v28  ;;  %v5162_v28 = vld [vmem:[%s4472_s14 + $0x64] sm:$0xff] }
 0x24e   : > { %1827 = vst [vmem:[#allocation1] ss:$2 sm:$0xff] %v1762_v38 }
 0x24f   : > { %1641 = vrot.lane.b32.xlu0 %v1565_v15, %s4436_s19  ;;  %1649 = vrot.lane.b32.xlu1 %v1573_v8, %s4436_s19  ;;  %v1832_v19 = vld.sshfl [vmem:[#allocation1 + $0x10] sm:$0xff pattern:$0x75316420] }
 0x251   : > { %v1345_v37 = vpop.permute.xlu0 %1344  ;;  %v1353_v39 = vpop.permute.xlu1 %1352 }
 0x252   : > { %v1389_v40 = vsel %vm1364_vm3, %v1345_v37, %v1347_v26 }
 0x253   : > { %1645 = vrot.lane.b32.xlu2 %v1568_v9, %s4436_s19  ;;  %1453 = vst [vmem:[#allocation2 + $0x2c0] sm:$0xf] %v1389_v40 }
 0x255   : > { %v1580_v46 = vpop.permute.xlu2 %1579 }
 0x257   : > { %1647 = vrot.lane.b32.xlu0 %v5074_v21, %s4436_s19  ;;  %1655 = vrot.lane.b32.xlu1 %v1576_v16, %s4436_s19  ;;  %v1828_v21 = vld.sshfl [vmem:[#allocation1] sm:$0xff pattern:$0x75316420] }
 0x258   : > { %1837 = vst [vmem:[#allocation1] ss:$2 sm:$0xff] %v4905_v45  ;;  %v1826_v45 = vld.sshfl [vmem:[#allocation1 + $0x38] sm:$0xff pattern:$0x75316420] }
 0x259   : > { %v1351_v17 = vpop.permute.xlu0 %1350  ;;  %v1359_v48 = vpop.permute.xlu1 %1358  ;;  %1831 = vst [vmem:[#allocation1 + $0x30] ss:$2 sm:$0xff] %v1765_v12  ;;  %v1834_v16 = vld.sshfl [vmem:[#allocation1 + $0x20] sm:$0xff pattern:$0x75316420] }
 0x25a   : > { %v1391_v54 = vsel %vm1364_vm3, %v1349_v18, %v1351_v17  ;;  %v1392_v49 = vsel %vm1364_vm3, %v1351_v17, %v1353_v39  ;;  %v1395_v50 = vsel %vm1364_vm3, %v1359_v48, %v1361_v33  ;;  %1839 = vst [vmem:[#allocation1 + $0x20] ss:$2 sm:$0xff] %v1768_v20  ;;  %v5223_v20 = vld [vmem:[%s4472_s14] sm:$0xff] }
 0x25b   : > { %1651 = vrot.lane.b32.xlu2 %v1574_v44, %s4436_s19  ;;  %1455 = vst [vmem:[#allocation2 + $0x4b0] sm:$0xf] %v1391_v54  ;;  %v5165_v44 = vld [vmem:[%s4472_s14 + $0x6c] sm:$0xff] }
 0x25c   : > { %1456 = vst [vmem:[#allocation2 + $0x5d0] sm:$0xf] %v1392_v49 }
 0x25d   : > { %v1586_v51 = vpop.permute.xlu2 %1585  ;;  %1459 = vst [vmem:[#allocation2 + $0x2c8] sm:$0xf] %v1395_v50 }
 0x25f   : > { %1653 = vrot.lane.b32.xlu0 %v1575_v34, %s4436_s19  ;;  %1873 = vrot.lane.b32.xlu1 %v1809_v13, %s4437_s20  ;;  %v1841_v29 = vld.sshfl [vmem:[#allocation1 + $0x8] sm:$0xff pattern:$0x75316420] }
 0x260   : > { %v1836_v34 = vld.sshfl [vmem:[#allocation1 + $0x30] sm:$0xff pattern:$0x75316420] }
 0x261   : > { %v1357_v62 = vpop.permute.xlu0 %1356  ;;  %v1578_v11 = vpop.permute.xlu1 %1577  ;;  %1845 = vst [vmem:[#allocation1 + $0x30] ss:$2 sm:$0xff] %v5162_v28 }
 0x262   : > { %v1393_v52 = vsel %vm1364_vm3, %v1355_v23, %v1357_v62  ;;  %v1394_v41 = vsel %vm1364_vm3, %v1357_v62, %v1359_v48  ;;  %v1658_v55 = vsel %vm1657_vm4, %v1578_v11, %v1580_v46  ;;  %v1833_v23 = vld.sshfl [vmem:[#allocation1 + $0x18] sm:$0xff pattern:$0x75316420]  ;;  %v1844_v48 = vld.sshfl [vmem:[#allocation1 + $0x20] sm:$0xff pattern:$0x75316420] }
 0x263   : > { %1869 = vrot.lane.b32.xlu2 %v1807_v24, %s4437_s20  ;;  %1457 = vst [vmem:[#allocation2 + $0x190] sm:$0xf] %v1393_v52  ;;  %v5186_v62 = vld [vmem:[%s4472_s14 + $0x80] sm:$0xff] }
 0x264   : > { %1458 = vst [vmem:[#allocation2 + $0x440] sm:$0xf] %v1394_v41 }
 0x265   : > { %v1592_v57 = vpop.permute.xlu2 %1591  ;;  %1722 = vst [vmem:[#allocation2 + $0x530] sm:$0xf0] %v1658_v55 }
 0x266   : > { %1838 = vst [vmem:[#allocation1 + $0x10] ss:$2 sm:$0xff] %v5149_v35 }
 0x267   : > { %1871 = vrot.lane.b32.xlu0 %v5089_v25, %s4437_s20  ;;  %1879 = vrot.lane.b32.xlu1 %v1814_v53, %s4437_s20  ;;  %v1840_v53 = vld.sshfl [vmem:[#allocation1] sm:$0xff pattern:$0x75316420] }
 0x268   : > { %1848 = vst [vmem:[#allocation1] ss:$2 sm:$0xff] %v5165_v44  ;;  %v1846_v11 = vld.sshfl [vmem:[#allocation1 + $0x30] sm:$0xff pattern:$0x75316420] }
 0x269   : > { %v1363_v60 = vpop.permute.xlu0 %1362  ;;  %v1584_v61 = vpop.permute.xlu1 %1583  ;;  %v1847_v52 = vld.sshfl [vmem:[#allocation1 + $0x38] sm:$0xff pattern:$0x75316420] }
 0x26a   : > { %v1396_v5 = vsel %vm1364_vm3, %v1361_v33, %v1363_v60  ;;  %v1661_v6 = vsel %vm1657_vm4, %v1584_v61, %v1586_v51  ;;  %1854 = vst [vmem:[#allocation1 + $0x30] ss:$2 sm:$0xff] %v5186_v62 }
 0x26b   : > { %1875 = vrot.lane.b32.xlu2 %v1810_v42, %s4437_s20  ;;  %1460 = vst [vmem:[#allocation2 + $0x298] sm:$0xf] %v1396_v5 }
 0x26c   : > { %1725 = vst [vmem:[#allocation2 + $0x550] sm:$0xf0] %v1661_v6 }
 0x26d   : > { %v1598_v9 = vpop.permute.xlu2 %1597  ;;  %v1843_v17 = vld.sshfl [vmem:[#allocation1 + $0x18] sm:$0xff pattern:$0x75316420] }
 0x26f   : > { %1877 = vrot.lane.b32.xlu0 %v1811_v3, %s4437_s20  ;;  %1885 = vrot.lane.b32.xlu1 %v1819_v63, %s4437_s20  ;;  %v1842_v3 = vld.sshfl [vmem:[#allocation1 + $0x10] sm:$0xff pattern:$0x75316420]  ;;  %v1851_v5 = vld.sshfl [vmem:[#allocation1 + $0x8] sm:$0xff pattern:$0x75316420] }
 0x270   : > { %1849 = vst [vmem:[#allocation1 + $0x10] ss:$2 sm:$0xff] %v1771_v0 }
 0x271   : > { %v1582_v31 = vpop.permute.xlu0 %1581  ;;  %v1590_v8 = vpop.permute.xlu1 %1589  ;;  %v1857_v12 = vld.sshfl [vmem:[#allocation1 + $0x30] sm:$0xff pattern:$0x75316420] }
 0x272   : > { %v1659_v4 = vsel %vm1657_vm4, %v1580_v46, %v1582_v31  ;;  %v1660_v10 = vsel %vm1657_vm4, %v1582_v31, %v1584_v61  ;;  %v1663_v30 = vsel %vm1657_vm4, %v1590_v8, %v1592_v57  ;;  %v5177_v46 = vld [vmem:[%s4472_s14 + $0x78] sm:$0xff] }
 0x273   : > { %1881 = vrot.lane.b32.xlu2 %v5102_v36, %s4437_s20  ;;  %1723 = vst [vmem:[#allocation2 + $0x280] sm:$0xf0] %v1659_v4  ;;  %v5207_v4 = vld [vmem:[%s4472_s14 + $0x94] sm:$0xff] }
 0x274   : > { %1724 = vst [vmem:[#allocation2 + $0x158] sm:$0xf0] %v1660_v10  ;;  %v1777_v10 = vld [vmem:[%s4472_s14 + $0x9c] sm:$0xf] }
 0x275   : > { %v5143_v32 = vpop.permute.xlu2 %1603  ;;  %1727 = vst [vmem:[#allocation2 + $0x40] sm:$0xf0] %v1663_v30 }
 0x276   : > { %1853 = vst [vmem:[#allocation1 + $0x20] ss:$2 sm:$0xff] %v5177_v46 }
 0x277   : > { %1883 = vrot.lane.b32.xlu0 %v1818_v56, %s4437_s20  ;;  %1891 = vrot.lane.b32.xlu1 %v1824_v59, %s4437_s20  ;;  %v1850_v59 = vld.sshfl [vmem:[#allocation1] sm:$0xff pattern:$0x75316420]  ;;  %v1852_v61 = vld.sshfl [vmem:[#allocation1 + $0x10] sm:$0xff pattern:$0x75316420] }
 0x279   : > { %v1588_v15 = vpop.permute.xlu0 %1587  ;;  %v1596_v18 = vpop.permute.xlu1 %1595 }
 0x27a   : > { %v1662_v1 = vsel %vm1657_vm4, %v1588_v15, %v1590_v8 }
 0x27b   : > { %1887 = vrot.lane.b32.xlu2 %v1820_v58, %s4437_s20  ;;  %1726 = vst [vmem:[#allocation2 + $0x240] sm:$0xf0] %v1662_v1  ;;  %v5197_v58 = vld [vmem:[%s4472_s14 + $0x8c] sm:$0xff] }
 0x27c   : > { %1861 = vst [vmem:[#allocation1 + $0x10] ss:$2 sm:$0xff] %v5197_v58  ;;  %v5220_v1 = vld [vmem:[%s4472_s14 + $0x8] sm:$0xff] }
 0x27d   : > { %v1610_v24 = vpop.permute.xlu2 %1609  ;;  %v1856_v8 = vld.sshfl [vmem:[#allocation1 + $0x28] sm:$0xff pattern:$0x75316420] }
 0x27f   : > { %1889 = vrot.lane.b32.xlu0 %v1823_v22, %s4437_s20  ;;  %1897 = vrot.lane.b32.xlu1 %v1828_v21, %s4437_s20  ;;  %v1774_v22 = vld [vmem:[%s4472_s14 + $0x88] sm:$0xf]  ;;  %v1855_v21 = vld.sshfl [vmem:[#allocation1 + $0x20] sm:$0xff pattern:$0x75316420] }
 0x280   : > { %1859 = vst [vmem:[#allocation1] ss:$2 sm:$0xff] %v1774_v22 }
 0x281   : > { %v1594_v25 = vpop.permute.xlu0 %1593  ;;  %v1602_v2 = vpop.permute.xlu1 %1601  ;;  %1862 = vst [vmem:[#allocation1 + $0x20] ss:$2 sm:$0xff] %v5207_v4 }
 0x282   : > { %v1664_v26 = vsel %vm1657_vm4, %v1592_v57, %v1594_v25  ;;  %v1665_v43 = vsel %vm1657_vm4, %v1594_v25, %v1596_v18  ;;  %v1668_v27 = vsel %vm1657_vm4, %v1602_v2, %v5143_v32 }
 0x283   : > { %1893 = vrot.lane.b32.xlu2 %v1825_v14, %s4437_s20  ;;  %1728 = vst [vmem:[#allocation2 + $0x300] sm:$0xf0] %v1664_v26  ;;  %v1858_v14 = vld.sshfl [vmem:[#allocation1 + $0x38] sm:$0xff pattern:$0x75316420] }
 0x284   : > { %1729 = vst [vmem:[#allocation2 + $0x460] sm:$0xf0] %v1665_v43 }
 0x285   : > { %v1616_v33 = vpop.permute.xlu2 %1615  ;;  %1732 = vst [vmem:[#allocation2 + $0x568] sm:$0xf0] %v1668_v27 }
 0x286   : > { %1863 = vst [vmem:[#allocation1 + $0x30] ss:$2 sm:$0xff] %v1777_v10 }
 0x287   : > { %1895 = vrot.lane.b32.xlu0 %v1826_v45, %s4437_s20  ;;  %1903 = vrot.lane.b32.xlu1 %v1834_v16, %s4437_s20  ;;  %v1865_v16 = vld.sshfl [vmem:[#allocation1 + $0x18] sm:$0xff pattern:$0x75316420] }
 0x289   : > { %v1600_v36 = vpop.permute.xlu0 %1599  ;;  %v1608_v37 = vpop.permute.xlu1 %1607 }
 0x28a   : > { %v1666_v39 = vsel %vm1657_vm4, %v1598_v9, %v1600_v36  ;;  %v1667_v40 = vsel %vm1657_vm4, %v1600_v36, %v1602_v2  ;;  %v1670_v13 = vsel %vm1657_vm4, %v1608_v37, %v1610_v24  ;;  %v1866_v37 = vld.sshfl [vmem:[#allocation1 + $0x20] sm:$0xff pattern:$0x75316420] }
 0x28b   : > { %1899 = vrot.lane.b32.xlu2 %v1832_v19, %s4437_s20  ;;  %1730 = vst [vmem:[#allocation2 + $0x458] sm:$0xf0] %v1666_v39 }
 0x28c   : > { %1731 = vst [vmem:[#allocation2 + $0x70] sm:$0xf0] %v1667_v40 }
 0x28d   : > { %v1622_v42 = vpop.permute.xlu2 %1621  ;;  %1734 = vst [vmem:[#allocation2 + $0x180] sm:$0xf0] %v1670_v13  ;;  %v1868_v36 = vld.sshfl [vmem:[#allocation1 + $0x30] sm:$0xff pattern:$0x75316420] }
 0x28f   : > { %1901 = vrot.lane.b32.xlu0 %v1833_v23, %s4437_s20  ;;  %1909 = vrot.lane.b32.xlu1 %v1840_v53, %s4437_s20  ;;  %v1867_v53 = vld.sshfl [vmem:[#allocation1 + $0x28] sm:$0xff pattern:$0x75316420] }
 0x291   : > { %v1606_v54 = vpop.permute.xlu0 %1605  ;;  %v1614_v49 = vpop.permute.xlu1 %1613 }
 0x292   : > { %v1669_v50 = vsel %vm1657_vm4, %v5143_v32, %v1606_v54  ;;  %v1673_v51 = vsel %vm1657_vm4, %v1614_v49, %v1616_v33 }
 0x293   : > { %1905 = vrot.lane.b32.xlu2 %v1835_v47, %s4437_s20  ;;  %1733 = vst [vmem:[#allocation2 + $0x1d8] sm:$0xf0] %v1669_v50  ;;  %v1864_v47 = vld.sshfl [vmem:[#allocation1 + $0x10] sm:$0xff pattern:$0x75316420] }
 0x294   : > { %1737 = vst [vmem:[#allocation2 + $0x230] sm:$0xf0] %v1673_v51 }
 0x295   : > { %v1628_v41 = vpop.permute.xlu2 %1627  ;;  %2097 = vst [vmem:[#allocation1 + $0x11] ss:$2 sm:$0xff] %v5220_v1 }
 0x297   : > { %1907 = vrot.lane.b32.xlu0 %v1836_v34, %s4437_s20  ;;  %1915 = vrot.lane.b32.xlu1 %v1843_v17, %s4437_s20  ;;  %v2048_v34 = vld [vmem:[%s4472_s14 + $0x10] sm:$0xf] }
 0x298   : > { %2099 = vst [vmem:[#allocation1 + $0x21] ss:$2 sm:$0xff] %v2048_v34 }
 0x299   : > { %v1612_v55 = vpop.permute.xlu0 %1611  ;;  %v1620_v63 = vpop.permute.xlu1 %1619 }
 0x29a   : > { %v1671_v56 = vsel %vm1657_vm4, %v1610_v24, %v1612_v55  ;;  %v1672_v38 = vsel %vm1657_vm4, %v1612_v55, %v1614_v49  ;;  %v1675_v57 = vsel %vm1657_vm4, %v1620_v63, %v1622_v42  ;;  %v1860_v24 = vld.sshfl [vmem:[#allocation1] sm:$0xff pattern:$0x75316420]  ;;  %v5261_v55 = vld [vmem:[%s4472_s14 + $0x28] sm:$0xff] }
 0x29b   : > { %1911 = vrot.lane.b32.xlu2 %v1841_v29, %s4437_s20  ;;  %1735 = vst [vmem:[#allocation2 + $0x5c0] sm:$0xf0] %v1671_v56  ;;  %v5234_v29 = vld [vmem:[%s4472_s14 + $0x14] sm:$0xff] }
 0x29c   : > { %1736 = vst [vmem:[#allocation2 + $0x338] sm:$0xf0] %v1672_v38  ;;  %v2103_v56 = vld.sshfl [vmem:[#allocation1 + $0x18] sm:$0xff pattern:$0x75316420] }
 0x29d   : > { %v5200_v60 = vpop.permute.xlu2 %1633  ;;  %1739 = vst [vmem:[#allocation2 + $0x528] sm:$0xf0] %v1675_v57 }
 0x29e   : > { %2095 = vst [vmem:[#allocation1 + $0x1] ss:$2 sm:$0xff] %v5223_v20 }
 0x29f   : > { %1913 = vrot.lane.b32.xlu0 %v1842_v3, %s4437_s20  ;;  %1921 = vrot.lane.b32.xlu1 %v1847_v52, %s4437_s20  ;;  %2106 = vst [vmem:[#allocation1 + $0x31] ss:$2 sm:$0xff] %v5234_v29  ;;  %v2051_v52 = vld [vmem:[%s4472_s14 + $0x24] sm:$0xf] }
 0x2a0   : > { %v2104_v38 = vld.sshfl [vmem:[#allocation1 + $0x20] sm:$0xff pattern:$0x75316420] }
 0x2a1   : > { %v1618_v6 = vpop.permute.xlu0 %1617  ;;  %v1626_v9 = vpop.permute.xlu1 %1625  ;;  %2114 = vst [vmem:[#allocation1 + $0x21] ss:$2 sm:$0xff] %v5261_v55 }
 0x2a2   : > { %v1674_v31 = vsel %vm1657_vm4, %v1618_v6, %v1620_v63  ;;  %v2054_v6 = vld [vmem:[%s4472_s14 + $0x38] sm:$0xf] }
 0x2a3   : > { %1917 = vrot.lane.b32.xlu2 %v1844_v48, %s4437_s20  ;;  %1738 = vst [vmem:[#allocation2 + $0x98] sm:$0xf0] %v1674_v31 }
 0x2a5   : > { %v1640_v30 = vpop.permute.xlu2 %1639  ;;  %v2101_v3 = vld.sshfl [vmem:[#allocation1 + $0x8] sm:$0xff pattern:$0x75316420]  ;;  %v2100_v17 = vld.sshfl [vmem:[#allocation1] sm:$0xff pattern:$0x75316420] }
 0x2a6   : > { %v2107_v22 = vld.sshfl [vmem:[#allocation1 + $0x30] sm:$0xff pattern:$0x75316420] }
 0x2a7   : > { %1919 = vrot.lane.b32.xlu0 %v1846_v11, %s4437_s20  ;;  %1927 = vrot.lane.b32.xlu1 %v1852_v61, %s4437_s20  ;;  %v2108_v61 = vld.sshfl [vmem:[#allocation1 + $0x38] sm:$0xff pattern:$0x75316420] }
 0x2a9   : > { %v1624_v32 = vpop.permute.xlu0 %1623  ;;  %v1632_v45 = vpop.permute.xlu1 %1631 }
 0x2aa   : > { %v1676_v15 = vsel %vm1657_vm4, %v1622_v42, %v1624_v32  ;;  %v1677_v18 = vsel %vm1657_vm4, %v1624_v32, %v1626_v9  ;;  %v1680_v19 = vsel %vm1657_vm4, %v1632_v45, %v5200_v60  ;;  %v5246_v42 = vld [vmem:[%s4472_s14 + $0x1c] sm:$0xff] }
 0x2ab   : > { %1923 = vrot.lane.b32.xlu2 %v1850_v59, %s4437_s20  ;;  %1740 = vst [vmem:[#allocation2 + $0x1e0] sm:$0xf0] %v1676_v15  ;;  %v2117_v15 = vld.sshfl [vmem:[#allocation1 + $0x28] sm:$0xff pattern:$0x75316420] }
 0x2ac   : > { %1741 = vst [vmem:[#allocation2 + $0x2a0] sm:$0xf0] %v1677_v18 }
 0x2ad   : > { %v1646_v23 = vpop.permute.xlu2 %1645  ;;  %1744 = vst [vmem:[#allocation2 + $0x570] sm:$0xf0] %v1680_v19  ;;  %v2116_v19 = vld.sshfl [vmem:[#allocation1 + $0x20] sm:$0xff pattern:$0x75316420] }
 0x2ae   : > { %2109 = vst [vmem:[#allocation1 + $0x1] ss:$2 sm:$0xff] %v5246_v42 }
 0x2af   : > { %1925 = vrot.lane.b32.xlu0 %v1851_v5, %s4437_s20  ;;  %1933 = vrot.lane.b32.xlu1 %v1857_v12, %s4437_s20  ;;  %v5270_v5 = vld [vmem:[%s4472_s14 + $0x30] sm:$0xff] }
 0x2b0   : > { %2115 = vst [vmem:[#allocation1 + $0x31] ss:$2 sm:$0xff] %v5270_v5 }
 0x2b1   : > { %v1630_v25 = vpop.permute.xlu0 %1629  ;;  %v1638_v2 = vpop.permute.xlu1 %1637 }
 0x2b2   : > { %v1678_v26 = vsel %vm1657_vm4, %v1628_v41, %v1630_v25  ;;  %v1679_v43 = vsel %vm1657_vm4, %v1630_v25, %v1632_v45  ;;  %v1682_v27 = vsel %vm1657_vm4, %v1638_v2, %v1640_v30  ;;  %v2102_v41 = vld.sshfl [vmem:[#allocation1 + $0x10] sm:$0xff pattern:$0x75316420]  ;;  %v5287_v45 = vld [vmem:[%s4472_s14 + $0x44] sm:$0xff] }
 0x2b3   : > { %1929 = vrot.lane.b32.xlu2 %v1855_v21, %s4437_s20  ;;  %1742 = vst [vmem:[#allocation2 + $0x438] sm:$0xf0] %v1678_v26 }
 0x2b4   : > { %1743 = vst [vmem:[#allocation2 + $0x170] sm:$0xf0] %v1679_v43  ;;  %v2057_v43 = vld [vmem:[%s4472_s14 + $0x4c] sm:$0xf] }
 0x2b5   : > { %v5236_v33 = vpop.permute.xlu2 %1651  ;;  %1746 = vst [vmem:[#allocation2 + $0x2c0] sm:$0xf0] %v1682_v27  ;;  %v2112_v9 = vld.sshfl [vmem:[#allocation1 + $0x8] sm:$0xff pattern:$0x75316420] }
 0x2b6   : > { %2110 = vst [vmem:[#allocation1 + $0x11] ss:$2 sm:$0xff] %v2051_v52  ;;  %v2111_v21 = vld.sshfl [vmem:[#allocation1] sm:$0xff pattern:$0x75316420] }
 0x2b7   : > { %1931 = vrot.lane.b32.xlu0 %v1856_v8, %s4437_s20  ;;  %1939 = vrot.lane.b32.xlu1 %v1864_v47, %s4437_s20  ;;  %2120 = vst [vmem:[#allocation1 + $0x1] ss:$2 sm:$0xff] %v2054_v6  ;;  %v2118_v27 = vld.sshfl [vmem:[#allocation1 + $0x30] sm:$0xff pattern:$0x75316420] }
 0x2b8   : > { %2123 = vst [vmem:[#allocation1 + $0x21] ss:$2 sm:$0xff] %v5287_v45  ;;  %v2060_v52 = vld [vmem:[%s4472_s14 + $0x60] sm:$0xf]  ;;  %v2063_v6 = vld [vmem:[%s4472_s14 + $0x74] sm:$0xf] }
 0x2b9   : > { %v1636_v39 = vpop.permute.xlu0 %1635  ;;  %v1644_v40 = vpop.permute.xlu1 %1643 }
 0x2ba   : > { %v1681_v13 = vsel %vm1657_vm4, %v5200_v60, %v1636_v39  ;;  %v1685_v0 = vsel %vm1657_vm4, %v1644_v40, %v1646_v23 }
 0x2bb   : > { %1935 = vrot.lane.b32.xlu2 %v1858_v14, %s4437_s20  ;;  %1745 = vst [vmem:[#allocation2 + $0x420] sm:$0xf0] %v1681_v13 }
 0x2bc   : > { %1749 = vst [vmem:[#allocation2 + $0x5d0] sm:$0xf0] %v1685_v0 }
 0x2bd   : > { %v5249_v48 = vpop.permute.xlu2 %1869  ;;  %v2113_v8 = vld.sshfl [vmem:[#allocation1 + $0x10] sm:$0xff pattern:$0x75316420] }
 0x2be   : > { %2122 = vst [vmem:[#allocation1 + $0x11] ss:$2 sm:$0xff] %v5123_v7 }
 0x2bf   : > { %1937 = vrot.lane.b32.xlu0 %v1860_v24, %s4437_s20  ;;  %1945 = vrot.lane.b32.xlu1 %v1867_v53, %s4437_s20  ;;  %v2119_v53 = vld.sshfl [vmem:[#allocation1 + $0x38] sm:$0xff pattern:$0x75316420] }
 0x2c0   : > { %2124 = vst [vmem:[#allocation1 + $0x31] ss:$2 sm:$0xff] %v2057_v43 }
 0x2c1   : > { %v1642_v54 = vpop.permute.xlu0 %1641  ;;  %v1650_v49 = vpop.permute.xlu1 %1649 }
 0x2c2   : > { %v1683_v50 = vsel %vm1657_vm4, %v1640_v30, %v1642_v54  ;;  %v1684_v51 = vsel %vm1657_vm4, %v1642_v54, %v1644_v40  ;;  %v1687_v11 = vsel %vm1657_vm4, %v1650_v49, %v5236_v33 }
 0x2c3   : > { %1941 = vrot.lane.b32.xlu2 %v1865_v16, %s4437_s20  ;;  %1747 = vst [vmem:[#allocation2 + $0x4c8] sm:$0xf0] %v1683_v50 }
 0x2c4   : > { %1748 = vst [vmem:[#allocation2 + $0x4b0] sm:$0xf0] %v1684_v51 }
 0x2c5   : > { %v5263_v63 = vpop.permute.xlu2 %1875  ;;  %1751 = vst [vmem:[#allocation2 + $0x440] sm:$0xf0] %v1687_v11  ;;  %v5292_v47 = vld.sshfl [vmem:[#allocation1 + $0x10] sm:$0xff pattern:$0x75316420] }
 0x2c6   : > { %v2126_v23 = vld.sshfl [vmem:[#allocation1 + $0x18] sm:$0xff pattern:$0x75316420] }
 0x2c7   : > { %1943 = vrot.lane.b32.xlu0 %v1866_v37, %s4437_s20  ;;  %2164 = vrot.lane.b32.xlu1 %v2101_v3, %s4438_s21  ;;  %2131 = vst [vmem:[#allocation1 + $0x11] ss:$2 sm:$0xff] %v5149_v35  ;;  %v2129_v3 = vld.sshfl [vmem:[#allocation1 + $0x30] sm:$0xff pattern:$0x75316420] }
 0x2c8   : > { %2138 = vst [vmem:[#allocation1 + $0x31] ss:$2 sm:$0xff] %v5162_v28 }
 0x2c9   : > { %v1648_v57 = vpop.permute.xlu0 %1647  ;;  %v1656_v59 = vpop.permute.xlu1 %1655 }
 0x2ca   : > { %v1686_v60 = vsel %vm1657_vm4, %v1648_v57, %v1650_v49 }
 0x2cb   : > { %1947 = vrot.lane.b32.xlu2 %v1868_v36, %s4437_s20  ;;  %1750 = vst [vmem:[#allocation2 + $0x190] sm:$0xf0] %v1686_v60  ;;  %v2121_v36 = vld.sshfl [vmem:[#allocation1] sm:$0xff pattern:$0x75316420] }
 0x2cd   : > { %v5275_v31 = vpop.permute.xlu2 %1881 }
 0x2cf   : > { %2162 = vrot.lane.b32.xlu0 %v2100_v17, %s4438_s21  ;;  %2170 = vrot.lane.b32.xlu1 %v2104_v38, %s4438_s21  ;;  %v2139_v38 = vld.sshfl [vmem:[#allocation1 + $0x30] sm:$0xff pattern:$0x75316420]  ;;  %v5326_v57 = vld.sshfl [vmem:[#allocation1 + $0x38] sm:$0xff pattern:$0x75316420] }
 0x2d0   : > { %2147 = vst [vmem:[#allocation1 + $0x31] ss:$2 sm:$0xff] %v5186_v62 }
 0x2d1   : > { %v1654_v10 = vpop.permute.xlu0 %1653  ;;  %v1874_v30 = vpop.permute.xlu1 %1873 }
 0x2d2   : > { %v1688_v12 = vsel %vm1657_vm4, %v5236_v33, %v1654_v10  ;;  %v1689_v14 = vsel %vm1657_vm4, %v1654_v10, %v1656_v59  ;;  %v1952_v32 = vsel %vm1949_vm5, %v1874_v30, %v5263_v63  ;;  %v5303_v33 = vld [vmem:[%s4472_s14 + $0x50] sm:$0xff] }
 0x2d3   : > { %2166 = vrot.lane.b32.xlu2 %v2102_v41, %s4438_s21  ;;  %1752 = vst [vmem:[#allocation2 + $0x2c8] sm:$0xf0] %v1688_v12  ;;  %v2127_v41 = vld.sshfl [vmem:[#allocation1 + $0x20] sm:$0xff pattern:$0x75316420] }
 0x2d4   : > { %1753 = vst [vmem:[#allocation2 + $0x298] sm:$0xf0] %v1689_v14 }
 0x2d5   : > { %v1888_v18 = vpop.permute.xlu2 %1887  ;;  %2016 = vst [vmem:[#allocation2 + $0x80] sm:$0xf] %v1952_v32 }
 0x2d6   : > { %2130 = vst [vmem:[#allocation1 + $0x1] ss:$2 sm:$0xff] %v5303_v33 }
 0x2d7   : > { %2168 = vrot.lane.b32.xlu0 %v2103_v56, %s4438_s21  ;;  %2176 = vrot.lane.b32.xlu1 %v2111_v21, %s4438_s21  ;;  %v2128_v56 = vld.sshfl [vmem:[#allocation1 + $0x28] sm:$0xff pattern:$0x75316420] }
 0x2d8   : > { %2132 = vst [vmem:[#allocation1 + $0x21] ss:$2 sm:$0xff] %v2060_v52 }
 0x2d9   : > { %v1872_v16 = vpop.permute.xlu0 %1871  ;;  %v1880_v24 = vpop.permute.xlu1 %1879 }
 0x2da   : > { %v1950_v25 = vsel %vm1949_vm5, %v5249_v48, %v1872_v16  ;;  %v1951_v2 = vsel %vm1949_vm5, %v1872_v16, %v1874_v30  ;;  %v1954_v26 = vsel %vm1949_vm5, %v1880_v24, %v5275_v31 }
 0x2db   : > { %2172 = vrot.lane.b32.xlu2 %v2107_v22, %s4438_s21  ;;  %2014 = vst [vmem:[#allocation2 + $0x218] sm:$0xf] %v1950_v25  ;;  %v2066_v25 = vld [vmem:[%s4472_s14 + $0x88] sm:$0xf] }
 0x2dc   : > { %2015 = vst [vmem:[#allocation2 + $0x398] sm:$0xf] %v1951_v2 }
 0x2dd   : > { %v1894_v34 = vpop.permute.xlu2 %1893  ;;  %2018 = vst [vmem:[#allocation2 + $0x548] sm:$0xf] %v1954_v26  ;;  %v2133_v17 = vld.sshfl [vmem:[#allocation1] sm:$0xff pattern:$0x75316420] }
 0x2de   : > { %v5314_v48 = vld.sshfl [vmem:[#allocation1 + $0x8] sm:$0xff pattern:$0x75316420] }
 0x2df   : > { %2174 = vrot.lane.b32.xlu0 %v2108_v61, %s4438_s21  ;;  %2182 = vrot.lane.b32.xlu1 %v2116_v19, %s4438_s21  ;;  %2141 = vst [vmem:[#allocation1 + $0x1] ss:$2 sm:$0xff] %v5165_v44  ;;  %v2135_v61 = vld.sshfl [vmem:[#allocation1 + $0x10] sm:$0xff pattern:$0x75316420] }
 0x2e1   : > { %v1878_v37 = vpop.permute.xlu0 %1877  ;;  %v1886_v39 = vpop.permute.xlu1 %1885 }
 0x2e2   : > { %v1953_v40 = vsel %vm1949_vm5, %v5263_v63, %v1878_v37  ;;  %v1957_v13 = vsel %vm1949_vm5, %v1886_v39, %v1888_v18 }
 0x2e3   : > { %2178 = vrot.lane.b32.xlu2 %v2112_v9, %s4438_s21  ;;  %2017 = vst [vmem:[#allocation2 + $0x538] sm:$0xf] %v1953_v40  ;;  %v2136_v9 = vld.sshfl [vmem:[#allocation1 + $0x18] sm:$0xff pattern:$0x75316420] }
 0x2e4   : > { %2021 = vst [vmem:[#allocation2 + $0x178] sm:$0xf] %v1957_v13 }
 0x2e5   : > { %v1900_v0 = vpop.permute.xlu2 %1899  ;;  %2142 = vst [vmem:[#allocation1 + $0x11] ss:$2 sm:$0xff] %v2063_v6  ;;  %v2344_v6 = vld [vmem:[%s4472_s14 + $0x24] sm:$0xf] }
 0x2e6   : > { %v2144_v24 = vld.sshfl [vmem:[#allocation1 + $0x8] sm:$0xff pattern:$0x75316420]  ;;  %v2143_v2 = vld.sshfl [vmem:[#allocation1] sm:$0xff pattern:$0x75316420] }
 0x2e7   : > { %2180 = vrot.lane.b32.xlu0 %v2113_v8, %s4438_s21  ;;  %2188 = vrot.lane.b32.xlu1 %v2119_v53, %s4438_s21  ;;  %2152 = vst [vmem:[#allocation1 + $0x1] ss:$2 sm:$0xff] %v2066_v25 }
 0x2e9   : > { %v1884_v54 = vpop.permute.xlu0 %1883  ;;  %v1892_v49 = vpop.permute.xlu1 %1891 }
 0x2ea   : > { %v1955_v50 = vsel %vm1949_vm5, %v5275_v31, %v1884_v54  ;;  %v1956_v51 = vsel %vm1949_vm5, %v1884_v54, %v1886_v39  ;;  %v1959_v11 = vsel %vm1949_vm5, %v1892_v49, %v1894_v34  ;;  %v2137_v31 = vld.sshfl [vmem:[#allocation1 + $0x20] sm:$0xff pattern:$0x75316420] }
 0x2eb   : > { %2184 = vrot.lane.b32.xlu2 %v2117_v15, %s4438_s21  ;;  %2019 = vst [vmem:[#allocation2 + $0x260] sm:$0xf] %v1955_v50 }
 0x2ec   : > { %2020 = vst [vmem:[#allocation2 + $0x278] sm:$0xf] %v1956_v51  ;;  %v2145_v15 = vld.sshfl [vmem:[#allocation1 + $0x10] sm:$0xff pattern:$0x75316420] }
 0x2ed   : > { %v1906_v63 = vpop.permute.xlu2 %1905  ;;  %2023 = vst [vmem:[#allocation2 + $0x370] sm:$0xf] %v1959_v11  ;;  %v2069_v51 = vld [vmem:[%s4472_s14 + $0x9c] sm:$0xf] }
 0x2ee   : > { %2146 = vst [vmem:[#allocation1 + $0x21] ss:$2 sm:$0xff] %v5177_v46  ;;  %v2153_v40 = vld.sshfl [vmem:[#allocation1] sm:$0xff pattern:$0x75316420] }
 0x2ef   : > { %2186 = vrot.lane.b32.xlu0 %v2118_v27, %s4438_s21  ;;  %2194 = vrot.lane.b32.xlu1 %v2126_v23, %s4438_s21  ;;  %2154 = vst [vmem:[#allocation1 + $0x11] ss:$2 sm:$0xff] %v5197_v58 }
 0x2f0   : > { %2387 = vst [vmem:[#allocation1] ss:$2 sm:$0xff] %v5223_v20  ;;  %v2150_v20 = vld.sshfl [vmem:[#allocation1 + $0x30] sm:$0xff pattern:$0x75316420] }
 0x2f1   : > { %v1890_v59 = vpop.permute.xlu0 %1889  ;;  %v1898_v22 = vpop.permute.xlu1 %1897 }
 0x2f2   : > { %v1958_v60 = vsel %vm1949_vm5, %v1890_v59, %v1892_v49  ;;  %v2151_v49 = vld.sshfl [vmem:[#allocation1 + $0x38] sm:$0xff pattern:$0x75316420] }
 0x2f3   : > { %2190 = vrot.lane.b32.xlu2 %v2121_v36, %s4438_s21  ;;  %2022 = vst [vmem:[#allocation2 + $0x560] sm:$0xf] %v1958_v60 }
 0x2f4   : > { %2156 = vst [vmem:[#allocation1 + $0x31] ss:$2 sm:$0xff] %v2069_v51 }
 0x2f5   : > { %v1912_v21 = vpop.permute.xlu2 %1911  ;;  %v2149_v43 = vld.sshfl [vmem:[#allocation1 + $0x28] sm:$0xff pattern:$0x75316420]  ;;  %v2148_v27 = vld.sshfl [vmem:[#allocation1 + $0x20] sm:$0xff pattern:$0x75316420] }
 0x2f6   : > { %2155 = vst [vmem:[#allocation1 + $0x21] ss:$2 sm:$0xff] %v5207_v4  ;;  %v5366_v54 = vld.sshfl [vmem:[#allocation1 + $0x18] sm:$0xff pattern:$0x75316420] }
 0x2f7   : > { %2192 = vrot.lane.b32.xlu0 %v5292_v47, %s4438_s21  ;;  %2200 = vrot.lane.b32.xlu1 %v2129_v3, %s4438_s21  ;;  %v5380_v59 = vld.sshfl [vmem:[#allocation1 + $0x8] sm:$0xff pattern:$0x75316420] }
 0x2f9   : > { %v1896_v8 = vpop.permute.xlu0 %1895  ;;  %v1904_v10 = vpop.permute.xlu1 %1903 }
 0x2fa   : > { %v1960_v30 = vsel %vm1949_vm5, %v1894_v34, %v1896_v8  ;;  %v1961_v12 = vsel %vm1949_vm5, %v1896_v8, %v1898_v22  ;;  %v1964_v14 = vsel %vm1949_vm5, %v1904_v10, %v1906_v63  ;;  %v2392_v22 = vld.sshfl [vmem:[#allocation1] sm:$0xff pattern:$0x75316420] }
 0x2fb   : > { %2196 = vrot.lane.b32.xlu2 %v2127_v41, %s4438_s21  ;;  %2024 = vst [vmem:[#allocation2 + $0x4c0] sm:$0xf] %v1960_v30  ;;  %v2341_v41 = vld [vmem:[%s4472_s14 + $0x10] sm:$0xf] }
 0x2fc   : > { %2025 = vst [vmem:[#allocation2 + $0x108] sm:$0xf] %v1961_v12 }
 0x2fd   : > { %v1918_v32 = vpop.permute.xlu2 %1917  ;;  %2028 = vst [vmem:[#allocation2 + $0x498] sm:$0xf] %v1964_v14  ;;  %v5370_v50 = vld.sshfl [vmem:[#allocation1 + $0x28] sm:$0xff pattern:$0x75316420] }
 0x2fe   : > { %v2159_v11 = vld.sshfl [vmem:[#allocation1 + $0x20] sm:$0xff pattern:$0x75316420]  ;;  %2401 = vst [vmem:[#allocation1] ss:$2 sm:$0xff] %v5246_v42 }
 0x2ff   : > { %2198 = vrot.lane.b32.xlu0 %v2128_v56, %s4438_s21  ;;  %2206 = vrot.lane.b32.xlu1 %v2135_v61, %s4438_s21  ;;  %2391 = vst [vmem:[#allocation1 + $0x20] ss:$2 sm:$0xff] %v2341_v41  ;;  %v2161_v61 = vld.sshfl [vmem:[#allocation1 + $0x30] sm:$0xff pattern:$0x75316420] }
 0x300   : > { %2398 = vst [vmem:[#allocation1 + $0x30] ss:$2 sm:$0xff] %v5234_v29 }
 0x301   : > { %v1902_v18 = vpop.permute.xlu0 %1901  ;;  %v1910_v19 = vpop.permute.xlu1 %1909 }
 0x302   : > { %v1962_v47 = vsel %vm1949_vm5, %v1900_v0, %v1902_v18  ;;  %v1963_v23 = vsel %vm1949_vm5, %v1902_v18, %v1904_v10  ;;  %v1966_v16 = vsel %vm1949_vm5, %v1910_v19, %v1912_v21 }
 0x303   : > { %2202 = vrot.lane.b32.xlu2 %v2133_v17, %s4438_s21  ;;  %2026 = vst [vmem:[#allocation2 + $0x470] sm:$0xf] %v1962_v47 }
 0x304   : > { %2027 = vst [vmem:[#allocation2 + $0x480] sm:$0xf] %v1963_v23 }
 0x305   : > { %v5348_v26 = vpop.permute.xlu2 %1923  ;;  %2030 = vst [vmem:[#allocation2 + $0xd0] sm:$0xf] %v1966_v16 }
 0x307   : > { %2204 = vrot.lane.b32.xlu0 %v5314_v48, %s4438_s21  ;;  %2212 = vrot.lane.b32.xlu1 %v2139_v38, %s4438_s21  ;;  %v5403_v29 = vld.sshfl [vmem:[#allocation1 + $0x30] sm:$0xff pattern:$0x75316420] }
 0x309   : > { %v1908_v34 = vpop.permute.xlu0 %1907  ;;  %v1916_v53 = vpop.permute.xlu1 %1915 }
 0x30a   : > { %v1965_v36 = vsel %vm1949_vm5, %v1906_v63, %v1908_v34  ;;  %v1969_v37 = vsel %vm1949_vm5, %v1916_v53, %v1918_v32  ;;  %v2157_v63 = vld.sshfl [vmem:[#allocation1 + $0x10] sm:$0xff pattern:$0x75316420] }
 0x30b   : > { %2208 = vrot.lane.b32.xlu2 %v2136_v9, %s4438_s21  ;;  %2029 = vst [vmem:[#allocation2 + $0x148] sm:$0xf] %v1965_v36 }
 0x30c   : > { %2033 = vst [vmem:[#allocation2 + $0x448] sm:$0xf] %v1969_v37  ;;  %v2347_v37 = vld [vmem:[%s4472_s14 + $0x38] sm:$0xf] }
 0x30d   : > { %v5357_v39 = vpop.permute.xlu2 %1929  ;;  %2389 = vst [vmem:[#allocation1 + $0x10] ss:$2 sm:$0xff] %v5220_v1 }
 0x30f   : > { %2210 = vrot.lane.b32.xlu0 %v2137_v31, %s4438_s21  ;;  %2218 = vrot.lane.b32.xlu1 %v2144_v24, %s4438_s21  ;;  %v5391_v31 = vld.sshfl [vmem:[#allocation1 + $0x20] sm:$0xff pattern:$0x75316420] }
 0x310   : > { %2406 = vst [vmem:[#allocation1 + $0x20] ss:$2 sm:$0xff] %v5261_v55 }
 0x311   : > { %v1914_v13 = vpop.permute.xlu0 %1913  ;;  %v1922_v0 = vpop.permute.xlu1 %1921 }
 0x312   : > { %v1967_v3 = vsel %vm1949_vm5, %v1912_v21, %v1914_v13  ;;  %v1968_v17 = vsel %vm1949_vm5, %v1914_v13, %v1916_v53  ;;  %v1971_v48 = vsel %vm1949_vm5, %v1922_v0, %v5348_v26 }
 0x313   : > { %2214 = vrot.lane.b32.xlu2 %v5326_v57, %s4438_s21  ;;  %2031 = vst [vmem:[#allocation2 + $0x90] sm:$0xf] %v1967_v3 }
 0x314   : > { %2032 = vst [vmem:[#allocation2 + $0x48] sm:$0xf] %v1968_v17  ;;  %v5387_v9 = vld.sshfl [vmem:[#allocation1 + $0x10] sm:$0xff pattern:$0x75316420] }
 0x315   : > { %v5373_v52 = vpop.permute.xlu2 %1935  ;;  %2035 = vst [vmem:[#allocation2 + $0x58] sm:$0xf] %v1971_v48  ;;  %v2395_v21 = vld.sshfl [vmem:[#allocation1 + $0x18] sm:$0xff pattern:$0x75316420] }
 0x316   : > { %2402 = vst [vmem:[#allocation1 + $0x10] ss:$2 sm:$0xff] %v2344_v6 }
 0x317   : > { %2216 = vrot.lane.b32.xlu0 %v2143_v2, %s4438_s21  ;;  %2224 = vrot.lane.b32.xlu1 %v2149_v43, %s4438_s21  ;;  %v5413_v25 = vld.sshfl [vmem:[#allocation1 + $0x20] sm:$0xff pattern:$0x75316420]  ;;  %v5417_v2 = vld.sshfl [vmem:[#allocation1 + $0x28] sm:$0xff pattern:$0x75316420] }
 0x318   : > { %2415 = vst [vmem:[#allocation1 + $0x20] ss:$2 sm:$0xff] %v5287_v45 }
 0x319   : > { %v1920_v56 = vpop.permute.xlu0 %1919  ;;  %v1928_v38 = vpop.permute.xlu1 %1927 }
 0x31a   : > { %v1970_v57 = vsel %vm1949_vm5, %v1920_v56, %v1922_v0 }
 0x31b   : > { %2220 = vrot.lane.b32.xlu2 %v2145_v15, %s4438_s21  ;;  %2034 = vst [vmem:[#allocation2 + $0x478] sm:$0xf] %v1970_v57  ;;  %v2400_v15 = vld.sshfl [vmem:[#allocation1 + $0x38] sm:$0xff pattern:$0x75316420] }
 0x31c   : > { %2407 = vst [vmem:[#allocation1 + $0x30] ss:$2 sm:$0xff] %v5270_v5 }
 0x31d   : > { %v5384_v60 = vpop.permute.xlu2 %1941  ;;  %v5405_v18 = vld.sshfl [vmem:[#allocation1 + $0x10] sm:$0xff pattern:$0x75316420] }
 0x31e   : > { %2414 = vst [vmem:[#allocation1 + $0x10] ss:$2 sm:$0xff] %v5123_v7  ;;  %v5425_v7 = vld.sshfl [vmem:[#allocation1 + $0x8] sm:$0xff pattern:$0x75316420] }
 0x31f   : > { %2222 = vrot.lane.b32.xlu0 %v2148_v27, %s4438_s21  ;;  %2230 = vrot.lane.b32.xlu1 %v2153_v40, %s4438_s21  ;;  %v2353_v40 = vld [vmem:[%s4472_s14 + $0x60] sm:$0xf]  ;;  %v5441_v0 = vld.sshfl [vmem:[#allocation1 + $0x28] sm:$0xff pattern:$0x75316420] }
 0x320   : > { %v5443_v3 = vld.sshfl [vmem:[#allocation1 + $0x20] sm:$0xff pattern:$0x75316420] }
 0x321   : > { %v1926_v8 = vpop.permute.xlu0 %1925  ;;  %v1934_v10 = vpop.permute.xlu1 %1933  ;;  %2424 = vst [vmem:[#allocation1 + $0x20] ss:$2 sm:$0xff] %v2353_v40 }
 0x322   : > { %v1972_v30 = vsel %vm1949_vm5, %v5348_v26, %v1926_v8  ;;  %v1973_v12 = vsel %vm1949_vm5, %v1926_v8, %v1928_v38  ;;  %v1976_v14 = vsel %vm1949_vm5, %v1934_v10, %v5373_v52 }
 0x323   : > { %2226 = vrot.lane.b32.xlu2 %v2150_v20, %s4438_s21  ;;  %2036 = vst [vmem:[#allocation2 + $0x2a8] sm:$0xf] %v1972_v30  ;;  %v2410_v38 = vld.sshfl [vmem:[#allocation1 + $0x30] sm:$0xff pattern:$0x75316420] }
 0x324   : > { %2037 = vst [vmem:[#allocation2 + $0x358] sm:$0xf] %v1973_v12 }
 0x325   : > { %v1948_v32 = vpop.permute.xlu2 %1947  ;;  %2040 = vst [vmem:[#allocation2 + $0xf0] sm:$0xf] %v1976_v14  ;;  %v5427_v27 = vld.sshfl [vmem:[#allocation1 + $0x10] sm:$0xff pattern:$0x75316420] }
 0x326   : > { %v5429_v34 = vld.sshfl [vmem:[#allocation1 + $0x18] sm:$0xff pattern:$0x75316420] }
 0x327   : > { %2228 = vrot.lane.b32.xlu0 %v2151_v49, %s4438_s21  ;;  %2236 = vrot.lane.b32.xlu1 %v2159_v11, %s4438_s21  ;;  %2423 = vst [vmem:[#allocation1 + $0x10] ss:$2 sm:$0xff] %v5149_v35  ;;  %v2356_v35 = vld [vmem:[%s4472_s14 + $0x74] sm:$0xf] }
 0x328   : > { %v5464_v41 = vld.sshfl [vmem:[#allocation1 + $0x20] sm:$0xff pattern:$0x75316420] }
 0x329   : > { %v1932_v19 = vpop.permute.xlu0 %1931  ;;  %v1940_v47 = vpop.permute.xlu1 %1939  ;;  %2438 = vst [vmem:[#allocation1 + $0x20] ss:$2 sm:$0xff] %v5177_v46 }
 0x32a   : > { %v1974_v23 = vsel %vm1949_vm5, %v5357_v39, %v1932_v19  ;;  %v1975_v16 = vsel %vm1949_vm5, %v1932_v19, %v1934_v10  ;;  %v1978_v24 = vsel %vm1949_vm5, %v1940_v47, %v5384_v60  ;;  %v2403_v39 = vld.sshfl [vmem:[#allocation1] sm:$0xff pattern:$0x75316420] }
 0x32b   : > { %2232 = vrot.lane.b32.xlu2 %v2157_v63, %s4438_s21  ;;  %2038 = vst [vmem:[#allocation2 + $0x140] sm:$0xf] %v1974_v23  ;;  %v2636_v47 = vld [vmem:[%s4472_s14 + $0x24] sm:$0xf] }
 0x32c   : > { %2039 = vst [vmem:[#allocation2 + $0x308] sm:$0xf] %v1975_v16 }
 0x32d   : > { %v5419_v5 = vpop.permute.xlu2 %2166  ;;  %2042 = vst [vmem:[#allocation2 + $0x110] sm:$0xf] %v1978_v24 }
 0x32e   : > { %2412 = vst [vmem:[#allocation1] ss:$2 sm:$0xff] %v2347_v37  ;;  %v5450_v20 = vld.sshfl [vmem:[#allocation1 + $0x18] sm:$0xff pattern:$0x75316420]  ;;  %v5535_v37 = vld [vmem:[%s4472_s14] sm:$0xff] }
 0x32f   : > { %2234 = vrot.lane.b32.xlu0 %v5366_v54, %s4438_s21  ;;  %2454 = vrot.lane.b32.xlu1 %v2392_v22, %s4439_s22  ;;  %v5448_v54 = vld.sshfl [vmem:[#allocation1 + $0x10] sm:$0xff pattern:$0x75316420]  ;;  %v2350_v22 = vld [vmem:[%s4472_s14 + $0x4c] sm:$0xf] }
 0x330   : > { %2434 = vst [vmem:[#allocation1 + $0x10] ss:$2 sm:$0xff] %v2356_v35 }
 0x331   : > { %v1938_v26 = vpop.permute.xlu0 %1937  ;;  %v1946_v43 = vpop.permute.xlu1 %1945 }
 0x332   : > { %v1977_v53 = vsel %vm1949_vm5, %v5373_v52, %v1938_v26  ;;  %v1981_v36 = vsel %vm1949_vm5, %v1946_v43, %v1948_v32  ;;  %v2359_v32 = vld [vmem:[%s4472_s14 + $0x88] sm:$0xf]  ;;  %v2633_v26 = vld [vmem:[%s4472_s14 + $0x10] sm:$0xf] }
 0x333   : > { %2238 = vrot.lane.b32.xlu2 %v5370_v50, %s4438_s21  ;;  %2041 = vst [vmem:[#allocation2 + $0x5f0] sm:$0xf] %v1977_v53 }
 0x334   : > { %2045 = vst [vmem:[#allocation2 + $0x3c8] sm:$0xf] %v1981_v36 }
 0x335   : > { %v5439_v13 = vpop.permute.xlu2 %2172  ;;  %v5459_v11 = vld.sshfl [vmem:[#allocation1] sm:$0xff pattern:$0x75316420] }
 0x336   : > { %2422 = vst [vmem:[#allocation1] ss:$2 sm:$0xff] %v5303_v33 }
 0x337   : > { %2240 = vrot.lane.b32.xlu0 %v2161_v61, %s4438_s21  ;;  %2460 = vrot.lane.b32.xlu1 %v2395_v21, %s4439_s22  ;;  %v5470_v57 = vld.sshfl [vmem:[#allocation1 + $0x10] sm:$0xff pattern:$0x75316420]  ;;  %v5492_v21 = vld.sshfl [vmem:[#allocation1 + $0x20] sm:$0xff pattern:$0x75316420] }
 0x338   : > { %2446 = vst [vmem:[#allocation1 + $0x10] ss:$2 sm:$0xff] %v5197_v58 }
 0x339   : > { %v1944_v17 = vpop.permute.xlu0 %1943  ;;  %v2165_v48 = vpop.permute.xlu1 %2164 }
 0x33a   : > { %v1979_v49 = vsel %vm1949_vm5, %v5384_v60, %v1944_v17  ;;  %v1980_v50 = vsel %vm1949_vm5, %v1944_v17, %v1946_v43  ;;  %v2244_v51 = vsel %vm2242_vm6, %v2165_v48, %v5419_v5  ;;  %v5477_v60 = vld.sshfl [vmem:[#allocation1 + $0x38] sm:$0xff pattern:$0x75316420] }
 0x33b   : > { %2456 = vrot.lane.b32.xlu2 %v5380_v59, %s4439_s22  ;;  %2043 = vst [vmem:[#allocation2 + $0x580] sm:$0xf] %v1979_v49 }
 0x33c   : > { %2044 = vst [vmem:[#allocation2 + $0x30] sm:$0xf] %v1980_v50 }
 0x33d   : > { %v5461_v52 = vpop.permute.xlu2 %2178  ;;  %2308 = vst [vmem:[#allocation2 + $0x398] sm:$0xf0] %v2244_v51  ;;  %v5481_v46 = vld.sshfl [vmem:[#allocation1 + $0x8] sm:$0xff pattern:$0x75316420] }
 0x33e   : > { %2416 = vst [vmem:[#allocation1 + $0x30] ss:$2 sm:$0xff] %v2350_v22  ;;  %v5483_v6 = vld.sshfl [vmem:[#allocation1] sm:$0xff pattern:$0x75316420] }
 0x33f   : > { %2458 = vrot.lane.b32.xlu0 %v5387_v9, %s4439_s22  ;;  %2466 = vrot.lane.b32.xlu1 %v2400_v15, %s4439_s22  ;;  %2433 = vst [vmem:[#allocation1] ss:$2 sm:$0xff] %v5165_v44  ;;  %v5486_v9 = vld.sshfl [vmem:[#allocation1 + $0x28] sm:$0xff pattern:$0x75316420] }
 0x340   : > { %2447 = vst [vmem:[#allocation1 + $0x20] ss:$2 sm:$0xff] %v5207_v4  ;;  %v5495_v10 = vld.sshfl [vmem:[#allocation1 + $0x10] sm:$0xff pattern:$0x75316420] }
 0x341   : > { %v2163_v63 = vpop.permute.xlu0 %2162  ;;  %v2171_v56 = vpop.permute.xlu1 %2170  ;;  %v5497_v30 = vld.sshfl [vmem:[#allocation1 + $0x18] sm:$0xff pattern:$0x75316420] }
 0x342   : > { %v2243_v59 = vsel %vm2242_vm6, %v2163_v63, %v2165_v48  ;;  %2682 = vst [vmem:[#allocation1 + $0x11] ss:$2 sm:$0xff] %v5220_v1  ;;  %v5574_v63 = vld [vmem:[%s4472_s14 + $0x58] sm:$0xff] }
 0x343   : > { %2462 = vrot.lane.b32.xlu2 %v5391_v31, %s4439_s22  ;;  %2307 = vst [vmem:[#allocation2 + $0x218] sm:$0xf0] %v2243_v59 }
 0x345   : > { %v5479_v61 = vpop.permute.xlu2 %2184 }
 0x346   : > { %v5512_v19 = vld.sshfl [vmem:[#allocation1] sm:$0xff pattern:$0x75316420] }
 0x347   : > { %2464 = vrot.lane.b32.xlu0 %v5403_v29, %s4439_s22  ;;  %2472 = vrot.lane.b32.xlu1 %v5405_v18, %s4439_s22  ;;  %v5507_v29 = vld.sshfl [vmem:[#allocation1 + $0x30] sm:$0xff pattern:$0x75316420]  ;;  %v5509_v18 = vld.sshfl [vmem:[#allocation1 + $0x8] sm:$0xff pattern:$0x75316420] }
 0x348   : > { %2430 = vst [vmem:[#allocation1 + $0x30] ss:$2 sm:$0xff] %v5162_v28  ;;  %v5528_v53 = vld.sshfl [vmem:[#allocation1 + $0x20] sm:$0xff pattern:$0x75316420] }
 0x349   : > { %v2169_v31 = vpop.permute.xlu0 %2168  ;;  %v2177_v8 = vpop.permute.xlu1 %2176  ;;  %2444 = vst [vmem:[#allocation1] ss:$2 sm:$0xff] %v2359_v32  ;;  %v5518_v24 = vld.sshfl [vmem:[#allocation1 + $0x10] sm:$0xff pattern:$0x75316420] }
 0x34a   : > { %v2245_v44 = vsel %vm2242_vm6, %v5419_v5, %v2169_v31  ;;  %v2246_v12 = vsel %vm2242_vm6, %v2169_v31, %v2171_v56  ;;  %v2249_v14 = vsel %vm2242_vm6, %v2177_v8, %v5461_v52  ;;  %v5520_v5 = vld.sshfl [vmem:[#allocation1 + $0x18] sm:$0xff pattern:$0x75316420]  ;;  %v5532_v36 = vld.sshfl [vmem:[#allocation1 + $0x28] sm:$0xff pattern:$0x75316420] }
 0x34b   : > { %2468 = vrot.lane.b32.xlu2 %v2403_v39, %s4439_s22  ;;  %2309 = vst [vmem:[#allocation2 + $0x80] sm:$0xf0] %v2245_v44 }
 0x34c   : > { %2310 = vst [vmem:[#allocation2 + $0x538] sm:$0xf0] %v2246_v12 }
 0x34d   : > { %v2191_v15 = vpop.permute.xlu2 %2190  ;;  %2313 = vst [vmem:[#allocation2 + $0x278] sm:$0xf0] %v2249_v14 }
 0x34e   : > { %2695 = vst [vmem:[#allocation1 + $0x11] ss:$2 sm:$0xff] %v2636_v47 }
 0x34f   : > { %2470 = vrot.lane.b32.xlu0 %v5425_v7, %s4439_s22  ;;  %2478 = vrot.lane.b32.xlu1 %v2410_v38, %s4439_s22  ;;  %2684 = vst [vmem:[#allocation1 + $0x21] ss:$2 sm:$0xff] %v2633_v26  ;;  %v5549_v17 = vld.sshfl [vmem:[#allocation1 + $0x30] sm:$0xff pattern:$0x75316420] }
 0x350   : > { %v5539_v40 = vld.sshfl [vmem:[#allocation1] sm:$0xff pattern:$0x75316420]  ;;  %v5624_v26 = vld [vmem:[%s4472_s14 + $0x14] sm:$0xff] }
 0x351   : > { %v2175_v23 = vpop.permute.xlu0 %2174  ;;  %v2183_v16 = vpop.permute.xlu1 %2182  ;;  %2680 = vst [vmem:[#allocation1 + $0x1] ss:$2 sm:$0xff] %v5535_v37 }
 0x352   : > { %v2247_v28 = vsel %vm2242_vm6, %v5439_v13, %v2175_v23  ;;  %v2248_v43 = vsel %vm2242_vm6, %v2175_v23, %v2177_v8  ;;  %v2251_v7 = vsel %vm2242_vm6, %v2183_v16, %v5479_v61  ;;  %v5546_v13 = vld [vmem:[%s4472_s14 + $0x3c] sm:$0xff]  ;;  %v2648_v8 = vld [vmem:[%s4472_s14 + $0x74] sm:$0xf] }
 0x353   : > { %2474 = vrot.lane.b32.xlu2 %v5413_v25, %s4439_s22  ;;  %2311 = vst [vmem:[#allocation2 + $0x548] sm:$0xf0] %v2247_v28 }
 0x354   : > { %2312 = vst [vmem:[#allocation2 + $0x260] sm:$0xf0] %v2248_v43 }
 0x355   : > { %v5537_v39 = vpop.permute.xlu2 %2196  ;;  %2315 = vst [vmem:[#allocation2 + $0x560] sm:$0xf0] %v2251_v7  ;;  %v5551_v48 = vld.sshfl [vmem:[#allocation1 + $0x10] sm:$0xff pattern:$0x75316420] }
 0x356   : > { %2707 = vst [vmem:[#allocation1 + $0x11] ss:$2 sm:$0xff] %v5546_v13  ;;  %v5564_v51 = vld.sshfl [vmem:[#allocation1 + $0x20] sm:$0xff pattern:$0x75316420] }
 0x357   : > { %2476 = vrot.lane.b32.xlu0 %v5417_v2, %s4439_s22  ;;  %2484 = vrot.lane.b32.xlu1 %v5427_v27, %s4439_s22  ;;  %v5556_v2 = vld.sshfl [vmem:[#allocation1 + $0x38] sm:$0xff pattern:$0x75316420]  ;;  %2699 = vst [vmem:[#allocation1 + $0x21] ss:$2 sm:$0xff] %v5261_v55 }
 0x358   : > { %2439 = vst [vmem:[#allocation1 + $0x30] ss:$2 sm:$0xff] %v5186_v62  ;;  %v5576_v56 = vld.sshfl [vmem:[#allocation1] sm:$0xff pattern:$0x75316420] }
 0x359   : > { %v2181_v25 = vpop.permute.xlu0 %2180  ;;  %v2189_v35 = vpop.permute.xlu1 %2188 }
 0x35a   : > { %v2250_v49 = vsel %vm2242_vm6, %v5461_v52, %v2181_v25  ;;  %v2254_v50 = vsel %vm2242_vm6, %v2189_v35, %v2191_v15  ;;  %v5567_v52 = vld.sshfl [vmem:[#allocation1 + $0x8] sm:$0xff pattern:$0x75316420] }
 0x35b   : > { %2480 = vrot.lane.b32.xlu2 %v5477_v60, %s4439_s22  ;;  %2314 = vst [vmem:[#allocation2 + $0x178] sm:$0xf0] %v2250_v49 }
 0x35c   : > { %2318 = vst [vmem:[#allocation2 + $0x108] sm:$0xf0] %v2254_v50 }
 0x35d   : > { %v5561_v27 = vpop.permute.xlu2 %2202  ;;  %2694 = vst [vmem:[#allocation1 + $0x1] ss:$2 sm:$0xff] %v5246_v42  ;;  %v5579_v59 = vld.sshfl [vmem:[#allocation1 + $0x10] sm:$0xff pattern:$0x75316420] }
 0x35e   : > { %v5581_v55 = vld.sshfl [vmem:[#allocation1 + $0x18] sm:$0xff pattern:$0x75316420]  ;;  %v5599_v44 = vld.sshfl [vmem:[#allocation1 + $0x20] sm:$0xff pattern:$0x75316420] }
 0x35f   : > { %2482 = vrot.lane.b32.xlu0 %v5459_v11, %s4439_s22  ;;  %2490 = vrot.lane.b32.xlu1 %v5441_v0, %s4439_s22  ;;  %2716 = vst [vmem:[#allocation1 + $0x11] ss:$2 sm:$0xff] %v5574_v63  ;;  %v2362_v42 = vld [vmem:[%s4472_s14 + $0x9c] sm:$0xf] }
 0x360   : > { %v5592_v60 = vld.sshfl [vmem:[#allocation1 + $0x30] sm:$0xff pattern:$0x75316420]  ;;  %v5601_v12 = vld.sshfl [vmem:[#allocation1 + $0x28] sm:$0xff pattern:$0x75316420] }
 0x361   : > { %v2187_v62 = vpop.permute.xlu0 %2186  ;;  %v2195_v38 = vpop.permute.xlu1 %2194  ;;  %2708 = vst [vmem:[#allocation1 + $0x21] ss:$2 sm:$0xff] %v5287_v45  ;;  %v2645_v45 = vld [vmem:[%s4472_s14 + $0x60] sm:$0xf] }
 0x362   : > { %v2252_v22 = vsel %vm2242_vm6, %v5479_v61, %v2187_v62  ;;  %v2253_v11 = vsel %vm2242_vm6, %v2187_v62, %v2189_v35  ;;  %v2256_v0 = vsel %vm2242_vm6, %v2195_v38, %v5537_v39  ;;  %v5596_v61 = vld.sshfl [vmem:[#allocation1 + $0x38] sm:$0xff pattern:$0x75316420] }
 0x363   : > { %2486 = vrot.lane.b32.xlu2 %v5429_v34, %s4439_s22  ;;  %2316 = vst [vmem:[#allocation2 + $0x370] sm:$0xf0] %v2252_v22  ;;  %v2639_v34 = vld [vmem:[%s4472_s14 + $0x38] sm:$0xf] }
 0x364   : > { %2317 = vst [vmem:[#allocation2 + $0x4c0] sm:$0xf0] %v2253_v11  ;;  %v5609_v14 = vld.sshfl [vmem:[#allocation1] sm:$0xff pattern:$0x75316420]  ;;  %v5650_v62 = vld [vmem:[%s4472_s14 + $0x78] sm:$0xff] }
 0x365   : > { %v5594_v31 = vpop.permute.xlu2 %2208  ;;  %2320 = vst [vmem:[#allocation2 + $0x480] sm:$0xf0] %v2256_v0  ;;  %v5611_v32 = vld.sshfl [vmem:[#allocation1 + $0x8] sm:$0xff pattern:$0x75316420] }
 0x366   : > { %2448 = vst [vmem:[#allocation1 + $0x30] ss:$2 sm:$0xff] %v2362_v42  ;;  %v5613_v23 = vld.sshfl [vmem:[#allocation1 + $0x10] sm:$0xff pattern:$0x75316420] }
 0x367   : > { %2488 = vrot.lane.b32.xlu0 %v5443_v3, %s4439_s22  ;;  %2496 = vrot.lane.b32.xlu1 %v5481_v46, %s4439_s22  ;;  %v5615_v16 = vld.sshfl [vmem:[#allocation1 + $0x18] sm:$0xff pattern:$0x75316420]  ;;  %2705 = vst [vmem:[#allocation1 + $0x1] ss:$2 sm:$0xff] %v2639_v34  ;;  %v5675_v42 = vld [vmem:[%s4472_s14 + $0x6c] sm:$0xff] }
 0x368   : > { %2727 = vst [vmem:[#allocation1 + $0x11] ss:$2 sm:$0xff] %v2648_v8  ;;  %v5626_v28 = vld.sshfl [vmem:[#allocation1 + $0x20] sm:$0xff pattern:$0x75316420] }
 0x369   : > { %v2193_v15 = vpop.permute.xlu0 %2192  ;;  %v2201_v47 = vpop.permute.xlu1 %2200  ;;  %v5628_v43 = vld.sshfl [vmem:[#allocation1 + $0x28] sm:$0xff pattern:$0x75316420] }
 0x36a   : > { %v2255_v3 = vsel %vm2242_vm6, %v2193_v15, %v2195_v38  ;;  %2717 = vst [vmem:[#allocation1 + $0x21] ss:$2 sm:$0xff] %v2645_v45 }
 0x36b   : > { %2492 = vrot.lane.b32.xlu2 %v5507_v29, %s4439_s22  ;;  %2319 = vst [vmem:[#allocation2 + $0x470] sm:$0xf0] %v2255_v3 }
 0x36d   : > { %v5621_v46 = vpop.permute.xlu2 %2214  ;;  %v5634_v29 = vld.sshfl [vmem:[#allocation1 + $0x30] sm:$0xff pattern:$0x75316420] }
 0x36e   : > { %2691 = vst [vmem:[#allocation1 + $0x31] ss:$2 sm:$0xff] %v5624_v26 }
 0x36f   : > { %2494 = vrot.lane.b32.xlu0 %v5483_v6, %s4439_s22  ;;  %2502 = vrot.lane.b32.xlu1 %v5464_v41, %s4439_s22  ;;  %v5637_v35 = vld.sshfl [vmem:[#allocation1 + $0x10] sm:$0xff pattern:$0x75316420]  ;;  %v5647_v41 = vld.sshfl [vmem:[#allocation1] sm:$0xff pattern:$0x75316420] }
 0x370   : > { %2739 = vst [vmem:[#allocation1 + $0x11] ss:$2 sm:$0xff] %v5197_v58 }
 0x371   : > { %v2199_v7 = vpop.permute.xlu0 %2198  ;;  %v2207_v25 = vpop.permute.xlu1 %2206  ;;  %v5652_v22 = vld.sshfl [vmem:[#allocation1 + $0x20] sm:$0xff pattern:$0x75316420]  ;;  %2715 = vst [vmem:[#allocation1 + $0x1] ss:$2 sm:$0xff] %v5303_v33 }
 0x372   : > { %v2257_v49 = vsel %vm2242_vm6, %v5537_v39, %v2199_v7  ;;  %v2258_v50 = vsel %vm2242_vm6, %v2199_v7, %v2201_v47  ;;  %v2261_v6 = vsel %vm2242_vm6, %v2207_v25, %v5594_v31  ;;  %2731 = vst [vmem:[#allocation1 + $0x21] ss:$2 sm:$0xff] %v5650_v62  ;;  %v5695_v47 = vld [vmem:[%s4472_s14 + $0x30] sm:$0xff] }
 0x373   : > { %2498 = vrot.lane.b32.xlu2 %v5448_v54, %s4439_s22  ;;  %2321 = vst [vmem:[#allocation2 + $0x498] sm:$0xf0] %v2257_v49 }
 0x374   : > { %2322 = vst [vmem:[#allocation2 + $0x148] sm:$0xf0] %v2258_v50 }
 0x375   : > { %v2221_v38 = vpop.permute.xlu2 %2220  ;;  %2325 = vst [vmem:[#allocation2 + $0x48] sm:$0xf0] %v2261_v6  ;;  %v5681_v34 = vld.sshfl [vmem:[#allocation1 + $0x38] sm:$0xff pattern:$0x75316420] }
 0x377   : > { %2500 = vrot.lane.b32.xlu0 %v5450_v20, %s4439_s22  ;;  %2508 = vrot.lane.b32.xlu1 %v5512_v19, %s4439_s22  ;;  %v5660_v39 = vld.sshfl [vmem:[#allocation1 + $0x10] sm:$0xff pattern:$0x75316420]  ;;  %v5662_v11 = vld.sshfl [vmem:[#allocation1 + $0x18] sm:$0xff pattern:$0x75316420] }
 0x378   : > { %2974 = vst [vmem:[#allocation1 + $0x10] ss:$2 sm:$0xff] %v5220_v1  ;;  %v5677_v8 = vld.sshfl [vmem:[#allocation1] sm:$0xff pattern:$0x75316420] }
 0x379   : > { %v2205_v58 = vpop.permute.xlu0 %2204  ;;  %v2213_v54 = vpop.permute.xlu1 %2212  ;;  %v5683_v15 = vld.sshfl [vmem:[#allocation1 + $0x20] sm:$0xff pattern:$0x75316420]  ;;  %v5685_v1 = vld.sshfl [vmem:[#allocation1 + $0x28] sm:$0xff pattern:$0x75316420] }
 0x37a   : > { %v2259_v0 = vsel %vm2242_vm6, %v5561_v27, %v2205_v58  ;;  %v2260_v33 = vsel %vm2242_vm6, %v2205_v58, %v2207_v25  ;;  %v2263_v20 = vsel %vm2242_vm6, %v2213_v54, %v5621_v46  ;;  %v5679_v27 = vld.sshfl [vmem:[#allocation1 + $0x30] sm:$0xff pattern:$0x75316420]  ;;  %2740 = vst [vmem:[#allocation1 + $0x21] ss:$2 sm:$0xff] %v5207_v4 }
 0x37b   : > { %2504 = vrot.lane.b32.xlu2 %v5549_v17, %s4439_s22  ;;  %2323 = vst [vmem:[#allocation2 + $0xd0] sm:$0xf0] %v2259_v0  ;;  %v5692_v17 = vld.sshfl [vmem:[#allocation1 + $0x8] sm:$0xff pattern:$0x75316420] }
 0x37c   : > { %2324 = vst [vmem:[#allocation2 + $0x90] sm:$0xf0] %v2260_v33  ;;  %v2926_v4 = vld [vmem:[%s4472_s14 + $0x10] sm:$0xf] }
 0x37d   : > { %v5672_v19 = vpop.permute.xlu2 %2226  ;;  %2327 = vst [vmem:[#allocation2 + $0x478] sm:$0xf0] %v2263_v20  ;;  %v2642_v20 = vld [vmem:[%s4472_s14 + $0x4c] sm:$0xf] }
 0x37e   : > { %2726 = vst [vmem:[#allocation1 + $0x1] ss:$2 sm:$0xff] %v5675_v42 }
 0x37f   : > { %2506 = vrot.lane.b32.xlu0 %v5556_v2, %s4439_s22  ;;  %2514 = vrot.lane.b32.xlu1 %v5492_v21, %s4439_s22  ;;  %2700 = vst [vmem:[#allocation1 + $0x31] ss:$2 sm:$0xff] %v5695_v47  ;;  %v2651_v2 = vld [vmem:[%s4472_s14 + $0x88] sm:$0xf] }
 0x380   : > { %v2980_v0 = vld.sshfl [vmem:[#allocation1 + $0x18] sm:$0xff pattern:$0x75316420] }
 0x381   : > { %v2211_v3 = vpop.permute.xlu0 %2210  ;;  %v2219_v45 = vpop.permute.xlu1 %2218  ;;  %v5708_v49 = vld.sshfl [vmem:[#allocation1 + $0x20] sm:$0xff pattern:$0x75316420]  ;;  %v5710_v50 = vld.sshfl [vmem:[#allocation1 + $0x28] sm:$0xff pattern:$0x75316420] }
 0x382   : > { %v2262_v7 = vsel %vm2242_vm6, %v5594_v31, %v2211_v3  ;;  %v2266_v25 = vsel %vm2242_vm6, %v2219_v45, %v2221_v38  ;;  %2976 = vst [vmem:[#allocation1 + $0x20] ss:$2 sm:$0xff] %v2926_v4 }
 0x383   : > { %2510 = vrot.lane.b32.xlu2 %v5509_v18, %s4439_s22  ;;  %2326 = vst [vmem:[#allocation2 + $0x448] sm:$0xf0] %v2262_v7 }
 0x384   : > { %2330 = vst [vmem:[#allocation2 + $0x358] sm:$0xf0] %v2266_v25 }
 0x385   : > { %v5705_v21 = vpop.permute.xlu2 %2232  ;;  %v5716_v18 = vld.sshfl [vmem:[#allocation1] sm:$0xff pattern:$0x75316420]  ;;  %v5718_v31 = vld.sshfl [vmem:[#allocation1 + $0x8] sm:$0xff pattern:$0x75316420] }
 0x386   : > { %2737 = vst [vmem:[#allocation1 + $0x1] ss:$2 sm:$0xff] %v2651_v2  ;;  %v5725_v33 = vld.sshfl [vmem:[#allocation1 + $0x30] sm:$0xff pattern:$0x75316420]  ;;  %v5745_v2 = vld [vmem:[%s4472_s14 + $0x64] sm:$0xff] }
 0x387   : > { %2512 = vrot.lane.b32.xlu0 %v5470_v57, %s4439_s22  ;;  %2520 = vrot.lane.b32.xlu1 %v5596_v61, %s4439_s22  ;;  %v2929_v61 = vld [vmem:[%s4472_s14 + $0x24] sm:$0xf]  ;;  %v5731_v3 = vld.sshfl [vmem:[#allocation1 + $0x38] sm:$0xff pattern:$0x75316420] }
 0x388   : > { %2709 = vst [vmem:[#allocation1 + $0x31] ss:$2 sm:$0xff] %v2642_v20 }
 0x389   : > { %v2217_v6 = vpop.permute.xlu0 %2216  ;;  %v2225_v38 = vpop.permute.xlu1 %2224 }
 0x38a   : > { %v2264_v58 = vsel %vm2242_vm6, %v5621_v46, %v2217_v6  ;;  %v2265_v54 = vsel %vm2242_vm6, %v2217_v6, %v2219_v45  ;;  %v2268_v57 = vsel %vm2242_vm6, %v2225_v38, %v5672_v19  ;;  %v2979_v46 = vld.sshfl [vmem:[#allocation1 + $0x10] sm:$0xff pattern:$0x75316420] }
 0x38b   : > { %2516 = vrot.lane.b32.xlu2 %v5486_v9, %s4439_s22  ;;  %2328 = vst [vmem:[#allocation2 + $0x58] sm:$0xf0] %v2264_v58  ;;  %v2928_v58 = vld [vmem:[%s4472_s14 + $0x1c] sm:$0xff] }
 0x38c   : > { %2329 = vst [vmem:[#allocation2 + $0x2a8] sm:$0xf0] %v2265_v54 }
 0x38d   : > { %v5733_v7 = vpop.permute.xlu2 %2238  ;;  %2332 = vst [vmem:[#allocation2 + $0x308] sm:$0xf0] %v2268_v57  ;;  %v5738_v9 = vld.sshfl [vmem:[#allocation1] sm:$0xff pattern:$0x75316420] }
 0x38e   : > { %2987 = vst [vmem:[#allocation1 + $0x10] ss:$2 sm:$0xff] %v2929_v61 }
 0x38f   : > { %2518 = vrot.lane.b32.xlu0 %v5592_v60, %s4439_s22  ;;  %3045 = vrot.lane.b32.xlu1 %v2980_v0, %s4440_s23  ;;  %2972 = vst [vmem:[#allocation1] ss:$2 sm:$0xff] %v5535_v37  ;;  %v5752_v54 = vld.sshfl [vmem:[#allocation1 + $0x30] sm:$0xff pattern:$0x75316420] }
 0x390   : > { %v2981_v37 = vld.sshfl [vmem:[#allocation1 + $0x20] sm:$0xff pattern:$0x75316420]  ;;  %2723 = vst [vmem:[#allocation1 + $0x31] ss:$2 sm:$0xff] %v5745_v2 }
 0x391   : > { %v2223_v45 = vpop.permute.xlu0 %2222  ;;  %v2231_v25 = vpop.permute.xlu1 %2230 }
 0x392   : > { %v2267_v4 = vsel %vm2242_vm6, %v2223_v45, %v2225_v38 }
 0x393   : > { %2522 = vrot.lane.b32.xlu2 %v5539_v40, %s4439_s22  ;;  %2331 = vst [vmem:[#allocation2 + $0x140] sm:$0xf0] %v2267_v4 }
 0x395   : > { %v5747_v6 = vpop.permute.xlu2 %2456  ;;  %v5749_v60 = vld.sshfl [vmem:[#allocation1 + $0x10] sm:$0xff pattern:$0x75316420] }
 0x396   : > { %2999 = vst [vmem:[#allocation1 + $0x10] ss:$2 sm:$0xff] %v5546_v13  ;;  %v2978_v40 = vld.sshfl [vmem:[#allocation1 + $0x8] sm:$0xff pattern:$0x75316420] }
 0x397   : > { %2524 = vrot.lane.b32.xlu0 %v5495_v10, %s4439_s22  ;;  %2755 = vrot.lane.b32.xlu1 %v5564_v51, %s4441_s24  ;;  %v2977_v38 = vld.sshfl [vmem:[#allocation1] sm:$0xff pattern:$0x75316420]  ;;  %v5769_v45 = vld.sshfl [vmem:[#allocation1 + $0x30] sm:$0xff pattern:$0x75316420] }
 0x398   : > { %2986 = vst [vmem:[#allocation1] ss:$2 sm:$0xff] %v2928_v58  ;;  %v5767_v51 = vld [vmem:[%s4472_s14 + $0x80] sm:$0xff]  ;;  %v5771_v4 = vld.sshfl [vmem:[#allocation1 + $0x38] sm:$0xff pattern:$0x75316420] }
 0x399   : > { %v2229_v57 = vpop.permute.xlu0 %2228  ;;  %v2237_v0 = vpop.permute.xlu1 %2236  ;;  %2732 = vst [vmem:[#allocation1 + $0x31] ss:$2 sm:$0xff] %v5767_v51 }
 0x39a   : > { %v2269_v61 = vsel %vm2242_vm6, %v5672_v19, %v2229_v57  ;;  %v2270_v13 = vsel %vm2242_vm6, %v2229_v57, %v2231_v25  ;;  %v2273_v10 = vsel %vm2242_vm6, %v2237_v0, %v5733_v7 }
 0x39b   : > { %3047 = vrot.lane.b32.xlu2 %v2981_v37, %s4440_s23  ;;  %2333 = vst [vmem:[#allocation2 + $0xf0] sm:$0xf0] %v2269_v61 }
 0x39c   : > { %2334 = vst [vmem:[#allocation2 + $0x5f0] sm:$0xf0] %v2270_v13 }
 0x39d   : > { %v2463_v20 = vpop.permute.xlu2 %2462  ;;  %2337 = vst [vmem:[#allocation2 + $0x30] sm:$0xf0] %v2273_v10 }
 0x39f   : > { %2753 = vrot.lane.b32.xlu0 %v5520_v5, %s4441_s24  ;;  %3041 = vrot.lane.b32.xlu1 %v2978_v40, %s4440_s23  ;;  %v2654_v5 = vld [vmem:[%s4472_s14 + $0x9c] sm:$0xf]  ;;  %v2989_v40 = vld.sshfl [vmem:[#allocation1 + $0x8] sm:$0xff pattern:$0x75316420] }
 0x3a0   : > { %v5784_v13 = vld.sshfl [vmem:[#allocation1 + $0x30] sm:$0xff pattern:$0x75316420]  ;;  %v5786_v10 = vld.sshfl [vmem:[#allocation1 + $0x38] sm:$0xff pattern:$0x75316420] }
 0x3a1   : > { %v2235_v19 = vpop.permute.xlu0 %2234  ;;  %v2455_v25 = vpop.permute.xlu1 %2454  ;;  %2741 = vst [vmem:[#allocation1 + $0x31] ss:$2 sm:$0xff] %v2654_v5 }
 0x3a2   : > { %v2271_v58 = vsel %vm2242_vm6, %v5705_v21, %v2235_v19  ;;  %v2272_v37 = vsel %vm2242_vm6, %v2235_v19, %v2237_v0  ;;  %v2535_v57 = vsel %vm2534_vm7, %v2455_v25, %v5747_v6  ;;  %v2932_v25 = vld [vmem:[%s4472_s14 + $0x38] sm:$0xf] }
 0x3a3   : > { %3043 = vrot.lane.b32.xlu2 %v2979_v46, %s4440_s23  ;;  %2335 = vst [vmem:[#allocation2 + $0x110] sm:$0xf0] %v2271_v58  ;;  %v2988_v58 = vld.sshfl [vmem:[#allocation1] sm:$0xff pattern:$0x75316420] }
 0x3a4   : > { %2336 = vst [vmem:[#allocation2 + $0x580] sm:$0xf0] %v2272_v37 }
 0x3a5   : > { %v2469_v61 = vpop.permute.xlu2 %2468  ;;  %2599 = vst [vmem:[#allocation2 + $0x330] sm:$0xf] %v2535_v57 }
 0x3a6   : > { %2997 = vst [vmem:[#allocation1] ss:$2 sm:$0xff] %v2932_v25  ;;  %v2935_v25 = vld [vmem:[%s4472_s14 + $0x4c] sm:$0xf] }
 0x3a7   : > { %2751 = vrot.lane.b32.xlu0 %v5518_v24, %s4441_s24  ;;  %3055 = vrot.lane.b32.xlu1 %v2989_v40, %s4440_s23 }
 0x3a8   : > { %v5797_v24 = vld.sshfl [vmem:[#allocation1 + $0x30] sm:$0xff pattern:$0x75316420] }
 0x3a9   : > { %v2241_v21 = vpop.permute.xlu0 %2240  ;;  %v2461_v0 = vpop.permute.xlu1 %2460  ;;  %2983 = vst [vmem:[#allocation1 + $0x30] ss:$2 sm:$0xff] %v5624_v26 }
 0x3aa   : > { %v2274_v46 = vsel %vm2242_vm6, %v5733_v7, %v2241_v21  ;;  %v2538_v19 = vsel %vm2534_vm7, %v2461_v0, %v2463_v20 }
 0x3ab   : > { %2749 = vrot.lane.b32.xlu2 %v5567_v52, %s4441_s24  ;;  %2338 = vst [vmem:[#allocation2 + $0x3c8] sm:$0xf0] %v2274_v46 }
 0x3ac   : > { %2602 = vst [vmem:[#allocation2 + $0x2d0] sm:$0xf] %v2538_v19 }
 0x3ad   : > { %v2475_v37 = vpop.permute.xlu2 %2474 }
 0x3af   : > { %3039 = vrot.lane.b32.xlu0 %v2977_v38, %s4440_s23  ;;  %2763 = vrot.lane.b32.xlu1 %v5611_v32, %s4441_s24 }
 0x3b0   : > { %v2984_v32 = vld.sshfl [vmem:[#allocation1 + $0x30] sm:$0xff pattern:$0x75316420]  ;;  %v2985_v40 = vld.sshfl [vmem:[#allocation1 + $0x38] sm:$0xff pattern:$0x75316420] }
 0x3b1   : > { %v2459_v7 = vpop.permute.xlu0 %2458  ;;  %v2467_v20 = vpop.permute.xlu1 %2466  ;;  %2992 = vst [vmem:[#allocation1 + $0x30] ss:$2 sm:$0xff] %v5695_v47 }
 0x3b2   : > { %v2536_v57 = vsel %vm2534_vm7, %v5747_v6, %v2459_v7  ;;  %v2537_v52 = vsel %vm2534_vm7, %v2459_v7, %v2461_v0  ;;  %v2540_v5 = vsel %vm2534_vm7, %v2467_v20, %v2469_v61 }
 0x3b3   : > { %3057 = vrot.lane.b32.xlu2 %v5749_v60, %s4440_s23  ;;  %2600 = vst [vmem:[#allocation2 + $0x3e8] sm:$0xf] %v2536_v57  ;;  %v2930_v60 = vld [vmem:[%s4472_s14 + $0x28] sm:$0xff] }
 0x3b4   : > { %2601 = vst [vmem:[#allocation2 + $0x378] sm:$0xf] %v2537_v52  ;;  %v2934_v57 = vld [vmem:[%s4472_s14 + $0x44] sm:$0xff] }
 0x3b5   : > { %v2481_v38 = vpop.permute.xlu2 %2480  ;;  %2604 = vst [vmem:[#allocation2 + $0x490] sm:$0xf] %v2540_v5 }
 0x3b6   : > { %2991 = vst [vmem:[#allocation1 + $0x20] ss:$2 sm:$0xff] %v2930_v60 }
 0x3b7   : > { %2747 = vrot.lane.b32.xlu0 %v5576_v56, %s4441_s24  ;;  %2761 = vrot.lane.b32.xlu1 %v5609_v14, %s4441_s24 }
 0x3b8   : > { %v2995_v52 = vld.sshfl [vmem:[#allocation1 + $0x30] sm:$0xff pattern:$0x75316420] }
 0x3b9   : > { %v2465_v26 = vpop.permute.xlu0 %2464  ;;  %v2473_v6 = vpop.permute.xlu1 %2472 }
 0x3ba   : > { %v2539_v21 = vsel %vm2534_vm7, %v2465_v26, %v2467_v20 }
 0x3bb   : > { %2765 = vrot.lane.b32.xlu2 %v5551_v48, %s4441_s24  ;;  %2603 = vst [vmem:[#allocation2 + $0x540] sm:$0xf] %v2539_v21  ;;  %v2996_v48 = vld.sshfl [vmem:[#allocation1 + $0x38] sm:$0xff pattern:$0x75316420] }
 0x3bc   : > { %3001 = vst [vmem:[#allocation1 + $0x30] ss:$2 sm:$0xff] %v2935_v25  ;;  %v5848_v25 = vld.sshfl [vmem:[#allocation1 + $0x10] sm:$0xff pattern:$0x75316420] }
 0x3bd   : > { %v2487_v0 = vpop.permute.xlu2 %2486  ;;  %v2993_v7 = vld.sshfl [vmem:[#allocation1 + $0x20] sm:$0xff pattern:$0x75316420]  ;;  %v2994_v20 = vld.sshfl [vmem:[#allocation1 + $0x28] sm:$0xff pattern:$0x75316420] }
 0x3be   : > { %3000 = vst [vmem:[#allocation1 + $0x20] ss:$2 sm:$0xff] %v2934_v57 }
 0x3bf   : > { %3053 = vrot.lane.b32.xlu0 %v2988_v58, %s4440_s23  ;;  %3049 = vrot.lane.b32.xlu1 %v2984_v32, %s4440_s23 }
 0x3c1   : > { %v2471_v56 = vpop.permute.xlu0 %2470  ;;  %v2479_v14 = vpop.permute.xlu1 %2478 }
 0x3c2   : > { %v2541_v47 = vsel %vm2534_vm7, %v2469_v61, %v2471_v56  ;;  %v2542_v46 = vsel %vm2534_vm7, %v2471_v56, %v2473_v6  ;;  %v2545_v19 = vsel %vm2534_vm7, %v2479_v14, %v2481_v38  ;;  %v2998_v6 = vld.sshfl [vmem:[#allocation1] sm:$0xff pattern:$0x75316420] }
 0x3c3   : > { %3051 = vrot.lane.b32.xlu2 %v2985_v40, %s4440_s23  ;;  %2605 = vst [vmem:[#allocation2 + $0xd8] sm:$0xf] %v2541_v47 }
 0x3c4   : > { %2606 = vst [vmem:[#allocation2 + $0x1c0] sm:$0xf] %v2542_v46 }
 0x3c5   : > { %v2493_v58 = vpop.permute.xlu2 %2492  ;;  %2609 = vst [vmem:[#allocation2 + $0x1a8] sm:$0xf] %v2545_v19 }
 0x3c7   : > { %2759 = vrot.lane.b32.xlu0 %v5681_v34, %s4441_s24  ;;  %2757 = vrot.lane.b32.xlu1 %v5679_v27, %s4441_s24  ;;  %v3006_v34 = vld.sshfl [vmem:[#allocation1 + $0x30] sm:$0xff pattern:$0x75316420] }
 0x3c8   : > { %3015 = vst [vmem:[#allocation1 + $0x30] ss:$2 sm:$0xff] %v5745_v2 }
 0x3c9   : > { %v2477_v61 = vpop.permute.xlu0 %2476  ;;  %v2485_v5 = vpop.permute.xlu1 %2484 }
 0x3ca   : > { %v2543_v32 = vsel %vm2534_vm7, %v2475_v37, %v2477_v61  ;;  %v2544_v40 = vsel %vm2534_vm7, %v2477_v61, %v2479_v14  ;;  %v2547_v26 = vsel %vm2534_vm7, %v2485_v5, %v2487_v0 }
 0x3cb   : > { %3065 = vrot.lane.b32.xlu2 %v2996_v48, %s4440_s23  ;;  %2607 = vst [vmem:[#allocation2 + $0x340] sm:$0xf] %v2543_v32  ;;  %v2938_v48 = vld [vmem:[%s4472_s14 + $0x60] sm:$0xf] }
 0x3cc   : > { %2608 = vst [vmem:[#allocation2 + $0xb8] sm:$0xf] %v2544_v40 }
 0x3cd   : > { %v2499_v21 = vpop.permute.xlu2 %2498  ;;  %2611 = vst [vmem:[#allocation2 + $0x4f0] sm:$0xf] %v2547_v26 }
 0x3cf   : > { %3067 = vrot.lane.b32.xlu0 %v2998_v6, %s4440_s23  ;;  %3063 = vrot.lane.b32.xlu1 %v2995_v52, %s4440_s23 }
 0x3d1   : > { %v2483_v27 = vpop.permute.xlu0 %2482  ;;  %v2491_v37 = vpop.permute.xlu1 %2490 }
 0x3d2   : > { %v2546_v60 = vsel %vm2534_vm7, %v2481_v38, %v2483_v27  ;;  %v2550_v56 = vsel %vm2534_vm7, %v2491_v37, %v2493_v58 }
 0x3d3   : > { %2773 = vrot.lane.b32.xlu2 %v5731_v3, %s4441_s24  ;;  %2610 = vst [vmem:[#allocation2 + $0xa8] sm:$0xf] %v2546_v60  ;;  %v3005_v3 = vld.sshfl [vmem:[#allocation1 + $0x28] sm:$0xff pattern:$0x75316420]  ;;  %v4442_v60 = vmov 1.0  }
 0x3d4   : > { %2614 = vst [vmem:[#allocation2 + $0x250] sm:$0xf] %v2550_v56 }
 0x3d5   : > { %v2505_v14 = vpop.permute.xlu2 %2504  ;;  %3218 = vst [vmem:[#allocation2] sm:$0xf0] %v4442_v60 }
 0x3d6   : > { %3216 = vst [vmem:[#allocation2 + $0x1a0] sm:$0xf0] %v4442_v60 }
 0x3d7   : > { %2775 = vrot.lane.b32.xlu0 %v5647_v41, %s4441_s24  ;;  %2769 = vrot.lane.b32.xlu1 %v5601_v12, %s4441_s24  ;;  %v3003_v41 = vld.sshfl [vmem:[#allocation1 + $0x18] sm:$0xff pattern:$0x75316420]  ;;  %v3004_v12 = vld.sshfl [vmem:[#allocation1 + $0x20] sm:$0xff pattern:$0x75316420] }
 0x3d8   : > { %3009 = vst [vmem:[#allocation1 + $0x20] ss:$2 sm:$0xff] %v2938_v48 }
 0x3d9   : > { %v2489_v2 = vpop.permute.xlu0 %2488  ;;  %v2497_v47 = vpop.permute.xlu1 %2496  ;;  %3008 = vst [vmem:[#allocation1 + $0x10] ss:$2 sm:$0xff] %v5574_v63 }
 0x3da   : > { %v2548_v46 = vsel %vm2534_vm7, %v2487_v0, %v2489_v2  ;;  %v2549_v38 = vsel %vm2534_vm7, %v2489_v2, %v2491_v37  ;;  %v2552_v19 = vsel %vm2534_vm7, %v2497_v47, %v2499_v21  ;;  %3217 = vst [vmem:[#allocation2 + $0x60] sm:$0xf0] %v4442_v60 }
 0x3db   : > { %2771 = vrot.lane.b32.xlu2 %v5725_v33, %s4441_s24  ;;  %2612 = vst [vmem:[#allocation2 + $0x248] sm:$0xf] %v2548_v46 }
 0x3dc   : > { %2613 = vst [vmem:[#allocation2 + $0x1f8] sm:$0xf] %v2549_v38 }
 0x3dd   : > { %v2511_v57 = vpop.permute.xlu2 %2510  ;;  %2616 = vst [vmem:[#allocation2 + $0x10] sm:$0xf] %v2552_v19 }
 0x3de   : > { %3219 = vst [vmem:[#allocation2 + $0x120] sm:$0xf0] %v4442_v60 }
 0x3df   : > { %3061 = vrot.lane.b32.xlu0 %v2994_v20, %s4440_s23  ;;  %3077 = vrot.lane.b32.xlu1 %v3006_v34, %s4440_s23  ;;  %v3014_v61 = vld.sshfl [vmem:[#allocation1 + $0x20] sm:$0xff pattern:$0x75316420]  ;;  %3220 = vst [vmem:[#allocation2 + $0x1b8] sm:$0xf0] %v4442_v60 }
 0x3e0   : > { %3023 = vst [vmem:[#allocation1 + $0x20] ss:$2 sm:$0xff] %v5650_v62 }
 0x3e1   : > { %v2495_v0 = vpop.permute.xlu0 %2494  ;;  %v2503_v58 = vpop.permute.xlu1 %2502  ;;  %3221 = vst [vmem:[#allocation2 + $0x1e8] sm:$0xf0] %v4442_v60 }
 0x3e2   : > { %v2551_v33 = vsel %vm2534_vm7, %v2495_v0, %v2497_v47  ;;  %3222 = vst [vmem:[#allocation2 + $0x4d8] sm:$0xf0] %v4442_v60 }
 0x3e3   : > { %3059 = vrot.lane.b32.xlu2 %v2993_v7, %s4440_s23  ;;  %2615 = vst [vmem:[#allocation2 + $0x3d8] sm:$0xf] %v2551_v33  ;;  %v2936_v7 = vld [vmem:[%s4472_s14 + $0x50] sm:$0xff] }
 0x3e4   : > { %3007 = vst [vmem:[#allocation1] ss:$2 sm:$0xff] %v2936_v7  ;;  %v3267_v7 = vld [vmem:[#allocation2 + $0x550] sm:$0xff] }
 0x3e5   : > { %v2517_v52 = vpop.permute.xlu2 %2516  ;;  %3223 = vst [vmem:[#allocation2 + $0x268] sm:$0xf0] %v4442_v60 }
 0x3e6   : > { %3224 = vst [vmem:[#allocation2 + $0x4a8] sm:$0xf0] %v4442_v60 }
 0x3e7   : > { %3075 = vrot.lane.b32.xlu0 %v3005_v3, %s4440_s23  ;;  %2785 = vrot.lane.b32.xlu1 %v5752_v54, %s4441_s24  ;;  %3225 = vst [vmem:[#allocation2 + $0x3c0] sm:$0xf0] %v4442_v60 }
 0x3e8   : > { %3226 = vst [vmem:[#allocation2 + $0x88] sm:$0xf0] %v4442_v60 }
 0x3e9   : > { %v2501_v20 = vpop.permute.xlu0 %2500  ;;  %v2509_v5 = vpop.permute.xlu1 %2508  ;;  %3227 = vst [vmem:[#allocation2 + $0x5f8] sm:$0xf0] %v4442_v60 }
 0x3ea   : > { %v2553_v63 = vsel %vm2534_vm7, %v2499_v21, %v2501_v20  ;;  %v2554_v32 = vsel %vm2534_vm7, %v2501_v20, %v2503_v58  ;;  %v2557_v40 = vsel %vm2534_vm7, %v2509_v5, %v2511_v57  ;;  %3228 = vst [vmem:[#allocation2 + $0x290] sm:$0xf0] %v4442_v60 }
 0x3eb   : > { %2767 = vrot.lane.b32.xlu2 %v5599_v44, %s4441_s24  ;;  %2617 = vst [vmem:[#allocation2 + $0xc0] sm:$0xf] %v2553_v63  ;;  %v3013_v44 = vld.sshfl [vmem:[#allocation1 + $0x18] sm:$0xff pattern:$0x75316420] }
 0x3ec   : > { %2618 = vst [vmem:[#allocation2 + $0x258] sm:$0xf] %v2554_v32  ;;  %v5875_v37 = vld.sshfl [vmem:[#allocation1 + $0x8] sm:$0xff pattern:$0x75316420] }
 0x3ed   : > { %v2523_v62 = vpop.permute.xlu2 %2522  ;;  %2621 = vst [vmem:[#allocation2 + $0x3a8] sm:$0xf] %v2557_v40 }
 0x3ee   : > { %3229 = vst [vmem:[#allocation2 + $0x1d0] sm:$0xf0] %v4442_v60 }
 0x3ef   : > { %2783 = vrot.lane.b32.xlu0 %v5628_v43, %s4441_s24  ;;  %3071 = vrot.lane.b32.xlu1 %v3003_v41, %s4440_s23  ;;  %v3010_v43 = vld.sshfl [vmem:[#allocation1] sm:$0xff pattern:$0x75316420]  ;;  %3230 = vst [vmem:[#allocation2 + $0x4d0] sm:$0xf0] %v4442_v60 }
 0x3f0   : > { %3018 = vst [vmem:[#allocation1] ss:$2 sm:$0xff] %v5675_v42 }
 0x3f1   : > { %v2507_v54 = vpop.permute.xlu0 %2506  ;;  %v2515_v26 = vpop.permute.xlu1 %2514  ;;  %3231 = vst [vmem:[#allocation2 + $0x3f8] sm:$0xf0] %v4442_v60 }
 0x3f2   : > { %v2555_v6 = vsel %vm2534_vm7, %v2505_v14, %v2507_v54  ;;  %v2556_v21 = vsel %vm2534_vm7, %v2507_v54, %v2509_v5  ;;  %v2559_v34 = vsel %vm2534_vm7, %v2515_v26, %v2517_v52  ;;  %3232 = vst [vmem:[#allocation2 + $0x1b0] sm:$0xf0] %v4442_v60  ;;  %v3263_v26 = vld [vmem:[#allocation2 + $0x2f0] sm:$0xff] }
 0x3f3   : > { %3073 = vrot.lane.b32.xlu2 %v3004_v12, %s4440_s23  ;;  %2619 = vst [vmem:[#allocation2 + $0x50] sm:$0xf] %v2555_v6 }
 0x3f4   : > { %2620 = vst [vmem:[#allocation2 + $0x238] sm:$0xf] %v2556_v21 }
 0x3f5   : > { %v3048_v27 = vpop.permute.xlu2 %3047  ;;  %2623 = vst [vmem:[#allocation2 + $0x38] sm:$0xf] %v2559_v34  ;;  %v5962_v34 = vld.sshfl [vmem:[#allocation1 + $0x38] sm:$0xff pattern:$0x75316420] }
 0x3f6   : > { %3233 = vst [vmem:[#allocation2 + $0x3f0] sm:$0xf0] %v4442_v60 }
 0x3f7   : > { %2781 = vrot.lane.b32.xlu0 %v5626_v28, %s4441_s24  ;;  %3085 = vrot.lane.b32.xlu1 %v3013_v44, %s4440_s23  ;;  %3234 = vst [vmem:[#allocation2 + $0x100] sm:$0xf0] %v4442_v60  ;;  %v3021_v33 = vld.sshfl [vmem:[#allocation1 + $0x8] sm:$0xff pattern:$0x75316420] }
 0x3f8   : > { %3235 = vst [vmem:[#allocation2 + $0x4b8] sm:$0xf0] %v4442_v60  ;;  %v3020_v63 = vld.sshfl [vmem:[#allocation1] sm:$0xff pattern:$0x75316420] }
 0x3f9   : > { %v2513_v56 = vpop.permute.xlu0 %2512  ;;  %v2521_v14 = vpop.permute.xlu1 %2520  ;;  %3236 = vst [vmem:[#allocation2 + $0x5a8] sm:$0xf0] %v4442_v60 }
 0x3fa   : > { %v2558_v2 = vsel %vm2534_vm7, %v2511_v57, %v2513_v56  ;;  %v2562_v47 = vsel %vm2534_vm7, %v2521_v14, %v2523_v62  ;;  %3237 = vst [vmem:[#allocation2 + $0x208] sm:$0xf0] %v4442_v60  ;;  %v2941_v62 = vld [vmem:[%s4472_s14 + $0x74] sm:$0xf]  ;;  %v2944_v56 = vld [vmem:[%s4472_s14 + $0x88] sm:$0xf] }
 0x3fb   : > { %2779 = vrot.lane.b32.xlu2 %v5581_v55, %s4441_s24  ;;  %2622 = vst [vmem:[#allocation2 + $0x188] sm:$0xf] %v2558_v2  ;;  %v3270_v2 = vld [vmem:[#allocation2 + $0x80] sm:$0xff] }
 0x3fc   : > { %2626 = vst [vmem:[#allocation2 + $0x360] sm:$0xf] %v2562_v47 }
 0x3fd   : > { %v5889_v28 = vpop.permute.xlu2 %3043  ;;  %3238 = vst [vmem:[#allocation2 + $0x150] sm:$0xf0] %v4442_v60 }
 0x3fe   : > { %3239 = vst [vmem:[#allocation2 + $0x320] sm:$0xf0] %v4442_v60 }
 0x3ff   : > { %3069 = vrot.lane.b32.xlu0 %v5848_v25, %s4440_s23  ;;  %2793 = vrot.lane.b32.xlu1 %v5615_v16, %s4441_s24  ;;  %3240 = vst [vmem:[#allocation2 + $0x1f0] sm:$0xf0] %v4442_v60 }
 0x400   : > { %3241 = vst [vmem:[#allocation2 + $0x500] sm:$0xf0] %v4442_v60 }
 0x401   : > { %v2519_v55 = vpop.permute.xlu0 %2518  ;;  %v3046_v42 = vpop.permute.xlu1 %3045  ;;  %3242 = vst [vmem:[#allocation2 + $0xe8] sm:$0xf0] %v4442_v60 }
 0x402   : > { %v2560_v46 = vsel %vm2534_vm7, %v2517_v52, %v2519_v55  ;;  %v2561_v38 = vsel %vm2534_vm7, %v2519_v55, %v2521_v14  ;;  %v3122_v19 = vsel %vm3119_vm8, %v5889_v28, %v3046_v42  ;;  %v3123_v16 = vsel %vm3119_vm8, %v3046_v42, %v3048_v27  ;;  %3243 = vst [vmem:[#allocation2 + $0x5b0] sm:$0xf0] %v4442_v60  ;;  %v3259_v27 = vld [vmem:[#allocation2 + $0x18] sm:$0xff]  ;;  %v3262_v42 = vld [vmem:[#allocation2 + $0x400] sm:$0xff] }
 0x403   : > { %3087 = vrot.lane.b32.xlu2 %v3014_v61, %s4440_s23  ;;  %2624 = vst [vmem:[#allocation2 + $0x2d8] sm:$0xf] %v2560_v46 }
 0x404   : > { %2625 = vst [vmem:[#allocation2 + $0x5b8] sm:$0xf] %v2561_v38 }
 0x405   : > { %v5907_v25 = vpop.permute.xlu2 %2749  ;;  %3186 = vst [vmem:[#allocation2] sm:$0xf] %v3122_v19 }
 0x406   : > { %3187 = vst [vmem:[#allocation2 + $0x120] sm:$0xf] %v3123_v16 }
 0x407   : > { %2777 = vrot.lane.b32.xlu0 %v5579_v59, %s4441_s24  ;;  %2791 = vrot.lane.b32.xlu1 %v5613_v23, %s4441_s24  ;;  %v3012_v59 = vld.sshfl [vmem:[#allocation1 + $0x10] sm:$0xff pattern:$0x75316420]  ;;  %3244 = vst [vmem:[#allocation2 + $0x118] sm:$0xf0] %v4442_v60 }
 0x408   : > { %3245 = vst [vmem:[#allocation2 + $0x350] sm:$0xf0] %v4442_v60 }
 0x409   : > { %v5915_v3 = vpop.permute.xlu0 %2524  ;;  %v2756_v48 = vpop.permute.xlu1 %2755  ;;  %3246 = vst [vmem:[#allocation2 + $0x2e8] sm:$0xf0] %v4442_v60 }
 0x40a   : > { %3247 = vst [vmem:[#allocation2 + $0x310] sm:$0xf0] %v4442_v60 }
 0x40b   : > { %2795 = vrot.lane.b32.xlu2 %v5652_v22, %s4441_s24  ;;  %3019 = vst [vmem:[#allocation1 + $0x10] ss:$2 sm:$0xff] %v2941_v62  ;;  %v6007_v62 = vld.sshfl [vmem:[#allocation1 + $0x20] sm:$0xff pattern:$0x75316420] }
 0x40c   : > { %v3278_v41 = vld [vmem:[#allocation2] sm:$0xff]  ;;  %3029 = vst [vmem:[#allocation1] ss:$2 sm:$0xff] %v2944_v56  ;;  %v3256_v56 = vld [vmem:[#allocation2 + $0x410] sm:$0xff] }
 0x40d   : > { %v3058_v23 = vpop.permute.xlu2 %3057  ;;  %3502 = vmatpush.msra.mxu2 %v3278_v41  ;;  %v3279_v57 = vld [vmem:[#allocation2 + $0x120] sm:$0xff] }
 0x40e   : > { %3522 = vmatpush.msra.mxu3 %v3279_v57  ;;  %v3265_v57 = vld [vmem:[#allocation2 + $0x280] sm:$0xff] }
 0x40f   : > { %3083 = vrot.lane.b32.xlu0 %v3012_v59, %s4440_s23  ;;  %3079 = vrot.lane.b32.xlu1 %v3010_v43, %s4440_s23  ;;  %v5966_v43 = vld.sshfl [vmem:[#allocation1 + $0x30] sm:$0xff pattern:$0x75316420]  ;;  %v3258_v59 = vld [vmem:[#allocation2 + $0x518] sm:$0xff] }
 0x410   : > { %3024 = vst [vmem:[#allocation1 + $0x30] ss:$2 sm:$0xff] %v5767_v51 }
 0x411   : > { %v2754_v22 = vpop.permute.xlu0 %2753  ;;  %v3042_v12 = vpop.permute.xlu1 %3041 }
 0x412   : > { %v2831_v0 = vsel %vm2827_vm9, %v2754_v22, %v2756_v48  ;;  %v3121_v40 = vsel %vm3119_vm8, %v3042_v12, %v5889_v28  ;;  %v3266_v28 = vld [vmem:[#allocation2 + $0x158] sm:$0xff]  ;;  %v3022_v55 = vld.sshfl [vmem:[#allocation1 + $0x10] sm:$0xff pattern:$0x75316420] }
 0x413   : > { %3081 = vrot.lane.b32.xlu2 %v5875_v37, %s4440_s23  ;;  %2895 = vst [vmem:[#allocation2 + $0x2d0] sm:$0xf0] %v2831_v0  ;;  %v3269_v48 = vld [vmem:[#allocation2 + $0x398] sm:$0xff] }
 0x414   : > { %3185 = vst [vmem:[#allocation2 + $0x60] sm:$0xf] %v3121_v40  ;;  %v3295_v0 = vld [vmem:[#allocation2 + $0x178] sm:$0xff] }
 0x415   : > { %v2766_v58 = vpop.permute.xlu2 %2765 }
 0x417   : > { %2789 = vrot.lane.b32.xlu0 %v5692_v17, %s4441_s24  ;;  %2787 = vrot.lane.b32.xlu1 %v5677_v8, %s4441_s24  ;;  %v3271_v8 = vld [vmem:[#allocation2 + $0x538] sm:$0xff] }
 0x419   : > { %v2752_v52 = vpop.permute.xlu0 %2751  ;;  %v5944_v61 = vpop.permute.xlu1 %3055 }
 0x41a   : > { %v2829_v20 = vsel %vm2827_vm9, %v5907_v25, %v2752_v52  ;;  %v2830_v5 = vsel %vm2827_vm9, %v2752_v52, %v2754_v22  ;;  %v3275_v17 = vld [vmem:[#allocation2 + $0x2d0] sm:$0xff]  ;;  %v3127_v54 = vsel %vm3119_vm8, %v5944_v61, %v3058_v23  ;;  %v3291_v52 = vld [vmem:[#allocation2 + $0x460] sm:$0xff] }
 0x41b   : > { %3095 = vrot.lane.b32.xlu2 %v3021_v33, %s4440_s23  ;;  %2893 = vst [vmem:[#allocation2 + $0x3e8] sm:$0xf0] %v2829_v20  ;;  %3523 = vmatpush.msra.mxu3 %v3275_v17  ;;  %v3277_v47 = vld [vmem:[#allocation2 + $0x60] sm:$0xff]  ;;  %v3261_v22 = vld [vmem:[#allocation2 + $0x3d0] sm:$0xff] }
 0x41c   : > { %2894 = vst [vmem:[#allocation2 + $0x378] sm:$0xf0] %v2830_v5  ;;  %3482 = vmatpush.msra.mxu1 %v3277_v47  ;;  %v3248_v5 = vld [vmem:[%s6269_s1] sm:$0xf]  ;;  %v2947_v17 = vld [vmem:[%s4472_s14 + $0x9c] sm:$0xf] }
 0x41d   : > { %v5952_v32 = vpop.permute.xlu2 %3051  ;;  %3524 = vmatpush.msra.mxu3 %v3271_v8  ;;  %3191 = vst [vmem:[#allocation2 + $0x268] sm:$0xf] %v3127_v54  ;;  %v2946_v54 = vld [vmem:[%s4472_s14 + $0x94] sm:$0xff] }
 0x41f   : > { %3525 = vmatpush.msra.mxu3 %v3267_v7  ;;  %3093 = vrot.lane.b32.xlu1 %v3020_v63, %s4440_s23  ;;  %v3026_v7 = vld.sshfl [vmem:[#allocation1 + $0x28] sm:$0xff pattern:$0x75316420] }
 0x420   : > { %3097 = vrot.lane.b32.xlu0 %v3022_v55, %s4440_s23  ;;  %3032 = vst [vmem:[#allocation1 + $0x20] ss:$2 sm:$0xff] %v2946_v54 }
 0x421   : > { %3526 = vmatpush.msra.mxu3 %v3263_v26  ;;  %v3040_v6 = vpop.permute.xlu0 %3039  ;;  %v2764_v21 = vpop.permute.xlu1 %2763  ;;  %v3268_v26 = vld [vmem:[#allocation2 + $0x218] sm:$0xff] }
 0x422   : > { %v3120_v44 = vsel %vm3119_vm8, %v3040_v6, %v3042_v12  ;;  %v2835_v37 = vsel %vm2827_vm9, %v2764_v21, %v2766_v58  ;;  %v3257_v12 = vld [vmem:[#allocation2 + $0x430] sm:$0xff]  ;;  %v5990_v58 = vld.sshfl [vmem:[#allocation1 + $0x30] sm:$0xff pattern:$0x75316420] }
 0x423   : > { %2803 = vrot.lane.b32.xlu2 %v5718_v31, %s4441_s24  ;;  %3184 = vst [vmem:[#allocation2 + $0x1a0] sm:$0xf] %v3120_v44  ;;  %v3274_v60 = vld [vmem:[#allocation2 + $0x378] sm:$0xff]  ;;  %3527 = vmatpush.msra.mxu3 %v3259_v27  ;;  %v3273_v31 = vld [vmem:[#allocation2 + $0x3e8] sm:$0xff] }
 0x424   : > { %3503 = vmatpush.msra.mxu2 %v3274_v60  ;;  %2899 = vst [vmem:[#allocation2 + $0x1c0] sm:$0xf0] %v2835_v37  ;;  %3483 = vmatpush.msra.mxu1 %v3273_v31  ;;  %v3303_v16 = vld [vmem:[#allocation2 + $0x268] sm:$0xff]  ;;  %v3283_v44 = vld [vmem:[#allocation2 + $0x2b8] sm:$0xff] }
 0x425   : > { %v5971_v14 = vpop.permute.xlu2 %3065  ;;  %3605 = vmatpush.msrb.mxu3 %v3303_v16  ;;  %v3260_v27 = vld [vmem:[#allocation2 + $0x318] sm:$0xff]  ;;  %v3286_v16 = vld [vmem:[#allocation2 + $0x508] sm:$0xff] }
 0x426   : > { %3504 = vmatpush.msra.mxu2 %v3270_v2  ;;  %3484 = vmatpush.msra.mxu1 %v3269_v48  ;;  %v3294_v31 = vld [vmem:[#allocation2 + $0x278] sm:$0xff]  ;;  %v3293_v48 = vld [vmem:[#allocation2 + $0x260] sm:$0xff] }
 0x427   : > { %2799 = vrot.lane.b32.xlu1 %v5771_v4, %s4441_s24  ;;  %4372 = vmatmul.msk.f32.vlgmr.msra.gmra.mxu3 %vm3448_vm10, %v3248_v5 }
 0x428   : > { %3505 = vmatpush.msra.mxu2 %v3266_v28  ;;  %3485 = vmatpush.msra.mxu1 %v3265_v57  ;;  %v3282_v57 = vld [vmem:[#allocation2 + $0x200] sm:$0xff] }
 0x429   : > { %v2748_v46 = vpop.permute.xlu0 %2747  ;;  %v5977_v38 = vpop.permute.xlu1 %2761  ;;  %2805 = vrot.lane.b32.xlu0 %v5637_v35, %s4441_s24 }
 0x42a   : > { %3506 = vmatpush.msra.mxu2 %v3262_v42  ;;  %v2828_v51 = vsel %vm2827_vm9, %v2748_v46, %v5907_v25  ;;  %v3276_v19 = vld [vmem:[#allocation2 + $0x1a0] sm:$0xff]  ;;  %v2834_v4 = vsel %vm2827_vm9, %v5977_v38, %v2764_v21  ;;  %v3030_v25 = vld.sshfl [vmem:[#allocation1] sm:$0xff pattern:$0x75316420]  ;;  %3486 = vmatpush.msra.mxu1 %v3261_v22  ;;  %v3264_v21 = vld [vmem:[#allocation2 + $0x530] sm:$0xff] }
 0x42b   : > { %2801 = vrot.lane.b32.xlu2 %v5716_v18, %s4441_s24  ;;  %2892 = vst [vmem:[#allocation2 + $0x330] sm:$0xf0] %v2828_v51  ;;  %3462 = vmatpush.msra.mxu0 %v3276_v19  ;;  %v3299_v41 = vld [vmem:[#allocation2 + $0x1c0] sm:$0xff]  ;;  %v5988_v18 = vld.sshfl [vmem:[#allocation1 + $0x38] sm:$0xff pattern:$0x75316420] }
 0x42c   : > { %3507 = vmatpush.msra.mxu2 %v3258_v59  ;;  %2898 = vst [vmem:[#allocation2 + $0xd8] sm:$0xf0] %v2834_v4  ;;  %3606 = vmatpush.msrb.mxu3 %v3299_v41  ;;  %v3037_v59 = vld.sshfl [vmem:[#allocation1 + $0x28] sm:$0xff pattern:$0x75316420] }
 0x42d   : > { %v5985_v23 = vpop.permute.xlu2 %2773  ;;  %3487 = vmatpush.msra.mxu1 %v3257_v12  ;;  %3033 = vst [vmem:[#allocation1 + $0x30] ss:$2 sm:$0xff] %v2947_v17  ;;  %4371 = vmatmul.msk.f32.vlgmr.msra.gmra.mxu2 %vm3448_vm10, %v3248_v5  ;;  %v3289_v22 = vld [vmem:[#allocation2 + $0x40] sm:$0xff]  ;;  %v3285_v12 = vld [vmem:[#allocation2 + $0x468] sm:$0xff] }
 0x42e   : > { %3607 = vmatpush.msrb.mxu3 %v3295_v0  ;;  %4370 = vmatmul.msk.f32.vlgmr.msra.gmra.mxu1 %vm3448_vm10, %v3248_v5 }
 0x42f   : > { %3107 = vrot.lane.b32.xlu1 %v3030_v25, %s4440_s23  ;;  %v3292_v25 = vld [vmem:[#allocation2 + $0x548] sm:$0xff] }
 0x430   : > { %3608 = vmatpush.msrb.mxu3 %v3291_v52 }
 0x431   : > { %v3054_v33 = vpop.permute.xlu0 %3053  ;;  %v3050_v20 = vpop.permute.xlu1 %3049  ;;  %3091 = vrot.lane.b32.xlu0 %v5962_v34, %s4440_s23 }
 0x432   : > { %v3125_v8 = vsel %vm3119_vm8, %v5952_v32, %v3054_v33  ;;  %v3126_v63 = vsel %vm3119_vm8, %v3054_v33, %v5944_v61  ;;  %v3272_v40 = vld [vmem:[#allocation2 + $0x330] sm:$0xff]  ;;  %v3124_v35 = vsel %vm3119_vm8, %v3050_v20, %v5952_v32  ;;  %v3287_v32 = vld [vmem:[#allocation2 + $0x5e8] sm:$0xff]  ;;  %v3249_v33 = vld [vmem:[%s6269_s1 + $0x4] sm:$0xf] }
 0x433   : > { %3089 = vrot.lane.b32.xlu2 %v5966_v43, %s4440_s23  ;;  %3189 = vst [vmem:[#allocation2 + $0x1e8] sm:$0xf] %v3125_v8  ;;  %3463 = vmatpush.msra.mxu0 %v3272_v40  ;;  %v3298_v55 = vld [vmem:[#allocation2 + $0xd8] sm:$0xff]  ;;  %v3281_v20 = vld [vmem:[#allocation2 + $0x128] sm:$0xff] }
 0x434   : > { %3190 = vst [vmem:[#allocation2 + $0x4d8] sm:$0xf] %v3126_v63  ;;  %3609 = vmatpush.msrb.mxu3 %v3287_v32 }
 0x435   : > { %v6011_v61 = vpop.permute.xlu2 %2771  ;;  %3464 = vmatpush.msra.mxu0 %v3268_v26  ;;  %3188 = vst [vmem:[#allocation2 + $0x1b8] sm:$0xf] %v3124_v35  ;;  %v3318_v35 = vld [vmem:[#allocation2 + $0x4c0] sm:$0xff] }
 0x436   : > { %v2838_v6 = vsel %vm2827_vm9, %v6011_v61, %v5985_v23  ;;  %3610 = vmatpush.msrb.mxu3 %v3283_v44  ;;  %v3315_v44 = vld [vmem:[#allocation2 + $0x1d8] sm:$0xff] }
 0x437   : > { %2902 = vst [vmem:[#allocation2 + $0x1a8] sm:$0xf0] %v2838_v6  ;;  %3465 = vmatpush.msra.mxu0 %v3264_v21  ;;  %2815 = vrot.lane.b32.xlu1 %v5738_v9, %s4441_s24  ;;  %v3319_v6 = vld [vmem:[#allocation2 + $0x108] sm:$0xff] }
 0x438   : > { %4376 = vmatmul.msk.f32.vlgmr.msrb.gmra.mxu3 %vm3448_vm10, %v3249_v33 }
 0x439   : > { %3466 = vmatpush.msra.mxu0 %v3260_v27  ;;  %v2760_v37 = vpop.permute.xlu0 %2759  ;;  %v2758_v43 = vpop.permute.xlu1 %2757  ;;  %3105 = vrot.lane.b32.xlu0 %v5988_v18, %s4440_s23  ;;  %v3306_v27 = vld [vmem:[#allocation2 + $0x390] sm:$0xff] }
 0x43a   : > { %v2833_v60 = vsel %vm2827_vm9, %v2760_v37, %v5977_v38  ;;  %v3301_v2 = vld [vmem:[#allocation2 + $0x1e8] sm:$0xff]  ;;  %v2832_v47 = vsel %vm2827_vm9, %v2758_v43, %v2760_v37  ;;  %v3311_v37 = vld [vmem:[#allocation2 + $0x520] sm:$0xff] }
 0x43b   : > { %2797 = vrot.lane.b32.xlu2 %v5769_v45, %s4441_s24  ;;  %2897 = vst [vmem:[#allocation2 + $0x490] sm:$0xf0] %v2833_v60  ;;  %3467 = vmatpush.msra.mxu0 %v3256_v56  ;;  %v3302_v9 = vld [vmem:[#allocation2 + $0x4d8] sm:$0xff]  ;;  %v3290_v45 = vld [vmem:[#allocation2 + $0x300] sm:$0xff] }
 0x43c   : > { %3565 = vmatpush.msrb.mxu1 %v3301_v2  ;;  %3585 = vmatpush.msrb.mxu2 %v3302_v9  ;;  %2896 = vst [vmem:[#allocation2 + $0x540] sm:$0xf0] %v2832_v47  ;;  %v3300_v34 = vld [vmem:[#allocation2 + $0x1b8] sm:$0xff] }
 0x43d   : > { %v6026_v28 = vpop.permute.xlu2 %3059  ;;  %3545 = vmatpush.msrb.mxu0 %v3300_v34  ;;  %v3307_v9 = vld [vmem:[#allocation2 + $0x78] sm:$0xff] }
 0x43e   : > { %3586 = vmatpush.msrb.mxu2 %v3298_v55  ;;  %4369 = vmatmul.msk.f32.vlgmr.msra.gmra.mxu0 %vm3448_vm10, %v3248_v5  ;;  %v3322_v40 = vld [vmem:[#allocation2 + $0x1a8] sm:$0xff]  ;;  %v3316_v55 = vld [vmem:[#allocation2 + $0x560] sm:$0xff] }
 0x43f   : > { %3101 = vrot.lane.b32.xlu1 %v3026_v7, %s4440_s23 }
 0x440   : > { %3587 = vmatpush.msrb.mxu2 %v3294_v31  ;;  %v2945_v31 = vld [vmem:[%s4472_s14 + $0x8c] sm:$0xff] }
 0x441   : > { %v3068_v42 = vpop.permute.xlu0 %3067  ;;  %v6032_v46 = vpop.permute.xlu1 %3063  ;;  %2813 = vrot.lane.b32.xlu0 %v5786_v10, %s4441_s24  ;;  %v3280_v10 = vld [vmem:[#allocation2 + $0x210] sm:$0xff]  ;;  %3031 = vst [vmem:[#allocation1 + $0x10] ss:$2 sm:$0xff] %v2945_v31 }
 0x442   : > { %3588 = vmatpush.msrb.mxu2 %v3290_v45  ;;  %v3131_v38 = vsel %vm3119_vm8, %v5971_v14, %v3068_v42  ;;  %v3297_v51 = vld [vmem:[#allocation2 + $0x490] sm:$0xff]  ;;  %v3130_v19 = vsel %vm3119_vm8, %v6032_v46, %v5971_v14  ;;  %v3288_v14 = vld [vmem:[#allocation2 + $0x240] sm:$0xff] }
 0x443   : > { %3103 = vrot.lane.b32.xlu2 %v5990_v58, %s4440_s23  ;;  %3195 = vst [vmem:[#allocation2 + $0x5f8] sm:$0xf] %v3131_v38  ;;  %3566 = vmatpush.msrb.mxu1 %v3297_v51  ;;  %v3296_v4 = vld [vmem:[#allocation2 + $0x540] sm:$0xff]  ;;  %v3284_v58 = vld [vmem:[#allocation2 + $0x3b8] sm:$0xff]  ;;  %v3317_v45 = vld [vmem:[#allocation2 + $0x370] sm:$0xff] }
 0x444   : > { %3589 = vmatpush.msrb.mxu2 %v3286_v16  ;;  %3194 = vst [vmem:[#allocation2 + $0x88] sm:$0xf] %v3130_v19  ;;  %3546 = vmatpush.msrb.mxu0 %v3296_v4  ;;  %v3313_v42 = vld [vmem:[#allocation2 + $0x70] sm:$0xff]  ;;  %v3250_v51 = vld [vmem:[%s6269_s1 + $0x8] sm:$0xf]  ;;  %v3308_v16 = vld [vmem:[#allocation2 + $0x578] sm:$0xff] }
 0x445   : > { %v2768_v41 = vpop.permute.xlu2 %2767  ;;  %3567 = vmatpush.msrb.mxu1 %v3293_v48  ;;  %v3036_v48 = vld.sshfl [vmem:[#allocation1 + $0x20] sm:$0xff pattern:$0x75316420] }
 0x446   : > { %3590 = vmatpush.msrb.mxu2 %v3282_v57  ;;  %3547 = vmatpush.msrb.mxu0 %v3292_v25  ;;  %v3305_v25 = vld [vmem:[#allocation2 + $0xb0] sm:$0xff] }
 0x447   : > { %3568 = vmatpush.msrb.mxu1 %v3289_v22  ;;  %3115 = vrot.lane.b32.xlu1 %v3037_v59, %s4440_s23 }
 0x448   : > { %3548 = vmatpush.msrb.mxu0 %v3288_v14  ;;  %4375 = vmatmul.msk.f32.vlgmr.msrb.gmra.mxu2 %vm3448_vm10, %v3249_v33 }
 0x449   : > { %3569 = vmatpush.msrb.mxu1 %v3285_v12  ;;  %v2776_v0 = vpop.permute.xlu0 %2775  ;;  %v2770_v18 = vpop.permute.xlu1 %2769  ;;  %2811 = vrot.lane.b32.xlu0 %v5784_v13, %s4441_s24  ;;  %v3310_v13 = vld [vmem:[#allocation2 + $0x4e8] sm:$0xff] }
 0x44a   : > { %v2839_v52 = vsel %vm2827_vm9, %v5985_v23, %v2776_v0  ;;  %v3327_v5 = vld [vmem:[#allocation2 + $0x5f8] sm:$0xff]  ;;  %v2836_v17 = vsel %vm2827_vm9, %v2768_v41, %v2770_v18  ;;  %v2837_v8 = vsel %vm2827_vm9, %v2770_v18, %v6011_v61  ;;  %3549 = vmatpush.msrb.mxu0 %v3284_v58  ;;  %v3304_v41 = vld [vmem:[#allocation2 + $0x28] sm:$0xff] }
 0x44b   : > { %2809 = vrot.lane.b32.xlu2 %v5685_v1, %s4441_s24  ;;  %2903 = vst [vmem:[#allocation2 + $0xa8] sm:$0xf0] %v2839_v52  ;;  %3570 = vmatpush.msrb.mxu1 %v3281_v20  ;;  %v3326_v63 = vld [vmem:[#allocation2 + $0x88] sm:$0xff]  ;;  %v3339_v20 = vld [vmem:[#allocation2 + $0x230] sm:$0xff] }
 0x44c   : > { %3688 = vmatpush.msra.mxu3 %v3327_v5  ;;  %2900 = vst [vmem:[#allocation2 + $0x340] sm:$0xf0] %v2836_v17  ;;  %3550 = vmatpush.msrb.mxu0 %v3280_v10  ;;  %v3038_v1 = vld.sshfl [vmem:[#allocation1 + $0x30] sm:$0xff pattern:$0x75316420]  ;;  %v3335_v5 = vld [vmem:[#allocation2 + $0x5a0] sm:$0xff] }
 0x44d   : > { %v6055_v23 = vpop.permute.xlu2 %3073  ;;  %2901 = vst [vmem:[#allocation2 + $0xb8] sm:$0xf0] %v2837_v8  ;;  %3668 = vmatpush.msra.mxu2 %v3326_v63  ;;  %4374 = vmatmul.msk.f32.vlgmr.msrb.gmra.mxu1 %vm3448_vm10, %v3249_v33  ;;  %v3343_v52 = vld [vmem:[#allocation2 + $0x148] sm:$0xff]  ;;  %v3331_v63 = vld [vmem:[#allocation2 + $0x418] sm:$0xff] }
 0x44e   : > { %4373 = vmatmul.msk.f32.vlgmr.msrb.gmra.mxu0 %vm3448_vm10, %v3249_v33 }
 0x44f   : > { %3669 = vmatpush.msra.mxu2 %v3322_v40  ;;  %2532 = vrot.lane.b32.xlu1 %v5634_v29, %s4439_s22  ;;  %v3314_v29 = vld [vmem:[#allocation2 + $0x568] sm:$0xff] }
 0x451   : > { %v3062_v7 = vpop.permute.xlu0 %3061  ;;  %3670 = vmatpush.msra.mxu2 %v3318_v35  ;;  %v3078_v54 = vpop.permute.xlu1 %3077  ;;  %3099 = vrot.lane.b32.xlu0 %v6007_v62, %s4440_s23  ;;  %v3034_v35 = vld.sshfl [vmem:[#allocation1 + $0x10] sm:$0xff pattern:$0x75316420] }
 0x452   : > { %v3128_v26 = vsel %vm3119_vm8, %v6026_v28, %v3062_v7  ;;  %v3129_v61 = vsel %vm3119_vm8, %v3062_v7, %v6032_v46  ;;  %v3323_v32 = vld [vmem:[#allocation2 + $0xa8] sm:$0xff]  ;;  %v3341_v7 = vld [vmem:[#allocation2 + $0x480] sm:$0xff] }
 0x453   : > { %3117 = vrot.lane.b32.xlu2 %v3038_v1, %s4440_s23  ;;  %3192 = vst [vmem:[#allocation2 + $0x4a8] sm:$0xf] %v3128_v26  ;;  %3689 = vmatpush.msra.mxu3 %v3323_v32  ;;  %v3320_v62 = vld [vmem:[#allocation2 + $0x340] sm:$0xff]  ;;  %v3338_v32 = vld [vmem:[#allocation2 + $0x338] sm:$0xff] }
 0x454   : > { %3193 = vst [vmem:[#allocation2 + $0x3c0] sm:$0xf] %v3129_v61  ;;  %3671 = vmatpush.msra.mxu2 %v3314_v29  ;;  %v3321_v28 = vld [vmem:[#allocation2 + $0xb8] sm:$0xff]  ;;  %v3337_v61 = vld [vmem:[#allocation2 + $0x5c0] sm:$0xff] }
 0x455   : > { %v6069_v21 = vpop.permute.xlu2 %2779  ;;  %3690 = vmatpush.msra.mxu3 %v3319_v6  ;;  %v3333_v29 = vld [vmem:[#allocation2 + $0x380] sm:$0xff]  ;;  %v3334_v6 = vld [vmem:[#allocation2 + $0x408] sm:$0xff] }
 0x456   : > { %3672 = vmatpush.msra.mxu2 %v3310_v13 }
 0x457   : > { %3691 = vmatpush.msra.mxu3 %v3315_v44  ;;  %2825 = vrot.lane.b32.xlu1 %v5797_v24, %s4441_s24 }
 0x458   : > { %3673 = vmatpush.msra.mxu2 %v3306_v27 }
 0x459   : > { %3692 = vmatpush.msra.mxu3 %v3311_v37  ;;  %v3076_v43 = vpop.permute.xlu0 %3075  ;;  %v2786_v60 = vpop.permute.xlu1 %2785  ;;  %2530 = vrot.lane.b32.xlu0 %v5532_v36, %s4439_s22  ;;  %v3309_v36 = vld [vmem:[#allocation2 + $0x590] sm:$0xff] }
 0x45a   : > { %v3134_v56 = vsel %vm3119_vm8, %v6055_v23, %v3076_v43  ;;  %v3135_v2 = vsel %vm3119_vm8, %v3076_v43, %v3078_v54  ;;  %v3324_v47 = vld [vmem:[#allocation2 + $0x4a8] sm:$0xff]  ;;  %4379 = vmatmul.msk.f32.vlgmr.msra.gmra.mxu2 %vm3448_vm10, %v3250_v51  ;;  %v3329_v43 = vld [vmem:[#allocation2 + $0xa0] sm:$0xff] }
 0x45b   : > { %2807 = vrot.lane.b32.xlu2 %v5683_v15, %s4441_s24  ;;  %3198 = vst [vmem:[#allocation2 + $0x4d0] sm:$0xf] %v3134_v56  ;;  %3628 = vmatpush.msra.mxu0 %v3324_v47  ;;  %v3325_v24 = vld [vmem:[#allocation2 + $0x3c0] sm:$0xff]  ;;  %v3312_v15 = vld [vmem:[#allocation2 + $0x458] sm:$0xff]  ;;  %v3367_v47 = vld [vmem:[#allocation2 + $0x448] sm:$0xff] }
 0x45c   : > { %3199 = vst [vmem:[#allocation2 + $0x3f8] sm:$0xf] %v3135_v2  ;;  %3648 = vmatpush.msra.mxu1 %v3325_v24  ;;  %3693 = vmatpush.msra.mxu3 %v3307_v9  ;;  %v3330_v56 = vld [vmem:[#allocation2 + $0x198] sm:$0xff]  ;;  %v3363_v24 = vld [vmem:[#allocation2 + $0x2a0] sm:$0xff] }
 0x45d   : > { %v3088_v34 = vpop.permute.xlu2 %3087  ;;  %3629 = vmatpush.msra.mxu0 %v3320_v62  ;;  %4380 = vmatmul.msk.f32.vlgmr.msra.gmra.mxu3 %vm3448_vm10, %v3250_v51  ;;  %v3359_v9 = vld [vmem:[#allocation2 + $0x558] sm:$0xff] }
 0x45e   : > { %3649 = vmatpush.msra.mxu1 %v3321_v28 }
 0x45f   : > { %3630 = vmatpush.msra.mxu0 %v3316_v55  ;;  %2821 = vrot.lane.b32.xlu1 %v5708_v49, %s4441_s24 }
 0x460   : > { %3650 = vmatpush.msra.mxu1 %v3317_v45  ;;  %v3355_v45 = vld [vmem:[#allocation2 + $0x4e0] sm:$0xff] }
 0x461   : > { %3631 = vmatpush.msra.mxu0 %v3312_v15  ;;  %v2784_v46 = vpop.permute.xlu0 %2783  ;;  %v3072_v38 = vpop.permute.xlu1 %3071  ;;  %2823 = vrot.lane.b32.xlu0 %v5710_v50, %s4441_s24  ;;  %v3340_v15 = vld [vmem:[#allocation2 + $0x470] sm:$0xff] }
 0x462   : > { %3651 = vmatpush.msra.mxu1 %v3313_v42  ;;  %v2843_v19 = vsel %vm2827_vm9, %v2784_v46, %v2786_v60  ;;  %v3350_v4 = vld [vmem:[#allocation2 + $0x4d0] sm:$0xff]  ;;  %v3133_v49 = vsel %vm3119_vm8, %v3072_v38, %v6055_v23 }
 0x463   : > { %2907 = vst [vmem:[#allocation2 + $0x250] sm:$0xf0] %v2843_v19  ;;  %3632 = vmatpush.msra.mxu0 %v3308_v16  ;;  %3751 = vmatpush.msrb.mxu2 %v3350_v4  ;;  %v3351_v59 = vld [vmem:[#allocation2 + $0x3f8] sm:$0xff] }
 0x464   : > { %3652 = vmatpush.msra.mxu1 %v3309_v36  ;;  %3771 = vmatpush.msrb.mxu3 %v3351_v59  ;;  %3197 = vst [vmem:[#allocation2 + $0x1d0] sm:$0xf] %v3133_v49  ;;  %v3328_v49 = vld [vmem:[#allocation2 + $0x228] sm:$0xff] }
 0x465   : > { %v2796_v57 = vpop.permute.xlu2 %2795  ;;  %3633 = vmatpush.msra.mxu0 %v3304_v41  ;;  %3113 = vrot.lane.b32.xlu2 %v3036_v48, %s4440_s23 }
 0x466   : > { %3653 = vmatpush.msra.mxu1 %v3305_v25  ;;  %4377 = vmatmul.msk.f32.vlgmr.msra.gmra.mxu0 %vm3448_vm10, %v3250_v51 }
 0x467   : > { %2819 = vrot.lane.b32.xlu1 %v5662_v11, %s4441_s24  ;;  %4378 = vmatmul.msk.f32.vlgmr.msra.gmra.mxu1 %vm3448_vm10, %v3250_v51  ;;  %v3035_v11 = vld.sshfl [vmem:[#allocation1 + $0x18] sm:$0xff pattern:$0x75316420]  ;;  %v3332_v51 = vld [vmem:[#allocation2 + $0x138] sm:$0xff] }
 0x469   : > { %v2782_v22 = vpop.permute.xlu0 %2781  ;;  %v6100_v14 = vpop.permute.xlu1 %3085  ;;  %2528 = vrot.lane.b32.xlu0 %v5528_v53, %s4439_s22  ;;  %v3342_v53 = vld [vmem:[#allocation2 + $0x498] sm:$0xff] }
 0x46a   : > { %v2841_v12 = vsel %vm2827_vm9, %v6069_v21, %v2782_v22  ;;  %v2842_v0 = vsel %vm2827_vm9, %v2782_v22, %v2784_v46  ;;  %v3347_v18 = vld [vmem:[#allocation2 + $0x250] sm:$0xff]  ;;  %v3139_v58 = vsel %vm3119_vm8, %v6100_v14, %v3088_v34  ;;  %v3366_v22 = vld [vmem:[#allocation2 + $0x48] sm:$0xff] }
 0x46b   : > { %2905 = vst [vmem:[#allocation2 + $0x248] sm:$0xf0] %v2841_v12  ;;  %3772 = vmatpush.msrb.mxu3 %v3347_v18  ;;  %v3349_v33 = vld [vmem:[#allocation2 + $0x1d0] sm:$0xff] }
 0x46c   : > { %2906 = vst [vmem:[#allocation2 + $0x1f8] sm:$0xf0] %v2842_v0  ;;  %3731 = vmatpush.msrb.mxu1 %v3349_v33  ;;  %v3365_v33 = vld [vmem:[#allocation2 + $0x90] sm:$0xff] }
 0x46d   : > { %v6107_v50 = vpop.permute.xlu2 %3081  ;;  %3773 = vmatpush.msrb.mxu3 %v3343_v52  ;;  %3203 = vst [vmem:[#allocation2 + $0x4b8] sm:$0xf] %v3139_v58  ;;  %3111 = vrot.lane.b32.xlu2 %v3035_v11, %s4440_s23  ;;  %v3358_v58 = vld [vmem:[#allocation2 + $0xc8] sm:$0xff] }
 0x46f   : > { %3774 = vmatpush.msrb.mxu3 %v3339_v20  ;;  %v3364_v20 = vld [vmem:[#allocation2 + $0xd0] sm:$0xff] }
 0x471   : > { %3775 = vmatpush.msrb.mxu3 %v3335_v5  ;;  %v3070_v17 = vpop.permute.xlu0 %3069  ;;  %v2794_v8 = vpop.permute.xlu1 %2793  ;;  %2526 = vrot.lane.b32.xlu0 %v5497_v30, %s4439_s22  ;;  %v3361_v5 = vld [vmem:[#allocation2 + $0x528] sm:$0xff] }
 0x472   : > { %v3132_v10 = vsel %vm3119_vm8, %v3070_v17, %v3072_v38  ;;  %v3345_v23 = vld [vmem:[#allocation2 + $0x248] sm:$0xff]  ;;  %v2847_v40 = vsel %vm2827_vm9, %v2794_v8, %v2796_v57  ;;  %v3336_v38 = vld [vmem:[#allocation2 + $0x180] sm:$0xff]  ;;  %v3360_v17 = vld [vmem:[#allocation2 + $0x98] sm:$0xff] }
 0x473   : > { %3196 = vst [vmem:[#allocation2 + $0x290] sm:$0xf] %v3132_v10  ;;  %v3346_v1 = vld [vmem:[#allocation2 + $0x1f8] sm:$0xff]  ;;  %3776 = vmatpush.msrb.mxu3 %v3331_v63  ;;  %3732 = vmatpush.msrb.mxu1 %v3345_v23  ;;  %v3353_v23 = vld [vmem:[#allocation2 + $0x3b0] sm:$0xff] }
 0x474   : > { %3752 = vmatpush.msrb.mxu2 %v3346_v1  ;;  %2911 = vst [vmem:[#allocation2 + $0x258] sm:$0xf0] %v2847_v40  ;;  %v3375_v54 = vld [vmem:[#allocation2 + $0x4b8] sm:$0xff] }
 0x475   : > { %v6114_v26 = vpop.permute.xlu2 %3095  ;;  %3733 = vmatpush.msrb.mxu1 %v3341_v7  ;;  %3854 = vmatpush.msra.mxu3 %v3375_v54  ;;  %v3356_v10 = vld [vmem:[#allocation2 + $0x4f8] sm:$0xff]  ;;  %v3352_v54 = vld [vmem:[#allocation2 + $0x3a0] sm:$0xff] }
 0x476   : > { %3753 = vmatpush.msrb.mxu2 %v3342_v53  ;;  %3109 = vrot.lane.b32.xlu2 %v3034_v35, %s4440_s23 }
 0x477   : > { %3734 = vmatpush.msrb.mxu1 %v3337_v61 }
 0x478   : > { %3754 = vmatpush.msrb.mxu2 %v3338_v32 }
 0x479   : > { %v2778_v13 = vpop.permute.xlu0 %2777  ;;  %3735 = vmatpush.msrb.mxu1 %v3333_v29  ;;  %v2792_v44 = vpop.permute.xlu1 %2791  ;;  %2817 = vrot.lane.b32.xlu0 %v5660_v39, %s4441_s24  ;;  %v3251_v39 = vld [vmem:[%s6269_s1 + $0xc] sm:$0xf]  ;;  %v3252_v29 = vld [vmem:[%s6269_s1 + $0x10] sm:$0xf] }
 0x47a   : > { %3755 = vmatpush.msrb.mxu2 %v3334_v6  ;;  %v2840_v27 = vsel %vm2827_vm9, %v2778_v13, %v6069_v21  ;;  %v3348_v37 = vld [vmem:[#allocation2 + $0x290] sm:$0xff]  ;;  %v2846_v60 = vsel %vm2827_vm9, %v2792_v44, %v2794_v8  ;;  %4384 = vmatmul.msk.f32.vlgmr.msrb.gmra.mxu3 %vm3448_vm10, %v3251_v39  ;;  %v3390_v6 = vld [vmem:[#allocation2 + $0x2a8] sm:$0xff] }
 0x47b   : > { %2904 = vst [vmem:[#allocation2 + $0x4f0] sm:$0xf0] %v2840_v27  ;;  %3711 = vmatpush.msrb.mxu0 %v3348_v37  ;;  %3736 = vmatpush.msrb.mxu1 %v3329_v43  ;;  %v3371_v2 = vld [vmem:[#allocation2 + $0x258] sm:$0xff]  ;;  %v3357_v8 = vld [vmem:[#allocation2 + $0x450] sm:$0xff] }
 0x47c   : > { %3756 = vmatpush.msrb.mxu2 %v3330_v56  ;;  %2910 = vst [vmem:[#allocation2 + $0xc0] sm:$0xf0] %v2846_v60  ;;  %3855 = vmatpush.msra.mxu3 %v3371_v2  ;;  %v3386_v13 = vld [vmem:[#allocation2 + $0x570] sm:$0xff]  ;;  %v3378_v60 = vld [vmem:[#allocation2 + $0x8] sm:$0xff] }
 0x47d   : > { %v6122_v30 = vpop.permute.xlu2 %2803  ;;  %4383 = vmatmul.msk.f32.vlgmr.msrb.gmra.mxu2 %vm3448_vm10, %v3251_v39  ;;  %4382 = vmatmul.msk.f32.vlgmr.msrb.gmra.mxu1 %vm3448_vm10, %v3251_v39 }
 0x47e   : > { %3856 = vmatpush.msra.mxu3 %v3367_v47 }
 0x480   : > { %3857 = vmatpush.msra.mxu3 %v3363_v24 }
 0x481   : > { %v3084_v21 = vpop.permute.xlu0 %3083  ;;  %v3080_v62 = vpop.permute.xlu1 %3079 }
 0x482   : > { %v3137_v34 = vsel %vm3119_vm8, %v6107_v50, %v3084_v21  ;;  %v3138_v28 = vsel %vm3119_vm8, %v3084_v21, %v6100_v14  ;;  %v3344_v55 = vld [vmem:[#allocation2 + $0x4f0] sm:$0xff]  ;;  %3858 = vmatpush.msra.mxu3 %v3359_v9  ;;  %v3136_v31 = vsel %vm3119_vm8, %v3080_v62, %v6107_v50  ;;  %v3362_v14 = vld [vmem:[#allocation2 + $0x1e0] sm:$0xff] }
 0x483   : > { %3201 = vst [vmem:[#allocation2 + $0x3f0] sm:$0xf] %v3137_v34  ;;  %3712 = vmatpush.msrb.mxu0 %v3344_v55  ;;  %v3370_v25 = vld [vmem:[#allocation2 + $0xc0] sm:$0xff]  ;;  %v3383_v55 = vld [vmem:[#allocation2 + $0x288] sm:$0xff] }
 0x484   : > { %3202 = vst [vmem:[#allocation2 + $0x100] sm:$0xf] %v3138_v28  ;;  %3859 = vmatpush.msra.mxu3 %v3355_v45  ;;  %v3354_v50 = vld [vmem:[#allocation2 + $0x220] sm:$0xff] }
 0x485   : > { %v2802_v42 = vpop.permute.xlu2 %2801  ;;  %3713 = vmatpush.msrb.mxu0 %v3340_v15  ;;  %3200 = vst [vmem:[#allocation2 + $0x1b0] sm:$0xf] %v3136_v31  ;;  %4388 = vmatmul.msk.f32.vlgmr.msra.gmra.mxu3 %vm3448_vm10, %v3252_v29  ;;  %v3387_v34 = vld [vmem:[#allocation2 + $0x420] sm:$0xff] }
 0x486   : > { %v2850_v46 = vsel %vm2827_vm9, %v2802_v42, %v6122_v30 }
 0x487   : > { %2914 = vst [vmem:[#allocation2 + $0x3a8] sm:$0xf0] %v2850_v46  ;;  %3714 = vmatpush.msrb.mxu0 %v3336_v38  ;;  %v3379_v46 = vld [vmem:[#allocation2 + $0x328] sm:$0xff] }
 0x489   : > { %3715 = vmatpush.msrb.mxu0 %v3332_v51  ;;  %v2790_v19 = vpop.permute.xlu0 %2789  ;;  %v2788_v16 = vpop.permute.xlu1 %2787 }
 0x48a   : > { %v2845_v4 = vsel %vm2827_vm9, %v2790_v19, %v2792_v44  ;;  %v3373_v48 = vld [vmem:[#allocation2 + $0x3f0] sm:$0xff]  ;;  %v2844_v36 = vsel %vm2827_vm9, %v2788_v16, %v2790_v19  ;;  %v3382_v44 = vld [vmem:[#allocation2 + $0x598] sm:$0xff] }
 0x48b   : > { %2909 = vst [vmem:[#allocation2 + $0x10] sm:$0xf0] %v2845_v4  ;;  %3716 = vmatpush.msrb.mxu0 %v3328_v49  ;;  %3814 = vmatpush.msra.mxu1 %v3373_v48  ;;  %v3374_v59 = vld [vmem:[#allocation2 + $0x100] sm:$0xff]  ;;  %v3388_v49 = vld [vmem:[#allocation2 + $0x478] sm:$0xff] }
 0x48c   : > { %3834 = vmatpush.msra.mxu2 %v3374_v59  ;;  %2908 = vst [vmem:[#allocation2 + $0x3d8] sm:$0xf0] %v2844_v36  ;;  %v3372_v41 = vld [vmem:[#allocation2 + $0x1b0] sm:$0xff]  ;;  %4381 = vmatmul.msk.f32.vlgmr.msrb.gmra.mxu0 %vm3448_vm10, %v3251_v39  ;;  %v3389_v48 = vld [vmem:[#allocation2 + $0x58] sm:$0xff] }
 0x48d   : > { %v6143_v57 = vpop.permute.xlu2 %3089  ;;  %3794 = vmatpush.msra.mxu0 %v3372_v41  ;;  %v3384_v59 = vld [vmem:[#allocation2 + $0x438] sm:$0xff] }
 0x48e   : > { %3835 = vmatpush.msra.mxu2 %v3370_v25  ;;  %v3394_v61 = vld [vmem:[#allocation2 + $0x3a8] sm:$0xff]  ;;  %v3385_v25 = vld [vmem:[#allocation2 + $0x170] sm:$0xff] }
 0x490   : > { %3836 = vmatpush.msra.mxu2 %v3366_v22  ;;  %v3253_v22 = vld [vmem:[%s6269_s1 + $0x14] sm:$0xf] }
 0x491   : > { %v6145_v12 = vpop.permute.xlu1 %3093 }
 0x492   : > { %3837 = vmatpush.msra.mxu2 %v3362_v14  ;;  %v3369_v0 = vld [vmem:[#allocation2 + $0x10] sm:$0xff]  ;;  %v3142_v18 = vsel %vm3119_vm8, %v6145_v12, %v6114_v26  ;;  %v3098_v7 = vpop.permute.xlu0 %3097 }
 0x493   : > { %3815 = vmatpush.msra.mxu1 %v3369_v0  ;;  %3206 = vst [vmem:[#allocation2 + $0x150] sm:$0xf] %v3142_v18  ;;  %v3368_v11 = vld [vmem:[#allocation2 + $0x3d8] sm:$0xff]  ;;  %v3143_v53 = vsel %vm3119_vm8, %v6114_v26, %v3098_v7  ;;  %v3381_v18 = vld [vmem:[#allocation2 + $0xe0] sm:$0xff] }
 0x494   : > { %3838 = vmatpush.msra.mxu2 %v3358_v58  ;;  %3795 = vmatpush.msra.mxu0 %v3368_v11  ;;  %3207 = vst [vmem:[#allocation2 + $0x320] sm:$0xf] %v3143_v53  ;;  %v3376_v11 = vld [vmem:[#allocation2 + $0x130] sm:$0xff] }
 0x495   : > { %v2798_v52 = vpop.permute.xlu2 %2797  ;;  %3816 = vmatpush.msra.mxu1 %v3365_v33 }
 0x496   : > { %3839 = vmatpush.msra.mxu2 %v3354_v50  ;;  %3796 = vmatpush.msra.mxu0 %v3364_v20 }
 0x497   : > { %3817 = vmatpush.msra.mxu1 %v3361_v5  ;;  %4387 = vmatmul.msk.f32.vlgmr.msra.gmra.mxu2 %vm3448_vm10, %v3252_v29 }
 0x498   : > { %3797 = vmatpush.msra.mxu0 %v3360_v17 }
 0x499   : > { %3818 = vmatpush.msra.mxu1 %v3357_v8  ;;  %v2800_v63 = vpop.permute.xlu1 %2799 }
 0x49a   : > { %3798 = vmatpush.msra.mxu0 %v3356_v10  ;;  %v2848_v40 = vsel %vm2827_vm9, %v2798_v52, %v2800_v63  ;;  %v2849_v1 = vsel %vm2827_vm9, %v2800_v63, %v2802_v42  ;;  %v3398_v35 = vld [vmem:[#allocation2 + $0x150] sm:$0xff]  ;;  %v3377_v52 = vld [vmem:[#allocation2 + $0x20] sm:$0xff] }
 0x49b   : > { %3819 = vmatpush.msra.mxu1 %v3353_v23  ;;  %2912 = vst [vmem:[#allocation2 + $0x50] sm:$0xf0] %v2848_v40  ;;  %3917 = vmatpush.msrb.mxu2 %v3398_v35  ;;  %v2806_v27 = vpop.permute.xlu0 %2805  ;;  %v3399_v43 = vld [vmem:[#allocation2 + $0x320] sm:$0xff]  ;;  %v3415_v23 = vld [vmem:[#allocation2 + $0x5f0] sm:$0xff] }
 0x49c   : > { %2913 = vst [vmem:[#allocation2 + $0x238] sm:$0xf0] %v2849_v1  ;;  %3799 = vmatpush.msra.mxu0 %v3352_v54  ;;  %4386 = vmatmul.msk.f32.vlgmr.msra.gmra.mxu1 %vm3448_vm10, %v3252_v29  ;;  %v2851_v37 = vsel %vm2827_vm9, %v6122_v30, %v2806_v27  ;;  %v3391_v30 = vld [vmem:[#allocation2 + $0x358] sm:$0xff]  ;;  %v3411_v1 = vld [vmem:[#allocation2 + $0x5d0] sm:$0xff]  ;;  %v3409_v27 = vld [vmem:[#allocation2 + $0x4c8] sm:$0xff] }
 0x49d   : > { %v3104_v32 = vpop.permute.xlu2 %3103  ;;  %3918 = vmatpush.msrb.mxu2 %v3394_v61  ;;  %4385 = vmatmul.msk.f32.vlgmr.msra.gmra.mxu0 %vm3448_vm10, %v3252_v29  ;;  %2915 = vst [vmem:[#allocation2 + $0x188] sm:$0xf0] %v2851_v37  ;;  %v3407_v54 = vld [vmem:[#allocation2 + $0x2b0] sm:$0xff]  ;;  %v3403_v29 = vld [vmem:[#allocation2 + $0x160] sm:$0xff] }
 0x49e   : > { %3937 = vmatpush.msrb.mxu3 %v3399_v43  ;;  %v3410_v43 = vld [vmem:[#allocation2 + $0x4b0] sm:$0xff] }
 0x49f   : > { %3919 = vmatpush.msrb.mxu2 %v3390_v6 }
 0x4a1   : > { %3920 = vmatpush.msrb.mxu2 %v3386_v13  ;;  %v3108_v26 = vpop.permute.xlu1 %3107 }
 0x4a2   : > { %v3392_v19 = vld [vmem:[#allocation2 + $0x50] sm:$0xff] }
 0x4a3   : > { %3921 = vmatpush.msrb.mxu2 %v3382_v44  ;;  %v3092_v47 = vpop.permute.xlu0 %3091  ;;  %v3393_v4 = vld [vmem:[#allocation2 + $0x238] sm:$0xff]  ;;  %v3414_v44 = vld [vmem:[#allocation2 + $0xf0] sm:$0xff] }
 0x4a4   : > { %v3140_v24 = vsel %vm3119_vm8, %v6143_v57, %v3092_v47  ;;  %v3141_v21 = vsel %vm3119_vm8, %v3092_v47, %v6145_v12  ;;  %v3395_v9 = vld [vmem:[#allocation2 + $0x188] sm:$0xff] }
 0x4a5   : > { %v6163_v56 = vpop.permute.xlu2 %2809  ;;  %3922 = vmatpush.msrb.mxu2 %v3378_v60  ;;  %3204 = vst [vmem:[#allocation2 + $0x5a8] sm:$0xf] %v3140_v24  ;;  %3938 = vmatpush.msrb.mxu3 %v3395_v9  ;;  %v3380_v12 = vld [vmem:[#allocation2 + $0x5c8] sm:$0xff] }
 0x4a6   : > { %3205 = vst [vmem:[#allocation2 + $0x208] sm:$0xf] %v3141_v21  ;;  %4391 = vmatmul.msk.f32.vlgmr.msrb.gmra.mxu2 %vm3448_vm10, %v3253_v22  ;;  %v3406_v24 = vld [vmem:[#allocation2 + $0x588] sm:$0xff] }
 0x4a7   : > { %3939 = vmatpush.msrb.mxu3 %v3391_v30  ;;  %v3401_v30 = vld [vmem:[#allocation2 + $0x488] sm:$0xff] }
 0x4a9   : > { %v2816_v2 = vpop.permute.xlu1 %2815  ;;  %3940 = vmatpush.msrb.mxu3 %v3387_v34 }
 0x4ab   : > { %v3106_v45 = vpop.permute.xlu0 %3105  ;;  %3941 = vmatpush.msrb.mxu3 %v3383_v55  ;;  %v3254_v55 = vld [vmem:[%s6269_s1 + $0x18] sm:$0xf] }
 0x4ac   : > { %v3146_v15 = vsel %vm3119_vm8, %v3104_v32, %v3106_v45  ;;  %v3147_v39 = vsel %vm3119_vm8, %v3106_v45, %v3108_v26  ;;  %v3396_v42 = vld [vmem:[#allocation2 + $0x5a8] sm:$0xff]  ;;  %v3412_v45 = vld [vmem:[#allocation2 + $0x140] sm:$0xff] }
 0x4ad   : > { %v3118_v62 = vpop.permute.xlu2 %3117  ;;  %3210 = vst [vmem:[#allocation2 + $0xe8] sm:$0xf] %v3146_v15  ;;  %3877 = vmatpush.msrb.mxu0 %v3396_v42  ;;  %v3397_v38 = vld [vmem:[#allocation2 + $0x208] sm:$0xff]  ;;  %3942 = vmatpush.msrb.mxu3 %v3379_v46 }
 0x4ae   : > { %3211 = vst [vmem:[#allocation2 + $0x5b0] sm:$0xf] %v3147_v39  ;;  %3897 = vmatpush.msrb.mxu1 %v3397_v38  ;;  %4392 = vmatmul.msk.f32.vlgmr.msrb.gmra.mxu3 %vm3448_vm10, %v3253_v22  ;;  %v3413_v26 = vld [vmem:[#allocation2 + $0x308] sm:$0xff]  ;;  %v3408_v39 = vld [vmem:[#allocation2 + $0x2c0] sm:$0xff] }
 0x4af   : > { %3878 = vmatpush.msrb.mxu0 %v3392_v19 }
 0x4b0   : > { %3898 = vmatpush.msrb.mxu1 %v3393_v4  ;;  %v3400_v4 = vld [vmem:[#allocation2 + $0x1c8] sm:$0xff] }
 0x4b1   : > { %v6169_v28 = vpop.permute.xlu1 %3101  ;;  %3879 = vmatpush.msrb.mxu0 %v3388_v49 }
 0x4b2   : > { %v3145_v31 = vsel %vm3119_vm8, %v6169_v28, %v3104_v32  ;;  %3899 = vmatpush.msrb.mxu1 %v3389_v48 }
 0x4b3   : > { %3209 = vst [vmem:[#allocation2 + $0x500] sm:$0xf] %v3145_v31  ;;  %v2814_v57 = vpop.permute.xlu0 %2813  ;;  %3880 = vmatpush.msrb.mxu0 %v3384_v59  ;;  %v3439_v59 = vld [vmem:[#allocation2 + $0x3c8] sm:$0xff] }
 0x4b4   : > { %3900 = vmatpush.msrb.mxu1 %v3385_v25  ;;  %v2855_v14 = vsel %vm2827_vm9, %v2814_v57, %v2816_v2  ;;  %v3422_v0 = vld [vmem:[#allocation2 + $0xe8] sm:$0xff]  ;;  %v3405_v2 = vld [vmem:[#allocation2 + $0x5d8] sm:$0xff]  ;;  %v3529_v25 = vpop.f32.mrf.mxu3 }
 0x4b5   : > { %v2808_v51 = vpop.permute.xlu2 %2807  ;;  %2919 = vst [vmem:[#allocation2 + $0x360] sm:$0xf0] %v2855_v14  ;;  %3881 = vmatpush.msrb.mxu0 %v3380_v12  ;;  %4000 = vmatpush.msra.mxu2 %v3422_v0  ;;  %v3423_v58 = vld [vmem:[#allocation2 + $0x5b0] sm:$0xff]  ;;  %vm4116_vm12 = vcmp.ge.f32.partialorder %v3529_v25, 0.0  ;;  %v4148_v14 = vmul.f32 0.2, %v3529_v25  ;;  %v3509_v0 = vpop.f32.mrf.mxu2 }
 0x4b6   : > { %v2852_v16 = vsel %vm2827_vm9, %v2808_v51, %v6163_v56  ;;  %3901 = vmatpush.msrb.mxu1 %v3381_v18  ;;  %4020 = vmatpush.msra.mxu3 %v3423_v58  ;;  %v3404_v51 = vld [vmem:[#allocation2 + $0x2e0] sm:$0xff]  ;;  %vm4115_vm14 = vcmp.ge.f32.partialorder %v3509_v0, 0.0  ;;  %v4147_v58 = vmul.f32 0.2, %v3509_v0 }
 0x4b7   : > { %2916 = vst [vmem:[#allocation2 + $0x38] sm:$0xf0] %v2852_v16  ;;  %3882 = vmatpush.msrb.mxu0 %v3376_v11 }
 0x4b8   : > { %3902 = vmatpush.msrb.mxu1 %v3377_v52  ;;  %4389 = vmatmul.msk.f32.vlgmr.msrb.gmra.mxu0 %vm3448_vm10, %v3253_v22  ;;  %v3431_v52 = vld [vmem:[#allocation2 + $0x4a0] sm:$0xff] }
 0x4b9   : > { %v3116_v36 = vpop.permute.xlu1 %3115  ;;  %4390 = vmatmul.msk.f32.vlgmr.msrb.gmra.mxu1 %vm3448_vm10, %v3253_v22 }
 0x4ba   : > { %v3151_v41 = vsel %vm3119_vm8, %v3116_v36, %v3118_v62  ;;  %v3421_v33 = vld [vmem:[#allocation2 + $0x500] sm:$0xff] }
 0x4bb   : > { %3215 = vst [vmem:[#allocation2 + $0x310] sm:$0xf] %v3151_v41  ;;  %3980 = vmatpush.msra.mxu1 %v3421_v33  ;;  %v2812_v17 = vpop.permute.xlu0 %2811  ;;  %v3435_v41 = vld [vmem:[#allocation2 + $0x298] sm:$0xff]  ;;  %v3469_v12 = vpop.f32.mrf.mxu0  ;;  %v4180_v33 = vsel %vm4116_vm12, %v3529_v25, %v4148_v14  ;;  %v3425_v25 = vld [vmem:[#allocation2 + $0x5e0] sm:$0xff]  ;;  %v3436_v14 = vld [vmem:[#allocation2 + $0x110] sm:$0xff] }
 0x4bc   : > { %v2853_v8 = vsel %vm2827_vm9, %v6163_v56, %v2812_v17  ;;  %v2854_v10 = vsel %vm2827_vm9, %v2812_v17, %v2814_v57  ;;  %v3419_v63 = vld [vmem:[#allocation2 + $0x360] sm:$0xff]  ;;  %v3489_v57 = vpop.f32.mrf.mxu1  ;;  %vm4113_vm13 = vcmp.ge.f32.partialorder %v3469_v12, 0.0  ;;  %v4145_v18 = vmul.f32 0.2, %v3469_v12 }
 0x4bd   : > { %2917 = vst [vmem:[#allocation2 + $0x2d8] sm:$0xf0] %v2853_v8  ;;  %4021 = vmatpush.msra.mxu3 %v3419_v63  ;;  %vm4114_vm11 = vcmp.ge.f32.partialorder %v3489_v57, 0.0  ;;  %v4146_v22 = vmul.f32 0.2, %v3489_v57  ;;  %v4179_v17 = vsel %vm4115_vm14, %v3509_v0, %v4147_v58  ;;  %v3428_v0 = vld [vmem:[#allocation2 + $0xf8] sm:$0xff] }
 0x4be   : > { %2918 = vst [vmem:[#allocation2 + $0x5b8] sm:$0xf0] %v2854_v10  ;;  %v3416_v31 = vld [vmem:[#allocation2 + $0x38] sm:$0xff]  ;;  %v6213_v10 = vld [vmem:[%s6269_s1 + $0x1c] sm:$0xf]  ;;  %v3424_v58 = vld [vmem:[#allocation2 + $0x428] sm:$0xff] }
 0x4bf   : > { %v3114_v50 = vpop.permute.xlu2 %3113  ;;  %4022 = vmatpush.msra.mxu3 %v3415_v23  ;;  %v4178_v11 = vsel %vm4114_vm11, %v3489_v57, %v4146_v22 }
 0x4c0   : > { %v3150_v20 = vsel %vm3119_vm8, %v3114_v50, %v3116_v36 }
 0x4c1   : > { %3214 = vst [vmem:[#allocation2 + $0x2e8] sm:$0xf] %v3150_v20  ;;  %v2533_v5 = vpop.permute.xlu1 %2532  ;;  %4023 = vmatpush.msra.mxu3 %v3411_v1  ;;  %v4242_v20 = vrot.slane %v4180_v33, 4  ;;  %v3427_v1 = vld [vmem:[#allocation2 + $0x510] sm:$0xff] }
 0x4c2   : > { %v3447_v61 = vld [vmem:[#allocation2 + $0x310] sm:$0xff] }
 0x4c3   : > { %v3100_v53 = vpop.permute.xlu0 %3099  ;;  %4024 = vmatpush.msra.mxu3 %v3407_v54 }
 0x4c4   : > { %v3144_v32 = vsel %vm3119_vm8, %v3100_v53, %v6169_v28  ;;  %v3417_v6 = vld [vmem:[#allocation2 + $0x2d8] sm:$0xff]  ;;  %v3402_v28 = vld [vmem:[#allocation2 + $0x368] sm:$0xff]  ;;  %v3612_v53 = vpop.f32.mrf.mxu3 }
 0x4c5   : > { %3208 = vst [vmem:[#allocation2 + $0x1f0] sm:$0xf] %v3144_v32  ;;  %v3418_v13 = vld [vmem:[#allocation2 + $0x5b8] sm:$0xff]  ;;  %4025 = vmatpush.msra.mxu3 %v3403_v29  ;;  %3981 = vmatpush.msra.mxu1 %v3417_v6  ;;  %vm4120_vm1 = vcmp.ge.f32.partialorder %v3612_v53, 0.0  ;;  %v4152_v32 = vmul.f32 0.2, %v3612_v53 }
 0x4c6   : > { %4001 = vmatpush.msra.mxu2 %v3418_v13  ;;  %4396 = vmatmul.msk.f32.vlgmr.msra.gmra.mxu3 %vm3448_vm10, %v3254_v55  ;;  %v3434_v13 = vld [vmem:[#allocation2 + $0x2c8] sm:$0xff] }
 0x4c7   : > { %v3112_v40 = vpop.permute.xlu2 %3111  ;;  %4103 = vmatpush.msrb.mxu3 %v3447_v61  ;;  %3982 = vmatpush.msra.mxu1 %v3413_v26 }
 0x4c8   : > { %v3149_v35 = vsel %vm3119_vm8, %v3112_v40, %v3114_v50  ;;  %4002 = vmatpush.msra.mxu2 %v3414_v44  ;;  %v3446_v34 = vld [vmem:[#allocation2 + $0x2e8] sm:$0xff]  ;;  %v4241_v50 = vrot.slane %v4178_v11, 4 }
 0x4c9   : > { %v2826_v7 = vpop.permute.xlu1 %2825  ;;  %3213 = vst [vmem:[#allocation2 + $0x350] sm:$0xf] %v3149_v35  ;;  %3983 = vmatpush.msra.mxu1 %v3409_v27  ;;  %v4184_v27 = vsel %vm4120_vm1, %v3612_v53, %v4152_v32 }
 0x4ca   : > { %4003 = vmatpush.msra.mxu2 %v3410_v43  ;;  %v3572_v54 = vpop.f32.mrf.mxu1  ;;  %v3430_v43 = vld [vmem:[#allocation2 + $0x168] sm:$0xff] }
 0x4cb   : > { %v2531_v47 = vpop.permute.xlu0 %2530  ;;  %3984 = vmatpush.msra.mxu1 %v3405_v2  ;;  %vm4118_vm0 = vcmp.ge.f32.partialorder %v3572_v54, 0.0  ;;  %v4150_v61 = vmul.f32 0.2, %v3572_v54  ;;  %v3552_v29 = vpop.f32.mrf.mxu0 }
 0x4cc   : > { %4004 = vmatpush.msra.mxu2 %v3406_v24  ;;  %v2566_v9 = vsel %vm2534_vm7, %v2531_v47, %v2533_v5  ;;  %v3420_v62 = vld [vmem:[#allocation2 + $0x1f0] sm:$0xff]  ;;  %v4177_v5 = vsel %vm4113_vm13, %v3469_v12, %v4145_v18  ;;  %v3592_v6 = vpop.f32.mrf.mxu2  ;;  %vm4117_vm2 = vcmp.ge.f32.partialorder %v3552_v29, 0.0  ;;  %v4149_v26 = vmul.f32 0.2, %v3552_v29 }
 0x4cd   : > { %2630 = vst [vmem:[#allocation2 + $0x348] sm:$0xf] %v2566_v9  ;;  %3960 = vmatpush.msra.mxu0 %v3420_v62  ;;  %3985 = vmatpush.msra.mxu1 %v3401_v30  ;;  %v4258_v35 = vsel %vm4257_vm15, %v4177_v5, %v4241_v50  ;;  %vm4119_vm3 = vcmp.ge.f32.partialorder %v3592_v6, 0.0  ;;  %v4182_v44 = vsel %vm4118_vm0, %v3572_v54, %v4150_v61  ;;  %v3426_v9 = vld [vmem:[#allocation2 + $0x388] sm:$0xff]  ;;  %v3432_v12 = vld [vmem:[#allocation2 + $0x190] sm:$0xff] }
 0x4ce   : > { %4005 = vmatpush.msra.mxu2 %v3402_v28  ;;  %4394 = vmatmul.msk.f32.vlgmr.msra.gmra.mxu1 %vm3448_vm10, %v3254_v55  ;;  %4290 = vst [vmem:[%s6221_s17] sm:$0xff] %v4258_v35  ;;  %v4181_v2 = vsel %vm4117_vm2, %v3552_v29, %v4149_v26 }
 0x4cf   : > { %3961 = vmatpush.msra.mxu0 %v3416_v31  ;;  %4395 = vmatmul.msk.f32.vlgmr.msra.gmra.mxu2 %vm3448_vm10, %v3254_v55  ;;  %v3437_v31 = vld [vmem:[#allocation2 + $0x580] sm:$0xff] }
 0x4d0   : > { %v3110_v37 = vpop.permute.xlu2 %3109  ;;  %v3445_v21 = vld [vmem:[#allocation2 + $0x350] sm:$0xff]  ;;  %4083 = vmatpush.msrb.mxu2 %v3446_v34 }
 0x4d1   : > { %v2822_v60 = vpop.permute.xlu1 %2821  ;;  %v3148_v56 = vsel %vm3119_vm8, %v3110_v37, %v3112_v40  ;;  %4063 = vmatpush.msrb.mxu1 %v3445_v21  ;;  %3962 = vmatpush.msra.mxu0 %v3412_v45  ;;  %v4151_v37 = vmul.f32 0.2, %v3592_v6 }
 0x4d2   : > { %3212 = vst [vmem:[#allocation2 + $0x118] sm:$0xf] %v3148_v56  ;;  %v4244_v56 = vrot.slane %v4184_v27, 4 }
 0x4d3   : > { %v2824_v46 = vpop.permute.xlu0 %2823  ;;  %3963 = vmatpush.msra.mxu0 %v3408_v39  ;;  %v4183_v24 = vsel %vm4119_vm3, %v3592_v6, %v4151_v37 }
 0x4d4   : > { %v2859_v38 = vsel %vm2827_vm9, %v2824_v46, %v2826_v7  ;;  %v2858_v19 = vsel %vm2827_vm9, %v2822_v60, %v2824_v46  ;;  %v4259_v7 = vsel %vm4257_vm15, %v4179_v17, %v4242_v20  ;;  %v4261_v30 = vsel %vm4257_vm15, %v4183_v24, %v4244_v56 }
 0x4d5   : > { %2923 = vst [vmem:[#allocation2 + $0x348] sm:$0xf0] %v2859_v38  ;;  %3964 = vmatpush.msra.mxu0 %v3404_v51  ;;  %v3433_v38 = vld [vmem:[#allocation2 + $0x440] sm:$0xff] }
 0x4d6   : > { %2922 = vst [vmem:[#allocation2 + $0x3e0] sm:$0xf0] %v2858_v19 }
 0x4d7   : > { %3965 = vmatpush.msra.mxu0 %v3400_v4  ;;  %4291 = vst [vmem:[%s6221_s17 + $0x8] sm:$0xff] %v4259_v7 }
 0x4d8   : > { %4393 = vmatmul.msk.f32.vlgmr.msra.gmra.mxu0 %vm3448_vm10, %v3254_v55  ;;  %4293 = vst [vmem:[%s6221_s17 + $0x18] sm:$0xff] %v4261_v30 }
 0x4d9   : > { %v6200_v15 = vpop.permute.xlu1 %2819  ;;  %v3444_v16 = vld [vmem:[#allocation2 + $0x118] sm:$0xff] }
 0x4da   : > { %v2857_v42 = vsel %vm2827_vm9, %v6200_v15, %v2822_v60  ;;  %4043 = vmatpush.msrb.mxu0 %v3444_v16  ;;  %v4243_v60 = vrot.slane %v4182_v44, 4 }
 0x4db   : > { %2921 = vst [vmem:[#allocation2 + $0x270] sm:$0xf0] %v2857_v42  ;;  %v2529_v49 = vpop.permute.xlu0 %2528 }
 0x4dc   : > { %v2565_v48 = vsel %vm2534_vm7, %v2529_v49, %v2531_v47  ;;  %v3443_v36 = vld [vmem:[#allocation2 + $0x348] sm:$0xff]  ;;  %v4260_v62 = vsel %vm4257_vm15, %v4181_v2, %v4243_v60 }
 0x4dd   : > { %2629 = vst [vmem:[#allocation2 + $0x3e0] sm:$0xf] %v2565_v48  ;;  %4104 = vmatpush.msrb.mxu3 %v3443_v36  ;;  %v3675_v39 = vpop.f32.mrf.mxu2  ;;  %v3429_v48 = vld [vmem:[#allocation2 + $0x68] sm:$0xff] }
 0x4de   : > { %4292 = vst [vmem:[%s6221_s17 + $0x10] sm:$0xff] %v4260_v62  ;;  %v4155_v19 = vmul.f32 0.2, %v3675_v39 }
 0x4df   : > { %4105 = vmatpush.msrb.mxu3 %v3439_v59 }
 0x4e0   : > { %v3695_v55 = vpop.f32.mrf.mxu3 }
 0x4e1   : > { %4106 = vmatpush.msrb.mxu3 %v3435_v41  ;;  %vm4124_vm5 = vcmp.ge.f32.partialorder %v3695_v55, 0.0  ;;  %v4156_v42 = vmul.f32 0.2, %v3695_v55 }
 0x4e3   : > { %v2527_v8 = vpop.permute.xlu0 %2526  ;;  %4107 = vmatpush.msrb.mxu3 %v3431_v52  ;;  %v4188_v4 = vsel %vm4124_vm5, %v3695_v55, %v4156_v42 }
 0x4e4   : > { %v2563_v63 = vsel %vm2534_vm7, %v5915_v3, %v2527_v8  ;;  %v2564_v23 = vsel %vm2534_vm7, %v2527_v8, %v2529_v49  ;;  %v3442_v40 = vld [vmem:[#allocation2 + $0x3e0] sm:$0xff]  ;;  %v3438_v3 = vld [vmem:[#allocation2 + $0x30] sm:$0xff]  ;;  %v3655_v28 = vpop.f32.mrf.mxu1  ;;  %vm4123_vm7 = vcmp.ge.f32.partialorder %v3675_v39, 0.0  ;;  %v4246_v36 = vrot.slane %v4188_v4, 4 }
 0x4e5   : > { %2627 = vst [vmem:[#allocation2 + $0x2f8] sm:$0xf] %v2563_v63  ;;  %4084 = vmatpush.msrb.mxu2 %v3442_v40  ;;  %4108 = vmatpush.msrb.mxu3 %v3427_v1  ;;  %vm4122_vm4 = vcmp.ge.f32.partialorder %v3655_v28, 0.0  ;;  %v4154_v45 = vmul.f32 0.2, %v3655_v28  ;;  %v4187_v59 = vsel %vm4123_vm7, %v3675_v39, %v4155_v19 }
 0x4e6   : > { %2628 = vst [vmem:[#allocation2 + $0x270] sm:$0xf] %v2564_v23  ;;  %4400 = vmatmul.msk.f32.vlgmr.msrb.gmra.mxu3 %vm3448_vm10, %v6213_v10  ;;  %v4263_v22 = vsel %vm4257_vm15, %v4187_v59, %v4246_v36 }
 0x4e7   : > { %4085 = vmatpush.msrb.mxu2 %v3438_v3  ;;  %v4186_v51 = vsel %vm4122_vm4, %v3655_v28, %v4154_v45  ;;  %4295 = vst [vmem:[%s6221_s17 + $0x28] sm:$0xff] %v4263_v22 }
 0x4e8   : > { %v4245_v16 = vrot.slane %v4186_v51, 4 }
 0x4e9   : > { %4086 = vmatpush.msrb.mxu2 %v3434_v13 }
 0x4eb   : > { %v2818_v47 = vpop.permute.xlu0 %2817  ;;  %4087 = vmatpush.msrb.mxu2 %v3430_v43 }
 0x4ec   : > { %v2856_v21 = vsel %vm2827_vm9, %v2818_v47, %v6200_v15  ;;  %v3635_v15 = vpop.f32.mrf.mxu0 }
 0x4ed   : > { %2920 = vst [vmem:[#allocation2 + $0x2f8] sm:$0xf0] %v2856_v21  ;;  %v3441_v34 = vld [vmem:[#allocation2 + $0x270] sm:$0xff]  ;;  %4088 = vmatpush.msrb.mxu2 %v3426_v9  ;;  %vm4121_vm6 = vcmp.ge.f32.partialorder %v3635_v15, 0.0  ;;  %v4153_v46 = vmul.f32 0.2, %v3635_v15 }
 0x4ee   : > { %4064 = vmatpush.msrb.mxu1 %v3441_v34  ;;  %4399 = vmatmul.msk.f32.vlgmr.msrb.gmra.mxu2 %vm3448_vm10, %v6213_v10 }
 0x4ef   : > { %v4185_v49 = vsel %vm4121_vm6, %v3635_v15, %v4153_v46 }
 0x4f0   : > { %4065 = vmatpush.msrb.mxu1 %v3437_v31  ;;  %v4262_v57 = vsel %vm4257_vm15, %v4185_v49, %v4245_v16 }
 0x4f1   : > { %4294 = vst [vmem:[%s6221_s17 + $0x20] sm:$0xff] %v4262_v57 }
 0x4f2   : > { %4066 = vmatpush.msrb.mxu1 %v3433_v38 }
 0x4f4   : > { %4067 = vmatpush.msrb.mxu1 %v3429_v48  ;;  %v3440_v41 = vld [vmem:[#allocation2 + $0x2f8] sm:$0xff] }
 0x4f5   : > { %4044 = vmatpush.msrb.mxu0 %v3440_v41 }
 0x4f6   : > { %4068 = vmatpush.msrb.mxu1 %v3425_v25 }
 0x4f7   : > { %4045 = vmatpush.msrb.mxu0 %v3436_v14  ;;  %4398 = vmatmul.msk.f32.vlgmr.msrb.gmra.mxu1 %vm3448_vm10, %v6213_v10 }
 0x4f9   : > { %4046 = vmatpush.msrb.mxu0 %v3432_v12 }
 0x4fa   : > { %v3738_v18 = vpop.f32.mrf.mxu1 }
 0x4fb   : > { %4047 = vmatpush.msrb.mxu0 %v3428_v0  ;;  %vm4126_vm8 = vcmp.ge.f32.partialorder %v3738_v18, 0.0  ;;  %v4158_v11 = vmul.f32 0.2, %v3738_v18 }
 0x4fd   : > { %4048 = vmatpush.msrb.mxu0 %v3424_v58  ;;  %v4190_v33 = vsel %vm4126_vm8, %v3738_v18, %v4158_v11  ;;  %v3778_v52 = vpop.f32.mrf.mxu3 }
 0x4fe   : > { %4397 = vmatmul.msk.f32.vlgmr.msrb.gmra.mxu0 %vm3448_vm10, %v6213_v10  ;;  %v4247_v50 = vrot.slane %v4190_v33, 4  ;;  %vm4128_vm9 = vcmp.ge.f32.partialorder %v3778_v52, 0.0  ;;  %v4160_v20 = vmul.f32 0.2, %v3778_v52 }
 0x500   : > { %v3758_v17 = vpop.f32.mrf.mxu2  ;;  %v4192_v23 = vsel %vm4128_vm9, %v3778_v52, %v4160_v20 }
 0x501   : > { %vm4127_vm12 = vcmp.ge.f32.partialorder %v3758_v17, 0.0  ;;  %v4159_v63 = vmul.f32 0.2, %v3758_v17  ;;  %v4248_v40 = vrot.slane %v4192_v23, 4 }
 0x503   : > { %v4191_v35 = vsel %vm4127_vm12, %v3758_v17, %v4159_v63 }
 0x504   : > { %v4265_v10 = vsel %vm4257_vm15, %v4191_v35, %v4248_v40 }
 0x505   : > { %4297 = vst [vmem:[%s6221_s17 + $0x38] sm:$0xff] %v4265_v10 }
 0x508   : > { %v3861_v13 = vpop.f32.mrf.mxu3 }
 0x509   : > { %v3718_v5 = vpop.f32.mrf.mxu0  ;;  %vm4132_vm14 = vcmp.ge.f32.partialorder %v3861_v13, 0.0  ;;  %v4164_v44 = vmul.f32 0.2, %v3861_v13 }
 0x50a   : > { %vm4125_vm11 = vcmp.ge.f32.partialorder %v3718_v5, 0.0  ;;  %v4157_v8 = vmul.f32 0.2, %v3718_v5 }
 0x50b   : > { %v4196_v43 = vsel %vm4132_vm14, %v3861_v13, %v4164_v44 }
 0x50c   : > { %v4189_v1 = vsel %vm4125_vm11, %v3718_v5, %v4157_v8  ;;  %v4250_v60 = vrot.slane %v4196_v43, 4 }
 0x50d   : > { %v4264_v7 = vsel %vm4257_vm15, %v4189_v1, %v4247_v50 }
 0x50e   : > { %4296 = vst [vmem:[%s6221_s17 + $0x30] sm:$0xff] %v4264_v7 }
 0x519   : > { %v3821_v3 = vpop.f32.mrf.mxu1 }
 0x51a   : > { %vm4130_vm10 = vcmp.ge.f32.partialorder %v3821_v3, 0.0  ;;  %v4162_v54 = vmul.f32 0.2, %v3821_v3  ;;  %v3801_v53 = vpop.f32.mrf.mxu0  ;;  %v3841_v26 = vpop.f32.mrf.mxu2 }
 0x51b   : > { %vm4129_vm13 = vcmp.ge.f32.partialorder %v3801_v53, 0.0  ;;  %v4161_v61 = vmul.f32 0.2, %v3801_v53  ;;  %vm4131_vm0 = vcmp.ge.f32.partialorder %v3841_v26, 0.0  ;;  %v4163_v37 = vmul.f32 0.2, %v3841_v26 }
 0x51c   : > { %v4194_v32 = vsel %vm4130_vm10, %v3821_v3, %v4162_v54 }
 0x51d   : > { %v4249_v29 = vrot.slane %v4194_v32, 4  ;;  %v4193_v6 = vsel %vm4129_vm13, %v3801_v53, %v4161_v61  ;;  %v4195_v56 = vsel %vm4131_vm0, %v3841_v26, %v4163_v37 }
 0x51e   : > { %v4267_v2 = vsel %vm4257_vm15, %v4195_v56, %v4250_v60 }
 0x51f   : > { %v4266_v27 = vsel %vm4257_vm15, %v4193_v6, %v4249_v29  ;;  %4299 = vst [vmem:[%s6221_s17 + $0x48] sm:$0xff] %v4267_v2 }
 0x520   : > { %4298 = vst [vmem:[%s6221_s17 + $0x40] sm:$0xff] %v4266_v27 }
 0x529   : > { %v3924_v9 = vpop.f32.mrf.mxu2 }
 0x52a   : > { %v4167_v30 = vmul.f32 0.2, %v3924_v9  ;;  %vm4135_vm3 = vcmp.ge.f32.partialorder %v3924_v9, 0.0 }
 0x52c   : > { %v4199_v42 = vsel %vm4135_vm3, %v3924_v9, %v4167_v30 }
 0x531   : > { %v3944_v28 = vpop.f32.mrf.mxu3 }
 0x532   : > { %vm4136_vm4 = vcmp.ge.f32.partialorder %v3944_v28, 0.0  ;;  %v4168_v45 = vmul.f32 0.2, %v3944_v28 }
 0x534   : > { %v4200_v15 = vsel %vm4136_vm4, %v3944_v28, %v4168_v45 }
 0x535   : > { %v3884_v47 = vpop.f32.mrf.mxu0  ;;  %v4252_v46 = vrot.slane %v4200_v15, 4 }
 0x536   : > { %v4165_v24 = vmul.f32 0.2, %v3884_v47  ;;  %v3904_v21 = vpop.f32.mrf.mxu1  ;;  %vm4133_vm1 = vcmp.ge.f32.partialorder %v3884_v47, 0.0 }
 0x537   : > { %vm4134_vm2 = vcmp.ge.f32.partialorder %v3904_v21, 0.0  ;;  %v4166_v62 = vmul.f32 0.2, %v3904_v21  ;;  %v4269_v38 = vsel %vm4257_vm15, %v4199_v42, %v4252_v46 }
 0x538   : > { %v4197_v55 = vsel %vm4133_vm1, %v3884_v47, %v4165_v24  ;;  %4301 = vst [vmem:[%s6221_s17 + $0x58] sm:$0xff] %v4269_v38 }
 0x539   : > { %v4198_v34 = vsel %vm4134_vm2, %v3904_v21, %v4166_v62 }
 0x53a   : > { %v4251_v31 = vrot.slane %v4198_v34, 4 }
 0x53c   : > { %v4268_v39 = vsel %vm4257_vm15, %v4197_v55, %v4251_v31 }
 0x53d   : > { %4300 = vst [vmem:[%s6221_s17 + $0x50] sm:$0xff] %v4268_v39 }
 0x549   : > { %v4027_v4 = vpop.f32.mrf.mxu3 }
 0x54a   : > { %vm4140_vm6 = vcmp.ge.f32.partialorder %v4027_v4, 0.0  ;;  %v4172_v48 = vmul.f32 0.2, %v4027_v4 }
 0x54b   : > { %v3987_v51 = vpop.f32.mrf.mxu1 }
 0x54c   : > { %v4170_v19 = vmul.f32 0.2, %v3987_v51  ;;  %vm4138_vm5 = vcmp.ge.f32.partialorder %v3987_v51, 0.0  ;;  %v4204_v41 = vsel %vm4140_vm6, %v4027_v4, %v4172_v48 }
 0x54d   : > { %v4254_v22 = vrot.slane %v4204_v41, 4 }
 0x54e   : > { %v4202_v16 = vsel %vm4138_vm5, %v3987_v51, %v4170_v19 }
 0x54f   : > { %v4253_v59 = vrot.slane %v4202_v16, 4 }
 0x552   : > { %v4007_v49 = vpop.f32.mrf.mxu2 }
 0x553   : > { %vm4139_vm7 = vcmp.ge.f32.partialorder %v4007_v49, 0.0  ;;  %v4171_v36 = vmul.f32 0.2, %v4007_v49 }
 0x555   : > { %v3967_v57 = vpop.f32.mrf.mxu0  ;;  %v4203_v25 = vsel %vm4139_vm7, %v4007_v49, %v4171_v36 }
 0x556   : > { %vm4137_vm8 = vcmp.ge.f32.partialorder %v3967_v57, 0.0  ;;  %v4169_v14 = vmul.f32 0.2, %v3967_v57  ;;  %v4271_v0 = vsel %vm4257_vm15, %v4203_v25, %v4254_v22 }
 0x557   : > { %4303 = vst [vmem:[%s6221_s17 + $0x68] sm:$0xff] %v4271_v0 }
 0x558   : > { %v4201_v12 = vsel %vm4137_vm8, %v3967_v57, %v4169_v14 }
 0x559   : > { %v4270_v18 = vsel %vm4257_vm15, %v4201_v12, %v4253_v59 }
 0x55a   : > { %4302 = vst [vmem:[%s6221_s17 + $0x60] sm:$0xff] %v4270_v18 }
 0x569   : > { %v4110_v58 = vpop.f32.mrf.mxu3 }
 0x56a   : > { %v4176_v11 = vmul.f32 0.2, %v4110_v58  ;;  %vm4144_vm9 = vcmp.ge.f32.partialorder %v4110_v58, 0.0 }
 0x56c   : > { %v4208_v33 = vsel %vm4144_vm9, %v4110_v58, %v4176_v11 }
 0x56d   : > { %v4256_v52 = vrot.slane %v4208_v33, 4 }
 0x571   : > { %v4090_v50 = vpop.f32.mrf.mxu2 }
 0x572   : > { %vm4143_vm11 = vcmp.ge.f32.partialorder %v4090_v50, 0.0  ;;  %v4175_v20 = vmul.f32 0.2, %v4090_v50 }
 0x574   : > { %v4070_v5 = vpop.f32.mrf.mxu1  ;;  %v4207_v17 = vsel %vm4143_vm11, %v4090_v50, %v4175_v20 }
 0x575   : > { %v4273_v8 = vsel %vm4257_vm15, %v4207_v17, %v4256_v52  ;;  %v4174_v63 = vmul.f32 0.2, %v4070_v5  ;;  %vm4142_vm12 = vcmp.ge.f32.partialorder %v4070_v5, 0.0 }
 0x576   : > { %4305 = vst [vmem:[%s6221_s17 + $0x78] sm:$0xff] %v4273_v8 }
 0x577   : > { %v4206_v23 = vsel %vm4142_vm12, %v4070_v5, %v4174_v63 }
 0x578   : > { %v4255_v35 = vrot.slane %v4206_v23, 4 }
 0x57b   : > { %v4050_v40 = vpop.f32.mrf.mxu0 }
 0x57c   : > { %vm4141_vm10 = vcmp.ge.f32.partialorder %v4050_v40, 0.0  ;;  %v4173_v1 = vmul.f32 0.2, %v4050_v40 }
 0x57e   : > { %v4205_v7 = vsel %vm4141_vm10, %v4050_v40, %v4173_v1 }
 0x57f   : > { %v4272_v10 = vsel %vm4257_vm15, %v4205_v7, %v4255_v35 }
 0x580   : > { %4304 = vst [vmem:[%s6221_s17 + $0x70] sm:$0xff] %v4272_v10 }
 0x581 PF: > { %s12_s9 = sadd.s32 1, %s4430_s9  }
 0x582   : > { %p9_p4 = scmp.ge.s32.totalorder %s12_s9, 4  }
 0x584   :  { %11 = sbr.rel (!%p9_p4) target bundleno = 1 (0x1), region = 96 }

</bundles_post_ra>
